<compile_context>
chip_gen: v7x
topology: tpu7x:2x2x1
jax: 0.10.0
libtpu: 0.0.40
codegen_flags: <defaults>
</compile_context>

<pallas_src>
import jax
import jax.numpy as jnp
from jax.experimental import pallas as pl
from jax.experimental.pallas import tpu as pltpu


PARAM_DTYPE = jnp.bfloat16


def _round_up(x, m):
    return ((x + m - 1) // m) * m


def _mlp_kernel(a1_ref, a2_ref, x_ref, w1_ref, b1_ref, w2_ref, b2_ref, o_ref):
    # Layer 1: x @ W1 on the MXU (f32 accumulate); bias + PReLU in f32 on the VPU.
    h = jnp.dot(x_ref[...], w1_ref[...], preferred_element_type=jnp.float32)
    h = h + b1_ref[...]
    h = jnp.where(h > 0, h, a1_ref[0] * h)

    # Layer 2: feed bf16 activations straight into the second matmul (no explicit
    # VMEM round-trip; Mosaic stages only what it must).
    y = jnp.dot(h.astype(w2_ref.dtype), w2_ref[...],
                preferred_element_type=jnp.float32)
    y = y + b2_ref[...]
    y = jnp.where(y > 0, y, a2_ref[0] * y)

    o_ref[...] = y.astype(o_ref.dtype)


def prepare_params(w1, b1, alpha1, w2, b2, alpha2, param_dtype=PARAM_DTYPE):
    """One-time parameter cast. Do this OUTSIDE the per-call path so the f32->bf16
    weight cast does not add HBM traffic on every invocation."""
    return (w1.astype(param_dtype), b1.astype(jnp.float32),
            alpha1.astype(jnp.float32),
            w2.astype(param_dtype), b2.astype(jnp.float32),
            alpha2.astype(jnp.float32))


def _dual_tensorcore():
    """True on chips with 2 TensorCores per chip (v7x), where the 'parallel' batch
    axis actually shards across cores. On v5e/v6e the grid is a serial loop."""
    try:
        kind = jax.devices()[0].device_kind.lower()
    except Exception:
        return False
    return "v7" in kind


def _choose_tile(B, dual_tc):
    """Pick (tm, padded_B). bf16 packs 16 sublanes per vreg, MXU-native tiles are
    128-row multiples, so keep tm 16-aligned (128-aligned when large enough)."""
    if dual_tc and B >= 256:
        # Even number of 128-aligned steps so both TensorCores get equal work.
        steps = 2 * max(1, pl.cdiv(B, 1024))          # <= 512 rows / step
        tm = min(512, _round_up(pl.cdiv(B, steps), 128))
        Bp = tm * steps
    else:
        if B <= 512:
            tm = _round_up(B, 128 if B >= 128 else 16)  # one big tile
        else:
            steps = pl.cdiv(B, 512)
            tm = _round_up(pl.cdiv(B, steps), 128)
        Bp = _round_up(B, tm)
    return tm, Bp


def _vmem_limit_bytes(tm, in_dim, hidden, out_dim, param_dtype, weight_buffers):
    """Actual VMEM footprint + ~35% headroom (never the full 64 MiB of a v7x TC)."""
    p = jnp.dtype(param_dtype).itemsize
    weights = (in_dim * hidden + hidden * out_dim) * p * weight_buffers
    biases = (hidden + out_dim) * 4 * weight_buffers
    x_tiles = 2 * tm * in_dim * p              # double-buffered input tile
    o_tiles = 2 * tm * out_dim * p             # double-buffered bf16 output tile
    h_stage = tm * hidden * p                  # compiler staging of layer-1 acts
    f32_tmp = tm * (hidden + out_dim) * 4      # f32 intermediates (spill to VMEM)
    total = weights + biases + x_tiles + o_tiles + h_stage + f32_tmp
    return min(int(total * 1.35) + (4 << 20), 48 * 1024 * 1024)


def projection_mlp(x, w1, b1, alpha1, w2, b2, alpha2, *, tm=None,
                   param_dtype=PARAM_DTYPE):
    """x: [B, in_dim]; w1: [in_dim, hidden] (bf16); b1: [1, hidden] (f32);
    w2: [hidden, out_dim] (bf16); b2: [1, out_dim] (f32); alpha*: [1] (f32).
    Use prepare_params() once to pre-cast the parameters. Returns bf16 [B, out_dim].
    """
    B, in_dim = x.shape
    hidden = w1.shape[1]
    out_dim = w2.shape[1]

    dual_tc = _dual_tensorcore()
    if tm is None:
        tm, Bp = _choose_tile(B, dual_tc)
    else:
        tm = _round_up(tm, 16)
        Bp = _round_up(B, tm)
    grid = (Bp // tm,)

    x_in = x.astype(param_dtype)
    if Bp != B:
        x_in = jnp.pad(x_in, ((0, Bp - B), (0, 0)))

    # Parameters are expected pre-cast by prepare_params(); these are no-ops then.
    w1c = w1 if w1.dtype == param_dtype else w1.astype(param_dtype)
    w2c = w2 if w2.dtype == param_dtype else w2.astype(param_dtype)
    b1c = b1 if b1.dtype == jnp.float32 else b1.astype(jnp.float32)
    b2c = b2 if b2.dtype == jnp.float32 else b2.astype(jnp.float32)
    a1c = alpha1 if alpha1.dtype == jnp.float32 else alpha1.astype(jnp.float32)
    a2c = alpha2 if alpha2.dtype == jnp.float32 else alpha2.astype(jnp.float32)

    p = jnp.dtype(param_dtype).itemsize
    flops = 2 * Bp * (in_dim * hidden + hidden * out_dim)
    bytes_accessed = (Bp * in_dim * p                       # x (bf16)
                      + in_dim * hidden * p + hidden * 4    # W1 (bf16) + b1 (f32)
                      + hidden * out_dim * p + out_dim * 4  # W2 (bf16) + b2 (f32)
                      + Bp * out_dim * p)                   # output (bf16)
    cost = pl.CostEstimate(flops=flops, transcendentals=0,
                           bytes_accessed=bytes_accessed)

    def build(weight_buffers):
        # Constant-index (resident) operands don't need double buffering.
        res_kw = ({"pipeline_mode": pl.Buffered(1)} if weight_buffers == 1 else {})
        vmem_bytes = _vmem_limit_bytes(tm, in_dim, hidden, out_dim, param_dtype,
                                       weight_buffers)
        return pl.pallas_call(
            _mlp_kernel,
            out_shape=jax.ShapeDtypeStruct((Bp, out_dim), param_dtype),
            grid_spec=pltpu.PrefetchScalarGridSpec(
                num_scalar_prefetch=2,          # alpha1, alpha2 -> SMEM scalars
                grid=grid,
                in_specs=[
                    pl.BlockSpec((tm, in_dim), lambda i, a1, a2: (i, 0)),        # x
                    pl.BlockSpec((in_dim, hidden), lambda i, a1, a2: (0, 0), **res_kw),   # W1
                    pl.BlockSpec((1, hidden), lambda i, a1, a2: (0, 0), **res_kw),        # b1
                    pl.BlockSpec((hidden, out_dim), lambda i, a1, a2: (0, 0), **res_kw),  # W2
                    pl.BlockSpec((1, out_dim), lambda i, a1, a2: (0, 0), **res_kw),       # b2
                ],
                out_specs=pl.BlockSpec((tm, out_dim), lambda i, a1, a2: (i, 0)),
            ),
            compiler_params=pltpu.CompilerParams(
                dimension_semantics=("parallel",),
                vmem_limit_bytes=vmem_bytes,
            ),
            cost_estimate=cost,
        )

    args = (a1c, a2c, x_in, w1c, b1c, w2c, b2c)
    try:
        out = build(1)(*args)
    except (TypeError, NotImplementedError, ValueError, pltpu.LoweringException):
        # Some Pallas versions reject Buffered(1); fall back to default double
        # buffering with a correspondingly widened VMEM budget.  Unrelated errors
        # (e.g. genuine VMEM OOM) propagate instead of being masked.
        out = build(2)(*args)

    return out[:B] if Bp != B else out


def projection_mlp_ref(x, w1, b1, alpha1, w2, b2, alpha2, param_dtype=PARAM_DTYPE):
    """Pure-JAX reference performing the same casts as the kernel."""
    xc = x.astype(param_dtype)
    w1c = w1.astype(param_dtype)
    w2c = w2.astype(param_dtype)
    h = jnp.dot(xc, w1c, preferred_element_type=jnp.float32) + b1.astype(jnp.float32)
    h = jnp.where(h > 0, h, alpha1.astype(jnp.float32)[0] * h)
    y = (jnp.dot(h.astype(param_dtype), w2c, preferred_element_type=jnp.float32)
         + b2.astype(jnp.float32))
    y = jnp.where(y > 0, y, alpha2.astype(jnp.float32)[0] * y)
    return y.astype(param_dtype)


if __name__ == "__main__":
    # Module architecture: in_dim=1536, hidden_dim=768, out_dim=768 (MXU-friendly).
    in_dim, hidden_dim, out_dim = 1536, 768, 768

    key = jax.random.PRNGKey(0)
    kx, kw1, kb1, kw2, kb2 = jax.random.split(key, 5)

    # Deterministic parameter init (uniform, roughly matching nn.Linear scale).
    lim1 = 1.0 / (in_dim ** 0.5)
    lim2 = 1.0 / (hidden_dim ** 0.5)
    w1 = jax.random.uniform(kw1, (in_dim, hidden_dim), jnp.float32, -lim1, lim1)
    b1 = jax.random.uniform(kb1, (1, hidden_dim), jnp.float32, -lim1, lim1)
    w2 = jax.random.uniform(kw2, (hidden_dim, out_dim), jnp.float32, -lim2, lim2)
    b2 = jax.random.uniform(kb2, (1, out_dim), jnp.float32, -lim2, lim2)
    # PReLU default init = 0.25 (single shared parameter per PReLU).
    alpha1 = jnp.array([0.25], dtype=jnp.float32)
    alpha2 = jnp.array([0.25], dtype=jnp.float32)

    # One-time parameter cast outside the per-call path (perf feedback #2).
    params = jax.block_until_ready(
        prepare_params(w1, b1, alpha1, w2, b2, alpha2))
    w1c, b1c, a1c, w2c, b2c, a2c = params

    # batch=256: aligned tiling (single tile on v5e/v6e, 2x128 on v7x).
    # batch=40 : exercises the ragged-batch padding path (16-aligned tile).
    for batch in (256, 40):
        x = jax.random.normal(kx, (batch, in_dim), dtype=jnp.float32)
        out = jax.block_until_ready(
            projection_mlp(x, w1c, b1c, a1c, w2c, b2c, a2c))
        ref = projection_mlp_ref(x, w1, b1, alpha1, w2, b2, alpha2)
        assert out.shape == (batch, out_dim)
        assert out.dtype == PARAM_DTYPE
        assert jnp.allclose(out.astype(jnp.float32), ref.astype(jnp.float32),
                            atol=2e-2, rtol=2e-2), \
            f"mismatch vs reference (batch={batch})"

    print("KERNEL_OK")
</pallas_src>

<mosaic_0001>
module attributes {stable_mosaic.version = 11 : i64} {
  func.func @_mlp_kernel(%arg0: i32, %arg1: memref<1xf32, #tpu.memory_space<smem>>, %arg2: memref<1xf32, #tpu.memory_space<smem>>, %arg3: memref<256x1536xbf16, #tpu.memory_space<vmem>>, %arg4: memref<1536x768xbf16, #tpu.memory_space<vmem>>, %arg5: memref<1x768xf32, #tpu.memory_space<vmem>>, %arg6: memref<768x768xbf16, #tpu.memory_space<vmem>>, %arg7: memref<1x768xf32, #tpu.memory_space<vmem>>, %arg8: memref<256x768xbf16, #tpu.memory_space<vmem>>) attributes {dimension_semantics = [#tpu.dimension_semantics<parallel>], iteration_bounds = array<i64: 1>, scalar_prefetch = 2 : i64, scratch_operands = 0 : i64, tpu.core_type = #tpu.core_type<tc>, window_params = [{transform_indices = @transform_0, window_bounds = array<i64: 256, 1536>}, {pipeline_mode = #tpu.pipeline_mode<synchronous>, transform_indices = @transform_1, window_bounds = array<i64: 1536, 768>}, {pipeline_mode = #tpu.pipeline_mode<synchronous>, transform_indices = @transform_2, window_bounds = array<i64: 1, 768>}, {pipeline_mode = #tpu.pipeline_mode<synchronous>, transform_indices = @transform_3, window_bounds = array<i64: 768, 768>}, {pipeline_mode = #tpu.pipeline_mode<synchronous>, transform_indices = @transform_4, window_bounds = array<i64: 1, 768>}, {transform_indices = @transform_5, window_bounds = array<i64: 256, 768>}]} {
    %c0 = arith.constant 0 : index
    %c0_0 = arith.constant 0 : index
    %0 = vector.load %arg3[%c0, %c0_0] : memref<256x1536xbf16, #tpu.memory_space<vmem>>, vector<256x1536xbf16>
    %c0_1 = arith.constant 0 : index
    %c0_2 = arith.constant 0 : index
    %1 = vector.load %arg4[%c0_1, %c0_2] : memref<1536x768xbf16, #tpu.memory_space<vmem>>, vector<1536x768xbf16>
    %cst = arith.constant dense<0.000000e+00> : vector<256x768xf32>
    %2 = tpu.matmul %0, %1, %cst {dimension_numbers = #tpu.dot_dimension_numbers<[1], [0], [0], [1], [0, 0, 1, 1], [], []>} : vector<256x1536xbf16>, vector<1536x768xbf16>, vector<256x768xf32> -> vector<256x768xf32>
    %c0_3 = arith.constant 0 : index
    %c0_4 = arith.constant 0 : index
    %3 = vector.load %arg5[%c0_3, %c0_4] : memref<1x768xf32, #tpu.memory_space<vmem>>, vector<1x768xf32>
    %4 = vector.broadcast %3 : vector<1x768xf32> to vector<256x768xf32>
    %5 = arith.addf %2, %4 : vector<256x768xf32>
    %cst_5 = arith.constant 0.000000e+00 : f32
    %6 = vector.broadcast %cst_5 : f32 to vector<256x768xf32>
    %7 = arith.cmpf ogt, %5, %6 : vector<256x768xf32>
    %c0_6 = arith.constant 0 : index
    %8 = memref.load %arg1[%c0_6] : memref<1xf32, #tpu.memory_space<smem>>
    %9 = vector.broadcast %8 : f32 to vector<256x768xf32>
    %10 = arith.mulf %9, %5 : vector<256x768xf32>
    %11 = arith.select %7, %5, %10 : vector<256x768xi1>, vector<256x768xf32>
    %12 = arith.truncf %11 : vector<256x768xf32> to vector<256x768xbf16>
    %c0_7 = arith.constant 0 : index
    %c0_8 = arith.constant 0 : index
    %13 = vector.load %arg6[%c0_7, %c0_8] : memref<768x768xbf16, #tpu.memory_space<vmem>>, vector<768x768xbf16>
    %cst_9 = arith.constant dense<0.000000e+00> : vector<256x768xf32>
    %14 = tpu.matmul %12, %13, %cst_9 {dimension_numbers = #tpu.dot_dimension_numbers<[1], [0], [0], [1], [0, 0, 1, 1], [], []>} : vector<256x768xbf16>, vector<768x768xbf16>, vector<256x768xf32> -> vector<256x768xf32>
    %c0_10 = arith.constant 0 : index
    %c0_11 = arith.constant 0 : index
    %15 = vector.load %arg7[%c0_10, %c0_11] : memref<1x768xf32, #tpu.memory_space<vmem>>, vector<1x768xf32>
    %16 = vector.broadcast %15 : vector<1x768xf32> to vector<256x768xf32>
    %17 = arith.addf %14, %16 : vector<256x768xf32>
    %cst_12 = arith.constant 0.000000e+00 : f32
    %18 = vector.broadcast %cst_12 : f32 to vector<256x768xf32>
    %19 = arith.cmpf ogt, %17, %18 : vector<256x768xf32>
    %c0_13 = arith.constant 0 : index
    %20 = memref.load %arg2[%c0_13] : memref<1xf32, #tpu.memory_space<smem>>
    %21 = vector.broadcast %20 : f32 to vector<256x768xf32>
    %22 = arith.mulf %21, %17 : vector<256x768xf32>
    %23 = arith.select %19, %17, %22 : vector<256x768xi1>, vector<256x768xf32>
    %24 = arith.truncf %23 : vector<256x768xf32> to vector<256x768xbf16>
    %c0_14 = arith.constant 0 : index
    %c0_15 = arith.constant 0 : index
    %25 = vector.load %arg8[%c0_14, %c0_15] : memref<256x768xbf16, #tpu.memory_space<vmem>>, vector<256x768xbf16>
    tpu.vector_store %arg8[%c0_14, %c0_15], %24 {strides = array<i32>} : memref<256x768xbf16, #tpu.memory_space<vmem>>, vector<256x768xbf16>,
    return
  }
  func.func @transform_0(%arg0: i32, %arg1: memref<1xf32, #tpu.memory_space<smem>>, %arg2: memref<1xf32, #tpu.memory_space<smem>>) -> (i32, i32) {
    %c0_i32 = arith.constant 0 : i32
    %c0_i32_0 = arith.constant 0 : i32
    return %arg0, %c0_i32 : i32, i32
  }
  func.func @transform_1(%arg0: i32, %arg1: memref<1xf32, #tpu.memory_space<smem>>, %arg2: memref<1xf32, #tpu.memory_space<smem>>) -> (i32, i32) {
    %c0_i32 = arith.constant 0 : i32
    %c0_i32_0 = arith.constant 0 : i32
    %c0_i32_1 = arith.constant 0 : i32
    return %c0_i32, %c0_i32_0 : i32, i32
  }
  func.func @transform_2(%arg0: i32, %arg1: memref<1xf32, #tpu.memory_space<smem>>, %arg2: memref<1xf32, #tpu.memory_space<smem>>) -> (i32, i32) {
    %c0_i32 = arith.constant 0 : i32
    %c0_i32_0 = arith.constant 0 : i32
    %c0_i32_1 = arith.constant 0 : i32
    return %c0_i32, %c0_i32_0 : i32, i32
  }
  func.func @transform_3(%arg0: i32, %arg1: memref<1xf32, #tpu.memory_space<smem>>, %arg2: memref<1xf32, #tpu.memory_space<smem>>) -> (i32, i32) {
    %c0_i32 = arith.constant 0 : i32
    %c0_i32_0 = arith.constant 0 : i32
    %c0_i32_1 = arith.constant 0 : i32
    return %c0_i32, %c0_i32_0 : i32, i32
  }
  func.func @transform_4(%arg0: i32, %arg1: memref<1xf32, #tpu.memory_space<smem>>, %arg2: memref<1xf32, #tpu.memory_space<smem>>) -> (i32, i32) {
    %c0_i32 = arith.constant 0 : i32
    %c0_i32_0 = arith.constant 0 : i32
    %c0_i32_1 = arith.constant 0 : i32
    return %c0_i32, %c0_i32_0 : i32, i32
  }
  func.func @transform_5(%arg0: i32, %arg1: memref<1xf32, #tpu.memory_space<smem>>, %arg2: memref<1xf32, #tpu.memory_space<smem>>) -> (i32, i32) {
    %c0_i32 = arith.constant 0 : i32
    %c0_i32_0 = arith.constant 0 : i32
    return %arg0, %c0_i32 : i32, i32
  }
}

</mosaic_0001>

<bundles_post_ra>
// kernel: tpu_custom_call.1
= control target key start
LH: loop header
LB: loop body
LE: loop exit
PB: predicated region body
PF: predicated region fallthrough
CT: control target
= control target key end

     0   :  { %14 = vsyncpa [#allocation6], 0  ;;  %s20618_s0 = inlined_call_operand.<no memory space> [shape: f32[1], index: 0, kind: input, shape index: {}]   ;;  %s20619_s1 = inlined_call_operand.<no memory space> [shape: f32[1], index: 1, kind: input, shape index: {}]   ;;  %s20620_s2 = inlined_call_operand.hbm [shape: bf16[256,1536], index: 2, kind: input, shape index: {}]   ;;  %s20621_s3 = inlined_call_operand.hbm [shape: bf16[1536,768], index: 3, kind: input, shape index: {}]   ;;  %s20622_s4 = inlined_call_operand.hbm [shape: f32[1,768], index: 4, kind: input, shape index: {}]   ;;  %s20623_s5 = inlined_call_operand.hbm [shape: bf16[768,768], index: 5, kind: input, shape index: {}]   ;;  %s20624_s6 = inlined_call_operand.hbm [shape: f32[1,768], index: 6, kind: input, shape index: {}]   ;;  %s20625_s7 = inlined_call_operand.hbm [shape: bf16[256,768], index: 7, kind: output, shape index: {}]  }
   0x1   :  { %15 = vsyncpa [#allocation9], 0 }
   0x2   :  { %16 = vsyncpa [#allocation12], 0 }
   0x3   :  { %17 = vsyncpa [#allocation7], 0  ;;  %s18772_s24 = smov [#allocation8]   ;;  %s18632_s28 = scalar_lea.hbm %s20621_s3, 73728 }
   0x4   :  { %s35_s25 = sshll.u32 %s18772_s24, 4  ;;  %p18633_p0 = scmp.ne.s32.totalorder %s20621_s3, %s18632_s28  ;;  %s36_s25 = int_to_ptr.vmem [resolvable:$true] %s35_s25 }
   0x5   :  { %p18636_p1 = scmp.lt.u32.totalorder %s18632_s28, %s20621_s3 }
   0x7   :  { %p18638_p2 = pnand %p18636_p1, %p18633_p0 }
   0x9   :  { %18641 = shalt.err (!%p18638_p2)
}
   0xa   :  { %s18642_s10 = scalar_lea.vmem %s36_s25, 73728  ;;  %p18647_p4 = scmp.lt.s32.totalorder %s36_s25, %s36_s25 }
   0xb   :  { %p18643_p3 = scmp.ne.s32.totalorder %s36_s25, %s18642_s10  ;;  %p18648_p5 = scmp.lt.s32.totalorder %s18642_s10, %s18642_s10 }
   0xd   :  { %p18649_p6 = por %p18648_p5, %p18647_p4 }
   0xf   :  { %p18650_p7 = pnand %p18649_p6, %p18643_p3 }
  0x11   :  { %18653 = shalt.err (!%p18650_p7)
}
  0x12   :  { %s18773_s11 = smov 384   ;;  %s18774_s12 = smov 24  }
  0x13   :  { %41 = dma.hbm_to_vmem [thread:$0]  %s20621_s3, 73728, %s36_s25, [#allocation9], %s18773_s11, %s18773_s11, %s18774_s12  }
  0x14   :  { %s18775_s15 = smov [#allocation11]   ;;  %s18776_s17 = smov [#allocation5]  }
  0x15   :  { %s57_s16 = sshll.u32 %s18775_s15, 4  ;;  %s23_s18 = sshll.u32 %s18776_s17, 4  ;;  %s58_s16 = int_to_ptr.vmem [resolvable:$true] %s57_s16  ;;  %s24_s18 = int_to_ptr.vmem [resolvable:$true] %s23_s18 }
  0x16   :  { %s18654_s21 = scalar_lea.hbm %s20623_s5, 36864 }
  0x17   :  { %p18655_p8 = scmp.ne.s32.totalorder %s20623_s5, %s18654_s21  ;;  %p18658_p9 = scmp.lt.u32.totalorder %s18654_s21, %s20623_s5 }
  0x19   :  { %p18660_p10 = pnand %p18658_p9, %p18655_p8 }
  0x1b   :  { %18663 = shalt.err (!%p18660_p10)
}
  0x1c   :  { %s18664_s3 = scalar_lea.vmem %s58_s16, 36864  ;;  %p18669_p12 = scmp.lt.s32.totalorder %s58_s16, %s58_s16 }
  0x1d   :  { %p18665_p11 = scmp.ne.s32.totalorder %s58_s16, %s18664_s3  ;;  %p18670_p13 = scmp.lt.s32.totalorder %s18664_s3, %s18664_s3 }
  0x1f   :  { %p18671_p0 = por %p18670_p13, %p18669_p12 }
  0x21   :  { %p18672_p1 = pnand %p18671_p0, %p18665_p11 }
  0x23   :  { %18675 = shalt.err (!%p18672_p1)
}
  0x24   :  { %63 = dma.hbm_to_vmem [thread:$0]  %s20623_s5, 36864, %s58_s16, [#allocation12], %s18773_s11, %s18773_s11, %s18774_s12  }
  0x25   :  { %s18676_s30 = scalar_lea.hbm %s20620_s2, 24576 }
  0x26   :  { %p18677_p2 = scmp.ne.s32.totalorder %s20620_s2, %s18676_s30  ;;  %p18680_p3 = scmp.lt.u32.totalorder %s18676_s30, %s20620_s2 }
  0x28   :  { %p18682_p4 = pnand %p18680_p3, %p18677_p2 }
  0x2a   :  { %18685 = shalt.err (!%p18682_p4)
}
  0x2b   :  { %s18686_s14 = scalar_lea.vmem %s24_s18, 24576  ;;  %p18691_p6 = scmp.lt.s32.totalorder %s24_s18, %s24_s18 }
  0x2c   :  { %p18687_p5 = scmp.ne.s32.totalorder %s24_s18, %s18686_s14  ;;  %p18692_p7 = scmp.lt.s32.totalorder %s18686_s14, %s18686_s14 }
  0x2e   :  { %p18693_p8 = por %p18692_p7, %p18691_p6 }
  0x30   :  { %p18694_p9 = pnand %p18693_p8, %p18687_p5 }
  0x32   :  { %18697 = shalt.err (!%p18694_p9)
}
  0x33   :  { %s18777_s5 = smov 768   ;;  %s18778_s15 = smov 48  }
  0x34   :  { %29 = dma.hbm_to_vmem [thread:$0]  %s20620_s2, 24576, %s24_s18, [#allocation6], %s18777_s5, %s18777_s5, %s18778_s15  }
  0x35   :  { %s18779_s19 = smov [#allocation10]   ;;  %s18780_s21 = smov [#allocation13]  }
  0x36   :  { %s48_s20 = sshll.u32 %s18779_s19, 4  ;;  %s70_s22 = sshll.u32 %s18780_s21, 4  ;;  %s49_s20 = int_to_ptr.vmem [resolvable:$true] %s48_s20  ;;  %s71_s22 = int_to_ptr.vmem [resolvable:$true] %s70_s22 }
  0x37   :  { %s18698_s26 = scalar_lea.hbm %s20622_s4, 96 }
  0x38   :  { %p18699_p10 = scmp.ne.s32.totalorder %s20622_s4, %s18698_s26  ;;  %p18702_p11 = scmp.lt.u32.totalorder %s18698_s26, %s20622_s4 }
  0x3a   :  { %p18704_p12 = pnand %p18702_p11, %p18699_p10 }
  0x3c   :  { %18707 = shalt.err (!%p18704_p12)
}
  0x3d   :  { %s18708_s2 = scalar_lea.vmem %s49_s20, 96  ;;  %p18713_p0 = scmp.lt.s32.totalorder %s49_s20, %s49_s20 }
  0x3e   :  { %p18709_p13 = scmp.ne.s32.totalorder %s49_s20, %s18708_s2  ;;  %p18714_p1 = scmp.lt.s32.totalorder %s18708_s2, %s18708_s2 }
  0x40   :  { %p18715_p2 = por %p18714_p1, %p18713_p0 }
  0x42   :  { %p18716_p3 = pnand %p18715_p2, %p18709_p13 }
  0x44   :  { %18719 = shalt.err (!%p18716_p3)
}
  0x45   :  { %51 = dma.hbm_to_vmem [thread:$0]  %s20622_s4, 96, %s49_s20, [#allocation9]  }
  0x46   :  { %s18720_s9 = scalar_lea.hbm %s20624_s6, 96 }
  0x47   :  { %p18721_p4 = scmp.ne.s32.totalorder %s20624_s6, %s18720_s9  ;;  %p18724_p5 = scmp.lt.u32.totalorder %s18720_s9, %s20624_s6 }
  0x49   :  { %p18726_p6 = pnand %p18724_p5, %p18721_p4 }
  0x4b   :  { %18729 = shalt.err (!%p18726_p6)
}
  0x4c   :  { %s18730_s15 = scalar_lea.vmem %s71_s22, 96  ;;  %p18735_p8 = scmp.lt.s32.totalorder %s71_s22, %s71_s22 }
  0x4d   :  { %p18731_p7 = scmp.ne.s32.totalorder %s71_s22, %s18730_s15  ;;  %p18736_p9 = scmp.lt.s32.totalorder %s18730_s15, %s18730_s15 }
  0x4f   :  { %p18737_p10 = por %p18736_p9, %p18735_p8 }
  0x51   :  { %p18738_p11 = pnand %p18737_p10, %p18731_p7 }
  0x53   :  { %18741 = shalt.err (!%p18738_p11)
}
  0x54   :  { %73 = dma.hbm_to_vmem [thread:$0]  %s20624_s6, 96, %s71_s22, [#allocation12]  }
  0x55   :  { %18764 = dma.done.wait [#allocation6], 24576  }
  0x56   :  { %18765 = vsyncadd [#allocation6], 4294942720 }
  0x57   :  { %18766 = dma.done.wait [#allocation9], 73824  }
  0x58   :  { %18767 = vsyncadd [#allocation9], 4294893472 }
  0x59   :  { %18768 = dma.done.wait [#allocation12], 36960  }
  0x5a   :  { %18769 = vsyncadd [#allocation12], 4294930336  ;;  %v16661_v0 = vld [vmem:[#allocation8 + $0x4] ss:$24 sps:$4 sm:$0xff]   ;;  %v16665_v2 = vld [vmem:[#allocation8] ss:$24 sps:$4 sm:$0xff]  }
  0x5b   :  { %v18888_v1 = vld [vmem:[#allocation8 + $0x304] ss:$24 sps:$4 sm:$0xff]   ;;  %4729 = vmatprep.subr.bf16.mxu1 %v16661_v0  ;;  %v18890_v3 = vld [vmem:[#allocation8 + $0x300] ss:$24 sps:$4 sm:$0xff]   ;;  %v16667_v4 = vld [vmem:[#allocation8 + $0x34] ss:$24 sps:$4 sm:$0xff]  }
  0x5c   :  { %4922 = vmatprep.subr.bf16.mxu0 %v18888_v1  ;;  %4730 = vmatpush1.bf16.msra.mxu1 %v16665_v2  ;;  %v18894_v5 = vld [vmem:[#allocation8 + $0x334] ss:$24 sps:$4 sm:$0xff]   ;;  %v16671_v6 = vld [vmem:[#allocation8 + $0x30] ss:$24 sps:$4 sm:$0xff]   ;;  %v16673_v8 = vld [vmem:[#allocation8 + $0x64] ss:$24 sps:$4 sm:$0xff]  }
  0x5d   :  { %4923 = vmatpush1.bf16.msra.mxu0 %v18890_v3  ;;  %4731 = vmatprep.subr.bf16.mxu1 %v16667_v4  ;;  %v18896_v7 = vld [vmem:[#allocation8 + $0x330] ss:$24 sps:$4 sm:$0xff]   ;;  %v18899_v9 = vld [vmem:[#allocation8 + $0x364] ss:$24 sps:$4 sm:$0xff]   ;;  %v16677_v10 = vld [vmem:[#allocation8 + $0x60] ss:$24 sps:$4 sm:$0xff]  }
  0x5e   :  { %4924 = vmatprep.subr.bf16.mxu0 %v18894_v5  ;;  %v18901_v11 = vld [vmem:[#allocation8 + $0x360] ss:$24 sps:$4 sm:$0xff]   ;;  %v16679_v12 = vld [vmem:[#allocation8 + $0x94] ss:$24 sps:$4 sm:$0xff]   ;;  %v16683_v14 = vld [vmem:[#allocation8 + $0x90] ss:$24 sps:$4 sm:$0xff]  }
  0x5f   :  { %v18905_v13 = vld [vmem:[#allocation8 + $0x394] ss:$24 sps:$4 sm:$0xff]   ;;  %v18908_v15 = vld [vmem:[#allocation8 + $0x390] ss:$24 sps:$4 sm:$0xff]   ;;  %v16685_v16 = vld [vmem:[#allocation8 + $0xc4] ss:$24 sps:$4 sm:$0xff]  }
  0x60   :  { %4732 = vmatpush1.bf16.msra.mxu1 %v16671_v6  ;;  %v18911_v17 = vld [vmem:[#allocation8 + $0x3c4] ss:$24 sps:$4 sm:$0xff]   ;;  %v16689_v18 = vld [vmem:[#allocation8 + $0xc0] ss:$24 sps:$4 sm:$0xff]   ;;  %v16691_v20 = vld [vmem:[#allocation8 + $0xf4] ss:$24 sps:$4 sm:$0xff]  }
  0x61   :  { %4925 = vmatpush1.bf16.msra.mxu0 %v18896_v7  ;;  %4733 = vmatprep.subr.bf16.mxu1 %v16673_v8  ;;  %v18913_v19 = vld [vmem:[#allocation8 + $0x3c0] ss:$24 sps:$4 sm:$0xff]   ;;  %v18917_v21 = vld [vmem:[#allocation8 + $0x3f4] ss:$24 sps:$4 sm:$0xff]   ;;  %v16695_v22 = vld [vmem:[#allocation8 + $0xf0] ss:$24 sps:$4 sm:$0xff]  }
  0x62   :  { %4926 = vmatprep.subr.bf16.mxu0 %v18899_v9  ;;  %v18920_v23 = vld [vmem:[#allocation8 + $0x3f0] ss:$24 sps:$4 sm:$0xff]   ;;  %v16697_v24 = vld [vmem:[#allocation8 + $0x124] ss:$24 sps:$4 sm:$0xff]   ;;  %v16701_v26 = vld [vmem:[#allocation8 + $0x120] ss:$24 sps:$4 sm:$0xff]  }
  0x63   :  { %v18923_v25 = vld [vmem:[#allocation8 + $0x424] ss:$24 sps:$4 sm:$0xff]   ;;  %v18925_v27 = vld [vmem:[#allocation8 + $0x420] ss:$24 sps:$4 sm:$0xff]   ;;  %v16703_v28 = vld [vmem:[#allocation8 + $0x154] ss:$24 sps:$4 sm:$0xff]  }
  0x64   :  { %4734 = vmatpush1.bf16.msra.mxu1 %v16677_v10  ;;  %v18929_v29 = vld [vmem:[#allocation8 + $0x454] ss:$24 sps:$4 sm:$0xff]   ;;  %v16707_v30 = vld [vmem:[#allocation8 + $0x150] ss:$24 sps:$4 sm:$0xff]   ;;  %v16709_v32 = vld [vmem:[#allocation8 + $0x184] ss:$24 sps:$4 sm:$0xff]  }
  0x65   :  { %4927 = vmatpush1.bf16.msra.mxu0 %v18901_v11  ;;  %4735 = vmatprep.subr.bf16.mxu1 %v16679_v12  ;;  %v18932_v31 = vld [vmem:[#allocation8 + $0x450] ss:$24 sps:$4 sm:$0xff]   ;;  %v18935_v33 = vld [vmem:[#allocation8 + $0x484] ss:$24 sps:$4 sm:$0xff]   ;;  %v16713_v34 = vld [vmem:[#allocation8 + $0x180] ss:$24 sps:$4 sm:$0xff]  }
  0x66   :  { %4928 = vmatprep.subr.bf16.mxu0 %v18905_v13  ;;  %v18937_v35 = vld [vmem:[#allocation8 + $0x480] ss:$24 sps:$4 sm:$0xff]   ;;  %v16715_v36 = vld [vmem:[#allocation8 + $0x1b4] ss:$24 sps:$4 sm:$0xff]   ;;  %v16719_v38 = vld [vmem:[#allocation8 + $0x1b0] ss:$24 sps:$4 sm:$0xff]  }
  0x67   :  { %v18941_v37 = vld [vmem:[#allocation8 + $0x4b4] ss:$24 sps:$4 sm:$0xff]   ;;  %v18944_v39 = vld [vmem:[#allocation8 + $0x4b0] ss:$24 sps:$4 sm:$0xff]   ;;  %v16721_v40 = vld [vmem:[#allocation8 + $0x1e4] ss:$24 sps:$4 sm:$0xff]  }
  0x68   :  { %4736 = vmatpush1.bf16.msra.mxu1 %v16683_v14  ;;  %v18947_v41 = vld [vmem:[#allocation8 + $0x4e4] ss:$24 sps:$4 sm:$0xff]   ;;  %v16725_v42 = vld [vmem:[#allocation8 + $0x1e0] ss:$24 sps:$4 sm:$0xff]   ;;  %v16727_v44 = vld [vmem:[#allocation8 + $0x214] ss:$24 sps:$4 sm:$0xff]  }
  0x69   :  { %4929 = vmatpush1.bf16.msra.mxu0 %v18908_v15  ;;  %4737 = vmatprep.subr.bf16.mxu1 %v16685_v16  ;;  %v18949_v43 = vld [vmem:[#allocation8 + $0x4e0] ss:$24 sps:$4 sm:$0xff]   ;;  %v18953_v45 = vld [vmem:[#allocation8 + $0x514] ss:$24 sps:$4 sm:$0xff]   ;;  %v16731_v46 = vld [vmem:[#allocation8 + $0x210] ss:$24 sps:$4 sm:$0xff]  }
  0x6a   :  { %4930 = vmatprep.subr.bf16.mxu0 %v18911_v17  ;;  %v18955_v47 = vld [vmem:[#allocation8 + $0x510] ss:$24 sps:$4 sm:$0xff]   ;;  %v16757_v48 = vld [vmem:[#allocation5 + $0x4] ss:$48 sps:$4 sm:$0xff]   ;;  %v16759_v50 = vld [vmem:[#allocation5 + $0xc] ss:$48 sps:$4 sm:$0xff]  }
  0x6b   :  { %v16733_v49 = vld [vmem:[#allocation8 + $0x244] ss:$24 sps:$4 sm:$0xff]   ;;  %4761 = vmatprep.mubr.bf16.mxu1 %v16757_v48  ;;  %4954 = vmatprep.mubr.bf16.mxu0 %v16759_v50  ;;  %v16737_v52 = vld [vmem:[#allocation8 + $0x240] ss:$24 sps:$4 sm:$0xff]   ;;  %v16739_v54 = vld [vmem:[#allocation8 + $0x274] ss:$24 sps:$4 sm:$0xff]  }
  0x6c   :  { %4738 = vmatpush1.bf16.msra.mxu1 %v16689_v18  ;;  %v18959_v51 = vld [vmem:[#allocation8 + $0x544] ss:$24 sps:$4 sm:$0xff]   ;;  %v18961_v53 = vld [vmem:[#allocation8 + $0x540] ss:$24 sps:$4 sm:$0xff]   ;;  %v18965_v55 = vld [vmem:[#allocation8 + $0x574] ss:$24 sps:$4 sm:$0xff]  }
  0x6d   :  { %4931 = vmatpush1.bf16.msra.mxu0 %v18913_v19  ;;  %4739 = vmatprep.subr.bf16.mxu1 %v16691_v20  ;;  %v16743_v56 = vld [vmem:[#allocation8 + $0x270] ss:$24 sps:$4 sm:$0xff]   ;;  %v16745_v58 = vld [vmem:[#allocation8 + $0x2a4] ss:$24 sps:$4 sm:$0xff]   ;;  %v16749_v60 = vld [vmem:[#allocation8 + $0x2a0] ss:$24 sps:$4 sm:$0xff]  }
  0x6e   :  { %4932 = vmatprep.subr.bf16.mxu0 %v18917_v21  ;;  %v18967_v57 = vld [vmem:[#allocation8 + $0x570] ss:$24 sps:$4 sm:$0xff]   ;;  %v18971_v59 = vld [vmem:[#allocation8 + $0x5a4] ss:$24 sps:$4 sm:$0xff]   ;;  %v18973_v61 = vld [vmem:[#allocation8 + $0x5a0] ss:$24 sps:$4 sm:$0xff]  }
  0x6f   :  { %v16751_v62 = vld [vmem:[#allocation8 + $0x2d4] ss:$24 sps:$4 sm:$0xff]   ;;  %v16755_v0 = vld [vmem:[#allocation8 + $0x2d0] ss:$24 sps:$4 sm:$0xff]   ;;  %v16765_v4 = vld [vmem:[#allocation8 + $0x604] ss:$24 sps:$4 sm:$0xff]  }
  0x70   :  { %4740 = vmatpush1.bf16.msra.mxu1 %v16695_v22  ;;  %v18977_v63 = vld [vmem:[#allocation8 + $0x5d4] ss:$24 sps:$4 sm:$0xff]   ;;  %v18980_v2 = vld [vmem:[#allocation8 + $0x5d0] ss:$24 sps:$4 sm:$0xff]   ;;  %v16763_v10 = vld [vmem:[#allocation8 + $0x600] ss:$24 sps:$4 sm:$0xff]  }
  0x71   :  { %4933 = vmatpush1.bf16.msra.mxu0 %v18920_v23  ;;  %4741 = vmatprep.subr.bf16.mxu1 %v16697_v24  ;;  %v16761_v6 = vld [vmem:[#allocation5] ss:$48 sps:$4 sm:$0xff]   ;;  %v16762_v8 = vld [vmem:[#allocation5 + $0x8] ss:$48 sps:$4 sm:$0xff]   ;;  %v16768_v12 = vld [vmem:[#allocation8 + $0x634] ss:$24 sps:$4 sm:$0xff]  }
  0x72   :  { %4934 = vmatprep.subr.bf16.mxu0 %v18923_v25  ;;  %v16769_v14 = vld [vmem:[#allocation5 + $0x64] ss:$48 sps:$4 sm:$0xff]   ;;  %v16771_v16 = vld [vmem:[#allocation5 + $0x6c] ss:$48 sps:$4 sm:$0xff]   ;;  %v16766_v18 = vld [vmem:[#allocation8 + $0x630] ss:$24 sps:$4 sm:$0xff]  }
  0x73   :  { %v16777_v20 = vld [vmem:[#allocation8 + $0x664] ss:$24 sps:$4 sm:$0xff]   ;;  %v16773_v22 = vld [vmem:[#allocation5 + $0x60] ss:$48 sps:$4 sm:$0xff]   ;;  %v16774_v24 = vld [vmem:[#allocation5 + $0x68] ss:$48 sps:$4 sm:$0xff]  }
  0x74   :  { %4742 = vmatpush1.bf16.msra.mxu1 %v16701_v26  ;;  %v16775_v26 = vld [vmem:[#allocation8 + $0x660] ss:$24 sps:$4 sm:$0xff]   ;;  %v16802_v50 = vld [vmem:[#allocation8 + $0x750] ss:$24 sps:$4 sm:$0xff]  }
  0x75   :  { %4935 = vmatpush1.bf16.msra.mxu0 %v18925_v27  ;;  %4743 = vmatprep.subr.bf16.mxu1 %v16703_v28  ;;  %v16780_v28 = vld [vmem:[#allocation8 + $0x694] ss:$24 sps:$4 sm:$0xff]   ;;  %v16799_v48 = vld [vmem:[#allocation8 + $0x720] ss:$24 sps:$4 sm:$0xff]  }
  0x76   :  { %4936 = vmatprep.subr.bf16.mxu0 %v18929_v29 }
  0x78   :  { %4744 = vmatpush1.bf16.msra.mxu1 %v16707_v30  ;;  %v16781_v30 = vld [vmem:[#allocation5 + $0xc4] ss:$48 sps:$4 sm:$0xff]  }
  0x79   :  { %4937 = vmatpush1.bf16.msra.mxu0 %v18932_v31  ;;  %4745 = vmatprep.subr.bf16.mxu1 %v16709_v32  ;;  %v16778_v32 = vld [vmem:[#allocation8 + $0x690] ss:$24 sps:$4 sm:$0xff]  }
  0x7a   :  { %4938 = vmatprep.subr.bf16.mxu0 %v18935_v33 }
  0x7c   :  { %4746 = vmatpush1.bf16.msra.mxu1 %v16713_v34  ;;  %v16789_v34 = vld [vmem:[#allocation8 + $0x6c4] ss:$24 sps:$4 sm:$0xff]  }
  0x7d   :  { %4939 = vmatpush1.bf16.msra.mxu0 %v18937_v35  ;;  %4747 = vmatprep.subr.bf16.mxu1 %v16715_v36  ;;  %v16786_v36 = vld [vmem:[#allocation5 + $0xc8] ss:$48 sps:$4 sm:$0xff]  }
  0x7e   :  { %4940 = vmatprep.subr.bf16.mxu0 %v18941_v37 }
  0x80   :  { %4748 = vmatpush1.bf16.msra.mxu1 %v16719_v38  ;;  %v16787_v38 = vld [vmem:[#allocation8 + $0x6c0] ss:$24 sps:$4 sm:$0xff]  }
  0x81   :  { %4941 = vmatpush1.bf16.msra.mxu0 %v18944_v39  ;;  %4749 = vmatprep.subr.bf16.mxu1 %v16721_v40  ;;  %v16793_v40 = vld [vmem:[#allocation5 + $0x124] ss:$48 sps:$4 sm:$0xff]  }
  0x82   :  { %4942 = vmatprep.subr.bf16.mxu0 %v18947_v41 }
  0x84   :  { %4750 = vmatpush1.bf16.msra.mxu1 %v16725_v42  ;;  %v16790_v42 = vld [vmem:[#allocation8 + $0x6f0] ss:$24 sps:$4 sm:$0xff]  }
  0x85   :  { %4943 = vmatpush1.bf16.msra.mxu0 %v18949_v43  ;;  %4751 = vmatprep.subr.bf16.mxu1 %v16727_v44  ;;  %v16801_v44 = vld [vmem:[#allocation8 + $0x724] ss:$24 sps:$4 sm:$0xff]  }
  0x86   :  { %4944 = vmatprep.subr.bf16.mxu0 %v18953_v45 }
  0x88   :  { %4752 = vmatpush1.bf16.msra.mxu1 %v16731_v46  ;;  %v16797_v46 = vld [vmem:[#allocation5 + $0x120] ss:$48 sps:$4 sm:$0xff]  }
  0x89   :  { %4945 = vmatpush1.bf16.msra.mxu0 %v18955_v47  ;;  %4753 = vmatprep.subr.bf16.mxu1 %v16733_v49  ;;  %v16807_v49 = vld [vmem:[#allocation5 + $0x18c] ss:$48 sps:$4 sm:$0xff]  }
  0x8a   :  { %4946 = vmatprep.subr.bf16.mxu0 %v18959_v51 }
  0x8c   :  { %4754 = vmatpush1.bf16.msra.mxu1 %v16737_v52  ;;  %v16813_v52 = vld [vmem:[#allocation8 + $0x784] ss:$24 sps:$4 sm:$0xff]  }
  0x8d   :  { %4947 = vmatpush1.bf16.msra.mxu0 %v18961_v53  ;;  %4755 = vmatprep.subr.bf16.mxu1 %v16739_v54  ;;  %v16810_v54 = vld [vmem:[#allocation5 + $0x188] ss:$48 sps:$4 sm:$0xff]  }
  0x8e   :  { %4948 = vmatprep.subr.bf16.mxu0 %v18965_v55 }
  0x90   :  { %4756 = vmatpush1.bf16.msra.mxu1 %v16743_v56  ;;  %v16811_v56 = vld [vmem:[#allocation8 + $0x780] ss:$24 sps:$4 sm:$0xff]  }
  0x91   :  { %4949 = vmatpush1.bf16.msra.mxu0 %v18967_v57  ;;  %4757 = vmatprep.subr.bf16.mxu1 %v16745_v58  ;;  %v16817_v58 = vld [vmem:[#allocation5 + $0x1e4] ss:$48 sps:$4 sm:$0xff]  }
  0x92   :  { %4950 = vmatprep.subr.bf16.mxu0 %v18971_v59 }
  0x94   :  { %4758 = vmatpush1.bf16.msra.mxu1 %v16749_v60  ;;  %v16814_v60 = vld [vmem:[#allocation8 + $0x7b0] ss:$24 sps:$4 sm:$0xff]  }
  0x95   :  { %4951 = vmatpush1.bf16.msra.mxu0 %v18973_v61  ;;  %4759 = vmatprep.subr.bf16.mxu1 %v16751_v62  ;;  %v16825_v62 = vld [vmem:[#allocation8 + $0x7e4] ss:$24 sps:$4 sm:$0xff]  }
  0x96   :  { %4952 = vmatprep.subr.bf16.mxu0 %v18977_v63 }
  0x98   :  { %4760 = vmatpush1.bf16.msra.mxu1 %v16755_v0  ;;  %v16822_v0 = vld [vmem:[#allocation5 + $0x1e8] ss:$48 sps:$4 sm:$0xff]  }
  0x99   :  { %4953 = vmatpush1.bf16.msra.mxu0 %v18980_v2  ;;  %14891 = vmatprep.subr.bf16.mxu1 %v18888_v1  ;;  %v16783_v1 = vld [vmem:[#allocation5 + $0xcc] ss:$48 sps:$4 sm:$0xff]  }
  0x9a   :  { %5115 = vmatprep.subr.bf16.mxu0 %v16765_v4  ;;  %v16823_v4 = vld [vmem:[#allocation8 + $0x7e0] ss:$24 sps:$4 sm:$0xff]  }
  0x9b   :  { %4762 = vmatmul.mubr.bf16.vlgmr.msra.gmra.mrb[0].mxu1 %v16761_v6  ;;  %v16831_v6 = vld [vmem:[#allocation5 + $0x24c] ss:$48 sps:$4 sm:$0xff]  }
  0x9c   :  { %4955 = vmatmul.mubr.bf16.vlgmr.msra.gmra.mrb[0].mxu0 %v16762_v8  ;;  %4771 = vmatprep.mubr.bf16.mxu1 %v16769_v14  ;;  %v16826_v8 = vld [vmem:[#allocation8 + $0x810] ss:$24 sps:$4 sm:$0xff]   ;;  %v16835_v14 = vld [vmem:[#allocation8 + $0x840] ss:$24 sps:$4 sm:$0xff]  }
  0x9d   :  { %5116 = vmatpush1.bf16.msra.mxu0 %v16763_v10  ;;  %4964 = vmatprep.mubr.bf16.mxu0 %v16771_v16  ;;  %v16837_v10 = vld [vmem:[#allocation8 + $0x844] ss:$24 sps:$4 sm:$0xff]  }
  0x9e   :  { %5117 = vmatprep.subr.bf16.mxu0 %v16768_v12  ;;  %14907 = vmatpush1.bf16.msra.mxu1 %v18890_v3  ;;  %v16785_v3 = vld [vmem:[#allocation5 + $0xc0] ss:$48 sps:$4 sm:$0xff]   ;;  %v16834_v12 = vld [vmem:[#allocation5 + $0x248] ss:$48 sps:$4 sm:$0xff]   ;;  %v16841_v16 = vld [vmem:[#allocation5 + $0x2a4] ss:$48 sps:$4 sm:$0xff]  }
  0x9f   :  { %14892 = vmatprep.subr.bf16.mxu1 %v18894_v5  ;;  %v16792_v5 = vld [vmem:[#allocation8 + $0x6f4] ss:$24 sps:$4 sm:$0xff]  }
  0xa1   :  { %5118 = vmatpush1.bf16.msra.mxu0 %v16766_v18  ;;  %v16838_v18 = vld [vmem:[#allocation8 + $0x870] ss:$24 sps:$4 sm:$0xff]  }
  0xa2   :  { %5119 = vmatprep.subr.bf16.mxu0 %v16777_v20  ;;  %14908 = vmatpush1.bf16.msra.mxu1 %v18896_v7  ;;  %v16795_v7 = vld [vmem:[#allocation5 + $0x12c] ss:$48 sps:$4 sm:$0xff]  }
  0xa3   :  { %4772 = vmatmul.mubr.bf16.gmra.mrb[4].mxu1 %v16773_v22  ;;  %14893 = vmatprep.subr.bf16.mxu1 %v18899_v9  ;;  %v16798_v9 = vld [vmem:[#allocation5 + $0x128] ss:$48 sps:$4 sm:$0xff]   ;;  %v16849_v20 = vld [vmem:[#allocation8 + $0x8a4] ss:$24 sps:$4 sm:$0xff]  }
  0xa4   :  { %4965 = vmatmul.mubr.bf16.gmra.mrb[4].mxu0 %v16774_v24  ;;  %4781 = vmatprep.mubr.bf16.mxu1 %v16781_v30  ;;  %v16846_v22 = vld [vmem:[#allocation5 + $0x2a8] ss:$48 sps:$4 sm:$0xff]   ;;  %v16861_v30 = vld [vmem:[#allocation8 + $0x904] ss:$24 sps:$4 sm:$0xff]  }
  0xa5   :  { %5120 = vmatpush1.bf16.msra.mxu0 %v16775_v26  ;;  %4974 = vmatprep.mubr.bf16.mxu0 %v16783_v1  ;;  %v16847_v24 = vld [vmem:[#allocation8 + $0x8a0] ss:$24 sps:$4 sm:$0xff]   ;;  %v16857_v26 = vld [vmem:[#allocation5 + $0x14] ss:$48 sps:$4 sm:$0xff]  }
  0xa6   :  { %5121 = vmatprep.subr.bf16.mxu0 %v16780_v28  ;;  %14909 = vmatpush1.bf16.msra.mxu1 %v18901_v11  ;;  %v16804_v11 = vld [vmem:[#allocation8 + $0x754] ss:$24 sps:$4 sm:$0xff]   ;;  %v16850_v28 = vld [vmem:[#allocation8 + $0x8d0] ss:$24 sps:$4 sm:$0xff]  }
  0xa7   :  { %14894 = vmatprep.subr.bf16.mxu1 %v18905_v13  ;;  %v16805_v13 = vld [vmem:[#allocation5 + $0x184] ss:$48 sps:$4 sm:$0xff]   ;;  %v16855_v1 = vld [vmem:[#allocation5 + $0x10] ss:$48 sps:$4 sm:$0xff]  }
  0xa9   :  { %5122 = vmatpush1.bf16.msra.mxu0 %v16778_v32  ;;  %v16859_v32 = vld [vmem:[#allocation8 + $0x900] ss:$24 sps:$4 sm:$0xff]  }
  0xaa   :  { %5123 = vmatprep.subr.bf16.mxu0 %v16789_v34  ;;  %14910 = vmatpush1.bf16.msra.mxu1 %v18908_v15  ;;  %v16809_v15 = vld [vmem:[#allocation5 + $0x180] ss:$48 sps:$4 sm:$0xff]   ;;  %v16864_v34 = vld [vmem:[#allocation5 + $0x74] ss:$48 sps:$4 sm:$0xff]  }
  0xab   :  { %4782 = vmatmul.mubr.bf16.gmra.mrb[8].mxu1 %v16785_v3  ;;  %14895 = vmatprep.subr.bf16.mxu1 %v18911_v17  ;;  %v16816_v17 = vld [vmem:[#allocation8 + $0x7b4] ss:$24 sps:$4 sm:$0xff]   ;;  %v16868_v3 = vld [vmem:[#allocation8 + $0x930] ss:$24 sps:$4 sm:$0xff]  }
  0xac   :  { %4975 = vmatmul.mubr.bf16.gmra.mrb[8].mxu0 %v16786_v36  ;;  %4791 = vmatprep.mubr.bf16.mxu1 %v16793_v40  ;;  %v16879_v36 = vld [vmem:[#allocation8 + $0x964] ss:$24 sps:$4 sm:$0xff]   ;;  %v16888_v40 = vld [vmem:[#allocation8 + $0x994] ss:$24 sps:$4 sm:$0xff]  }
  0xad   :  { %5124 = vmatpush1.bf16.msra.mxu0 %v16787_v38  ;;  %4984 = vmatprep.mubr.bf16.mxu0 %v16795_v7  ;;  %v16866_v38 = vld [vmem:[#allocation5 + $0x360] ss:$48 sps:$4 sm:$0xff]  }
  0xae   :  { %5125 = vmatprep.subr.bf16.mxu0 %v16792_v5  ;;  %14911 = vmatpush1.bf16.msra.mxu1 %v18913_v19  ;;  %v16819_v19 = vld [vmem:[#allocation5 + $0x1ec] ss:$48 sps:$4 sm:$0xff]   ;;  %v16871_v5 = vld [vmem:[#allocation5 + $0x3c4] ss:$48 sps:$4 sm:$0xff]   ;;  %v16875_v7 = vld [vmem:[#allocation5 + $0x3c0] ss:$48 sps:$4 sm:$0xff]  }
  0xaf   :  { %14896 = vmatprep.subr.bf16.mxu1 %v18917_v21  ;;  %v16821_v21 = vld [vmem:[#allocation5 + $0x1e0] ss:$48 sps:$4 sm:$0xff]  }
  0xb1   :  { %5126 = vmatpush1.bf16.msra.mxu0 %v16790_v42  ;;  %v16886_v42 = vld [vmem:[#allocation8 + $0x990] ss:$24 sps:$4 sm:$0xff]  }
  0xb2   :  { %5127 = vmatprep.subr.bf16.mxu0 %v16801_v44  ;;  %14912 = vmatpush1.bf16.msra.mxu1 %v18920_v23  ;;  %v16828_v23 = vld [vmem:[#allocation8 + $0x814] ss:$24 sps:$4 sm:$0xff]   ;;  %v16897_v44 = vld [vmem:[#allocation8 + $0x9c4] ss:$24 sps:$4 sm:$0xff]  }
  0xb3   :  { %4792 = vmatmul.mubr.bf16.gmra.mrb[12].mxu1 %v16797_v46  ;;  %14897 = vmatprep.subr.bf16.mxu1 %v18923_v25  ;;  %v16829_v25 = vld [vmem:[#allocation5 + $0x244] ss:$48 sps:$4 sm:$0xff]  }
  0xb4   :  { %4985 = vmatmul.mubr.bf16.gmra.mrb[12].mxu0 %v16798_v9  ;;  %4801 = vmatprep.mubr.bf16.mxu1 %v16805_v13  ;;  %v16882_v46 = vld [vmem:[#allocation5 + $0x134] ss:$48 sps:$4 sm:$0xff]   ;;  %v16895_v9 = vld [vmem:[#allocation8 + $0x9c0] ss:$24 sps:$4 sm:$0xff]  }
  0xb5   :  { %5128 = vmatpush1.bf16.msra.mxu0 %v16799_v48  ;;  %4994 = vmatprep.mubr.bf16.mxu0 %v16807_v49  ;;  %v16906_v48 = vld [vmem:[#allocation8 + $0x9f4] ss:$24 sps:$4 sm:$0xff]   ;;  %v16885_v13 = vld [vmem:[#allocation5 + $0x130] ss:$48 sps:$4 sm:$0xff]  }
  0xb6   :  { %5129 = vmatprep.subr.bf16.mxu0 %v16804_v11  ;;  %14913 = vmatpush1.bf16.msra.mxu1 %v18925_v27  ;;  %v16833_v27 = vld [vmem:[#allocation5 + $0x240] ss:$48 sps:$4 sm:$0xff]   ;;  %v16889_v49 = vld [vmem:[#allocation5 + $0x484] ss:$48 sps:$4 sm:$0xff]  }
  0xb7   :  { %14898 = vmatprep.subr.bf16.mxu1 %v18929_v29  ;;  %v16840_v29 = vld [vmem:[#allocation8 + $0x874] ss:$24 sps:$4 sm:$0xff]   ;;  %v16884_v11 = vld [vmem:[#allocation5 + $0x420] ss:$48 sps:$4 sm:$0xff]  }
  0xb9   :  { %5130 = vmatpush1.bf16.msra.mxu0 %v16802_v50  ;;  %v16913_v50 = vld [vmem:[#allocation8 + $0xa20] ss:$24 sps:$4 sm:$0xff]  }
  0xba   :  { %5131 = vmatprep.subr.bf16.mxu0 %v16813_v52  ;;  %14914 = vmatpush1.bf16.msra.mxu1 %v18932_v31  ;;  %v16843_v31 = vld [vmem:[#allocation5 + $0x2ac] ss:$48 sps:$4 sm:$0xff]  }
  0xbb   :  { %4802 = vmatmul.mubr.bf16.gmra.mrb[16].mxu1 %v16809_v15  ;;  %14899 = vmatprep.subr.bf16.mxu1 %v18935_v33  ;;  %v16845_v33 = vld [vmem:[#allocation5 + $0x2a0] ss:$48 sps:$4 sm:$0xff]   ;;  %v16924_v52 = vld [vmem:[#allocation8 + $0xa54] ss:$24 sps:$4 sm:$0xff]   ;;  %v16933_v15 = vld [vmem:[#allocation8 + $0xa84] ss:$24 sps:$4 sm:$0xff]  }
  0xbc   :  { %4995 = vmatmul.mubr.bf16.gmra.mrb[16].mxu0 %v16810_v54  ;;  %4811 = vmatprep.mubr.bf16.mxu1 %v16817_v58  ;;  %v16893_v54 = vld [vmem:[#allocation5 + $0x480] ss:$48 sps:$4 sm:$0xff]   ;;  %v16900_v58 = vld [vmem:[#allocation5 + $0x1f4] ss:$48 sps:$4 sm:$0xff]  }
  0xbd   :  { %5132 = vmatpush1.bf16.msra.mxu0 %v16811_v56  ;;  %5004 = vmatprep.mubr.bf16.mxu0 %v16819_v19  ;;  %v16894_v56 = vld [vmem:[#allocation5 + $0x190] ss:$48 sps:$4 sm:$0xff]  }
  0xbe   :  { %5133 = vmatprep.subr.bf16.mxu0 %v16816_v17  ;;  %14915 = vmatpush1.bf16.msra.mxu1 %v18937_v35  ;;  %v16852_v35 = vld [vmem:[#allocation8 + $0x8d4] ss:$24 sps:$4 sm:$0xff]   ;;  %v16931_v19 = vld [vmem:[#allocation8 + $0xa80] ss:$24 sps:$4 sm:$0xff]  }
  0xbf   :  { %14900 = vmatprep.subr.bf16.mxu1 %v18941_v37  ;;  %v16853_v37 = vld [vmem:[#allocation5 + $0x304] ss:$48 sps:$4 sm:$0xff]  }
  0xc0   :  { %v16898_v17 = vld [vmem:[#allocation5 + $0x4e4] ss:$48 sps:$4 sm:$0xff]  }
  0xc1   :  { %5134 = vmatpush1.bf16.msra.mxu0 %v16814_v60  ;;  %v16948_v60 = vld [vmem:[#allocation8 + $0xab4] ss:$24 sps:$4 sm:$0xff]  }
  0xc2   :  { %5135 = vmatprep.subr.bf16.mxu0 %v16825_v62  ;;  %14916 = vmatpush1.bf16.msra.mxu1 %v18944_v39  ;;  %v16858_v39 = vld [vmem:[#allocation5 + $0x300] ss:$48 sps:$4 sm:$0xff]  }
  0xc3   :  { %4812 = vmatmul.mubr.bf16.gmra.mrb[20].mxu1 %v16821_v21  ;;  %14901 = vmatprep.subr.bf16.mxu1 %v18947_v41  ;;  %v16862_v41 = vld [vmem:[#allocation5 + $0x364] ss:$48 sps:$4 sm:$0xff]   ;;  %v16946_v62 = vld [vmem:[#allocation8 + $0xab0] ss:$24 sps:$4 sm:$0xff]  }
  0xc4   :  { %5005 = vmatmul.mubr.bf16.gmra.mrb[20].mxu0 %v16822_v0  ;;  %4821 = vmatprep.mubr.bf16.mxu1 %v16829_v25  ;;  %v16902_v21 = vld [vmem:[#allocation5 + $0x4e0] ss:$48 sps:$4 sm:$0xff]   ;;  %v16963_v0 = vld [vmem:[#allocation8 + $0xae4] ss:$24 sps:$4 sm:$0xff]  }
  0xc5   :  { %5136 = vmatpush1.bf16.msra.mxu0 %v16823_v4  ;;  %5014 = vmatprep.mubr.bf16.mxu0 %v16831_v6  ;;  %v16903_v4 = vld [vmem:[#allocation5 + $0x1f0] ss:$48 sps:$4 sm:$0xff]   ;;  %v16909_v25 = vld [vmem:[#allocation5 + $0x254] ss:$48 sps:$4 sm:$0xff]  }
  0xc6   :  { %5137 = vmatprep.subr.bf16.mxu0 %v16828_v23  ;;  %14917 = vmatpush1.bf16.msra.mxu1 %v18949_v43  ;;  %v16870_v43 = vld [vmem:[#allocation8 + $0x934] ss:$24 sps:$4 sm:$0xff]   ;;  %v16961_v6 = vld [vmem:[#allocation8 + $0xae0] ss:$24 sps:$4 sm:$0xff]  }
  0xc7   :  { %14902 = vmatprep.subr.bf16.mxu1 %v18953_v45  ;;  %v16867_v45 = vld [vmem:[#allocation5 + $0x70] ss:$48 sps:$4 sm:$0xff]   ;;  %v16907_v23 = vld [vmem:[#allocation5 + $0x544] ss:$48 sps:$4 sm:$0xff]  }
  0xc9   :  { %5138 = vmatpush1.bf16.msra.mxu0 %v16826_v8  ;;  %v16978_v8 = vld [vmem:[#allocation8 + $0xb14] ss:$24 sps:$4 sm:$0xff]  }
  0xca   :  { %5139 = vmatprep.subr.bf16.mxu0 %v16837_v10  ;;  %14918 = vmatpush1.bf16.msra.mxu1 %v18955_v47  ;;  %v16873_v47 = vld [vmem:[#allocation5 + $0xd4] ss:$48 sps:$4 sm:$0xff]   ;;  %v16976_v10 = vld [vmem:[#allocation8 + $0xb10] ss:$24 sps:$4 sm:$0xff]  }
  0xcb   :  { %4822 = vmatmul.mubr.bf16.gmra.mrb[24].mxu1 %v16833_v27  ;;  %14903 = vmatprep.subr.bf16.mxu1 %v18959_v51  ;;  %v16877_v51 = vld [vmem:[#allocation8 + $0x960] ss:$24 sps:$4 sm:$0xff]  }
  0xcc   :  { %5015 = vmatmul.mubr.bf16.gmra.mrb[24].mxu0 %v16834_v12  ;;  %4831 = vmatprep.mubr.bf16.mxu1 %v16841_v16  ;;  %v16911_v27 = vld [vmem:[#allocation5 + $0x540] ss:$48 sps:$4 sm:$0xff]   ;;  %v16993_v12 = vld [vmem:[#allocation8 + $0xb44] ss:$24 sps:$4 sm:$0xff]  }
  0xcd   :  { %5140 = vmatpush1.bf16.msra.mxu0 %v16835_v14  ;;  %5024 = vmatprep.mubr.bf16.mxu0 %v16843_v31  ;;  %v16912_v14 = vld [vmem:[#allocation5 + $0x250] ss:$48 sps:$4 sm:$0xff]   ;;  %v16918_v16 = vld [vmem:[#allocation5 + $0x2b4] ss:$48 sps:$4 sm:$0xff]  }
  0xce   :  { %5141 = vmatprep.subr.bf16.mxu0 %v16840_v29  ;;  %14919 = vmatpush1.bf16.msra.mxu1 %v18961_v53  ;;  %v16876_v53 = vld [vmem:[#allocation5 + $0xd0] ss:$48 sps:$4 sm:$0xff]   ;;  %v16916_v29 = vld [vmem:[#allocation5 + $0x5a4] ss:$48 sps:$4 sm:$0xff]  }
  0xcf   :  { %14904 = vmatprep.subr.bf16.mxu1 %v18965_v55  ;;  %v16880_v55 = vld [vmem:[#allocation5 + $0x424] ss:$48 sps:$4 sm:$0xff]   ;;  %v16991_v31 = vld [vmem:[#allocation8 + $0xb40] ss:$24 sps:$4 sm:$0xff]  }
  0xd1   :  { %5142 = vmatpush1.bf16.msra.mxu0 %v16838_v18  ;;  %v17008_v18 = vld [vmem:[#allocation8 + $0xb74] ss:$24 sps:$4 sm:$0xff]  }
  0xd2   :  { %5143 = vmatprep.subr.bf16.mxu0 %v16849_v20  ;;  %14920 = vmatpush1.bf16.msra.mxu1 %v18967_v57  ;;  %v16936_v57 = vld [vmem:[#allocation8 + $0xc] ss:$24 sps:$4 sm:$0xff]   ;;  %v17006_v20 = vld [vmem:[#allocation8 + $0xb70] ss:$24 sps:$4 sm:$0xff]  }
  0xd3   :  { %4832 = vmatmul.mubr.bf16.gmra.mrb[28].mxu1 %v16845_v33  ;;  %14905 = vmatprep.subr.bf16.mxu1 %v18971_v59  ;;  %v16904_v59 = vld [vmem:[#allocation8 + $0x9f0] ss:$24 sps:$4 sm:$0xff]  }
  0xd4   :  { %5025 = vmatmul.mubr.bf16.gmra.mrb[28].mxu0 %v16846_v22  ;;  %4841 = vmatprep.mubr.bf16.mxu1 %v16853_v37  ;;  %v16920_v33 = vld [vmem:[#allocation5 + $0x5a0] ss:$48 sps:$4 sm:$0xff]   ;;  %v17023_v22 = vld [vmem:[#allocation8 + $0xba4] ss:$24 sps:$4 sm:$0xff]  }
  0xd5   :  { %5144 = vmatpush1.bf16.msra.mxu0 %v16847_v24  ;;  %5147 = vmatprep.mubr.bf16.mxu0 %v16857_v26  ;;  %v16921_v24 = vld [vmem:[#allocation5 + $0x2b0] ss:$48 sps:$4 sm:$0xff]   ;;  %v16928_v37 = vld [vmem:[#allocation5 + $0x314] ss:$48 sps:$4 sm:$0xff]  }
  0xd6   :  { %5145 = vmatprep.subr.bf16.mxu0 %v16852_v35  ;;  %14921 = vmatpush1.bf16.msra.mxu1 %v18973_v61  ;;  %v16915_v61 = vld [vmem:[#allocation8 + $0xa24] ss:$24 sps:$4 sm:$0xff]   ;;  %v17021_v26 = vld [vmem:[#allocation8 + $0xba0] ss:$24 sps:$4 sm:$0xff]  }
  0xd7   :  { %14906 = vmatprep.subr.bf16.mxu1 %v18977_v63  ;;  %v16891_v63 = vld [vmem:[#allocation5 + $0x194] ss:$48 sps:$4 sm:$0xff]   ;;  %v16927_v35 = vld [vmem:[#allocation5 + $0x30c] ss:$48 sps:$4 sm:$0xff]  }
  0xd9   :  { %5146 = vmatpush1.bf16.msra.mxu0 %v16850_v28  ;;  %v17038_v28 = vld [vmem:[#allocation8 + $0xbd4] ss:$24 sps:$4 sm:$0xff]  }
  0xda   :  { %5308 = vmatprep.subr.bf16.mxu0 %v16861_v30  ;;  %14922 = vmatpush1.bf16.msra.mxu1 %v18980_v2  ;;  %v16922_v2 = vld [vmem:[#allocation8 + $0xa50] ss:$24 sps:$4 sm:$0xff]  }
  0xdb   :  { %4842 = vmatmul.mubr.bf16.gmra.mrb[32].mxu1 %v16858_v39  ;;  %5887 = vmatprep.subr.bf16.mxu1 %v16936_v57  ;;  %v16925_v30 = vld [vmem:[#allocation5 + $0x308] ss:$48 sps:$4 sm:$0xff]   ;;  %v16930_v39 = vld [vmem:[#allocation5 + $0x310] ss:$48 sps:$4 sm:$0xff]   ;;  %v16969_v57 = vld [vmem:[#allocation8 + $0xfc] ss:$24 sps:$4 sm:$0xff]  }
  0xdc   :  { %5148 = vmatmul.mubr.bf16.vlgmr.msra.gmra.mrb[0].mxu0 %v16855_v1  ;;  %4851 = vmatprep.mubr.bf16.mxu1 %v16862_v41  ;;  %v17036_v1 = vld [vmem:[#allocation8 + $0xbd0] ss:$24 sps:$4 sm:$0xff]  }
  0xdd   :  { %5309 = vmatpush1.bf16.msra.mxu0 %v16859_v32  ;;  %5157 = vmatprep.mubr.bf16.mxu0 %v16864_v34  ;;  %v17050_v32 = vld [vmem:[#allocation8 + $0xc04] ss:$24 sps:$4 sm:$0xff]   ;;  %v16934_v41 = vld [vmem:[#allocation8 + $0x8] ss:$24 sps:$4 sm:$0xff]  }
  0xde   :  { %5310 = vmatprep.subr.bf16.mxu0 %v16870_v43  ;;  %v16939_v34 = vld [vmem:[#allocation8 + $0x3c] ss:$24 sps:$4 sm:$0xff]  }
  0xdf   :  { %v16940_v43 = vld [vmem:[#allocation5 + $0x36c] ss:$48 sps:$4 sm:$0xff]  }
  0xe1   :  { %5311 = vmatpush1.bf16.msra.mxu0 %v16868_v3  ;;  %v16942_v3 = vld [vmem:[#allocation5 + $0x374] ss:$48 sps:$4 sm:$0xff]  }
  0xe2   :  { %5312 = vmatprep.subr.bf16.mxu0 %v16879_v36  ;;  %v16937_v36 = vld [vmem:[#allocation8 + $0x38] ss:$24 sps:$4 sm:$0xff]  }
  0xe3   :  { %4852 = vmatmul.mubr.bf16.gmra.mrb[36].mxu1 %v16866_v38  ;;  %v16944_v38 = vld [vmem:[#allocation5 + $0x368] ss:$48 sps:$4 sm:$0xff]  }
  0xe4   :  { %5158 = vmatmul.mubr.bf16.gmra.mrb[4].mxu0 %v16867_v45  ;;  %4861 = vmatprep.mubr.bf16.mxu1 %v16871_v5  ;;  %v16945_v45 = vld [vmem:[#allocation5 + $0x370] ss:$48 sps:$4 sm:$0xff]   ;;  %v16951_v5 = vld [vmem:[#allocation8 + $0x6c] ss:$24 sps:$4 sm:$0xff]  }
  0xe5   :  { %5167 = vmatprep.mubr.bf16.mxu0 %v16873_v47  ;;  %5313 = vmatpush1.bf16.msra.mxu0 %v16877_v51  ;;  %v16949_v47 = vld [vmem:[#allocation8 + $0x68] ss:$24 sps:$4 sm:$0xff]   ;;  %v16955_v51 = vld [vmem:[#allocation5 + $0x3cc] ss:$48 sps:$4 sm:$0xff]  }
  0xe6   :  { %5314 = vmatprep.subr.bf16.mxu0 %v16888_v40  ;;  %v16954_v40 = vld [vmem:[#allocation8 + $0x9c] ss:$24 sps:$4 sm:$0xff]  }
  0xe9   :  { %5315 = vmatpush1.bf16.msra.mxu0 %v16886_v42  ;;  %v16952_v42 = vld [vmem:[#allocation8 + $0x98] ss:$24 sps:$4 sm:$0xff]  }
  0xea   :  { %5316 = vmatprep.subr.bf16.mxu0 %v16897_v44  ;;  %v16959_v44 = vld [vmem:[#allocation5 + $0x3c8] ss:$48 sps:$4 sm:$0xff]  }
  0xeb   :  { %4862 = vmatmul.mubr.bf16.gmra.mrb[40].mxu1 %v16875_v7  ;;  %v16957_v7 = vld [vmem:[#allocation5 + $0x3d4] ss:$48 sps:$4 sm:$0xff]  }
  0xec   :  { %5168 = vmatmul.mubr.bf16.gmra.mrb[8].mxu0 %v16876_v53  ;;  %4871 = vmatprep.mubr.bf16.mxu1 %v16880_v55  ;;  %v16966_v53 = vld [vmem:[#allocation8 + $0xcc] ss:$24 sps:$4 sm:$0xff]   ;;  %v16960_v55 = vld [vmem:[#allocation5 + $0x3d0] ss:$48 sps:$4 sm:$0xff]  }
  0xed   :  { %5177 = vmatprep.mubr.bf16.mxu0 %v16882_v46  ;;  %5317 = vmatpush1.bf16.msra.mxu0 %v16895_v9  ;;  %v16964_v46 = vld [vmem:[#allocation8 + $0xc8] ss:$24 sps:$4 sm:$0xff]   ;;  %v16970_v9 = vld [vmem:[#allocation5 + $0x42c] ss:$48 sps:$4 sm:$0xff]  }
  0xee   :  { %5318 = vmatprep.subr.bf16.mxu0 %v16906_v48  ;;  %v16972_v48 = vld [vmem:[#allocation5 + $0x434] ss:$48 sps:$4 sm:$0xff]  }
  0xf1   :  { %5319 = vmatpush1.bf16.msra.mxu0 %v16904_v59  ;;  %v16967_v59 = vld [vmem:[#allocation8 + $0xf8] ss:$24 sps:$4 sm:$0xff]  }
  0xf2   :  { %5320 = vmatprep.subr.bf16.mxu0 %v16915_v61  ;;  %v16974_v61 = vld [vmem:[#allocation5 + $0x428] ss:$48 sps:$4 sm:$0xff]  }
  0xf3   :  { %4872 = vmatmul.mubr.bf16.gmra.mrb[44].mxu1 %v16884_v11  ;;  %v16981_v11 = vld [vmem:[#allocation8 + $0x12c] ss:$24 sps:$4 sm:$0xff]  }
  0xf4   :  { %5178 = vmatmul.mubr.bf16.gmra.mrb[12].mxu0 %v16885_v13  ;;  %4881 = vmatprep.mubr.bf16.mxu1 %v16889_v49  ;;  %v16975_v13 = vld [vmem:[#allocation5 + $0x430] ss:$48 sps:$4 sm:$0xff]  }
  0xf5   :  { %5187 = vmatprep.mubr.bf16.mxu0 %v16891_v63  ;;  %5321 = vmatpush1.bf16.msra.mxu0 %v16913_v50  ;;  %v16979_v49 = vld [vmem:[#allocation8 + $0x128] ss:$24 sps:$4 sm:$0xff]   ;;  %v16985_v63 = vld [vmem:[#allocation5 + $0x48c] ss:$48 sps:$4 sm:$0xff]  }
  0xf6   :  { %5322 = vmatprep.subr.bf16.mxu0 %v16924_v52  ;;  %v16984_v50 = vld [vmem:[#allocation8 + $0x15c] ss:$24 sps:$4 sm:$0xff]  }
  0xf7   :  { %v16987_v52 = vld [vmem:[#allocation5 + $0x494] ss:$48 sps:$4 sm:$0xff]  }
  0xf9   :  { %5323 = vmatpush1.bf16.msra.mxu0 %v16922_v2  ;;  %v16982_v2 = vld [vmem:[#allocation8 + $0x158] ss:$24 sps:$4 sm:$0xff]  }
  0xfa   :  { %5324 = vmatprep.subr.bf16.mxu0 %v16933_v15  ;;  %v16996_v15 = vld [vmem:[#allocation8 + $0x18c] ss:$24 sps:$4 sm:$0xff]  }
  0xfb   :  { %4882 = vmatmul.mubr.bf16.gmra.mrb[48].mxu1 %v16893_v54  ;;  %v16989_v54 = vld [vmem:[#allocation5 + $0x488] ss:$48 sps:$4 sm:$0xff]  }
  0xfc   :  { %5188 = vmatmul.mubr.bf16.gmra.mrb[16].mxu0 %v16894_v56  ;;  %4891 = vmatprep.mubr.bf16.mxu1 %v16898_v17  ;;  %v16990_v56 = vld [vmem:[#allocation5 + $0x490] ss:$48 sps:$4 sm:$0xff]  }
  0xfd   :  { %5197 = vmatprep.mubr.bf16.mxu0 %v16900_v58  ;;  %5325 = vmatpush1.bf16.msra.mxu0 %v16931_v19  ;;  %v16994_v17 = vld [vmem:[#allocation8 + $0x188] ss:$24 sps:$4 sm:$0xff]   ;;  %v17000_v58 = vld [vmem:[#allocation5 + $0x4ec] ss:$48 sps:$4 sm:$0xff]  }
  0xfe   :  { %5326 = vmatprep.subr.bf16.mxu0 %v16948_v60  ;;  %v16999_v19 = vld [vmem:[#allocation8 + $0x1bc] ss:$24 sps:$4 sm:$0xff]  }
  0xff   :  { %v17002_v60 = vld [vmem:[#allocation5 + $0x4f4] ss:$48 sps:$4 sm:$0xff]  }
 0x101   :  { %5327 = vmatpush1.bf16.msra.mxu0 %v16946_v62  ;;  %v16997_v62 = vld [vmem:[#allocation8 + $0x1b8] ss:$24 sps:$4 sm:$0xff]  }
 0x102   :  { %5328 = vmatprep.subr.bf16.mxu0 %v16963_v0  ;;  %v17004_v0 = vld [vmem:[#allocation5 + $0x4e8] ss:$48 sps:$4 sm:$0xff]  }
 0x103   :  { %4892 = vmatmul.mubr.bf16.gmra.mrb[52].mxu1 %v16902_v21  ;;  %v17011_v21 = vld [vmem:[#allocation8 + $0x1ec] ss:$24 sps:$4 sm:$0xff]  }
 0x104   :  { %5198 = vmatmul.mubr.bf16.gmra.mrb[20].mxu0 %v16903_v4  ;;  %4901 = vmatprep.mubr.bf16.mxu1 %v16907_v23  ;;  %v17005_v4 = vld [vmem:[#allocation5 + $0x4f0] ss:$48 sps:$4 sm:$0xff]  }
 0x105   :  { %5207 = vmatprep.mubr.bf16.mxu0 %v16909_v25  ;;  %5329 = vmatpush1.bf16.msra.mxu0 %v16961_v6  ;;  %v17009_v23 = vld [vmem:[#allocation8 + $0x1e8] ss:$24 sps:$4 sm:$0xff]   ;;  %v17015_v25 = vld [vmem:[#allocation5 + $0x54c] ss:$48 sps:$4 sm:$0xff]  }
 0x106   :  { %5330 = vmatprep.subr.bf16.mxu0 %v16978_v8  ;;  %v17014_v6 = vld [vmem:[#allocation8 + $0x21c] ss:$24 sps:$4 sm:$0xff]  }
 0x107   :  { %v17017_v8 = vld [vmem:[#allocation5 + $0x554] ss:$48 sps:$4 sm:$0xff]  }
 0x109   :  { %5331 = vmatpush1.bf16.msra.mxu0 %v16976_v10  ;;  %v17012_v10 = vld [vmem:[#allocation8 + $0x218] ss:$24 sps:$4 sm:$0xff]  }
 0x10a   :  { %5332 = vmatprep.subr.bf16.mxu0 %v16993_v12  ;;  %v17019_v12 = vld [vmem:[#allocation5 + $0x548] ss:$48 sps:$4 sm:$0xff]  }
 0x10b   :  { %4902 = vmatmul.mubr.bf16.gmra.mrb[56].mxu1 %v16911_v27  ;;  %v17026_v27 = vld [vmem:[#allocation8 + $0x24c] ss:$24 sps:$4 sm:$0xff]  }
 0x10c   :  { %5208 = vmatmul.mubr.bf16.gmra.mrb[24].mxu0 %v16912_v14  ;;  %4911 = vmatprep.mubr.bf16.mxu1 %v16916_v29  ;;  %v17020_v14 = vld [vmem:[#allocation5 + $0x550] ss:$48 sps:$4 sm:$0xff]  }
 0x10d   :  { %5217 = vmatprep.mubr.bf16.mxu0 %v16918_v16  ;;  %5333 = vmatpush1.bf16.msra.mxu0 %v16991_v31  ;;  %v17024_v29 = vld [vmem:[#allocation8 + $0x248] ss:$24 sps:$4 sm:$0xff]   ;;  %v17030_v16 = vld [vmem:[#allocation5 + $0x5ac] ss:$48 sps:$4 sm:$0xff]  }
 0x10e   :  { %5334 = vmatprep.subr.bf16.mxu0 %v17008_v18  ;;  %v17029_v31 = vld [vmem:[#allocation8 + $0x27c] ss:$24 sps:$4 sm:$0xff]  }
 0x10f   :  { %v17032_v18 = vld [vmem:[#allocation5 + $0x5b4] ss:$48 sps:$4 sm:$0xff]  }
 0x111   :  { %5335 = vmatpush1.bf16.msra.mxu0 %v17006_v20  ;;  %v17027_v20 = vld [vmem:[#allocation8 + $0x278] ss:$24 sps:$4 sm:$0xff]  }
 0x112   :  { %5336 = vmatprep.subr.bf16.mxu0 %v17023_v22  ;;  %v17034_v22 = vld [vmem:[#allocation5 + $0x5a8] ss:$48 sps:$4 sm:$0xff]  }
 0x113   :  { %4912 = vmatmul.mubr.bf16.gmra.mrb[60].mxu1 %v16920_v33  ;;  %v17041_v33 = vld [vmem:[#allocation8 + $0x2ac] ss:$24 sps:$4 sm:$0xff]  }
 0x114   :  { %5218 = vmatmul.mubr.bf16.gmra.mrb[28].mxu0 %v16921_v24  ;;  %5034 = vmatprep.mubr.bf16.mxu1 %v16927_v35  ;;  %v17035_v24 = vld [vmem:[#allocation5 + $0x5b0] ss:$48 sps:$4 sm:$0xff]  }
 0x115   :  { %5227 = vmatprep.mubr.bf16.mxu0 %v16928_v37  ;;  %5337 = vmatpush1.bf16.msra.mxu0 %v17021_v26  ;;  %v17039_v35 = vld [vmem:[#allocation8 + $0x2a8] ss:$24 sps:$4 sm:$0xff]   ;;  %v17047_v37 = vld [vmem:[#allocation5 + $0x1c] ss:$48 sps:$4 sm:$0xff]  }
 0x116   :  { %5338 = vmatprep.subr.bf16.mxu0 %v17038_v28  ;;  %v17044_v26 = vld [vmem:[#allocation8 + $0x2dc] ss:$24 sps:$4 sm:$0xff]   ;;  %v17042_v28 = vld [vmem:[#allocation8 + $0x2d8] ss:$24 sps:$4 sm:$0xff]  }
 0x119   :  { %5339 = vmatpush1.bf16.msra.mxu0 %v17036_v1  ;;  %v17045_v1 = vld [vmem:[#allocation5 + $0x18] ss:$48 sps:$4 sm:$0xff]  }
 0x11a   :  { %5501 = vmatprep.subr.bf16.mxu0 %v17050_v32  ;;  %v17048_v32 = vld [vmem:[#allocation8 + $0xc00] ss:$24 sps:$4 sm:$0xff]  }
 0x11b   :  { %5035 = vmatmul.mubr.bf16.vlgmr.msra.gmra.mrb[32].mxu1 %v16925_v30  ;;  %v17101_v30 = vld [vmem:[#allocation8 + $0x30c] ss:$24 sps:$4 sm:$0xff]  }
 0x11c   :  { %5228 = vmatmul.mubr.bf16.gmra.mrb[32].mxu0 %v16930_v39  ;;  %5888 = vmatpush1.bf16.msra.mxu1 %v16934_v41  ;;  %v18245_v39 = vld [vmem:[#allocation5 + $0x4] ss:$48 sps:$4 sm:$0xff]   ;;  %v17051_v41 = vld [vmem:[#allocation5 + $0x7c] ss:$48 sps:$4 sm:$0xff]  }
 0x11d   :  { %5044 = vmatprep.mubr.bf16.mxu1 %v16940_v43  ;;  %5889 = vmatprep.subr.bf16.mxu1 %v16939_v34  ;;  %v17056_v34 = vld [vmem:[#allocation8 + $0xc34] ss:$24 sps:$4 sm:$0xff]   ;;  %v17099_v43 = vld [vmem:[#allocation8 + $0x308] ss:$24 sps:$4 sm:$0xff]  }
 0x11e   :  { %5237 = vmatprep.mubr.bf16.mxu0 %v16942_v3  ;;  %v18246_v3 = vld [vmem:[#allocation5] ss:$48 sps:$4 sm:$0xff]  }
 0x120   :  { %5890 = vmatpush1.bf16.msra.mxu1 %v16937_v36  ;;  %v17054_v36 = vld [vmem:[#allocation8 + $0xc30] ss:$24 sps:$4 sm:$0xff]  }
 0x121   :  { %5891 = vmatprep.subr.bf16.mxu1 %v16951_v5  ;;  %v18247_v5 = vld [vmem:[#allocation5 + $0x64] ss:$48 sps:$4 sm:$0xff]  }
 0x123   :  { %5045 = vmatmul.mubr.bf16.gmra.mrb[36].mxu1 %v16944_v38  ;;  %v17104_v38 = vld [vmem:[#allocation8 + $0x33c] ss:$24 sps:$4 sm:$0xff]  }
 0x124   :  { %5238 = vmatmul.mubr.bf16.gmra.mrb[36].mxu0 %v16945_v45  ;;  %5892 = vmatpush1.bf16.msra.mxu1 %v16949_v47  ;;  %v17062_v45 = vld [vmem:[#allocation8 + $0xc64] ss:$24 sps:$4 sm:$0xff]   ;;  %v17053_v47 = vld [vmem:[#allocation5 + $0x78] ss:$48 sps:$4 sm:$0xff]  }
 0x125   :  { %5054 = vmatprep.mubr.bf16.mxu1 %v16955_v51  ;;  %5893 = vmatprep.subr.bf16.mxu1 %v16954_v40  ;;  %v17102_v51 = vld [vmem:[#allocation8 + $0x338] ss:$24 sps:$4 sm:$0xff]   ;;  %v17057_v40 = vld [vmem:[#allocation5 + $0xdc] ss:$48 sps:$4 sm:$0xff]  }
 0x126   :  { %5247 = vmatprep.mubr.bf16.mxu0 %v16957_v7  ;;  %v17060_v7 = vld [vmem:[#allocation8 + $0xc60] ss:$24 sps:$4 sm:$0xff]  }
 0x128   :  { %5894 = vmatpush1.bf16.msra.mxu1 %v16952_v42  ;;  %v17113_v42 = vld [vmem:[#allocation8 + $0x36c] ss:$24 sps:$4 sm:$0xff]  }
 0x129   :  { %5895 = vmatprep.subr.bf16.mxu1 %v16966_v53  ;;  %v17068_v53 = vld [vmem:[#allocation8 + $0xc94] ss:$24 sps:$4 sm:$0xff]  }
 0x12b   :  { %5055 = vmatmul.mubr.bf16.gmra.mrb[40].mxu1 %v16959_v44  ;;  %v17111_v44 = vld [vmem:[#allocation8 + $0x368] ss:$24 sps:$4 sm:$0xff]  }
 0x12c   :  { %5248 = vmatmul.mubr.bf16.gmra.mrb[40].mxu0 %v16960_v55  ;;  %5896 = vmatpush1.bf16.msra.mxu1 %v16964_v46  ;;  %v18248_v55 = vld [vmem:[#allocation5 + $0x60] ss:$48 sps:$4 sm:$0xff]  }
 0x12d   :  { %5064 = vmatprep.mubr.bf16.mxu1 %v16970_v9  ;;  %5897 = vmatprep.subr.bf16.mxu1 %v16969_v57  ;;  %v17066_v46 = vld [vmem:[#allocation8 + $0xc90] ss:$24 sps:$4 sm:$0xff]   ;;  %v17116_v9 = vld [vmem:[#allocation8 + $0x39c] ss:$24 sps:$4 sm:$0xff]  }
 0x12e   :  { %5257 = vmatprep.mubr.bf16.mxu0 %v16972_v48  ;;  %v18249_v57 = vld [vmem:[#allocation5 + $0xc4] ss:$48 sps:$4 sm:$0xff]  }
 0x12f   :  { %v17074_v48 = vld [vmem:[#allocation8 + $0xcc4] ss:$24 sps:$4 sm:$0xff]  }
 0x130   :  { %5898 = vmatpush1.bf16.msra.mxu1 %v16967_v59  ;;  %v17114_v59 = vld [vmem:[#allocation8 + $0x398] ss:$24 sps:$4 sm:$0xff]  }
 0x131   :  { %5899 = vmatprep.subr.bf16.mxu1 %v16981_v11  ;;  %v17059_v11 = vld [vmem:[#allocation5 + $0xd8] ss:$48 sps:$4 sm:$0xff]  }
 0x133   :  { %5065 = vmatmul.mubr.bf16.gmra.mrb[44].mxu1 %v16974_v61  ;;  %v17063_v61 = vld [vmem:[#allocation5 + $0x13c] ss:$48 sps:$4 sm:$0xff]  }
 0x134   :  { %5258 = vmatmul.mubr.bf16.gmra.mrb[44].mxu0 %v16975_v13  ;;  %5900 = vmatpush1.bf16.msra.mxu1 %v16979_v49  ;;  %v17072_v13 = vld [vmem:[#allocation8 + $0xcc0] ss:$24 sps:$4 sm:$0xff]   ;;  %v17125_v49 = vld [vmem:[#allocation8 + $0x3cc] ss:$24 sps:$4 sm:$0xff]  }
 0x135   :  { %5074 = vmatprep.mubr.bf16.mxu1 %v16985_v63  ;;  %5901 = vmatprep.subr.bf16.mxu1 %v16984_v50  ;;  %v17080_v63 = vld [vmem:[#allocation8 + $0xcf4] ss:$24 sps:$4 sm:$0xff]   ;;  %v17123_v50 = vld [vmem:[#allocation8 + $0x3c8] ss:$24 sps:$4 sm:$0xff]  }
 0x136   :  { %5267 = vmatprep.mubr.bf16.mxu0 %v16987_v52  ;;  %v18250_v52 = vld [vmem:[#allocation5 + $0xc0] ss:$48 sps:$4 sm:$0xff]  }
 0x138   :  { %5902 = vmatpush1.bf16.msra.mxu1 %v16982_v2  ;;  %v17078_v2 = vld [vmem:[#allocation8 + $0xcf0] ss:$24 sps:$4 sm:$0xff]  }
 0x139   :  { %5903 = vmatprep.subr.bf16.mxu1 %v16996_v15  ;;  %v17128_v15 = vld [vmem:[#allocation8 + $0x3fc] ss:$24 sps:$4 sm:$0xff]  }
 0x13b   :  { %5075 = vmatmul.mubr.bf16.gmra.mrb[48].mxu1 %v16989_v54  ;;  %v18251_v54 = vld [vmem:[#allocation5 + $0x124] ss:$48 sps:$4 sm:$0xff]  }
 0x13c   :  { %5268 = vmatmul.mubr.bf16.gmra.mrb[48].mxu0 %v16990_v56  ;;  %5904 = vmatpush1.bf16.msra.mxu1 %v16994_v17  ;;  %v17086_v56 = vld [vmem:[#allocation8 + $0xd24] ss:$24 sps:$4 sm:$0xff]   ;;  %v17126_v17 = vld [vmem:[#allocation8 + $0x3f8] ss:$24 sps:$4 sm:$0xff]  }
 0x13d   :  { %5084 = vmatprep.mubr.bf16.mxu1 %v17000_v58  ;;  %5905 = vmatprep.subr.bf16.mxu1 %v16999_v19  ;;  %v17065_v58 = vld [vmem:[#allocation5 + $0x138] ss:$48 sps:$4 sm:$0xff]   ;;  %v17069_v19 = vld [vmem:[#allocation5 + $0x19c] ss:$48 sps:$4 sm:$0xff]  }
 0x13e   :  { %5277 = vmatprep.mubr.bf16.mxu0 %v17002_v60  ;;  %v17084_v60 = vld [vmem:[#allocation8 + $0xd20] ss:$24 sps:$4 sm:$0xff]  }
 0x140   :  { %5906 = vmatpush1.bf16.msra.mxu1 %v16997_v62  ;;  %v17137_v62 = vld [vmem:[#allocation8 + $0x42c] ss:$24 sps:$4 sm:$0xff]  }
 0x141   :  { %5907 = vmatprep.subr.bf16.mxu1 %v17011_v21  ;;  %v17092_v21 = vld [vmem:[#allocation8 + $0xd54] ss:$24 sps:$4 sm:$0xff]  }
 0x143   :  { %5085 = vmatmul.mubr.bf16.gmra.mrb[52].mxu1 %v17004_v0  ;;  %v17135_v0 = vld [vmem:[#allocation8 + $0x428] ss:$24 sps:$4 sm:$0xff]  }
 0x144   :  { %5278 = vmatmul.mubr.bf16.gmra.mrb[52].mxu0 %v17005_v4  ;;  %5908 = vmatpush1.bf16.msra.mxu1 %v17009_v23  ;;  %v18252_v4 = vld [vmem:[#allocation5 + $0x120] ss:$48 sps:$4 sm:$0xff]  }
 0x145   :  { %5094 = vmatprep.mubr.bf16.mxu1 %v17015_v25  ;;  %5909 = vmatprep.subr.bf16.mxu1 %v17014_v6  ;;  %v17090_v23 = vld [vmem:[#allocation8 + $0xd50] ss:$24 sps:$4 sm:$0xff]   ;;  %v17140_v25 = vld [vmem:[#allocation8 + $0x45c] ss:$24 sps:$4 sm:$0xff]  }
 0x146   :  { %5287 = vmatprep.mubr.bf16.mxu0 %v17017_v8  ;;  %v18253_v6 = vld [vmem:[#allocation5 + $0x184] ss:$48 sps:$4 sm:$0xff]  }
 0x147   :  { %v17098_v8 = vld [vmem:[#allocation8 + $0xd84] ss:$24 sps:$4 sm:$0xff]  }
 0x148   :  { %5910 = vmatpush1.bf16.msra.mxu1 %v17012_v10  ;;  %v17138_v10 = vld [vmem:[#allocation8 + $0x458] ss:$24 sps:$4 sm:$0xff]  }
 0x149   :  { %5911 = vmatprep.subr.bf16.mxu1 %v17026_v27  ;;  %v17071_v27 = vld [vmem:[#allocation5 + $0x198] ss:$48 sps:$4 sm:$0xff]  }
 0x14b   :  { %5095 = vmatmul.mubr.bf16.gmra.mrb[56].mxu1 %v17019_v12  ;;  %v17075_v12 = vld [vmem:[#allocation5 + $0x1fc] ss:$48 sps:$4 sm:$0xff]  }
 0x14c   :  { %5288 = vmatmul.mubr.bf16.gmra.mrb[56].mxu0 %v17020_v14  ;;  %5912 = vmatpush1.bf16.msra.mxu1 %v17024_v29  ;;  %v17096_v14 = vld [vmem:[#allocation8 + $0xd80] ss:$24 sps:$4 sm:$0xff]   ;;  %v17149_v29 = vld [vmem:[#allocation8 + $0x48c] ss:$24 sps:$4 sm:$0xff]  }
 0x14d   :  { %5104 = vmatprep.mubr.bf16.mxu1 %v17030_v16  ;;  %5913 = vmatprep.subr.bf16.mxu1 %v17029_v31  ;;  %v17110_v16 = vld [vmem:[#allocation8 + $0xdb4] ss:$24 sps:$4 sm:$0xff]   ;;  %v17147_v31 = vld [vmem:[#allocation8 + $0x488] ss:$24 sps:$4 sm:$0xff]  }
 0x14e   :  { %5297 = vmatprep.mubr.bf16.mxu0 %v17032_v18  ;;  %v18254_v18 = vld [vmem:[#allocation5 + $0x180] ss:$48 sps:$4 sm:$0xff]  }
 0x150   :  { %5914 = vmatpush1.bf16.msra.mxu1 %v17027_v20  ;;  %v17108_v20 = vld [vmem:[#allocation8 + $0xdb0] ss:$24 sps:$4 sm:$0xff]  }
 0x151   :  { %5915 = vmatprep.subr.bf16.mxu1 %v17041_v33  ;;  %v17152_v33 = vld [vmem:[#allocation8 + $0x4bc] ss:$24 sps:$4 sm:$0xff]  }
 0x153   :  { %5105 = vmatmul.mubr.bf16.gmra.mrb[60].mxu1 %v17034_v22  ;;  %v18255_v22 = vld [vmem:[#allocation5 + $0x1e4] ss:$48 sps:$4 sm:$0xff]  }
 0x154   :  { %5298 = vmatmul.mubr.bf16.gmra.mrb[60].mxu0 %v17035_v24  ;;  %5916 = vmatpush1.bf16.msra.mxu1 %v17039_v35  ;;  %v17122_v24 = vld [vmem:[#allocation8 + $0xde4] ss:$24 sps:$4 sm:$0xff]   ;;  %v17150_v35 = vld [vmem:[#allocation8 + $0x4b8] ss:$24 sps:$4 sm:$0xff]  }
 0x155   :  { %5340 = vmatprep.mubr.bf16.mxu0 %v17047_v37  ;;  %5917 = vmatprep.subr.bf16.mxu1 %v17044_v26  ;;  %v17077_v37 = vld [vmem:[#allocation5 + $0x1f8] ss:$48 sps:$4 sm:$0xff]   ;;  %v17081_v26 = vld [vmem:[#allocation5 + $0x25c] ss:$48 sps:$4 sm:$0xff]  }
 0x156   :  { %5919 = vmatprep.mubr.bf16.mxu1 %v18245_v39  ;;  %v17159_v39 = vld [vmem:[#allocation8 + $0x4e8] ss:$24 sps:$4 sm:$0xff]  }
 0x158   :  { %5918 = vmatpush1.bf16.msra.mxu1 %v17042_v28  ;;  %v17120_v28 = vld [vmem:[#allocation8 + $0xde0] ss:$24 sps:$4 sm:$0xff]  }
 0x159   :  { %6080 = vmatprep.subr.bf16.mxu1 %v17101_v30  ;;  %v17161_v30 = vld [vmem:[#allocation8 + $0x4ec] ss:$24 sps:$4 sm:$0xff]  }
 0x15b   :  { %5920 = vmatmul.mubr.bf16.vlgmr.msra.gmra.mrb[64].mxu1 %v18246_v3  ;;  %v17146_v3 = vld [vmem:[#allocation8 + $0xe44] ss:$24 sps:$4 sm:$0xff]  }
 0x15c   :  { %5341 = vmatmul.mubr.bf16.vlgmr.msra.gmra.mrb[0].mxu0 %v17045_v1  ;;  %5929 = vmatprep.mubr.bf16.mxu1 %v18247_v5  ;;  %v17134_v1 = vld [vmem:[#allocation8 + $0xe14] ss:$24 sps:$4 sm:$0xff]   ;;  %v17144_v5 = vld [vmem:[#allocation8 + $0xe40] ss:$24 sps:$4 sm:$0xff]  }
 0x15d   :  { %5502 = vmatpush1.bf16.msra.mxu0 %v17048_v32  ;;  %5350 = vmatprep.mubr.bf16.mxu0 %v17051_v41  ;;  %v18256_v32 = vld [vmem:[#allocation5 + $0x1e0] ss:$48 sps:$4 sm:$0xff]  }
 0x15e   :  { %5503 = vmatprep.subr.bf16.mxu0 %v17056_v34  ;;  %6081 = vmatpush1.bf16.msra.mxu1 %v17099_v43  ;;  %v17132_v41 = vld [vmem:[#allocation8 + $0xe10] ss:$24 sps:$4 sm:$0xff]   ;;  %v17164_v34 = vld [vmem:[#allocation8 + $0x51c] ss:$24 sps:$4 sm:$0xff]  }
 0x15f   :  { %6082 = vmatprep.subr.bf16.mxu1 %v17104_v38  ;;  %v18257_v43 = vld [vmem:[#allocation5 + $0x244] ss:$48 sps:$4 sm:$0xff]   ;;  %v17083_v38 = vld [vmem:[#allocation5 + $0x258] ss:$48 sps:$4 sm:$0xff]  }
 0x161   :  { %5504 = vmatpush1.bf16.msra.mxu0 %v17054_v36  ;;  %v17162_v36 = vld [vmem:[#allocation8 + $0x518] ss:$24 sps:$4 sm:$0xff]  }
 0x162   :  { %5505 = vmatprep.subr.bf16.mxu0 %v17062_v45  ;;  %6083 = vmatpush1.bf16.msra.mxu1 %v17102_v51  ;;  %v17087_v45 = vld [vmem:[#allocation5 + $0x2bc] ss:$48 sps:$4 sm:$0xff]  }
 0x163   :  { %5930 = vmatmul.mubr.bf16.gmra.mrb[68].mxu1 %v18248_v55  ;;  %6084 = vmatprep.subr.bf16.mxu1 %v17113_v42  ;;  %v17158_v51 = vld [vmem:[#allocation8 + $0xe74] ss:$24 sps:$4 sm:$0xff]   ;;  %v17156_v42 = vld [vmem:[#allocation8 + $0xe70] ss:$24 sps:$4 sm:$0xff]   ;;  %v17170_v55 = vld [vmem:[#allocation8 + $0xea4] ss:$24 sps:$4 sm:$0xff]  }
 0x164   :  { %5351 = vmatmul.mubr.bf16.gmra.mrb[4].mxu0 %v17053_v47  ;;  %5939 = vmatprep.mubr.bf16.mxu1 %v18249_v57  ;;  %v17173_v47 = vld [vmem:[#allocation8 + $0x54c] ss:$24 sps:$4 sm:$0xff]  }
 0x165   :  { %5360 = vmatprep.mubr.bf16.mxu0 %v17057_v40  ;;  %5506 = vmatpush1.bf16.msra.mxu0 %v17060_v7  ;;  %v17171_v40 = vld [vmem:[#allocation8 + $0x548] ss:$24 sps:$4 sm:$0xff]   ;;  %v17093_v57 = vld [vmem:[#allocation5 + $0x31c] ss:$48 sps:$4 sm:$0xff]  }
 0x166   :  { %5507 = vmatprep.subr.bf16.mxu0 %v17068_v53  ;;  %6085 = vmatpush1.bf16.msra.mxu1 %v17111_v44  ;;  %v18258_v7 = vld [vmem:[#allocation5 + $0x240] ss:$48 sps:$4 sm:$0xff]   ;;  %v17176_v53 = vld [vmem:[#allocation8 + $0x57c] ss:$24 sps:$4 sm:$0xff]  }
 0x167   :  { %6086 = vmatprep.subr.bf16.mxu1 %v17116_v9  ;;  %v18259_v44 = vld [vmem:[#allocation5 + $0x2a4] ss:$48 sps:$4 sm:$0xff]   ;;  %v17089_v9 = vld [vmem:[#allocation5 + $0x2b8] ss:$48 sps:$4 sm:$0xff]  }
 0x169   :  { %5508 = vmatpush1.bf16.msra.mxu0 %v17066_v46  ;;  %v17174_v46 = vld [vmem:[#allocation8 + $0x578] ss:$24 sps:$4 sm:$0xff]  }
 0x16a   :  { %5509 = vmatprep.subr.bf16.mxu0 %v17074_v48  ;;  %6087 = vmatpush1.bf16.msra.mxu1 %v17114_v59  ;;  %v17168_v48 = vld [vmem:[#allocation8 + $0xea0] ss:$24 sps:$4 sm:$0xff]   ;;  %v17185_v59 = vld [vmem:[#allocation8 + $0x5ac] ss:$24 sps:$4 sm:$0xff]  }
 0x16b   :  { %5940 = vmatmul.mubr.bf16.gmra.mrb[72].mxu1 %v18250_v52  ;;  %6088 = vmatprep.subr.bf16.mxu1 %v17125_v49  ;;  %v17180_v49 = vld [vmem:[#allocation8 + $0xed0] ss:$24 sps:$4 sm:$0xff]  }
 0x16c   :  { %5361 = vmatmul.mubr.bf16.gmra.mrb[8].mxu0 %v17059_v11  ;;  %5949 = vmatprep.mubr.bf16.mxu1 %v18251_v54  ;;  %v17182_v11 = vld [vmem:[#allocation8 + $0xed4] ss:$24 sps:$4 sm:$0xff]   ;;  %v17186_v52 = vld [vmem:[#allocation8 + $0x5d8] ss:$24 sps:$4 sm:$0xff]  }
 0x16d   :  { %5370 = vmatprep.mubr.bf16.mxu0 %v17063_v61  ;;  %5510 = vmatpush1.bf16.msra.mxu0 %v17072_v13  ;;  %v17183_v61 = vld [vmem:[#allocation8 + $0x5a8] ss:$24 sps:$4 sm:$0xff]   ;;  %v17105_v54 = vld [vmem:[#allocation5 + $0x37c] ss:$48 sps:$4 sm:$0xff]  }
 0x16e   :  { %5511 = vmatprep.subr.bf16.mxu0 %v17080_v63  ;;  %6089 = vmatpush1.bf16.msra.mxu1 %v17123_v50  ;;  %v18260_v13 = vld [vmem:[#allocation5 + $0x2a0] ss:$48 sps:$4 sm:$0xff]   ;;  %v17188_v63 = vld [vmem:[#allocation8 + $0x5dc] ss:$24 sps:$4 sm:$0xff]  }
 0x16f   :  { %6090 = vmatprep.subr.bf16.mxu1 %v17128_v15  ;;  %v18261_v50 = vld [vmem:[#allocation5 + $0x304] ss:$48 sps:$4 sm:$0xff]   ;;  %v17095_v15 = vld [vmem:[#allocation5 + $0x318] ss:$48 sps:$4 sm:$0xff]  }
 0x171   :  { %5512 = vmatpush1.bf16.msra.mxu0 %v17078_v2  ;;  %v17194_v2 = vld [vmem:[#allocation8 + $0xf04] ss:$24 sps:$4 sm:$0xff]  }
 0x172   :  { %5513 = vmatprep.subr.bf16.mxu0 %v17086_v56  ;;  %6091 = vmatpush1.bf16.msra.mxu1 %v17126_v17  ;;  %v17245_v56 = vld [vmem:[#allocation8 + $0x60c] ss:$24 sps:$4 sm:$0xff]   ;;  %v18262_v17 = vld [vmem:[#allocation5 + $0x300] ss:$48 sps:$4 sm:$0xff]  }
 0x173   :  { %5950 = vmatmul.mubr.bf16.gmra.mrb[76].mxu1 %v18252_v4  ;;  %6092 = vmatprep.subr.bf16.mxu1 %v17137_v62  ;;  %v18264_v62 = vld [vmem:[#allocation5 + $0x360] ss:$48 sps:$4 sm:$0xff]   ;;  %v17129_v4 = vld [vmem:[#allocation5 + $0x43c] ss:$48 sps:$4 sm:$0xff]  }
 0x174   :  { %5371 = vmatmul.mubr.bf16.gmra.mrb[12].mxu0 %v17065_v58  ;;  %5959 = vmatprep.mubr.bf16.mxu1 %v18253_v6  ;;  %v18263_v58 = vld [vmem:[#allocation5 + $0x364] ss:$48 sps:$4 sm:$0xff]   ;;  %v17131_v6 = vld [vmem:[#allocation5 + $0x438] ss:$48 sps:$4 sm:$0xff]  }
 0x175   :  { %5380 = vmatprep.mubr.bf16.mxu0 %v17069_v19  ;;  %5514 = vmatpush1.bf16.msra.mxu0 %v17084_v60  ;;  %v17107_v19 = vld [vmem:[#allocation5 + $0x378] ss:$48 sps:$4 sm:$0xff]   ;;  %v17117_v60 = vld [vmem:[#allocation5 + $0x3dc] ss:$48 sps:$4 sm:$0xff]  }
 0x176   :  { %5515 = vmatprep.subr.bf16.mxu0 %v17092_v21  ;;  %6093 = vmatpush1.bf16.msra.mxu1 %v17135_v0  ;;  %v18265_v21 = vld [vmem:[#allocation5 + $0x3c4] ss:$48 sps:$4 sm:$0xff]   ;;  %v17119_v0 = vld [vmem:[#allocation5 + $0x3d8] ss:$48 sps:$4 sm:$0xff]  }
 0x177   :  { %6094 = vmatprep.subr.bf16.mxu1 %v17140_v25  ;;  %v18267_v25 = vld [vmem:[#allocation5 + $0x424] ss:$48 sps:$4 sm:$0xff]  }
 0x179   :  { %5516 = vmatpush1.bf16.msra.mxu0 %v17090_v23  ;;  %v18266_v23 = vld [vmem:[#allocation5 + $0x3c0] ss:$48 sps:$4 sm:$0xff]  }
 0x17a   :  { %5517 = vmatprep.subr.bf16.mxu0 %v17098_v8  ;;  %6095 = vmatpush1.bf16.msra.mxu1 %v17138_v10  ;;  %v17141_v8 = vld [vmem:[#allocation5 + $0x49c] ss:$48 sps:$4 sm:$0xff]   ;;  %v18268_v10 = vld [vmem:[#allocation5 + $0x420] ss:$48 sps:$4 sm:$0xff]  }
 0x17b   :  { %5960 = vmatmul.mubr.bf16.gmra.mrb[80].mxu1 %v18254_v18  ;;  %6096 = vmatprep.subr.bf16.mxu1 %v17149_v29  ;;  %v18270_v29 = vld [vmem:[#allocation5 + $0x480] ss:$48 sps:$4 sm:$0xff]   ;;  %v17165_v18 = vld [vmem:[#allocation5 + $0x55c] ss:$48 sps:$4 sm:$0xff]  }
 0x17c   :  { %5381 = vmatmul.mubr.bf16.gmra.mrb[16].mxu0 %v17071_v27  ;;  %5969 = vmatprep.mubr.bf16.mxu1 %v18255_v22  ;;  %v18269_v27 = vld [vmem:[#allocation5 + $0x484] ss:$48 sps:$4 sm:$0xff]   ;;  %v17167_v22 = vld [vmem:[#allocation5 + $0x558] ss:$48 sps:$4 sm:$0xff]  }
 0x17d   :  { %5390 = vmatprep.mubr.bf16.mxu0 %v17075_v12  ;;  %5518 = vmatpush1.bf16.msra.mxu0 %v17096_v14  ;;  %v17143_v12 = vld [vmem:[#allocation5 + $0x498] ss:$48 sps:$4 sm:$0xff]   ;;  %v17153_v14 = vld [vmem:[#allocation5 + $0x4fc] ss:$48 sps:$4 sm:$0xff]  }
 0x17e   :  { %5519 = vmatprep.subr.bf16.mxu0 %v17110_v16  ;;  %6097 = vmatpush1.bf16.msra.mxu1 %v17147_v31  ;;  %v18271_v16 = vld [vmem:[#allocation5 + $0x4e4] ss:$48 sps:$4 sm:$0xff]   ;;  %v17155_v31 = vld [vmem:[#allocation5 + $0x4f8] ss:$48 sps:$4 sm:$0xff]  }
 0x17f   :  { %6098 = vmatprep.subr.bf16.mxu1 %v17152_v33  ;;  %v18273_v33 = vld [vmem:[#allocation5 + $0x544] ss:$48 sps:$4 sm:$0xff]  }
 0x181   :  { %5520 = vmatpush1.bf16.msra.mxu0 %v17108_v20  ;;  %v18272_v20 = vld [vmem:[#allocation5 + $0x4e0] ss:$48 sps:$4 sm:$0xff]  }
 0x182   :  { %5521 = vmatprep.subr.bf16.mxu0 %v17122_v24  ;;  %6099 = vmatpush1.bf16.msra.mxu1 %v17150_v35  ;;  %v19016_v24 = vpop.f32.mrb[0].mxu1  ;;  %v17177_v35 = vld [vmem:[#allocation5 + $0x5bc] ss:$48 sps:$4 sm:$0xff]  }
 0x183   :  { %5970 = vmatmul.mubr.bf16.gmra.mrb[84].mxu1 %v18256_v32  ;;  %6100 = vmatprep.subr.bf16.mxu1 %v17161_v30  ;;  %v17191_v32 = vld [vmem:[#allocation5 + $0x24] ss:$48 sps:$4 sm:$0xff]  }
 0x184   :  { %5391 = vmatmul.mubr.bf16.gmra.mrb[20].mxu0 %v17077_v37  ;;  %5979 = vmatprep.mubr.bf16.mxu1 %v18257_v43  ;;  %v18274_v37 = vld [vmem:[#allocation5 + $0x540] ss:$48 sps:$4 sm:$0xff]  }
 0x185   :  { %5400 = vmatprep.mubr.bf16.mxu0 %v17081_v26  ;;  %5522 = vmatpush1.bf16.msra.mxu0 %v17120_v28  ;;  %v19018_v26 = vpop.f32.mrb[1].mxu1  ;;  %v18275_v28 = vld [vmem:[#allocation5 + $0x5a4] ss:$48 sps:$4 sm:$0xff]  }
 0x186   :  { %5523 = vmatprep.subr.bf16.mxu0 %v17134_v1  ;;  %6101 = vmatpush1.bf16.msra.mxu1 %v17159_v39  ;;  %v19020_v30 = vpop.f32.mrb[2].mxu1  ;;  %v17179_v1 = vld [vmem:[#allocation5 + $0x5b8] ss:$48 sps:$4 sm:$0xff]  }
 0x187   :  { %6102 = vmatprep.subr.bf16.mxu1 %v17164_v34  ;;  %v19022_v39 = vpop.f32.mrb[3].mxu1  ;;  %v18276_v34 = vld [vmem:[#allocation5 + $0x5a0] ss:$48 sps:$4 sm:$0xff]  }
 0x189   :  { %5524 = vmatpush1.bf16.msra.mxu0 %v17132_v41  ;;  %v19024_v41 = vpop.f32.mrb[4].mxu1 }
 0x18a   :  { %5525 = vmatprep.subr.bf16.mxu0 %v17146_v3  ;;  %6103 = vmatpush1.bf16.msra.mxu1 %v17162_v36  ;;  %v19026_v43 = vpop.f32.mrb[5].mxu1  ;;  %v18277_v3 = vld [vmem:[#allocation5 + $0xc] ss:$48 sps:$4 sm:$0xff]  }
 0x18b   :  { %5980 = vmatmul.mubr.bf16.gmra.mrb[88].mxu1 %v18258_v7  ;;  %6104 = vmatprep.subr.bf16.mxu1 %v17173_v47  ;;  %v19028_v36 = vpop.f32.mrb[6].mxu1  ;;  %v17195_v47 = vld [vmem:[#allocation5 + $0x84] ss:$48 sps:$4 sm:$0xff]   ;;  %v17243_v7 = vld [vmem:[#allocation8 + $0x608] ss:$24 sps:$4 sm:$0xff]  }
 0x18c   :  { %5401 = vmatmul.mubr.bf16.gmra.mrb[24].mxu0 %v17083_v38  ;;  %5989 = vmatprep.mubr.bf16.mxu1 %v18259_v44  ;;  %v17189_v38 = vld [vmem:[#allocation5 + $0x20] ss:$48 sps:$4 sm:$0xff]   ;;  %v17248_v44 = vld [vmem:[#allocation8 + $0x63c] ss:$24 sps:$4 sm:$0xff]  }
 0x18d   :  { %5410 = vmatprep.mubr.bf16.mxu0 %v17087_v45  ;;  %5526 = vmatpush1.bf16.msra.mxu0 %v17144_v5  ;;  %v19030_v45 = vpop.f32.mrb[7].mxu1  ;;  %v17192_v5 = vld [vmem:[#allocation8 + $0xf00] ss:$24 sps:$4 sm:$0xff]  }
 0x18e   :  { %5527 = vmatprep.subr.bf16.mxu0 %v17158_v51  ;;  %6105 = vmatpush1.bf16.msra.mxu1 %v17171_v40  ;;  %v19032_v51 = vpop.f32.mrb[8].mxu1  ;;  %v17200_v40 = vld [vmem:[#allocation8 + $0xf34] ss:$24 sps:$4 sm:$0xff]  }
 0x18f   :  { %6106 = vmatprep.subr.bf16.mxu1 %v17176_v53  ;;  %v17198_v53 = vld [vmem:[#allocation8 + $0xf30] ss:$24 sps:$4 sm:$0xff]  }
 0x191   :  { %5528 = vmatpush1.bf16.msra.mxu0 %v17156_v42  ;;  %v18278_v42 = vld [vmem:[#allocation5 + $0x8] ss:$48 sps:$4 sm:$0xff]  }
 0x192   :  { %5529 = vmatprep.subr.bf16.mxu0 %v17170_v55  ;;  %6107 = vmatpush1.bf16.msra.mxu1 %v17174_v46  ;;  %v19034_v55 = vpop.f32.mrb[9].mxu1  ;;  %v17206_v46 = vld [vmem:[#allocation8 + $0xf64] ss:$24 sps:$4 sm:$0xff]  }
 0x193   :  { %5990 = vmatmul.mubr.bf16.gmra.mrb[92].mxu1 %v18260_v13  ;;  %6108 = vmatprep.subr.bf16.mxu1 %v17185_v59  ;;  %v17246_v59 = vld [vmem:[#allocation8 + $0x638] ss:$24 sps:$4 sm:$0xff]  }
 0x194   :  { %5411 = vmatmul.mubr.bf16.gmra.mrb[28].mxu0 %v17089_v9  ;;  %5999 = vmatprep.mubr.bf16.mxu1 %v18261_v50  ;;  %v19036_v9 = vpop.f32.mrb[10].mxu1  ;;  %v17212_v50 = vld [vmem:[#allocation8 + $0xf94] ss:$24 sps:$4 sm:$0xff]  }
 0x195   :  { %5420 = vmatprep.mubr.bf16.mxu0 %v17093_v57  ;;  %5530 = vmatpush1.bf16.msra.mxu0 %v17168_v48  ;;  %v18279_v57 = vld [vmem:[#allocation5 + $0x6c] ss:$48 sps:$4 sm:$0xff]   ;;  %v17197_v48 = vld [vmem:[#allocation5 + $0x80] ss:$48 sps:$4 sm:$0xff]  }
 0x196   :  { %5531 = vmatprep.subr.bf16.mxu0 %v17182_v11  ;;  %6109 = vmatpush1.bf16.msra.mxu1 %v17183_v61  ;;  %v19038_v11 = vpop.f32.mrb[11].mxu1  ;;  %v17201_v61 = vld [vmem:[#allocation5 + $0xe4] ss:$48 sps:$4 sm:$0xff]  }
 0x197   :  { %6110 = vmatprep.subr.bf16.mxu1 %v17188_v63  ;;  %v19040_v13 = vpop.f32.mrb[12].mxu1  ;;  %v17257_v63 = vld [vmem:[#allocation8 + $0x66c] ss:$24 sps:$4 sm:$0xff]  }
 0x199   :  { %5532 = vmatpush1.bf16.msra.mxu0 %v17180_v49  ;;  %v17204_v49 = vld [vmem:[#allocation8 + $0xf60] ss:$24 sps:$4 sm:$0xff]  }
 0x19a   :  { %6111 = vmatpush1.bf16.msra.mxu1 %v17186_v52  ;;  %5694 = vmatprep.subr.bf16.mxu0 %v17194_v2  ;;  %v17255_v52 = vld [vmem:[#allocation8 + $0x668] ss:$24 sps:$4 sm:$0xff]  }
 0x19b   :  { %6000 = vmatmul.mubr.bf16.gmra.mrb[96].mxu1 %v18262_v17  ;;  %6273 = vmatprep.subr.bf16.mxu1 %v17245_v56  ;;  %v18280_v2 = vld [vmem:[#allocation5 + $0x68] ss:$48 sps:$4 sm:$0xff]   ;;  %v19042_v56 = vpop.f32.mrb[13].mxu1  ;;  %v18281_v17 = vld [vmem:[#allocation5 + $0xcc] ss:$48 sps:$4 sm:$0xff]  }
 0x19c   :  { %5421 = vmatmul.mubr.bf16.gmra.mrb[32].mxu0 %v17095_v15  ;;  %6009 = vmatprep.mubr.bf16.mxu1 %v18263_v58  ;;  %v17210_v15 = vld [vmem:[#allocation8 + $0xf90] ss:$24 sps:$4 sm:$0xff]   ;;  %v17218_v58 = vld [vmem:[#allocation8 + $0xfc4] ss:$24 sps:$4 sm:$0xff]  }
 0x19d   :  { %5430 = vmatprep.mubr.bf16.mxu0 %v17105_v54  ;;  %v17260_v54 = vld [vmem:[#allocation8 + $0x69c] ss:$24 sps:$4 sm:$0xff]  }
 0x1a3   :  { %6010 = vmatmul.mubr.bf16.gmra.mrb[100].mxu1 %v18264_v62  ;;  %v17203_v62 = vld [vmem:[#allocation5 + $0xe0] ss:$48 sps:$4 sm:$0xff]  }
 0x1a4   :  { %5431 = vmatmul.mubr.bf16.gmra.mrb[36].mxu0 %v17107_v19  ;;  %6019 = vmatprep.mubr.bf16.mxu1 %v18265_v21  ;;  %v17258_v19 = vld [vmem:[#allocation8 + $0x698] ss:$24 sps:$4 sm:$0xff]  }
 0x1a5   :  { %5440 = vmatprep.mubr.bf16.mxu0 %v17117_v60  ;;  %v19044_v60 = vpop.f32.mrb[14].mxu1 }
 0x1a6   :  { %v19046_v21 = vpop.f32.mrb[15].mxu1 }
 0x1ab   :  { %6020 = vmatmul.mubr.bf16.gmra.mrb[104].mxu1 %v18266_v23  ;;  %v17216_v23 = vld [vmem:[#allocation8 + $0xfc0] ss:$24 sps:$4 sm:$0xff]  }
 0x1ac   :  { %5441 = vmatmul.mubr.bf16.gmra.mrb[40].mxu0 %v17119_v0  ;;  %6029 = vmatprep.mubr.bf16.mxu1 %v18267_v25  ;;  %v17207_v0 = vld [vmem:[#allocation5 + $0x144] ss:$48 sps:$4 sm:$0xff]  }
 0x1ad   :  { %5450 = vmatprep.mubr.bf16.mxu0 %v17129_v4  ;;  %v19048_v4 = vpop.f32.mrb[16].mxu1  ;;  %v17269_v25 = vld [vmem:[#allocation8 + $0x6cc] ss:$24 sps:$4 sm:$0xff]  }
 0x1b3   :  { %6030 = vmatmul.mubr.bf16.gmra.mrb[108].mxu1 %v18268_v10  ;;  %v18282_v10 = vld [vmem:[#allocation5 + $0xc8] ss:$48 sps:$4 sm:$0xff]  }
 0x1b4   :  { %5451 = vmatmul.mubr.bf16.gmra.mrb[44].mxu0 %v17131_v6  ;;  %6039 = vmatprep.mubr.bf16.mxu1 %v18269_v27  ;;  %v17224_v6 = vld [vmem:[#allocation8 + $0xff4] ss:$24 sps:$4 sm:$0xff]   ;;  %v17222_v27 = vld [vmem:[#allocation8 + $0xff0] ss:$24 sps:$4 sm:$0xff]  }
 0x1b5   :  { %5460 = vmatprep.mubr.bf16.mxu0 %v17141_v8  ;;  %v17267_v8 = vld [vmem:[#allocation8 + $0x6c8] ss:$24 sps:$4 sm:$0xff]  }
 0x1bb   :  { %6040 = vmatmul.mubr.bf16.gmra.mrb[112].mxu1 %v18270_v29  ;;  %v18283_v29 = vld [vmem:[#allocation5 + $0x12c] ss:$48 sps:$4 sm:$0xff]  }
 0x1bc   :  { %5461 = vmatmul.mubr.bf16.gmra.mrb[48].mxu0 %v17143_v12  ;;  %6049 = vmatprep.mubr.bf16.mxu1 %v18271_v16  ;;  %v17272_v12 = vld [vmem:[#allocation8 + $0x6fc] ss:$24 sps:$4 sm:$0xff]  }
 0x1bd   :  { %5470 = vmatprep.mubr.bf16.mxu0 %v17153_v14  ;;  %v19050_v14 = vpop.f32.mrb[17].mxu1  ;;  %v17230_v16 = vld [vmem:[#allocation8 + $0x1024] ss:$24 sps:$4 sm:$0xff]  }
 0x1c3   :  { %6050 = vmatmul.mubr.bf16.gmra.mrb[116].mxu1 %v18272_v20  ;;  %v17209_v20 = vld [vmem:[#allocation5 + $0x140] ss:$48 sps:$4 sm:$0xff]  }
 0x1c4   :  { %5471 = vmatmul.mubr.bf16.gmra.mrb[52].mxu0 %v17155_v31  ;;  %6059 = vmatprep.mubr.bf16.mxu1 %v18273_v33  ;;  %v17270_v31 = vld [vmem:[#allocation8 + $0x6f8] ss:$24 sps:$4 sm:$0xff]  }
 0x1c5   :  { %5480 = vmatprep.mubr.bf16.mxu0 %v17165_v18  ;;  %v19052_v18 = vpop.f32.mrb[18].mxu1 }
 0x1c6   :  { %v19054_v33 = vpop.f32.mrb[19].mxu1 }
 0x1cb   :  { %6060 = vmatmul.mubr.bf16.gmra.mrb[120].mxu1 %v18274_v37  ;;  %v17228_v37 = vld [vmem:[#allocation8 + $0x1020] ss:$24 sps:$4 sm:$0xff]  }
 0x1cc   :  { %5481 = vmatmul.mubr.bf16.gmra.mrb[56].mxu0 %v17167_v22  ;;  %6069 = vmatprep.mubr.bf16.mxu1 %v18275_v28  ;;  %v17213_v22 = vld [vmem:[#allocation5 + $0x1a4] ss:$48 sps:$4 sm:$0xff]  }
 0x1cd   :  { %5490 = vmatprep.mubr.bf16.mxu0 %v17177_v35  ;;  %v19056_v35 = vpop.f32.mrb[20].mxu1  ;;  %v17281_v28 = vld [vmem:[#allocation8 + $0x72c] ss:$24 sps:$4 sm:$0xff]  }
 0x1d3   :  { %6070 = vmatmul.mubr.bf16.gmra.mrb[124].mxu1 %v18276_v34  ;;  %v18284_v34 = vld [vmem:[#allocation5 + $0x128] ss:$48 sps:$4 sm:$0xff]  }
 0x1d4   :  { %5491 = vmatmul.mubr.bf16.gmra.mrb[60].mxu0 %v17179_v1  ;;  %6112 = vmatprep.mubr.bf16.mxu1 %v18277_v3  ;;  %v17236_v1 = vld [vmem:[#allocation8 + $0x1054] ss:$24 sps:$4 sm:$0xff]   ;;  %v17234_v3 = vld [vmem:[#allocation8 + $0x1050] ss:$24 sps:$4 sm:$0xff]  }
 0x1d5   :  { %5533 = vmatprep.mubr.bf16.mxu0 %v17191_v32  ;;  %v17279_v32 = vld [vmem:[#allocation8 + $0x728] ss:$24 sps:$4 sm:$0xff]  }
 0x1db   :  { %6113 = vmatmul.mubr.bf16.vlgmr.msra.gmra.mrb[64].mxu1 %v18278_v42 }
 0x1dc   :  { %5534 = vmatmul.mubr.bf16.vlgmr.msra.gmra.mrb[0].mxu0 %v17189_v38  ;;  %6122 = vmatprep.mubr.bf16.mxu1 %v18279_v57  ;;  %v17284_v38 = vld [vmem:[#allocation8 + $0x75c] ss:$24 sps:$4 sm:$0xff]  }
 0x1dd   :  { %5695 = vmatpush1.bf16.msra.mxu0 %v17192_v5  ;;  %5543 = vmatprep.mubr.bf16.mxu0 %v17195_v47  ;;  %v19058_v5 = vpop.f32.mrb[21].mxu1  ;;  %v18285_v47 = vld [vmem:[#allocation5 + $0x18c] ss:$48 sps:$4 sm:$0xff]  }
 0x1de   :  { %5696 = vmatprep.subr.bf16.mxu0 %v17200_v40  ;;  %6274 = vmatpush1.bf16.msra.mxu1 %v17243_v7  ;;  %v17242_v40 = vld [vmem:[#allocation8 + $0x1084] ss:$24 sps:$4 sm:$0xff]   ;;  %v17282_v7 = vld [vmem:[#allocation8 + $0x758] ss:$24 sps:$4 sm:$0xff]   ;;  %v19060_v42 = vpop.f32.mrb[22].mxu1 }
 0x1df   :  { %6275 = vmatprep.subr.bf16.mxu1 %v17248_v44  ;;  %v19062_v44 = vpop.f32.mrb[23].mxu1 }
 0x1e0   :  { %v19064_v57 = vpop.f32.mrb[24].mxu1 }
 0x1e1   :  { %5697 = vmatpush1.bf16.msra.mxu0 %v17198_v53  ;;  %v17215_v53 = vld [vmem:[#allocation5 + $0x1a0] ss:$48 sps:$4 sm:$0xff]  }
 0x1e2   :  { %5698 = vmatprep.subr.bf16.mxu0 %v17206_v46  ;;  %6276 = vmatpush1.bf16.msra.mxu1 %v17246_v59  ;;  %v17219_v46 = vld [vmem:[#allocation5 + $0x204] ss:$48 sps:$4 sm:$0xff]  }
 0x1e3   :  { %6123 = vmatmul.mubr.bf16.gmra.mrb[68].mxu1 %v18280_v2  ;;  %6277 = vmatprep.subr.bf16.mxu1 %v17257_v63  ;;  %v17293_v59 = vld [vmem:[#allocation8 + $0x78c] ss:$24 sps:$4 sm:$0xff]   ;;  %v18286_v63 = vld [vmem:[#allocation5 + $0x188] ss:$48 sps:$4 sm:$0xff]   ;;  %v19066_v2 = vpop.f32.mrb[25].mxu1 }
 0x1e4   :  { %5544 = vmatmul.mubr.bf16.gmra.mrb[4].mxu0 %v17197_v48  ;;  %6132 = vmatprep.mubr.bf16.mxu1 %v18281_v17  ;;  %v17240_v48 = vld [vmem:[#allocation8 + $0x1080] ss:$24 sps:$4 sm:$0xff]  }
 0x1e5   :  { %5553 = vmatprep.mubr.bf16.mxu0 %v17201_v61  ;;  %5699 = vmatpush1.bf16.msra.mxu0 %v17204_v49  ;;  %v17254_v61 = vld [vmem:[#allocation8 + $0x10b4] ss:$24 sps:$4 sm:$0xff]   ;;  %v17291_v49 = vld [vmem:[#allocation8 + $0x788] ss:$24 sps:$4 sm:$0xff]   ;;  %v17294_v17 = vld [vmem:[#allocation8 + $0x7b8] ss:$24 sps:$4 sm:$0xff]  }
 0x1e6   :  { %5700 = vmatprep.subr.bf16.mxu0 %v17212_v50  ;;  %6278 = vmatpush1.bf16.msra.mxu1 %v17255_v52  ;;  %v17252_v50 = vld [vmem:[#allocation8 + $0x10b0] ss:$24 sps:$4 sm:$0xff]   ;;  %v17296_v52 = vld [vmem:[#allocation8 + $0x7bc] ss:$24 sps:$4 sm:$0xff]  }
 0x1e7   :  { %6279 = vmatprep.subr.bf16.mxu1 %v17260_v54  ;;  %v17266_v54 = vld [vmem:[#allocation8 + $0x10e4] ss:$24 sps:$4 sm:$0xff]  }
 0x1e9   :  { %5701 = vmatpush1.bf16.msra.mxu0 %v17210_v15  ;;  %v18287_v15 = vld [vmem:[#allocation5 + $0x1ec] ss:$48 sps:$4 sm:$0xff]  }
 0x1ea   :  { %5702 = vmatprep.subr.bf16.mxu0 %v17218_v58  ;;  %6280 = vmatpush1.bf16.msra.mxu1 %v17258_v19  ;;  %v19068_v58 = vpop.f32.mrb[26].mxu1  ;;  %v17221_v19 = vld [vmem:[#allocation5 + $0x200] ss:$48 sps:$4 sm:$0xff]  }
 0x1eb   :  { %6133 = vmatmul.mubr.bf16.gmra.mrb[72].mxu1 %v18282_v10  ;;  %6281 = vmatprep.subr.bf16.mxu1 %v17269_v25  ;;  %v17264_v25 = vld [vmem:[#allocation8 + $0x10e0] ss:$24 sps:$4 sm:$0xff]  }
 0x1ec   :  { %5554 = vmatmul.mubr.bf16.gmra.mrb[8].mxu0 %v17203_v62  ;;  %6142 = vmatprep.mubr.bf16.mxu1 %v18283_v29  ;;  %v19070_v62 = vpop.f32.mrb[27].mxu1  ;;  %v17303_v10 = vld [vmem:[#allocation8 + $0x7e8] ss:$24 sps:$4 sm:$0xff]   ;;  %v17308_v29 = vld [vmem:[#allocation8 + $0x81c] ss:$24 sps:$4 sm:$0xff]  }
 0x1ed   :  { %5563 = vmatprep.mubr.bf16.mxu0 %v17207_v0  ;;  %5703 = vmatpush1.bf16.msra.mxu0 %v17216_v23  ;;  %v17225_v0 = vld [vmem:[#allocation5 + $0x264] ss:$48 sps:$4 sm:$0xff]   ;;  %v19072_v23 = vpop.f32.mrb[28].mxu1 }
 0x1ee   :  { %5704 = vmatprep.subr.bf16.mxu0 %v17224_v6  ;;  %6282 = vmatpush1.bf16.msra.mxu1 %v17267_v8  ;;  %v17305_v6 = vld [vmem:[#allocation8 + $0x7ec] ss:$24 sps:$4 sm:$0xff]  }
 0x1ef   :  { %6283 = vmatprep.subr.bf16.mxu1 %v17272_v12  ;;  %v17278_v8 = vld [vmem:[#allocation8 + $0x1114] ss:$24 sps:$4 sm:$0xff]   ;;  %v17276_v12 = vld [vmem:[#allocation8 + $0x1110] ss:$24 sps:$4 sm:$0xff]  }
 0x1f1   :  { %5705 = vmatpush1.bf16.msra.mxu0 %v17222_v27  ;;  %v18288_v27 = vld [vmem:[#allocation5 + $0x1e8] ss:$48 sps:$4 sm:$0xff]  }
 0x1f2   :  { %5706 = vmatprep.subr.bf16.mxu0 %v17230_v16  ;;  %6284 = vmatpush1.bf16.msra.mxu1 %v17270_v31  ;;  %v19074_v16 = vpop.f32.mrb[29].mxu1  ;;  %v18289_v31 = vld [vmem:[#allocation5 + $0x24c] ss:$48 sps:$4 sm:$0xff]  }
 0x1f3   :  { %6143 = vmatmul.mubr.bf16.gmra.mrb[76].mxu1 %v18284_v34  ;;  %6285 = vmatprep.subr.bf16.mxu1 %v17281_v28  ;;  %v17227_v28 = vld [vmem:[#allocation5 + $0x260] ss:$48 sps:$4 sm:$0xff]  }
 0x1f4   :  { %5564 = vmatmul.mubr.bf16.gmra.mrb[12].mxu0 %v17209_v20  ;;  %6152 = vmatprep.mubr.bf16.mxu1 %v18285_v47  ;;  %v17290_v20 = vld [vmem:[#allocation8 + $0x1144] ss:$24 sps:$4 sm:$0xff]   ;;  %v17302_v47 = vld [vmem:[#allocation8 + $0x1174] ss:$24 sps:$4 sm:$0xff]  }
 0x1f5   :  { %5573 = vmatprep.mubr.bf16.mxu0 %v17213_v22  ;;  %5707 = vmatpush1.bf16.msra.mxu0 %v17228_v37  ;;  %v17306_v22 = vld [vmem:[#allocation8 + $0x818] ss:$24 sps:$4 sm:$0xff]   ;;  %v19076_v37 = vpop.f32.mrb[30].mxu1 }
 0x1f6   :  { %5708 = vmatprep.subr.bf16.mxu0 %v17236_v1  ;;  %6286 = vmatpush1.bf16.msra.mxu1 %v17279_v32  ;;  %v19078_v1 = vpop.f32.mrb[31].mxu1  ;;  %v17231_v32 = vld [vmem:[#allocation5 + $0x2c4] ss:$48 sps:$4 sm:$0xff]  }
 0x1f7   :  { %6287 = vmatprep.subr.bf16.mxu1 %v17284_v38  ;;  %v19080_v34 = vpop.f32.mrb[32].mxu1  ;;  %v17317_v38 = vld [vmem:[#allocation8 + $0x84c] ss:$24 sps:$4 sm:$0xff]  }
 0x1f9   :  { %5709 = vmatpush1.bf16.msra.mxu0 %v17234_v3  ;;  %v17288_v3 = vld [vmem:[#allocation8 + $0x1140] ss:$24 sps:$4 sm:$0xff]  }
 0x1fa   :  { %5710 = vmatprep.subr.bf16.mxu0 %v17242_v40  ;;  %6288 = vmatpush1.bf16.msra.mxu1 %v17282_v7  ;;  %v17315_v40 = vld [vmem:[#allocation8 + $0x848] ss:$24 sps:$4 sm:$0xff]  }
 0x1fb   :  { %6153 = vmatmul.mubr.bf16.gmra.mrb[80].mxu1 %v18286_v63  ;;  %6289 = vmatprep.subr.bf16.mxu1 %v17293_v59  ;;  %v18290_v7 = vld [vmem:[#allocation5 + $0x248] ss:$48 sps:$4 sm:$0xff]   ;;  %v18291_v59 = vld [vmem:[#allocation5 + $0x2ac] ss:$48 sps:$4 sm:$0xff]  }
 0x1fc   :  { %5574 = vmatmul.mubr.bf16.gmra.mrb[16].mxu0 %v17215_v53  ;;  %6162 = vmatprep.mubr.bf16.mxu1 %v18287_v15  ;;  %v17300_v53 = vld [vmem:[#allocation8 + $0x1170] ss:$24 sps:$4 sm:$0xff]   ;;  %v17237_v15 = vld [vmem:[#allocation5 + $0x324] ss:$48 sps:$4 sm:$0xff]  }
 0x1fd   :  { %5583 = vmatprep.mubr.bf16.mxu0 %v17219_v46  ;;  %5711 = vmatpush1.bf16.msra.mxu0 %v17240_v48  ;;  %v17320_v46 = vld [vmem:[#allocation8 + $0x87c] ss:$24 sps:$4 sm:$0xff]   ;;  %v19082_v48 = vpop.f32.mrb[33].mxu1 }
 0x1fe   :  { %5712 = vmatprep.subr.bf16.mxu0 %v17254_v61  ;;  %6290 = vmatpush1.bf16.msra.mxu1 %v17291_v49  ;;  %v17314_v61 = vld [vmem:[#allocation8 + $0x11a4] ss:$24 sps:$4 sm:$0xff]   ;;  %v17318_v49 = vld [vmem:[#allocation8 + $0x878] ss:$24 sps:$4 sm:$0xff]   ;;  %v19084_v63 = vpop.f32.mrb[34].mxu1 }
 0x1ff   :  { %6291 = vmatprep.subr.bf16.mxu1 %v17296_v52  ;;  %v19086_v52 = vpop.f32.mrb[35].mxu1 }
 0x201   :  { %5713 = vmatpush1.bf16.msra.mxu0 %v17252_v50  ;;  %v17233_v50 = vld [vmem:[#allocation5 + $0x2c0] ss:$48 sps:$4 sm:$0xff]  }
 0x202   :  { %5714 = vmatprep.subr.bf16.mxu0 %v17266_v54  ;;  %6292 = vmatpush1.bf16.msra.mxu1 %v17294_v17  ;;  %v19088_v54 = vpop.f32.mrb[36].mxu1  ;;  %v17312_v17 = vld [vmem:[#allocation8 + $0x11a0] ss:$24 sps:$4 sm:$0xff]  }
 0x203   :  { %6163 = vmatmul.mubr.bf16.gmra.mrb[84].mxu1 %v18288_v27  ;;  %6293 = vmatprep.subr.bf16.mxu1 %v17305_v6  ;;  %v18292_v6 = vld [vmem:[#allocation5 + $0x2a8] ss:$48 sps:$4 sm:$0xff]   ;;  %v19090_v27 = vpop.f32.mrb[37].mxu1 }
 0x204   :  { %5584 = vmatmul.mubr.bf16.gmra.mrb[20].mxu0 %v17221_v19  ;;  %6172 = vmatprep.mubr.bf16.mxu1 %v18289_v31  ;;  %v17329_v19 = vld [vmem:[#allocation8 + $0x8ac] ss:$24 sps:$4 sm:$0xff]  }
 0x205   :  { %5593 = vmatprep.mubr.bf16.mxu0 %v17225_v0  ;;  %5715 = vmatpush1.bf16.msra.mxu0 %v17264_v25  ;;  %v17326_v0 = vld [vmem:[#allocation8 + $0x11d4] ss:$24 sps:$4 sm:$0xff]   ;;  %v17327_v25 = vld [vmem:[#allocation8 + $0x8a8] ss:$24 sps:$4 sm:$0xff]  }
 0x206   :  { %5716 = vmatprep.subr.bf16.mxu0 %v17278_v8  ;;  %6294 = vmatpush1.bf16.msra.mxu1 %v17303_v10  ;;  %v17324_v8 = vld [vmem:[#allocation8 + $0x11d0] ss:$24 sps:$4 sm:$0xff]   ;;  %v17332_v10 = vld [vmem:[#allocation8 + $0x8dc] ss:$24 sps:$4 sm:$0xff]  }
 0x207   :  { %6295 = vmatprep.subr.bf16.mxu1 %v17308_v29  ;;  %v17330_v29 = vld [vmem:[#allocation8 + $0x8d8] ss:$24 sps:$4 sm:$0xff]   ;;  %v17338_v31 = vld [vmem:[#allocation8 + $0x14] ss:$24 sps:$4 sm:$0xff]  }
 0x209   :  { %5717 = vmatpush1.bf16.msra.mxu0 %v17276_v12  ;;  %v18293_v12 = vld [vmem:[#allocation5 + $0x30c] ss:$48 sps:$4 sm:$0xff]  }
 0x20a   :  { %5718 = vmatprep.subr.bf16.mxu0 %v17290_v20  ;;  %6296 = vmatpush1.bf16.msra.mxu1 %v17306_v22  ;;  %v19092_v20 = vpop.f32.mrb[38].mxu1  ;;  %v17239_v22 = vld [vmem:[#allocation5 + $0x320] ss:$48 sps:$4 sm:$0xff]  }
 0x20b   :  { %6173 = vmatmul.mubr.bf16.gmra.mrb[88].mxu1 %v18290_v7  ;;  %6297 = vmatprep.subr.bf16.mxu1 %v17317_v38  ;;  %v17386_v38 = vld [vmem:[#allocation8 + $0x90c] ss:$24 sps:$4 sm:$0xff]  }
 0x20c   :  { %5594 = vmatmul.mubr.bf16.gmra.mrb[24].mxu0 %v17227_v28  ;;  %6182 = vmatprep.mubr.bf16.mxu1 %v18291_v59  ;;  %v19094_v28 = vpop.f32.mrb[39].mxu1  ;;  %v18295_v7 = vld [vmem:[#allocation5 + $0x36c] ss:$48 sps:$4 sm:$0xff]  }
 0x20d   :  { %5603 = vmatprep.mubr.bf16.mxu0 %v17231_v32  ;;  %5719 = vmatpush1.bf16.msra.mxu0 %v17288_v3  ;;  %v17249_v32 = vld [vmem:[#allocation5 + $0x384] ss:$48 sps:$4 sm:$0xff]   ;;  %v19096_v3 = vpop.f32.mrb[40].mxu1 }
 0x20e   :  { %5720 = vmatprep.subr.bf16.mxu0 %v17302_v47  ;;  %6298 = vmatpush1.bf16.msra.mxu1 %v17315_v40  ;;  %v18294_v47 = vld [vmem:[#allocation5 + $0x308] ss:$48 sps:$4 sm:$0xff]   ;;  %v19098_v40 = vpop.f32.mrb[41].mxu1 }
 0x20f   :  { %6299 = vmatprep.subr.bf16.mxu1 %v17320_v46  ;;  %v17251_v46 = vld [vmem:[#allocation5 + $0x380] ss:$48 sps:$4 sm:$0xff]  }
 0x211   :  { %5721 = vmatpush1.bf16.msra.mxu0 %v17300_v53  ;;  %v19100_v53 = vpop.f32.mrb[42].mxu1 }
 0x212   :  { %5722 = vmatprep.subr.bf16.mxu0 %v17314_v61  ;;  %6300 = vmatpush1.bf16.msra.mxu1 %v17318_v49  ;;  %v19102_v59 = vpop.f32.mrb[43].mxu1  ;;  %v17261_v61 = vld [vmem:[#allocation5 + $0x3e4] ss:$48 sps:$4 sm:$0xff]  }
 0x213   :  { %6183 = vmatmul.mubr.bf16.gmra.mrb[92].mxu1 %v18292_v6  ;;  %6301 = vmatprep.subr.bf16.mxu1 %v17329_v19  ;;  %v19104_v49 = vpop.f32.mrb[44].mxu1  ;;  %v17273_v6 = vld [vmem:[#allocation5 + $0x444] ss:$48 sps:$4 sm:$0xff]  }
 0x214   :  { %5604 = vmatmul.mubr.bf16.gmra.mrb[28].mxu0 %v17233_v50  ;;  %6192 = vmatprep.mubr.bf16.mxu1 %v18293_v12  ;;  %v18296_v50 = vld [vmem:[#allocation5 + $0x368] ss:$48 sps:$4 sm:$0xff]  }
 0x215   :  { %5613 = vmatprep.mubr.bf16.mxu0 %v17237_v15  ;;  %5723 = vmatpush1.bf16.msra.mxu0 %v17312_v17  ;;  %v19106_v15 = vpop.f32.mrb[45].mxu1  ;;  %v18297_v17 = vld [vmem:[#allocation5 + $0x3cc] ss:$48 sps:$4 sm:$0xff]  }
 0x216   :  { %5724 = vmatprep.subr.bf16.mxu0 %v17326_v0  ;;  %6302 = vmatpush1.bf16.msra.mxu1 %v17327_v25  ;;  %20731 = vst [vmem:[#allocation19_spill] sm:$0xff] %v19106_v15  ;;  %v19108_v19 = vpop.f32.mrb[46].mxu1  ;;  %v17263_v0 = vld [vmem:[#allocation5 + $0x3e0] ss:$48 sps:$4 sm:$0xff]  }
 0x217   :  { %6303 = vmatprep.subr.bf16.mxu1 %v17332_v10  ;;  %20732 = vst [vmem:[#allocation20_spill] sm:$0xff] %v19108_v19  ;;  %v19110_v25 = vpop.f32.mrb[47].mxu1  ;;  %v18298_v10 = vld [vmem:[#allocation5 + $0x3c8] ss:$48 sps:$4 sm:$0xff]  }
 0x218   :  { %20733 = vst [vmem:[#allocation21_spill] sm:$0xff] %v19110_v25  ;;  %v17396_v25 = vld [vmem:[#allocation8 + $0x968] ss:$24 sps:$4 sm:$0xff]  }
 0x219   :  { %5725 = vmatpush1.bf16.msra.mxu0 %v17324_v8  ;;  %v19112_v8 = vpop.f32.mrb[48].mxu1  ;;  %v17347_v19 = vld [vmem:[#allocation5 + $0xe8] ss:$48 sps:$4 sm:$0xff]  }
 0x21a   :  { %6304 = vmatpush1.bf16.msra.mxu1 %v17330_v29  ;;  %7045 = vmatprep.subr.bf16.mxu0 %v17338_v31  ;;  %20734 = vst [vmem:[#allocation22_spill] sm:$0xff] %v19112_v8  ;;  %v19114_v12 = vpop.f32.mrb[49].mxu1  ;;  %v18299_v29 = vld [vmem:[#allocation5 + $0x42c] ss:$48 sps:$4 sm:$0xff]  }
 0x21b   :  { %6193 = vmatmul.mubr.bf16.gmra.mrb[96].mxu1 %v18294_v47  ;;  %6466 = vmatprep.subr.bf16.mxu1 %v17386_v38  ;;  %20735 = vst [vmem:[#allocation23_spill] sm:$0xff] %v19114_v12  ;;  %v19116_v31 = vpop.f32.mrb[50].mxu1  ;;  %v17285_v38 = vld [vmem:[#allocation5 + $0x4a4] ss:$48 sps:$4 sm:$0xff]  }
 0x21c   :  { %5614 = vmatmul.mubr.bf16.gmra.mrb[32].mxu0 %v17239_v22  ;;  %6202 = vmatprep.mubr.bf16.mxu1 %v18295_v7  ;;  %20736 = vst [vmem:[#allocation24_spill] sm:$0xff] %v19116_v31  ;;  %v17275_v22 = vld [vmem:[#allocation5 + $0x440] ss:$48 sps:$4 sm:$0xff]   ;;  %v18300_v7 = vld [vmem:[#allocation5 + $0x428] ss:$48 sps:$4 sm:$0xff]  }
 0x21d   :  { %5623 = vmatprep.mubr.bf16.mxu0 %v17249_v32  ;;  %v19118_v32 = vpop.f32.mrb[51].mxu1  ;;  %v17342_v31 = vld [vmem:[#allocation8 + $0x40] ss:$24 sps:$4 sm:$0xff]   ;;  %v17398_v12 = vld [vmem:[#allocation8 + $0x96c] ss:$24 sps:$4 sm:$0xff]  }
 0x21e   :  { %20737 = vst [vmem:[#allocation25_spill] sm:$0xff] %v19118_v32  ;;  %v19120_v47 = vpop.f32.mrb[52].mxu1  ;;  %v17344_v32 = vld [vmem:[#allocation8 + $0x44] ss:$24 sps:$4 sm:$0xff]  }
 0x21f   :  { %20738 = vst [vmem:[#allocation26_spill] sm:$0xff] %v19120_v47  ;;  %v17356_v8 = vld [vmem:[#allocation8 + $0xa4] ss:$24 sps:$4 sm:$0xff]  }
 0x223   :  { %6203 = vmatmul.mubr.bf16.gmra.mrb[100].mxu1 %v18296_v50 }
 0x224   :  { %5624 = vmatmul.mubr.bf16.gmra.mrb[36].mxu0 %v17251_v46  ;;  %6212 = vmatprep.mubr.bf16.mxu1 %v18297_v17  ;;  %v19122_v46 = vpop.f32.mrb[53].mxu1  ;;  %v17287_v17 = vld [vmem:[#allocation5 + $0x4a0] ss:$48 sps:$4 sm:$0xff]  }
 0x225   :  { %5633 = vmatprep.mubr.bf16.mxu0 %v17261_v61  ;;  %20739 = vst [vmem:[#allocation27_spill] sm:$0xff] %v19122_v46  ;;  %v18301_v61 = vld [vmem:[#allocation5 + $0x48c] ss:$48 sps:$4 sm:$0xff]   ;;  %v19124_v50 = vpop.f32.mrb[54].mxu1 }
 0x226   :  { %20740 = vst [vmem:[#allocation28_spill] sm:$0xff] %v19124_v50  ;;  %v17309_v50 = vld [vmem:[#allocation5 + $0x564] ss:$48 sps:$4 sm:$0xff]  }
 0x22b   :  { %6213 = vmatmul.mubr.bf16.gmra.mrb[104].mxu1 %v18298_v10 }
 0x22c   :  { %5634 = vmatmul.mubr.bf16.gmra.mrb[40].mxu0 %v17263_v0  ;;  %6222 = vmatprep.mubr.bf16.mxu1 %v18299_v29  ;;  %v19126_v0 = vpop.f32.mrb[55].mxu1  ;;  %v18302_v29 = vld [vmem:[#allocation5 + $0x488] ss:$48 sps:$4 sm:$0xff]  }
 0x22d   :  { %5643 = vmatprep.mubr.bf16.mxu0 %v17273_v6  ;;  %20741 = vst [vmem:[#allocation29_spill] sm:$0xff] %v19126_v0  ;;  %v17297_v6 = vld [vmem:[#allocation5 + $0x504] ss:$48 sps:$4 sm:$0xff]   ;;  %v19128_v10 = vpop.f32.mrb[56].mxu1  ;;  %v18304_v0 = vld [vmem:[#allocation5 + $0x4e8] ss:$48 sps:$4 sm:$0xff]  }
 0x22e   :  { %20742 = vst [vmem:[#allocation30_spill] sm:$0xff] %v19128_v10  ;;  %v19130_v47 = vpop.f32.mrb[57].mxu1 }
 0x22f   :  { %20743 = vst [vmem:[#allocation31_spill] sm:$0xff] %v19130_v47  ;;  %v18306_v47 = vld [vmem:[#allocation5 + $0x548] ss:$48 sps:$4 sm:$0xff]  }
 0x233   :  { %6223 = vmatmul.mubr.bf16.gmra.mrb[108].mxu1 %v18300_v7  ;;  %v19132_v7 = vpop.f32.mrb[58].mxu1 }
 0x234   :  { %5644 = vmatmul.mubr.bf16.gmra.mrb[44].mxu0 %v17275_v22  ;;  %6232 = vmatprep.mubr.bf16.mxu1 %v18301_v61  ;;  %v18303_v22 = vld [vmem:[#allocation5 + $0x4ec] ss:$48 sps:$4 sm:$0xff]   ;;  %20744 = vst [vmem:[#allocation32_spill] sm:$0xff] %v19132_v7  ;;  %v19134_v61 = vpop.f32.mrb[59].mxu1  ;;  %v17321_v7 = vld [vmem:[#allocation5 + $0x5c4] ss:$48 sps:$4 sm:$0xff]  }
 0x235   :  { %5653 = vmatprep.mubr.bf16.mxu0 %v17285_v38  ;;  %v17299_v38 = vld [vmem:[#allocation5 + $0x500] ss:$48 sps:$4 sm:$0xff]   ;;  %20745 = vst [vmem:[#allocation33_spill] sm:$0xff] %v19134_v61  ;;  %v19136_v46 = vpop.f32.mrb[60].mxu1  ;;  %v18307_v61 = vld [vmem:[#allocation5 + $0x5ac] ss:$48 sps:$4 sm:$0xff]  }
 0x236   :  { %20746 = vst [vmem:[#allocation34_spill] sm:$0xff] %v19136_v46  ;;  %v19138_v10 = vpop.f32.mrb[61].mxu1  ;;  %v17335_v46 = vld [vmem:[#allocation5 + $0x2c] ss:$48 sps:$4 sm:$0xff]  }
 0x237   :  { %20747 = vst [vmem:[#allocation35_spill] sm:$0xff] %v19138_v10  ;;  %v17339_v10 = vld [vmem:[#allocation5 + $0x8c] ss:$48 sps:$4 sm:$0xff]  }
 0x23b   :  { %6233 = vmatmul.mubr.bf16.gmra.mrb[112].mxu1 %v18302_v29  ;;  %v19140_v29 = vpop.f32.mrb[62].mxu1 }
 0x23c   :  { %5654 = vmatmul.mubr.bf16.gmra.mrb[48].mxu0 %v17287_v17  ;;  %6242 = vmatprep.mubr.bf16.mxu1 %v18303_v22  ;;  %v18305_v17 = vld [vmem:[#allocation5 + $0x54c] ss:$48 sps:$4 sm:$0xff]   ;;  %20748 = vst [vmem:[#allocation36_spill] sm:$0xff] %v19140_v29  ;;  %v19142_v22 = vpop.f32.mrb[63].mxu1  ;;  %v17336_v29 = vld [vmem:[#allocation8 + $0x10] ss:$24 sps:$4 sm:$0xff]  }
 0x23d   :  { %5663 = vmatprep.mubr.bf16.mxu0 %v17297_v6  ;;  %v17311_v6 = vld [vmem:[#allocation5 + $0x560] ss:$48 sps:$4 sm:$0xff]   ;;  %20749 = vst [vmem:[#allocation37_spill] sm:$0xff] %v19142_v22 }
 0x23e   :  { %v17384_v22 = vld [vmem:[#allocation8 + $0x908] ss:$24 sps:$4 sm:$0xff]  }
 0x243   :  { %6243 = vmatmul.mubr.bf16.gmra.mrb[116].mxu1 %v18304_v0  ;;  %v18308_v0 = vld [vmem:[#allocation5 + $0x5a8] ss:$48 sps:$4 sm:$0xff]  }
 0x244   :  { %5664 = vmatmul.mubr.bf16.gmra.mrb[52].mxu0 %v17299_v38  ;;  %6252 = vmatprep.mubr.bf16.mxu1 %v18305_v17  ;;  %v17323_v38 = vld [vmem:[#allocation5 + $0x5c0] ss:$48 sps:$4 sm:$0xff]   ;;  %v17333_v17 = vld [vmem:[#allocation5 + $0x28] ss:$48 sps:$4 sm:$0xff]  }
 0x245   :  { %5673 = vmatprep.mubr.bf16.mxu0 %v17309_v50  ;;  %v18309_v50 = vld [vmem:[#allocation5 + $0x14] ss:$48 sps:$4 sm:$0xff]  }
 0x24b   :  { %6253 = vmatmul.mubr.bf16.gmra.mrb[120].mxu1 %v18306_v47  ;;  %v17350_v47 = vld [vmem:[#allocation8 + $0x74] ss:$24 sps:$4 sm:$0xff]  }
 0x24c   :  { %5674 = vmatmul.mubr.bf16.gmra.mrb[56].mxu0 %v17311_v6  ;;  %6262 = vmatprep.mubr.bf16.mxu1 %v18307_v61  ;;  %v18310_v6 = vld [vmem:[#allocation5 + $0x10] ss:$48 sps:$4 sm:$0xff]  }
 0x24d   :  { %5683 = vmatprep.mubr.bf16.mxu0 %v17321_v7  ;;  %v17392_v7 = vld [vmem:[#allocation8 + $0x93c] ss:$24 sps:$4 sm:$0xff]   ;;  %v17390_v61 = vld [vmem:[#allocation8 + $0x938] ss:$24 sps:$4 sm:$0xff]  }
 0x253   :  { %6263 = vmatmul.mubr.bf16.gmra.mrb[124].mxu1 %v18308_v0  ;;  %v17341_v0 = vld [vmem:[#allocation5 + $0x88] ss:$48 sps:$4 sm:$0xff]  }
 0x254   :  { %5684 = vmatmul.mubr.bf16.gmra.mrb[60].mxu0 %v17323_v38  ;;  %6305 = vmatprep.mubr.bf16.mxu1 %v18309_v50  ;;  %v18311_v38 = vld [vmem:[#allocation5 + $0x74] ss:$48 sps:$4 sm:$0xff]   ;;  %v17348_v50 = vld [vmem:[#allocation8 + $0x70] ss:$24 sps:$4 sm:$0xff]  }
 0x255   :  { %5726 = vmatprep.mubr.bf16.mxu0 %v17335_v46  ;;  %v17345_v46 = vld [vmem:[#allocation5 + $0xec] ss:$48 sps:$4 sm:$0xff]  }
 0x25b   :  { %6306 = vmatmul.mubr.bf16.vlgmr.msra.gmra.mrb[64].mxu1 %v18310_v6  ;;  %v18313_v6 = vld [vmem:[#allocation5 + $0xd4] ss:$48 sps:$4 sm:$0xff]  }
 0x25c   :  { %5727 = vmatmul.mubr.bf16.vlgmr.msra.gmra.mrb[0].mxu0 %v17333_v17  ;;  %6315 = vmatprep.mubr.bf16.mxu1 %v18311_v38  ;;  %v18312_v17 = vld [vmem:[#allocation5 + $0x70] ss:$48 sps:$4 sm:$0xff]   ;;  %v17362_v38 = vld [vmem:[#allocation8 + $0xd4] ss:$24 sps:$4 sm:$0xff]  }
 0x25d   :  { %7046 = vmatpush1.bf16.msra.mxu0 %v17336_v29  ;;  %5736 = vmatprep.mubr.bf16.mxu0 %v17339_v10  ;;  %v17354_v29 = vld [vmem:[#allocation8 + $0xa0] ss:$24 sps:$4 sm:$0xff]   ;;  %v17404_v10 = vld [vmem:[#allocation8 + $0x99c] ss:$24 sps:$4 sm:$0xff]  }
 0x25e   :  { %7047 = vmatprep.subr.bf16.mxu0 %v17344_v32  ;;  %6467 = vmatpush1.bf16.msra.mxu1 %v17384_v22  ;;  %v17402_v32 = vld [vmem:[#allocation8 + $0x998] ss:$24 sps:$4 sm:$0xff]   ;;  %v17351_v22 = vld [vmem:[#allocation5 + $0x14c] ss:$48 sps:$4 sm:$0xff]  }
 0x25f   :  { %6468 = vmatprep.subr.bf16.mxu1 %v17392_v7  ;;  %v17368_v7 = vld [vmem:[#allocation8 + $0x104] ss:$24 sps:$4 sm:$0xff]  }
 0x261   :  { %7048 = vmatpush1.bf16.msra.mxu0 %v17342_v31  ;;  %v17360_v31 = vld [vmem:[#allocation8 + $0xd0] ss:$24 sps:$4 sm:$0xff]  }
 0x262   :  { %7049 = vmatprep.subr.bf16.mxu0 %v17350_v47  ;;  %6469 = vmatpush1.bf16.msra.mxu1 %v17390_v61  ;;  %v17410_v47 = vld [vmem:[#allocation8 + $0x9cc] ss:$24 sps:$4 sm:$0xff]   ;;  %v17408_v61 = vld [vmem:[#allocation8 + $0x9c8] ss:$24 sps:$4 sm:$0xff]  }
 0x263   :  { %6316 = vmatmul.mubr.bf16.gmra.mrb[68].mxu1 %v18312_v17  ;;  %6470 = vmatprep.subr.bf16.mxu1 %v17398_v12  ;;  %v17416_v17 = vld [vmem:[#allocation8 + $0x9fc] ss:$24 sps:$4 sm:$0xff]  }
 0x264   :  { %5737 = vmatmul.mubr.bf16.gmra.mrb[4].mxu0 %v17341_v0  ;;  %6325 = vmatprep.mubr.bf16.mxu1 %v18313_v6  ;;  %v18314_v0 = vld [vmem:[#allocation5 + $0xd0] ss:$48 sps:$4 sm:$0xff]   ;;  %v18315_v6 = vld [vmem:[#allocation5 + $0x134] ss:$48 sps:$4 sm:$0xff]  }
 0x265   :  { %5746 = vmatprep.mubr.bf16.mxu0 %v17345_v46  ;;  %7050 = vmatpush1.bf16.msra.mxu0 %v17348_v50  ;;  %v17366_v46 = vld [vmem:[#allocation8 + $0x100] ss:$24 sps:$4 sm:$0xff]   ;;  %v17374_v12 = vld [vmem:[#allocation8 + $0x134] ss:$24 sps:$4 sm:$0xff]  }
 0x266   :  { %7051 = vmatprep.subr.bf16.mxu0 %v17356_v8  ;;  %6471 = vmatpush1.bf16.msra.mxu1 %v17396_v25  ;;  %v17414_v50 = vld [vmem:[#allocation8 + $0x9f8] ss:$24 sps:$4 sm:$0xff]   ;;  %v17357_v8 = vld [vmem:[#allocation5 + $0x1ac] ss:$48 sps:$4 sm:$0xff]  }
 0x267   :  { %6472 = vmatprep.subr.bf16.mxu1 %v17404_v10  ;;  %v17353_v25 = vld [vmem:[#allocation5 + $0x148] ss:$48 sps:$4 sm:$0xff]   ;;  %v17422_v10 = vld [vmem:[#allocation8 + $0xa2c] ss:$24 sps:$4 sm:$0xff]  }
 0x269   :  { %7052 = vmatpush1.bf16.msra.mxu0 %v17354_v29  ;;  %v17372_v29 = vld [vmem:[#allocation8 + $0x130] ss:$24 sps:$4 sm:$0xff]  }
 0x26a   :  { %7053 = vmatprep.subr.bf16.mxu0 %v17362_v38  ;;  %6473 = vmatpush1.bf16.msra.mxu1 %v17402_v32  ;;  %v17420_v38 = vld [vmem:[#allocation8 + $0xa28] ss:$24 sps:$4 sm:$0xff]  }
 0x26b   :  { %6326 = vmatmul.mubr.bf16.gmra.mrb[72].mxu1 %v18314_v0  ;;  %6474 = vmatprep.subr.bf16.mxu1 %v17410_v47  ;;  %v18316_v32 = vld [vmem:[#allocation5 + $0x130] ss:$48 sps:$4 sm:$0xff]   ;;  %v18317_v0 = vld [vmem:[#allocation5 + $0x194] ss:$48 sps:$4 sm:$0xff]  }
 0x26c   :  { %5747 = vmatmul.mubr.bf16.gmra.mrb[8].mxu0 %v17347_v19  ;;  %6335 = vmatprep.mubr.bf16.mxu1 %v18315_v6  ;;  %v17380_v19 = vld [vmem:[#allocation8 + $0x164] ss:$24 sps:$4 sm:$0xff]   ;;  %v17389_v47 = vld [vmem:[#allocation8 + $0x194] ss:$24 sps:$4 sm:$0xff]  }
 0x26d   :  { %5756 = vmatprep.mubr.bf16.mxu0 %v17351_v22  ;;  %7054 = vmatpush1.bf16.msra.mxu0 %v17360_v31  ;;  %v17428_v22 = vld [vmem:[#allocation8 + $0xa5c] ss:$24 sps:$4 sm:$0xff]   ;;  %v17378_v31 = vld [vmem:[#allocation8 + $0x160] ss:$24 sps:$4 sm:$0xff]   ;;  %v17434_v6 = vld [vmem:[#allocation8 + $0xa8c] ss:$24 sps:$4 sm:$0xff]  }
 0x26e   :  { %7055 = vmatprep.subr.bf16.mxu0 %v17368_v7  ;;  %6475 = vmatpush1.bf16.msra.mxu1 %v17408_v61  ;;  %v17426_v7 = vld [vmem:[#allocation8 + $0xa58] ss:$24 sps:$4 sm:$0xff]  }
 0x26f   :  { %6476 = vmatprep.subr.bf16.mxu1 %v17416_v17  ;;  %v17359_v61 = vld [vmem:[#allocation5 + $0x1a8] ss:$48 sps:$4 sm:$0xff]  }
 0x270   :  { %v17387_v17 = vld [vmem:[#allocation8 + $0x190] ss:$24 sps:$4 sm:$0xff]  }
 0x271   :  { %7056 = vmatpush1.bf16.msra.mxu0 %v17366_v46  ;;  %v17363_v46 = vld [vmem:[#allocation5 + $0x20c] ss:$48 sps:$4 sm:$0xff]  }
 0x272   :  { %7057 = vmatprep.subr.bf16.mxu0 %v17374_v12  ;;  %6477 = vmatpush1.bf16.msra.mxu1 %v17414_v50  ;;  %v17401_v12 = vld [vmem:[#allocation8 + $0x1c4] ss:$24 sps:$4 sm:$0xff]   ;;  %v17432_v50 = vld [vmem:[#allocation8 + $0xa88] ss:$24 sps:$4 sm:$0xff]  }
 0x273   :  { %6336 = vmatmul.mubr.bf16.gmra.mrb[76].mxu1 %v18316_v32  ;;  %6478 = vmatprep.subr.bf16.mxu1 %v17422_v10  ;;  %v17399_v10 = vld [vmem:[#allocation8 + $0x1c0] ss:$24 sps:$4 sm:$0xff]  }
 0x274   :  { %5757 = vmatmul.mubr.bf16.gmra.mrb[12].mxu0 %v17353_v25  ;;  %6345 = vmatprep.mubr.bf16.mxu1 %v18317_v0  ;;  %v18318_v25 = vld [vmem:[#allocation5 + $0x190] ss:$48 sps:$4 sm:$0xff]   ;;  %v17365_v32 = vld [vmem:[#allocation5 + $0x208] ss:$48 sps:$4 sm:$0xff]  }
 0x275   :  { %5766 = vmatprep.mubr.bf16.mxu0 %v17357_v8  ;;  %7058 = vmatpush1.bf16.msra.mxu0 %v17372_v29  ;;  %v17440_v8 = vld [vmem:[#allocation8 + $0xabc] ss:$24 sps:$4 sm:$0xff]   ;;  %v17411_v0 = vld [vmem:[#allocation8 + $0x1f0] ss:$24 sps:$4 sm:$0xff]  }
 0x276   :  { %7059 = vmatprep.subr.bf16.mxu0 %v17380_v19  ;;  %6479 = vmatpush1.bf16.msra.mxu1 %v17420_v38  ;;  %v18319_v29 = vld [vmem:[#allocation5 + $0x1f4] ss:$48 sps:$4 sm:$0xff]   ;;  %v17438_v38 = vld [vmem:[#allocation8 + $0xab8] ss:$24 sps:$4 sm:$0xff]  }
 0x277   :  { %6480 = vmatprep.subr.bf16.mxu1 %v17428_v22  ;;  %v17413_v19 = vld [vmem:[#allocation8 + $0x1f4] ss:$24 sps:$4 sm:$0xff]  }
 0x278   :  { %v17369_v22 = vld [vmem:[#allocation5 + $0x26c] ss:$48 sps:$4 sm:$0xff]  }
 0x279   :  { %7060 = vmatpush1.bf16.msra.mxu0 %v17378_v31  ;;  %v17446_v31 = vld [vmem:[#allocation8 + $0xaec] ss:$24 sps:$4 sm:$0xff]  }
 0x27a   :  { %7061 = vmatprep.subr.bf16.mxu0 %v17389_v47  ;;  %6481 = vmatpush1.bf16.msra.mxu1 %v17426_v7  ;;  %v17425_v47 = vld [vmem:[#allocation8 + $0x224] ss:$24 sps:$4 sm:$0xff]   ;;  %v17444_v7 = vld [vmem:[#allocation8 + $0xae8] ss:$24 sps:$4 sm:$0xff]  }
 0x27b   :  { %6346 = vmatmul.mubr.bf16.gmra.mrb[80].mxu1 %v18318_v25  ;;  %6482 = vmatprep.subr.bf16.mxu1 %v17434_v6  ;;  %v17423_v6 = vld [vmem:[#allocation8 + $0x220] ss:$24 sps:$4 sm:$0xff]  }
 0x27c   :  { %5767 = vmatmul.mubr.bf16.gmra.mrb[16].mxu0 %v17359_v61  ;;  %6355 = vmatprep.mubr.bf16.mxu1 %v18319_v29  ;;  %v18320_v61 = vld [vmem:[#allocation5 + $0x1f0] ss:$48 sps:$4 sm:$0xff]   ;;  %v17371_v25 = vld [vmem:[#allocation5 + $0x268] ss:$48 sps:$4 sm:$0xff]  }
 0x27d   :  { %5776 = vmatprep.mubr.bf16.mxu0 %v17363_v46  ;;  %7062 = vmatpush1.bf16.msra.mxu0 %v17387_v17  ;;  %v17452_v46 = vld [vmem:[#allocation8 + $0xb1c] ss:$24 sps:$4 sm:$0xff]   ;;  %v17435_v29 = vld [vmem:[#allocation8 + $0x250] ss:$24 sps:$4 sm:$0xff]  }
 0x27e   :  { %7063 = vmatprep.subr.bf16.mxu0 %v17401_v12  ;;  %6483 = vmatpush1.bf16.msra.mxu1 %v17432_v50  ;;  %v18321_v17 = vld [vmem:[#allocation5 + $0x254] ss:$48 sps:$4 sm:$0xff]   ;;  %v17450_v50 = vld [vmem:[#allocation8 + $0xb18] ss:$24 sps:$4 sm:$0xff]  }
 0x27f   :  { %6484 = vmatprep.subr.bf16.mxu1 %v17440_v8  ;;  %v17437_v12 = vld [vmem:[#allocation8 + $0x254] ss:$24 sps:$4 sm:$0xff]  }
 0x280   :  { %v17375_v8 = vld [vmem:[#allocation5 + $0x2cc] ss:$48 sps:$4 sm:$0xff]  }
 0x281   :  { %7064 = vmatpush1.bf16.msra.mxu0 %v17399_v10  ;;  %v17458_v10 = vld [vmem:[#allocation8 + $0xb4c] ss:$24 sps:$4 sm:$0xff]  }
 0x282   :  { %7065 = vmatprep.subr.bf16.mxu0 %v17413_v19  ;;  %6485 = vmatpush1.bf16.msra.mxu1 %v17438_v38  ;;  %v17449_v19 = vld [vmem:[#allocation8 + $0x284] ss:$24 sps:$4 sm:$0xff]   ;;  %v17456_v38 = vld [vmem:[#allocation8 + $0xb48] ss:$24 sps:$4 sm:$0xff]  }
 0x283   :  { %6356 = vmatmul.mubr.bf16.gmra.mrb[84].mxu1 %v18320_v61  ;;  %6486 = vmatprep.subr.bf16.mxu1 %v17446_v31  ;;  %v17447_v31 = vld [vmem:[#allocation8 + $0x280] ss:$24 sps:$4 sm:$0xff]  }
 0x284   :  { %5777 = vmatmul.mubr.bf16.gmra.mrb[20].mxu0 %v17365_v32  ;;  %6365 = vmatprep.mubr.bf16.mxu1 %v18321_v17  ;;  %v18322_v32 = vld [vmem:[#allocation5 + $0x250] ss:$48 sps:$4 sm:$0xff]   ;;  %v17377_v61 = vld [vmem:[#allocation5 + $0x2c8] ss:$48 sps:$4 sm:$0xff]  }
 0x285   :  { %5786 = vmatprep.mubr.bf16.mxu0 %v17369_v22  ;;  %7066 = vmatpush1.bf16.msra.mxu0 %v17411_v0  ;;  %v17464_v22 = vld [vmem:[#allocation8 + $0xb7c] ss:$24 sps:$4 sm:$0xff]   ;;  %v17459_v17 = vld [vmem:[#allocation8 + $0x2b0] ss:$24 sps:$4 sm:$0xff]  }
 0x286   :  { %7067 = vmatprep.subr.bf16.mxu0 %v17425_v47  ;;  %6487 = vmatpush1.bf16.msra.mxu1 %v17444_v7  ;;  %v18323_v0 = vld [vmem:[#allocation5 + $0x2b4] ss:$48 sps:$4 sm:$0xff]   ;;  %v17462_v7 = vld [vmem:[#allocation8 + $0xb78] ss:$24 sps:$4 sm:$0xff]  }
 0x287   :  { %6488 = vmatprep.subr.bf16.mxu1 %v17452_v46  ;;  %v17461_v47 = vld [vmem:[#allocation8 + $0x2b4] ss:$24 sps:$4 sm:$0xff]  }
 0x288   :  { %v17381_v46 = vld [vmem:[#allocation5 + $0x32c] ss:$48 sps:$4 sm:$0xff]  }
 0x289   :  { %7068 = vmatpush1.bf16.msra.mxu0 %v17423_v6  ;;  %v17470_v6 = vld [vmem:[#allocation8 + $0xbac] ss:$24 sps:$4 sm:$0xff]  }
 0x28a   :  { %7069 = vmatprep.subr.bf16.mxu0 %v17437_v12  ;;  %6489 = vmatpush1.bf16.msra.mxu1 %v17450_v50  ;;  %v17468_v12 = vld [vmem:[#allocation8 + $0xba8] ss:$24 sps:$4 sm:$0xff]   ;;  %v17473_v50 = vld [vmem:[#allocation8 + $0x2e4] ss:$24 sps:$4 sm:$0xff]  }
 0x28b   :  { %6366 = vmatmul.mubr.bf16.gmra.mrb[88].mxu1 %v18322_v32  ;;  %6490 = vmatprep.subr.bf16.mxu1 %v17458_v10  ;;  %v17471_v10 = vld [vmem:[#allocation8 + $0x2e0] ss:$24 sps:$4 sm:$0xff]  }
 0x28c   :  { %5787 = vmatmul.mubr.bf16.gmra.mrb[24].mxu0 %v17371_v25  ;;  %6375 = vmatprep.mubr.bf16.mxu1 %v18323_v0  ;;  %v18324_v25 = vld [vmem:[#allocation5 + $0x2b0] ss:$48 sps:$4 sm:$0xff]   ;;  %v17383_v32 = vld [vmem:[#allocation5 + $0x328] ss:$48 sps:$4 sm:$0xff]   ;;  %v17503_v0 = vld [vmem:[#allocation8 + $0xc0c] ss:$24 sps:$4 sm:$0xff]  }
 0x28d   :  { %5796 = vmatprep.mubr.bf16.mxu0 %v17375_v8  ;;  %7070 = vmatpush1.bf16.msra.mxu0 %v17435_v29  ;;  %v17476_v8 = vld [vmem:[#allocation8 + $0xbdc] ss:$24 sps:$4 sm:$0xff]  }
 0x28e   :  { %7071 = vmatprep.subr.bf16.mxu0 %v17449_v19  ;;  %6491 = vmatpush1.bf16.msra.mxu1 %v17456_v38  ;;  %v18325_v29 = vld [vmem:[#allocation5 + $0x314] ss:$48 sps:$4 sm:$0xff]   ;;  %v17474_v19 = vld [vmem:[#allocation8 + $0xbd8] ss:$24 sps:$4 sm:$0xff]  }
 0x28f   :  { %6492 = vmatprep.subr.bf16.mxu1 %v17464_v22  ;;  %v17479_v38 = vld [vmem:[#allocation8 + $0x314] ss:$24 sps:$4 sm:$0xff]  }
 0x290   :  { %v17393_v22 = vld [vmem:[#allocation5 + $0x38c] ss:$48 sps:$4 sm:$0xff]  }
 0x291   :  { %7072 = vmatpush1.bf16.msra.mxu0 %v17447_v31  ;;  %v18326_v31 = vld [vmem:[#allocation5 + $0x310] ss:$48 sps:$4 sm:$0xff]  }
 0x292   :  { %7073 = vmatprep.subr.bf16.mxu0 %v17461_v47  ;;  %6493 = vmatpush1.bf16.msra.mxu1 %v17462_v7  ;;  %v18327_v47 = vld [vmem:[#allocation5 + $0x374] ss:$48 sps:$4 sm:$0xff]   ;;  %v17395_v7 = vld [vmem:[#allocation5 + $0x388] ss:$48 sps:$4 sm:$0xff]  }
 0x293   :  { %6376 = vmatmul.mubr.bf16.gmra.mrb[92].mxu1 %v18324_v25  ;;  %6494 = vmatprep.subr.bf16.mxu1 %v17470_v6  ;;  %v17407_v6 = vld [vmem:[#allocation5 + $0x3e8] ss:$48 sps:$4 sm:$0xff]   ;;  %v18331_v25 = vld [vmem:[#allocation5 + $0x434] ss:$48 sps:$4 sm:$0xff]  }
 0x294   :  { %5797 = vmatmul.mubr.bf16.gmra.mrb[28].mxu0 %v17377_v61  ;;  %6385 = vmatprep.mubr.bf16.mxu1 %v18325_v29  ;;  %v17405_v61 = vld [vmem:[#allocation5 + $0x3ec] ss:$48 sps:$4 sm:$0xff]  }
 0x295   :  { %5806 = vmatprep.mubr.bf16.mxu0 %v17381_v46  ;;  %7074 = vmatpush1.bf16.msra.mxu0 %v17459_v17  ;;  %v18328_v46 = vld [vmem:[#allocation5 + $0x370] ss:$48 sps:$4 sm:$0xff]   ;;  %v18329_v17 = vld [vmem:[#allocation5 + $0x3d4] ss:$48 sps:$4 sm:$0xff]   ;;  %v17429_v29 = vld [vmem:[#allocation5 + $0x4ac] ss:$48 sps:$4 sm:$0xff]  }
 0x296   :  { %7075 = vmatprep.subr.bf16.mxu0 %v17473_v50  ;;  %6495 = vmatpush1.bf16.msra.mxu1 %v17468_v12  ;;  %v17417_v12 = vld [vmem:[#allocation5 + $0x44c] ss:$48 sps:$4 sm:$0xff]   ;;  %v18330_v50 = vld [vmem:[#allocation5 + $0x3d0] ss:$48 sps:$4 sm:$0xff]  }
 0x297   :  { %6496 = vmatprep.subr.bf16.mxu1 %v17476_v8  ;;  %v17419_v8 = vld [vmem:[#allocation5 + $0x448] ss:$48 sps:$4 sm:$0xff]  }
 0x299   :  { %7076 = vmatpush1.bf16.msra.mxu0 %v17471_v10  ;;  %v18332_v10 = vld [vmem:[#allocation5 + $0x430] ss:$48 sps:$4 sm:$0xff]  }
 0x29a   :  { %6497 = vmatpush1.bf16.msra.mxu1 %v17474_v19  ;;  %7238 = vmatprep.subr.bf16.mxu0 %v17479_v38  ;;  %v18333_v19 = vld [vmem:[#allocation5 + $0x494] ss:$48 sps:$4 sm:$0xff]   ;;  %v17431_v38 = vld [vmem:[#allocation5 + $0x4a8] ss:$48 sps:$4 sm:$0xff]  }
 0x29b   :  { %6386 = vmatmul.mubr.bf16.gmra.mrb[96].mxu1 %v18326_v31  ;;  %6659 = vmatprep.subr.bf16.mxu1 %v17503_v0  ;;  %v18335_v0 = vld [vmem:[#allocation5 + $0x4f4] ss:$48 sps:$4 sm:$0xff]   ;;  %v17443_v31 = vld [vmem:[#allocation5 + $0x508] ss:$48 sps:$4 sm:$0xff]  }
 0x29c   :  { %5807 = vmatmul.mubr.bf16.gmra.mrb[32].mxu0 %v17383_v32  ;;  %6395 = vmatprep.mubr.bf16.mxu1 %v18327_v47  ;;  %v17441_v32 = vld [vmem:[#allocation5 + $0x50c] ss:$48 sps:$4 sm:$0xff]  }
 0x29d   :  { %5816 = vmatprep.mubr.bf16.mxu0 %v17393_v22  ;;  %v18334_v22 = vld [vmem:[#allocation5 + $0x490] ss:$48 sps:$4 sm:$0xff]   ;;  %v17453_v47 = vld [vmem:[#allocation5 + $0x56c] ss:$48 sps:$4 sm:$0xff]  }
 0x2a3   :  { %6396 = vmatmul.mubr.bf16.gmra.mrb[100].mxu1 %v18328_v46  ;;  %v17455_v46 = vld [vmem:[#allocation5 + $0x568] ss:$48 sps:$4 sm:$0xff]  }
 0x2a4   :  { %5817 = vmatmul.mubr.bf16.gmra.mrb[36].mxu0 %v17395_v7  ;;  %6405 = vmatprep.mubr.bf16.mxu1 %v18329_v17  ;;  %v18336_v7 = vld [vmem:[#allocation5 + $0x4f0] ss:$48 sps:$4 sm:$0xff]   ;;  %v17465_v17 = vld [vmem:[#allocation5 + $0x5cc] ss:$48 sps:$4 sm:$0xff]  }
 0x2a5   :  { %5826 = vmatprep.mubr.bf16.mxu0 %v17405_v61  ;;  %v18337_v61 = vld [vmem:[#allocation5 + $0x554] ss:$48 sps:$4 sm:$0xff]  }
 0x2ab   :  { %6406 = vmatmul.mubr.bf16.gmra.mrb[104].mxu1 %v18330_v50  ;;  %v17467_v50 = vld [vmem:[#allocation5 + $0x5c8] ss:$48 sps:$4 sm:$0xff]  }
 0x2ac   :  { %5827 = vmatmul.mubr.bf16.gmra.mrb[40].mxu0 %v17407_v6  ;;  %6415 = vmatprep.mubr.bf16.mxu1 %v18331_v25  ;;  %v18338_v6 = vld [vmem:[#allocation5 + $0x550] ss:$48 sps:$4 sm:$0xff]  }
 0x2ad   :  { %5836 = vmatprep.mubr.bf16.mxu0 %v17417_v12  ;;  %v18339_v12 = vld [vmem:[#allocation5 + $0x5b4] ss:$48 sps:$4 sm:$0xff]   ;;  %v18340_v25 = vld [vmem:[#allocation5 + $0x5b0] ss:$48 sps:$4 sm:$0xff]  }
 0x2b3   :  { %6416 = vmatmul.mubr.bf16.gmra.mrb[108].mxu1 %v18332_v10  ;;  %v17477_v10 = vld [vmem:[#allocation8 + $0x310] ss:$24 sps:$4 sm:$0xff]  }
 0x2b4   :  { %5837 = vmatmul.mubr.bf16.gmra.mrb[44].mxu0 %v17419_v8  ;;  %6425 = vmatprep.mubr.bf16.mxu1 %v18333_v19  ;;  %v18341_v8 = vld [vmem:[#allocation5 + $0x1c] ss:$48 sps:$4 sm:$0xff]  }
 0x2b5   :  { %5846 = vmatprep.mubr.bf16.mxu0 %v17429_v29  ;;  %v18342_v29 = vld [vmem:[#allocation5 + $0x4] ss:$48 sps:$4 sm:$0xff]  }
 0x2b6   :  { %v17482_v19 = vld [vmem:[#allocation8 + $0x344] ss:$24 sps:$4 sm:$0xff]  }
 0x2bb   :  { %6426 = vmatmul.mubr.bf16.gmra.mrb[112].mxu1 %v18334_v22  ;;  %v18344_v22 = vld [vmem:[#allocation5] ss:$48 sps:$4 sm:$0xff]  }
 0x2bc   :  { %5847 = vmatmul.mubr.bf16.gmra.mrb[48].mxu0 %v17431_v38  ;;  %6435 = vmatprep.mubr.bf16.mxu1 %v18335_v0  ;;  %v17501_v38 = vld [vmem:[#allocation8 + $0xc08] ss:$24 sps:$4 sm:$0xff]   ;;  %v17509_v0 = vld [vmem:[#allocation8 + $0xc3c] ss:$24 sps:$4 sm:$0xff]  }
 0x2bd   :  { %5856 = vmatprep.mubr.bf16.mxu0 %v17441_v32  ;;  %v18343_v32 = vld [vmem:[#allocation5 + $0x18] ss:$48 sps:$4 sm:$0xff]  }
 0x2c3   :  { %6436 = vmatmul.mubr.bf16.gmra.mrb[116].mxu1 %v18336_v7  ;;  %v18346_v7 = vld [vmem:[#allocation5 + $0x64] ss:$48 sps:$4 sm:$0xff]  }
 0x2c4   :  { %5857 = vmatmul.mubr.bf16.gmra.mrb[52].mxu0 %v17443_v31  ;;  %6445 = vmatprep.mubr.bf16.mxu1 %v18337_v61  ;;  %v18345_v31 = vld [vmem:[#allocation5 + $0x7c] ss:$48 sps:$4 sm:$0xff]  }
 0x2c5   :  { %5866 = vmatprep.mubr.bf16.mxu0 %v17453_v47  ;;  %v17480_v47 = vld [vmem:[#allocation8 + $0x340] ss:$24 sps:$4 sm:$0xff]   ;;  %v17485_v61 = vld [vmem:[#allocation8 + $0x374] ss:$24 sps:$4 sm:$0xff]  }
 0x2cb   :  { %6446 = vmatmul.mubr.bf16.gmra.mrb[120].mxu1 %v18338_v6  ;;  %v17512_v6 = vld [vmem:[#allocation8 + $0xc6c] ss:$24 sps:$4 sm:$0xff]  }
 0x2cc   :  { %5867 = vmatmul.mubr.bf16.gmra.mrb[56].mxu0 %v17455_v46  ;;  %6455 = vmatprep.mubr.bf16.mxu1 %v18339_v12  ;;  %v17507_v46 = vld [vmem:[#allocation8 + $0xc38] ss:$24 sps:$4 sm:$0xff]   ;;  %v17488_v12 = vld [vmem:[#allocation8 + $0x3a4] ss:$24 sps:$4 sm:$0xff]  }
 0x2cd   :  { %5876 = vmatprep.mubr.bf16.mxu0 %v17465_v17  ;;  %v17483_v17 = vld [vmem:[#allocation8 + $0x370] ss:$24 sps:$4 sm:$0xff]  }
 0x2d3   :  { %6456 = vmatmul.mubr.bf16.gmra.mrb[124].mxu1 %v18340_v25  ;;  %v18347_v25 = vld [vmem:[#allocation5 + $0x78] ss:$48 sps:$4 sm:$0xff]  }
 0x2d4   :  { %5877 = vmatmul.mubr.bf16.gmra.mrb[60].mxu0 %v17467_v50  ;;  %6498 = vmatprep.mubr.bf16.mxu1 %v18341_v8  ;;  %v17510_v50 = vld [vmem:[#allocation8 + $0xc68] ss:$24 sps:$4 sm:$0xff]  }
 0x2d5   :  { %7077 = vmatprep.mubr.bf16.mxu0 %v18342_v29  ;;  %v18348_v8 = vld [vmem:[#allocation5 + $0x60] ss:$48 sps:$4 sm:$0xff]   ;;  %v17518_v29 = vld [vmem:[#allocation8 + $0xc9c] ss:$24 sps:$4 sm:$0xff]  }
 0x2db   :  { %6499 = vmatmul.mubr.bf16.vlgmr.msra.gmra.mrb[64].mxu1 %v18343_v32  ;;  %v18350_v32 = vld [vmem:[#allocation5 + $0xc4] ss:$48 sps:$4 sm:$0xff]  }
 0x2dc   :  { %7078 = vmatmul.mubr.bf16.vlgmr.msra.gmra.mrb[64].mxu0 %v18344_v22  ;;  %6508 = vmatprep.mubr.bf16.mxu1 %v18345_v31  ;;  %v17516_v22 = vld [vmem:[#allocation8 + $0xc98] ss:$24 sps:$4 sm:$0xff]   ;;  %v17521_v31 = vld [vmem:[#allocation8 + $0xccc] ss:$24 sps:$4 sm:$0xff]  }
 0x2dd   :  { %7239 = vmatpush1.bf16.msra.mxu0 %v17477_v10  ;;  %7087 = vmatprep.mubr.bf16.mxu0 %v18346_v7  ;;  %v18349_v10 = vld [vmem:[#allocation5 + $0xdc] ss:$48 sps:$4 sm:$0xff]   ;;  %v17519_v7 = vld [vmem:[#allocation8 + $0xcc8] ss:$24 sps:$4 sm:$0xff]  }
 0x2de   :  { %7240 = vmatprep.subr.bf16.mxu0 %v17482_v19  ;;  %6660 = vmatpush1.bf16.msra.mxu1 %v17501_v38  ;;  %v17486_v19 = vld [vmem:[#allocation8 + $0x3a0] ss:$24 sps:$4 sm:$0xff]   ;;  %v17491_v38 = vld [vmem:[#allocation8 + $0x3d4] ss:$24 sps:$4 sm:$0xff]  }
 0x2df   :  { %6661 = vmatprep.subr.bf16.mxu1 %v17509_v0  ;;  %v17489_v0 = vld [vmem:[#allocation8 + $0x3d0] ss:$24 sps:$4 sm:$0xff]  }
 0x2e1   :  { %7241 = vmatpush1.bf16.msra.mxu0 %v17480_v47  ;;  %v17494_v47 = vld [vmem:[#allocation8 + $0x404] ss:$24 sps:$4 sm:$0xff]  }
 0x2e2   :  { %7242 = vmatprep.subr.bf16.mxu0 %v17485_v61  ;;  %6662 = vmatpush1.bf16.msra.mxu1 %v17507_v46  ;;  %v18351_v61 = vld [vmem:[#allocation5 + $0xd8] ss:$48 sps:$4 sm:$0xff]   ;;  %v18352_v46 = vld [vmem:[#allocation5 + $0xc0] ss:$48 sps:$4 sm:$0xff]  }
 0x2e3   :  { %6509 = vmatmul.mubr.bf16.gmra.mrb[68].mxu1 %v18347_v25  ;;  %6663 = vmatprep.subr.bf16.mxu1 %v17512_v6  ;;  %v17527_v25 = vld [vmem:[#allocation8 + $0xcfc] ss:$24 sps:$4 sm:$0xff]  }
 0x2e4   :  { %7088 = vmatmul.mubr.bf16.gmra.mrb[68].mxu0 %v18348_v8  ;;  %6518 = vmatprep.mubr.bf16.mxu1 %v18349_v10  ;;  %v18354_v6 = vld [vmem:[#allocation5 + $0x124] ss:$48 sps:$4 sm:$0xff]   ;;  %v17525_v8 = vld [vmem:[#allocation8 + $0xcf8] ss:$24 sps:$4 sm:$0xff]  }
 0x2e5   :  { %7097 = vmatprep.mubr.bf16.mxu0 %v18350_v32  ;;  %7243 = vmatpush1.bf16.msra.mxu0 %v17483_v17  ;;  %v18353_v17 = vld [vmem:[#allocation5 + $0x13c] ss:$48 sps:$4 sm:$0xff]  }
 0x2e6   :  { %7244 = vmatprep.subr.bf16.mxu0 %v17488_v12  ;;  %6664 = vmatpush1.bf16.msra.mxu1 %v17510_v50  ;;  %v17492_v12 = vld [vmem:[#allocation8 + $0x400] ss:$24 sps:$4 sm:$0xff]   ;;  %v17497_v50 = vld [vmem:[#allocation8 + $0x434] ss:$24 sps:$4 sm:$0xff]   ;;  %v17500_v32 = vld [vmem:[#allocation8 + $0x464] ss:$24 sps:$4 sm:$0xff]  }
 0x2e7   :  { %6665 = vmatprep.subr.bf16.mxu1 %v17518_v29  ;;  %v17495_v29 = vld [vmem:[#allocation8 + $0x430] ss:$24 sps:$4 sm:$0xff]   ;;  %v17530_v10 = vld [vmem:[#allocation8 + $0xd2c] ss:$24 sps:$4 sm:$0xff]  }
 0x2e9   :  { %7245 = vmatpush1.bf16.msra.mxu0 %v17486_v19  ;;  %v17528_v19 = vld [vmem:[#allocation8 + $0xd28] ss:$24 sps:$4 sm:$0xff]  }
 0x2ea   :  { %7246 = vmatprep.subr.bf16.mxu0 %v17491_v38  ;;  %6666 = vmatpush1.bf16.msra.mxu1 %v17516_v22  ;;  %v18355_v38 = vld [vmem:[#allocation5 + $0x138] ss:$48 sps:$4 sm:$0xff]   ;;  %v18356_v22 = vld [vmem:[#allocation5 + $0x120] ss:$48 sps:$4 sm:$0xff]  }
 0x2eb   :  { %6519 = vmatmul.mubr.bf16.gmra.mrb[72].mxu1 %v18351_v61  ;;  %6667 = vmatprep.subr.bf16.mxu1 %v17521_v31  ;;  %v17536_v61 = vld [vmem:[#allocation8 + $0xd5c] ss:$24 sps:$4 sm:$0xff]  }
 0x2ec   :  { %7098 = vmatmul.mubr.bf16.gmra.mrb[72].mxu0 %v18352_v46  ;;  %6528 = vmatprep.mubr.bf16.mxu1 %v18353_v17  ;;  %v18358_v31 = vld [vmem:[#allocation5 + $0x184] ss:$48 sps:$4 sm:$0xff]   ;;  %v17534_v46 = vld [vmem:[#allocation8 + $0xd58] ss:$24 sps:$4 sm:$0xff]  }
 0x2ed   :  { %7107 = vmatprep.mubr.bf16.mxu0 %v18354_v6  ;;  %7247 = vmatpush1.bf16.msra.mxu0 %v17489_v0  ;;  %v18357_v0 = vld [vmem:[#allocation5 + $0x19c] ss:$48 sps:$4 sm:$0xff]  }
 0x2ee   :  { %7248 = vmatprep.subr.bf16.mxu0 %v17494_v47  ;;  %6668 = vmatpush1.bf16.msra.mxu1 %v17519_v7  ;;  %v17498_v47 = vld [vmem:[#allocation8 + $0x460] ss:$24 sps:$4 sm:$0xff]   ;;  %v17506_v7 = vld [vmem:[#allocation8 + $0x494] ss:$24 sps:$4 sm:$0xff]   ;;  %v17515_v6 = vld [vmem:[#allocation8 + $0x4c4] ss:$24 sps:$4 sm:$0xff]  }
 0x2ef   :  { %6669 = vmatprep.subr.bf16.mxu1 %v17527_v25  ;;  %v17504_v25 = vld [vmem:[#allocation8 + $0x490] ss:$24 sps:$4 sm:$0xff]   ;;  %v17539_v17 = vld [vmem:[#allocation8 + $0xd8c] ss:$24 sps:$4 sm:$0xff]  }
 0x2f1   :  { %7249 = vmatpush1.bf16.msra.mxu0 %v17492_v12  ;;  %v17537_v12 = vld [vmem:[#allocation8 + $0xd88] ss:$24 sps:$4 sm:$0xff]  }
 0x2f2   :  { %7250 = vmatprep.subr.bf16.mxu0 %v17497_v50  ;;  %6670 = vmatpush1.bf16.msra.mxu1 %v17525_v8  ;;  %v18359_v50 = vld [vmem:[#allocation5 + $0x198] ss:$48 sps:$4 sm:$0xff]   ;;  %v18360_v8 = vld [vmem:[#allocation5 + $0x180] ss:$48 sps:$4 sm:$0xff]  }
 0x2f3   :  { %6529 = vmatmul.mubr.bf16.gmra.mrb[76].mxu1 %v18355_v38  ;;  %6671 = vmatprep.subr.bf16.mxu1 %v17530_v10  ;;  %v17545_v38 = vld [vmem:[#allocation8 + $0xdbc] ss:$24 sps:$4 sm:$0xff]  }
 0x2f4   :  { %7108 = vmatmul.mubr.bf16.gmra.mrb[76].mxu0 %v18356_v22  ;;  %6538 = vmatprep.mubr.bf16.mxu1 %v18357_v0  ;;  %v18362_v10 = vld [vmem:[#allocation5 + $0x1e4] ss:$48 sps:$4 sm:$0xff]   ;;  %v17543_v22 = vld [vmem:[#allocation8 + $0xdb8] ss:$24 sps:$4 sm:$0xff]  }
 0x2f5   :  { %7117 = vmatprep.mubr.bf16.mxu0 %v18358_v31  ;;  %7251 = vmatpush1.bf16.msra.mxu0 %v17495_v29  ;;  %v18361_v29 = vld [vmem:[#allocation5 + $0x1fc] ss:$48 sps:$4 sm:$0xff]  }
 0x2f6   :  { %7252 = vmatprep.subr.bf16.mxu0 %v17500_v32  ;;  %6672 = vmatpush1.bf16.msra.mxu1 %v17528_v19  ;;  %v17513_v32 = vld [vmem:[#allocation8 + $0x4c0] ss:$24 sps:$4 sm:$0xff]   ;;  %v17524_v19 = vld [vmem:[#allocation8 + $0x4f4] ss:$24 sps:$4 sm:$0xff]   ;;  %v17533_v31 = vld [vmem:[#allocation8 + $0x524] ss:$24 sps:$4 sm:$0xff]  }
 0x2f7   :  { %6673 = vmatprep.subr.bf16.mxu1 %v17536_v61  ;;  %v17522_v61 = vld [vmem:[#allocation8 + $0x4f0] ss:$24 sps:$4 sm:$0xff]   ;;  %v17548_v0 = vld [vmem:[#allocation8 + $0xdec] ss:$24 sps:$4 sm:$0xff]  }
 0x2f9   :  { %7253 = vmatpush1.bf16.msra.mxu0 %v17498_v47  ;;  %v17546_v47 = vld [vmem:[#allocation8 + $0xde8] ss:$24 sps:$4 sm:$0xff]  }
 0x2fa   :  { %7254 = vmatprep.subr.bf16.mxu0 %v17506_v7  ;;  %6674 = vmatpush1.bf16.msra.mxu1 %v17534_v46  ;;  %v18363_v7 = vld [vmem:[#allocation5 + $0x1f8] ss:$48 sps:$4 sm:$0xff]   ;;  %v18364_v46 = vld [vmem:[#allocation5 + $0x1e0] ss:$48 sps:$4 sm:$0xff]  }
 0x2fb   :  { %6539 = vmatmul.mubr.bf16.gmra.mrb[80].mxu1 %v18359_v50  ;;  %6675 = vmatprep.subr.bf16.mxu1 %v17539_v17  ;;  %v17554_v50 = vld [vmem:[#allocation8 + $0xe1c] ss:$24 sps:$4 sm:$0xff]  }
 0x2fc   :  { %7118 = vmatmul.mubr.bf16.gmra.mrb[80].mxu0 %v18360_v8  ;;  %6548 = vmatprep.mubr.bf16.mxu1 %v18361_v29  ;;  %v18366_v17 = vld [vmem:[#allocation5 + $0x244] ss:$48 sps:$4 sm:$0xff]   ;;  %v17552_v8 = vld [vmem:[#allocation8 + $0xe18] ss:$24 sps:$4 sm:$0xff]  }
 0x2fd   :  { %7127 = vmatprep.mubr.bf16.mxu0 %v18362_v10  ;;  %7255 = vmatpush1.bf16.msra.mxu0 %v17504_v25  ;;  %v18365_v25 = vld [vmem:[#allocation5 + $0x25c] ss:$48 sps:$4 sm:$0xff]  }
 0x2fe   :  { %7256 = vmatprep.subr.bf16.mxu0 %v17515_v6  ;;  %6676 = vmatpush1.bf16.msra.mxu1 %v17537_v12  ;;  %v17531_v6 = vld [vmem:[#allocation8 + $0x520] ss:$24 sps:$4 sm:$0xff]   ;;  %v17542_v12 = vld [vmem:[#allocation8 + $0x554] ss:$24 sps:$4 sm:$0xff]   ;;  %v17551_v10 = vld [vmem:[#allocation8 + $0x584] ss:$24 sps:$4 sm:$0xff]  }
 0x2ff   :  { %6677 = vmatprep.subr.bf16.mxu1 %v17545_v38  ;;  %v17540_v38 = vld [vmem:[#allocation8 + $0x550] ss:$24 sps:$4 sm:$0xff]   ;;  %v17557_v29 = vld [vmem:[#allocation8 + $0xe4c] ss:$24 sps:$4 sm:$0xff]  }
 0x301   :  { %7257 = vmatpush1.bf16.msra.mxu0 %v17513_v32  ;;  %v17555_v32 = vld [vmem:[#allocation8 + $0xe48] ss:$24 sps:$4 sm:$0xff]  }
 0x302   :  { %7258 = vmatprep.subr.bf16.mxu0 %v17524_v19  ;;  %6678 = vmatpush1.bf16.msra.mxu1 %v17543_v22  ;;  %v18367_v19 = vld [vmem:[#allocation5 + $0x258] ss:$48 sps:$4 sm:$0xff]   ;;  %v18368_v22 = vld [vmem:[#allocation5 + $0x240] ss:$48 sps:$4 sm:$0xff]  }
 0x303   :  { %6549 = vmatmul.mubr.bf16.gmra.mrb[84].mxu1 %v18363_v7  ;;  %6679 = vmatprep.subr.bf16.mxu1 %v17548_v0  ;;  %v17563_v7 = vld [vmem:[#allocation8 + $0xe7c] ss:$24 sps:$4 sm:$0xff]  }
 0x304   :  { %7128 = vmatmul.mubr.bf16.gmra.mrb[84].mxu0 %v18364_v46  ;;  %6558 = vmatprep.mubr.bf16.mxu1 %v18365_v25  ;;  %v18370_v0 = vld [vmem:[#allocation5 + $0x2a4] ss:$48 sps:$4 sm:$0xff]   ;;  %v17561_v46 = vld [vmem:[#allocation8 + $0xe78] ss:$24 sps:$4 sm:$0xff]  }
 0x305   :  { %7137 = vmatprep.mubr.bf16.mxu0 %v18366_v17  ;;  %7259 = vmatpush1.bf16.msra.mxu0 %v17522_v61  ;;  %v18369_v61 = vld [vmem:[#allocation5 + $0x2bc] ss:$48 sps:$4 sm:$0xff]   ;;  %v17564_v17 = vld [vmem:[#allocation8 + $0xea8] ss:$24 sps:$4 sm:$0xff]  }
 0x306   :  { %7260 = vmatprep.subr.bf16.mxu0 %v17533_v31  ;;  %6680 = vmatpush1.bf16.msra.mxu1 %v17546_v47  ;;  %v17549_v31 = vld [vmem:[#allocation8 + $0x580] ss:$24 sps:$4 sm:$0xff]   ;;  %v17560_v47 = vld [vmem:[#allocation8 + $0x5b4] ss:$24 sps:$4 sm:$0xff]  }
 0x307   :  { %6681 = vmatprep.subr.bf16.mxu1 %v17554_v50  ;;  %v17558_v50 = vld [vmem:[#allocation8 + $0x5b0] ss:$24 sps:$4 sm:$0xff]   ;;  %v17566_v25 = vld [vmem:[#allocation8 + $0xeac] ss:$24 sps:$4 sm:$0xff]  }
 0x309   :  { %7261 = vmatpush1.bf16.msra.mxu0 %v17531_v6  ;;  %v17569_v6 = vld [vmem:[#allocation8 + $0x5e4] ss:$24 sps:$4 sm:$0xff]  }
 0x30a   :  { %7262 = vmatprep.subr.bf16.mxu0 %v17542_v12  ;;  %6682 = vmatpush1.bf16.msra.mxu1 %v17552_v8  ;;  %v18371_v12 = vld [vmem:[#allocation5 + $0x2b8] ss:$48 sps:$4 sm:$0xff]   ;;  %v18372_v8 = vld [vmem:[#allocation5 + $0x2a0] ss:$48 sps:$4 sm:$0xff]  }
 0x30b   :  { %6559 = vmatmul.mubr.bf16.gmra.mrb[88].mxu1 %v18367_v19  ;;  %6683 = vmatprep.subr.bf16.mxu1 %v17557_v29  ;;  %v17572_v19 = vld [vmem:[#allocation8 + $0xedc] ss:$24 sps:$4 sm:$0xff]  }
 0x30c   :  { %7138 = vmatmul.mubr.bf16.gmra.mrb[88].mxu0 %v18368_v22  ;;  %6568 = vmatprep.mubr.bf16.mxu1 %v18369_v61  ;;  %v18374_v29 = vld [vmem:[#allocation5 + $0x304] ss:$48 sps:$4 sm:$0xff]   ;;  %v18375_v61 = vld [vmem:[#allocation5 + $0x318] ss:$48 sps:$4 sm:$0xff]  }
 0x30d   :  { %7147 = vmatprep.mubr.bf16.mxu0 %v18370_v0  ;;  %7263 = vmatpush1.bf16.msra.mxu0 %v17540_v38  ;;  %v18373_v38 = vld [vmem:[#allocation5 + $0x31c] ss:$48 sps:$4 sm:$0xff]   ;;  %v18376_v0 = vld [vmem:[#allocation5 + $0x300] ss:$48 sps:$4 sm:$0xff]  }
 0x30e   :  { %7264 = vmatprep.subr.bf16.mxu0 %v17551_v10  ;;  %6684 = vmatpush1.bf16.msra.mxu1 %v17555_v32  ;;  %v17567_v10 = vld [vmem:[#allocation8 + $0x5e0] ss:$24 sps:$4 sm:$0xff]   ;;  %v17575_v22 = vld [vmem:[#allocation8 + $0x614] ss:$24 sps:$4 sm:$0xff]  }
 0x30f   :  { %6685 = vmatprep.subr.bf16.mxu1 %v17563_v7  ;;  %v17570_v32 = vld [vmem:[#allocation8 + $0xed8] ss:$24 sps:$4 sm:$0xff]   ;;  %v17599_v7 = vld [vmem:[#allocation8 + $0xf0c] ss:$24 sps:$4 sm:$0xff]  }
 0x311   :  { %7265 = vmatpush1.bf16.msra.mxu0 %v17549_v31  ;;  %v18377_v31 = vld [vmem:[#allocation5 + $0x37c] ss:$48 sps:$4 sm:$0xff]  }
 0x312   :  { %7266 = vmatprep.subr.bf16.mxu0 %v17560_v47  ;;  %6686 = vmatpush1.bf16.msra.mxu1 %v17561_v46  ;;  %v18378_v47 = vld [vmem:[#allocation5 + $0x364] ss:$48 sps:$4 sm:$0xff]   ;;  %v859_v46 = vlaneseq }
 0x313   :  { %6569 = vmatmul.mubr.bf16.gmra.mrb[92].mxu1 %v18371_v12  ;;  %6687 = vmatprep.subr.bf16.mxu1 %v17566_v25  ;;  %v18379_v25 = vld [vmem:[#allocation5 + $0x378] ss:$48 sps:$4 sm:$0xff]   ;;  %v18382_v12 = vld [vmem:[#allocation5 + $0x3c4] ss:$48 sps:$4 sm:$0xff]  }
 0x314   :  { %7148 = vmatmul.mubr.bf16.gmra.mrb[92].mxu0 %v18372_v8  ;;  %6578 = vmatprep.mubr.bf16.mxu1 %v18373_v38 }
 0x315   :  { %7157 = vmatprep.mubr.bf16.mxu0 %v18374_v29  ;;  %7267 = vmatpush1.bf16.msra.mxu0 %v17558_v50  ;;  %v19144_v50 = vshrl.u32 %v859_v46, 7  ;;  %v19163_v46 = vstv %s20618_s0 }
 0x316   :  { %7268 = vmatprep.subr.bf16.mxu0 %v17569_v6  ;;  %6688 = vmatpush1.bf16.msra.mxu1 %v17564_v17  ;;  %v18380_v17 = vld [vmem:[#allocation5 + $0x360] ss:$48 sps:$4 sm:$0xff]   ;;  %v18381_v6 = vld [vmem:[#allocation5 + $0x3dc] ss:$48 sps:$4 sm:$0xff]  }
 0x317   :  { %6689 = vmatprep.subr.bf16.mxu1 %v17572_v19  ;;  %20750 = vst [vmem:[#allocation38_spill] sm:$0xff] %v19144_v50  ;;  %v20627_v8 = vsub.s32 0, %v19144_v50  ;;  %v857_v19 = vld [vmem:[#allocation10] sm:$0x3f]  ;;  %v20626_v38 = vsub.s32 1, %v19144_v50 }
 0x319   :  { %7269 = vmatpush1.bf16.msra.mxu0 %v17567_v10  ;;  %v19150_v29 = vrot.slane %v857_v19, %v20627_v8  ;;  %v19154_v10 = vrot.slane %v857_v19, %v20626_v38 }
 0x31a   :  { %6690 = vmatpush1.bf16.msra.mxu1 %v17570_v32  ;;  %7431 = vmatprep.subr.bf16.mxu0 %v17575_v22  ;;  %v18383_v32 = vld [vmem:[#allocation5 + $0x3d8] ss:$48 sps:$4 sm:$0xff]   ;;  %v18384_v22 = vld [vmem:[#allocation5 + $0x3c0] ss:$48 sps:$4 sm:$0xff]  }
 0x31b   :  { %6579 = vmatmul.mubr.bf16.gmra.mrb[96].mxu1 %v18375_v61  ;;  %6852 = vmatprep.subr.bf16.mxu1 %v17599_v7  ;;  %v18385_v7 = vld [vmem:[#allocation5 + $0x43c] ss:$48 sps:$4 sm:$0xff]   ;;  %v18386_v61 = vld [vmem:[#allocation5 + $0x424] ss:$48 sps:$4 sm:$0xff]  }
 0x31c   :  { %7158 = vmatmul.mubr.bf16.gmra.mrb[96].mxu0 %v18376_v0  ;;  %6588 = vmatprep.mubr.bf16.mxu1 %v18377_v31  ;;  %v4764_v0 = vadd.f32 %v19016_v24, %v19150_v29  ;;  %v4766_v31 = vadd.f32 %v19018_v26, %v19154_v10 }
 0x31d   :  { %7167 = vmatprep.mubr.bf16.mxu0 %v18378_v47 }
 0x323   :  { %6589 = vmatmul.mubr.bf16.gmra.mrb[100].mxu1 %v18379_v25  ;;  %v4768_v25 = vadd.f32 %v19020_v30, %v19150_v29  ;;  %v18387_v30 = vld [vmem:[#allocation5 + $0x438] ss:$48 sps:$4 sm:$0xff]  }
 0x324   :  { %7168 = vmatmul.mubr.bf16.gmra.mrb[100].mxu0 %v18380_v17  ;;  %6598 = vmatprep.mubr.bf16.mxu1 %v18381_v6 }
 0x325   :  { %7177 = vmatprep.mubr.bf16.mxu0 %v18382_v12  ;;  %v4770_v12 = vadd.f32 %v19022_v39, %v19154_v10 }
 0x32b   :  { %6599 = vmatmul.mubr.bf16.gmra.mrb[104].mxu1 %v18383_v32 }
 0x32c   :  { %7178 = vmatmul.mubr.bf16.gmra.mrb[104].mxu0 %v18384_v22  ;;  %6608 = vmatprep.mubr.bf16.mxu1 %v18385_v7 }
 0x32d   :  { %7187 = vmatprep.mubr.bf16.mxu0 %v18386_v61 }
 0x32f   :  { %v5728_v47 = vpop.f32.mrb[0].mxu0 }
 0x330   :  { %v14924_v17 = vadd.f32 %v5728_v47, %v4764_v0  ;;  %v5730_v6 = vpop.f32.mrb[1].mxu0  ;;  %v18388_v0 = vld [vmem:[#allocation5 + $0x420] ss:$48 sps:$4 sm:$0xff]   ;;  %v18390_v47 = vld [vmem:[#allocation5 + $0x484] ss:$48 sps:$4 sm:$0xff]  }
 0x331   :  { %v14926_v19 = vadd.f32 %v5730_v6, %v4766_v31  ;;  %v5732_v32 = vpop.f32.mrb[2].mxu0  ;;  %v18389_v31 = vld [vmem:[#allocation5 + $0x49c] ss:$48 sps:$4 sm:$0xff]  }
 0x332   :  { %v8397_v24 = vmul.f32 %v14924_v17, %v19163_v46  ;;  %v14928_v22 = vadd.f32 %v5732_v32, %v4768_v25  ;;  %v5734_v26 = vpop.f32.mrb[3].mxu0  ;;  %vm8203_vm0 = vcmp.gt.f32.partialorder %v14924_v17, 0.0  ;;  %v4774_v25 = vadd.f32 %v19024_v41, %v19150_v29 }
 0x333   :  { %v8398_v7 = vmul.f32 %v14926_v19, %v19163_v46  ;;  %v14930_v61 = vadd.f32 %v5734_v26, %v4770_v12  ;;  %vm8204_vm1 = vcmp.gt.f32.partialorder %v14926_v19, 0.0  ;;  %6609 = vmatmul.mubr.bf16.gmra.mrb[108].mxu1 %v18387_v30  ;;  %v4776_v32 = vadd.f32 %v19026_v43, %v19154_v10 }
 0x334   :  { %vm8209_vm2 = vcmp.gt.f32.partialorder %v14928_v22, 0.0  ;;  %v8403_v38 = vmul.f32 %v14928_v22, %v19163_v46  ;;  %7188 = vmatmul.mubr.bf16.gmra.mrb[108].mxu0 %v18388_v0  ;;  %6618 = vmatprep.mubr.bf16.mxu1 %v18389_v31  ;;  %v8589_v6 = vsel %vm8203_vm0, %v14924_v17, %v8397_v24  ;;  %v4778_v31 = vadd.f32 %v19028_v36, %v19150_v29 }
 0x335   :  { %vm8210_vm3 = vcmp.gt.f32.partialorder %v14930_v61, 0.0  ;;  %v8404_v39 = vmul.f32 %v14930_v61, %v19163_v46  ;;  %7197 = vmatprep.mubr.bf16.mxu0 %v18390_v47  ;;  %v8590_v0 = vsel %vm8204_vm1, %v14926_v19, %v8398_v7  ;;  %v4780_v41 = vadd.f32 %v19030_v45, %v19154_v10 }
 0x336   :  { %v8595_v12 = vsel %vm8209_vm2, %v14928_v22, %v8403_v38 }
 0x337   :  { %v19178_v26 = vpack.c.bf16 %v8595_v12, %v8589_v6  ;;  %v5738_v30 = vpop.f32.mrb[4].mxu0  ;;  %v8596_v8 = vsel %vm8210_vm3, %v14930_v61, %v8404_v39  ;;  %v18391_v61 = vld [vmem:[#allocation5 + $0x498] ss:$48 sps:$4 sm:$0xff]   ;;  %v18393_v39 = vld [vmem:[#allocation5 + $0x4fc] ss:$48 sps:$4 sm:$0xff]   ;;  %v4784_v6 = vadd.f32 %v19032_v51, %v19150_v29  ;;  %v4790_v51 = vadd.f32 %v19038_v11, %v19154_v10 }
 0x338   :  { %v14932_v50 = vadd.f32 %v5738_v30, %v4774_v25  ;;  %v5740_v47 = vpop.f32.mrb[5].mxu0  ;;  %v19183_v15 = vpack.c.bf16 %v8596_v8, %v8590_v0  ;;  %v18392_v8 = vld [vmem:[#allocation5 + $0x480] ss:$48 sps:$4 sm:$0xff]   ;;  %v18394_v25 = vld [vmem:[#allocation5 + $0x4e4] ss:$48 sps:$4 sm:$0xff]   ;;  %v4786_v30 = vadd.f32 %v19034_v55, %v19154_v10 }
 0x339   :  { %v14934_v38 = vadd.f32 %v5740_v47, %v4776_v32  ;;  %v5742_v17 = vpop.f32.mrb[6].mxu0 }
 0x33a   :  { %v8409_v43 = vmul.f32 %v14932_v50, %v19163_v46  ;;  %v14936_v24 = vadd.f32 %v5742_v17, %v4778_v31  ;;  %v5744_v22 = vpop.f32.mrb[7].mxu0  ;;  %vm8215_vm4 = vcmp.gt.f32.partialorder %v14932_v50, 0.0  ;;  %v4788_v17 = vadd.f32 %v19036_v9, %v19150_v29 }
 0x33b   :  { %v8410_v19 = vmul.f32 %v14934_v38, %v19163_v46  ;;  %v14938_v7 = vadd.f32 %v5744_v22, %v4780_v41  ;;  %vm8216_vm5 = vcmp.gt.f32.partialorder %v14934_v38, 0.0  ;;  %6619 = vmatmul.mubr.bf16.gmra.mrb[112].mxu1 %v18391_v61 }
 0x33c   :  { %vm8221_vm6 = vcmp.gt.f32.partialorder %v14936_v24, 0.0  ;;  %v8415_v36 = vmul.f32 %v14936_v24, %v19163_v46  ;;  %7198 = vmatmul.mubr.bf16.gmra.mrb[112].mxu0 %v18392_v8  ;;  %6628 = vmatprep.mubr.bf16.mxu1 %v18393_v39  ;;  %v8601_v12 = vsel %vm8215_vm4, %v14932_v50, %v8409_v43  ;;  %v18397_v39 = vld [vmem:[#allocation5 + $0x55c] ss:$48 sps:$4 sm:$0xff]  }
 0x33d   :  { %vm8222_vm7 = vcmp.gt.f32.partialorder %v14938_v7, 0.0  ;;  %v8416_v45 = vmul.f32 %v14938_v7, %v19163_v46  ;;  %7207 = vmatprep.mubr.bf16.mxu0 %v18394_v25  ;;  %v8602_v31 = vsel %vm8216_vm5, %v14934_v38, %v8410_v19  ;;  %v18398_v25 = vld [vmem:[#allocation5 + $0x544] ss:$48 sps:$4 sm:$0xff]  }
 0x33e   :  { %v8607_v32 = vsel %vm8221_vm6, %v14936_v24, %v8415_v36 }
 0x33f   :  { %v5748_v0 = vpop.f32.mrb[8].mxu0  ;;  %v8608_v47 = vsel %vm8222_vm7, %v14938_v7, %v8416_v45  ;;  %v19197_v41 = vpack.c.bf16 %v8607_v32, %v8601_v12  ;;  %v18395_v7 = vld [vmem:[#allocation5 + $0x4f8] ss:$48 sps:$4 sm:$0xff]   ;;  %v18396_v45 = vld [vmem:[#allocation5 + $0x4e0] ss:$48 sps:$4 sm:$0xff]  }
 0x340   :  { %v14940_v22 = vadd.f32 %v5748_v0, %v4784_v6  ;;  %v5750_v61 = vpop.f32.mrb[9].mxu0  ;;  %v19201_v8 = vpack.c.bf16 %v8608_v47, %v8602_v31  ;;  %v4794_v6 = vadd.f32 %v19040_v13, %v19150_v29  ;;  %v4800_v13 = vadd.f32 %v19046_v21, %v19154_v10 }
 0x341   :  { %v14942_v50 = vadd.f32 %v5750_v61, %v4786_v30  ;;  %v5752_v43 = vpop.f32.mrb[10].mxu0  ;;  %v4796_v30 = vadd.f32 %v19042_v56, %v19154_v10  ;;  %v4798_v61 = vadd.f32 %v19044_v60, %v19150_v29 }
 0x342   :  { %v8421_v55 = vmul.f32 %v14940_v22, %v19163_v46  ;;  %v14944_v24 = vadd.f32 %v5752_v43, %v4788_v17  ;;  %v5754_v36 = vpop.f32.mrb[11].mxu0  ;;  %vm8227_vm8 = vcmp.gt.f32.partialorder %v14940_v22, 0.0 }
 0x343   :  { %v8422_v38 = vmul.f32 %v14942_v50, %v19163_v46  ;;  %v14946_v19 = vadd.f32 %v5754_v36, %v4790_v51  ;;  %vm8228_vm9 = vcmp.gt.f32.partialorder %v14942_v50, 0.0  ;;  %6629 = vmatmul.mubr.bf16.gmra.mrb[116].mxu1 %v18395_v7  ;;  %v18400_v7 = vld [vmem:[#allocation5 + $0x540] ss:$48 sps:$4 sm:$0xff]  }
 0x344   :  { %vm8233_vm10 = vcmp.gt.f32.partialorder %v14944_v24, 0.0  ;;  %v8427_v9 = vmul.f32 %v14944_v24, %v19163_v46  ;;  %7208 = vmatmul.mubr.bf16.gmra.mrb[116].mxu0 %v18396_v45  ;;  %6638 = vmatprep.mubr.bf16.mxu1 %v18397_v39  ;;  %v8613_v12 = vsel %vm8227_vm8, %v14940_v22, %v8421_v55  ;;  %v18401_v45 = vld [vmem:[#allocation5 + $0x5bc] ss:$48 sps:$4 sm:$0xff]   ;;  %v4804_v39 = vadd.f32 %v19048_v4, %v19150_v29 }
 0x345   :  { %vm8234_vm11 = vcmp.gt.f32.partialorder %v14946_v19, 0.0  ;;  %v8428_v11 = vmul.f32 %v14946_v19, %v19163_v46  ;;  %7217 = vmatprep.mubr.bf16.mxu0 %v18398_v25  ;;  %v8614_v31 = vsel %vm8228_vm9, %v14942_v50, %v8422_v38  ;;  %v4810_v4 = vadd.f32 %v19054_v33, %v19154_v10 }
 0x346   :  { %v8619_v32 = vsel %vm8233_vm10, %v14944_v24, %v8427_v9 }
 0x347   :  { %v5758_v0 = vpop.f32.mrb[12].mxu0  ;;  %v8620_v47 = vsel %vm8234_vm11, %v14946_v19, %v8428_v11  ;;  %v19215_v17 = vpack.c.bf16 %v8619_v32, %v8613_v12  ;;  %v18399_v19 = vld [vmem:[#allocation5 + $0x558] ss:$48 sps:$4 sm:$0xff]   ;;  %v18402_v11 = vld [vmem:[#allocation5 + $0x5a4] ss:$48 sps:$4 sm:$0xff]   ;;  %v4806_v12 = vadd.f32 %v19050_v14, %v19154_v10 }
 0x348   :  { %v14948_v51 = vadd.f32 %v5758_v0, %v4794_v6  ;;  %v5760_v43 = vpop.f32.mrb[13].mxu0  ;;  %v19219_v36 = vpack.c.bf16 %v8620_v47, %v8614_v31  ;;  %v4808_v47 = vadd.f32 %v19052_v18, %v19150_v29 }
 0x349   :  { %v14950_v22 = vadd.f32 %v5760_v43, %v4796_v30  ;;  %v5762_v55 = vpop.f32.mrb[14].mxu0 }
 0x34a   :  { %v8433_v56 = vmul.f32 %v14948_v51, %v19163_v46  ;;  %v14952_v24 = vadd.f32 %v5762_v55, %v4798_v61  ;;  %v5764_v9 = vpop.f32.mrb[15].mxu0  ;;  %vm8239_vm12 = vcmp.gt.f32.partialorder %v14948_v51, 0.0 }
 0x34b   :  { %v8434_v50 = vmul.f32 %v14950_v22, %v19163_v46  ;;  %v14954_v38 = vadd.f32 %v5764_v9, %v4800_v13  ;;  %vm8240_vm13 = vcmp.gt.f32.partialorder %v14950_v22, 0.0  ;;  %6639 = vmatmul.mubr.bf16.gmra.mrb[120].mxu1 %v18399_v19  ;;  %v18406_v19 = vld [vmem:[#allocation5 + $0xc] ss:$48 sps:$4 sm:$0xff]  }
 0x34c   :  { %vm8245_vm14 = vcmp.gt.f32.partialorder %v14952_v24, 0.0  ;;  %v8439_v60 = vmul.f32 %v14952_v24, %v19163_v46  ;;  %7218 = vmatmul.mubr.bf16.gmra.mrb[120].mxu0 %v18400_v7  ;;  %6648 = vmatprep.mubr.bf16.mxu1 %v18401_v45  ;;  %v8625_v25 = vsel %vm8239_vm12, %v14948_v51, %v8433_v56  ;;  %v4814_v7 = vadd.f32 %v19056_v35, %v19150_v29 }
 0x34d   :  { %vm8246_vm15 = vcmp.gt.f32.partialorder %v14954_v38, 0.0  ;;  %v8440_v21 = vmul.f32 %v14954_v38, %v19163_v46  ;;  %7227 = vmatprep.mubr.bf16.mxu0 %v18402_v11  ;;  %v8626_v30 = vsel %vm8240_vm13, %v14950_v22, %v8434_v50  ;;  %v18403_v50 = vld [vmem:[#allocation5 + $0x5b8] ss:$48 sps:$4 sm:$0xff]   ;;  %v4816_v11 = vadd.f32 %v19058_v5, %v19154_v10 }
 0x34e   :  { %v8631_v6 = vsel %vm8245_vm14, %v14952_v24, %v8439_v60  ;;  %v18405_v60 = vld [vmem:[#allocation5 + $0x24] ss:$48 sps:$4 sm:$0xff]   ;;  %v4820_v35 = vadd.f32 %v19062_v44, %v19154_v10  ;;  %v18408_v44 = vld [vmem:[#allocation5 + $0x8] ss:$48 sps:$4 sm:$0xff]  }
 0x34f   :  { %v5768_v32 = vpop.f32.mrb[16].mxu0  ;;  %v8632_v0 = vsel %vm8246_vm15, %v14954_v38, %v8440_v21  ;;  %v19233_v31 = vpack.c.bf16 %v8631_v6, %v8625_v25  ;;  %v18404_v38 = vld [vmem:[#allocation5 + $0x5a0] ss:$48 sps:$4 sm:$0xff]  }
 0x350   :  { %v14956_v61 = vadd.f32 %v5768_v32, %v4804_v39  ;;  %v5770_v43 = vpop.f32.mrb[17].mxu0  ;;  %v19237_v13 = vpack.c.bf16 %v8632_v0, %v8626_v30  ;;  %v4818_v32 = vadd.f32 %v19060_v42, %v19150_v29  ;;  %v17597_v42 = vld [vmem:[#allocation8 + $0xf08] ss:$24 sps:$4 sm:$0xff]  }
 0x351   :  { %v14958_v51 = vadd.f32 %v5770_v43, %v4806_v12  ;;  %v5772_v55 = vpop.f32.mrb[18].mxu0 }
 0x352   :  { %v8445_v14 = vmul.f32 %v14956_v61, %v19163_v46  ;;  %v14960_v56 = vadd.f32 %v5772_v55, %v4808_v47  ;;  %v5774_v24 = vpop.f32.mrb[19].mxu0  ;;  %vm8251_vm0 = vcmp.gt.f32.partialorder %v14956_v61, 0.0 }
 0x353   :  { %v8446_v22 = vmul.f32 %v14958_v51, %v19163_v46  ;;  %v14962_v9 = vadd.f32 %v5774_v24, %v4810_v4  ;;  %vm8252_vm1 = vcmp.gt.f32.partialorder %v14958_v51, 0.0  ;;  %6649 = vmatmul.mubr.bf16.gmra.mrb[124].mxu1 %v18403_v50  ;;  %v17573_v4 = vld [vmem:[#allocation8 + $0x610] ss:$24 sps:$4 sm:$0xff]  }
 0x354   :  { %vm8257_vm2 = vcmp.gt.f32.partialorder %v14960_v56, 0.0  ;;  %v8451_v18 = vmul.f32 %v14960_v56, %v19163_v46  ;;  %7228 = vmatmul.mubr.bf16.gmra.mrb[124].mxu0 %v18404_v38  ;;  %6691 = vmatprep.mubr.bf16.mxu1 %v18405_v60  ;;  %v8637_v21 = vsel %vm8251_vm0, %v14956_v61, %v8445_v14  ;;  %v17578_v14 = vld [vmem:[#allocation8 + $0x644] ss:$24 sps:$4 sm:$0xff]   ;;  %v4824_v60 = vadd.f32 %v19064_v57, %v19150_v29 }
 0x355   :  { %vm8258_vm3 = vcmp.gt.f32.partialorder %v14962_v9, 0.0  ;;  %v8452_v33 = vmul.f32 %v14962_v9, %v19163_v46  ;;  %7270 = vmatprep.mubr.bf16.mxu0 %v18406_v19  ;;  %v8638_v25 = vsel %vm8252_vm1, %v14958_v51, %v8446_v22  ;;  %v18409_v38 = vld [vmem:[#allocation5 + $0x84] ss:$48 sps:$4 sm:$0xff]   ;;  %v18410_v19 = vld [vmem:[#allocation5 + $0x6c] ss:$48 sps:$4 sm:$0xff]   ;;  %v4828_v57 = vadd.f32 %v19068_v58, %v19150_v29 }
 0x356   :  { %v8643_v45 = vsel %vm8257_vm2, %v14960_v56, %v8451_v18  ;;  %v17605_v18 = vld [vmem:[#allocation8 + $0xf3c] ss:$24 sps:$4 sm:$0xff]  }
 0x357   :  { %v5778_v39 = vpop.f32.mrb[20].mxu0  ;;  %v8644_v6 = vsel %vm8258_vm3, %v14962_v9, %v8452_v33  ;;  %v19251_v12 = vpack.c.bf16 %v8643_v45, %v8637_v21  ;;  %v18407_v9 = vld [vmem:[#allocation5 + $0x20] ss:$48 sps:$4 sm:$0xff]  }
 0x358   :  { %v14964_v30 = vadd.f32 %v5778_v39, %v4814_v7  ;;  %v5780_v0 = vpop.f32.mrb[21].mxu0  ;;  %v19255_v47 = vpack.c.bf16 %v8644_v6, %v8638_v25  ;;  %v17576_v33 = vld [vmem:[#allocation8 + $0x640] ss:$24 sps:$4 sm:$0xff]   ;;  %v17581_v7 = vld [vmem:[#allocation8 + $0x674] ss:$24 sps:$4 sm:$0xff]  }
 0x359   :  { %v14966_v61 = vadd.f32 %v5780_v0, %v4816_v11  ;;  %v5782_v43 = vpop.f32.mrb[22].mxu0  ;;  %v4826_v11 = vadd.f32 %v19066_v2, %v19154_v10  ;;  %v17603_v25 = vld [vmem:[#allocation8 + $0xf38] ss:$24 sps:$4 sm:$0xff]   ;;  %v4830_v2 = vadd.f32 %v19070_v62, %v19154_v10 }
 0x35a   :  { %v8457_v5 = vmul.f32 %v14964_v30, %v19163_v46  ;;  %v14968_v55 = vadd.f32 %v5782_v43, %v4818_v32  ;;  %v5784_v51 = vpop.f32.mrb[23].mxu0  ;;  %vm8263_vm4 = vcmp.gt.f32.partialorder %v14964_v30, 0.0 }
 0x35b   :  { %v8458_v56 = vmul.f32 %v14966_v61, %v19163_v46  ;;  %v14970_v24 = vadd.f32 %v5784_v51, %v4820_v35  ;;  %vm8264_vm5 = vcmp.gt.f32.partialorder %v14966_v61, 0.0  ;;  %6692 = vmatmul.mubr.bf16.vlgmr.msra.gmra.mrb[64].mxu1 %v18407_v9  ;;  %v18411_v9 = vld [vmem:[#allocation5 + $0x80] ss:$48 sps:$4 sm:$0xff]  }
 0x35c   :  { %vm8269_vm6 = vcmp.gt.f32.partialorder %v14968_v55, 0.0  ;;  %v8463_v22 = vmul.f32 %v14968_v55, %v19163_v46  ;;  %7271 = vmatmul.mubr.bf16.vlgmr.msra.gmra.mrb[64].mxu0 %v18408_v44  ;;  %6701 = vmatprep.mubr.bf16.mxu1 %v18409_v38  ;;  %v8649_v21 = vsel %vm8263_vm4, %v14964_v30, %v8457_v5  ;;  %v18412_v44 = vld [vmem:[#allocation5 + $0x68] ss:$48 sps:$4 sm:$0xff]  }
 0x35d   :  { %vm8270_vm7 = vcmp.gt.f32.partialorder %v14970_v24, 0.0  ;;  %v8464_v50 = vmul.f32 %v14970_v24, %v19163_v46  ;;  %7432 = vmatpush1.bf16.msra.mxu0 %v17573_v4  ;;  %7280 = vmatprep.mubr.bf16.mxu0 %v18410_v19  ;;  %v8650_v6 = vsel %vm8264_vm5, %v14966_v61, %v8458_v56  ;;  %v17608_v56 = vld [vmem:[#allocation8 + $0xf6c] ss:$24 sps:$4 sm:$0xff]   ;;  %v4836_v19 = vadd.f32 %v19074_v16, %v19154_v10 }
 0x35e   :  { %7433 = vmatprep.subr.bf16.mxu0 %v17578_v14  ;;  %v8655_v45 = vsel %vm8269_vm6, %v14968_v55, %v8463_v22  ;;  %6853 = vmatpush1.bf16.msra.mxu1 %v17597_v42  ;;  %v17579_v14 = vld [vmem:[#allocation8 + $0x670] ss:$24 sps:$4 sm:$0xff]   ;;  %v17584_v42 = vld [vmem:[#allocation8 + $0x6a4] ss:$24 sps:$4 sm:$0xff]   ;;  %v4838_v16 = vadd.f32 %v19076_v37, %v19150_v29 }
 0x35f   :  { %v5788_v39 = vpop.f32.mrb[24].mxu0  ;;  %v8656_v32 = vsel %vm8270_vm7, %v14970_v24, %v8464_v50  ;;  %v19271_v0 = vpack.c.bf16 %v8655_v45, %v8649_v21  ;;  %6854 = vmatprep.subr.bf16.mxu1 %v17605_v18  ;;  %v17606_v22 = vld [vmem:[#allocation8 + $0xf68] ss:$24 sps:$4 sm:$0xff]   ;;  %v17614_v18 = vld [vmem:[#allocation8 + $0xf9c] ss:$24 sps:$4 sm:$0xff]   ;;  %v4834_v50 = vadd.f32 %v19072_v23, %v19150_v29 }
 0x360   :  { %v14972_v35 = vadd.f32 %v5788_v39, %v4824_v60  ;;  %v5790_v43 = vpop.f32.mrb[25].mxu0  ;;  %v19275_v30 = vpack.c.bf16 %v8656_v32, %v8650_v6  ;;  %v18414_v60 = vld [vmem:[#allocation5 + $0xcc] ss:$48 sps:$4 sm:$0xff]   ;;  %v17612_v39 = vld [vmem:[#allocation8 + $0xf98] ss:$24 sps:$4 sm:$0xff]  }
 0x361   :  { %v14974_v4 = vadd.f32 %v5790_v43, %v4826_v11  ;;  %v5792_v5 = vpop.f32.mrb[26].mxu0  ;;  %7434 = vmatpush1.bf16.msra.mxu0 %v17576_v33  ;;  %v18413_v33 = vld [vmem:[#allocation5 + $0xe4] ss:$48 sps:$4 sm:$0xff]  }
 0x362   :  { %v8469_v61 = vmul.f32 %v14972_v35, %v19163_v46  ;;  %v14976_v55 = vadd.f32 %v5792_v5, %v4828_v57  ;;  %v5794_v51 = vpop.f32.mrb[27].mxu0  ;;  %7435 = vmatprep.subr.bf16.mxu0 %v17581_v7  ;;  %vm8275_vm8 = vcmp.gt.f32.partialorder %v14972_v35, 0.0  ;;  %6855 = vmatpush1.bf16.msra.mxu1 %v17603_v25  ;;  %v17582_v7 = vld [vmem:[#allocation8 + $0x6a0] ss:$24 sps:$4 sm:$0xff]   ;;  %v17587_v23 = vld [vmem:[#allocation8 + $0x6d4] ss:$24 sps:$4 sm:$0xff]  }
 0x363   :  { %v8470_v58 = vmul.f32 %v14974_v4, %v19163_v46  ;;  %v14978_v24 = vadd.f32 %v5794_v51, %v4830_v2  ;;  %vm8276_vm9 = vcmp.gt.f32.partialorder %v14974_v4, 0.0  ;;  %6702 = vmatmul.mubr.bf16.gmra.mrb[68].mxu1 %v18411_v9  ;;  %6856 = vmatprep.subr.bf16.mxu1 %v17608_v56  ;;  %v4840_v2 = vadd.f32 %v19078_v1, %v19154_v10  ;;  %v17617_v56 = vld [vmem:[#allocation8 + $0xfcc] ss:$24 sps:$4 sm:$0xff]   ;;  %v17623_v9 = vld [vmem:[#allocation8 + $0xffc] ss:$24 sps:$4 sm:$0xff]  }
 0x364   :  { %vm8281_vm10 = vcmp.gt.f32.partialorder %v14976_v55, 0.0  ;;  %v8475_v62 = vmul.f32 %v14976_v55, %v19163_v46  ;;  %7281 = vmatmul.mubr.bf16.gmra.mrb[68].mxu0 %v18412_v44  ;;  %6711 = vmatprep.mubr.bf16.mxu1 %v18413_v33  ;;  %v8661_v21 = vsel %vm8275_vm8, %v14972_v35, %v8469_v61  ;;  %v14987_v44 = vadd.f32 %v19080_v34, %v19150_v29  ;;  %v17593_v34 = vld [vmem:[#allocation8 + $0x734] ss:$24 sps:$4 sm:$0xff]  }
 0x365   :  { %vm8282_vm11 = vcmp.gt.f32.partialorder %v14978_v24, 0.0  ;;  %v8476_v38 = vmul.f32 %v14978_v24, %v19163_v46  ;;  %7290 = vmatprep.mubr.bf16.mxu0 %v18414_v60  ;;  %7436 = vmatpush1.bf16.msra.mxu0 %v17579_v14  ;;  %v8662_v25 = vsel %vm8276_vm9, %v14974_v4, %v8470_v58  ;;  %v17585_v14 = vld [vmem:[#allocation8 + $0x6d0] ss:$24 sps:$4 sm:$0xff]   ;;  %v14989_v33 = vadd.f32 %v19082_v48, %v19154_v10  ;;  %v17588_v60 = vld [vmem:[#allocation8 + $0x700] ss:$24 sps:$4 sm:$0xff]  }
 0x366   :  { %v8667_v45 = vsel %vm8281_vm10, %v14976_v55, %v8475_v62  ;;  %7437 = vmatprep.subr.bf16.mxu0 %v17584_v42  ;;  %6857 = vmatpush1.bf16.msra.mxu1 %v17606_v22  ;;  %v17615_v42 = vld [vmem:[#allocation8 + $0xfc8] ss:$24 sps:$4 sm:$0xff]   ;;  %v14991_v48 = vadd.f32 %v19084_v63, %v19150_v29 }
 0x367   :  { %v5798_v11 = vpop.f32.mrb[28].mxu0  ;;  %v8668_v6 = vsel %vm8282_vm11, %v14978_v24, %v8476_v38  ;;  %v19291_v32 = vpack.c.bf16 %v8667_v45, %v8661_v21  ;;  %6858 = vmatprep.subr.bf16.mxu1 %v17614_v18  ;;  %v17590_v24 = vld [vmem:[#allocation8 + $0x704] ss:$24 sps:$4 sm:$0xff]   ;;  %v18415_v22 = vld [vmem:[#allocation5 + $0xe0] ss:$48 sps:$4 sm:$0xff]  }
 0x368   :  { %v14980_v57 = vadd.f32 %v5798_v11, %v4834_v50  ;;  %v5800_v43 = vpop.f32.mrb[29].mxu0  ;;  %v19295_v35 = vpack.c.bf16 %v8668_v6, %v8662_v25  ;;  %v18416_v62 = vld [vmem:[#allocation5 + $0xc8] ss:$48 sps:$4 sm:$0xff]   ;;  %v18417_v50 = vld [vmem:[#allocation5 + $0x144] ss:$48 sps:$4 sm:$0xff]  }
 0x369   :  { %v14982_v5 = vadd.f32 %v5800_v43, %v4836_v19  ;;  %v5802_v61 = vpop.f32.mrb[30].mxu0  ;;  %7438 = vmatpush1.bf16.msra.mxu0 %v17582_v7  ;;  %v18418_v38 = vld [vmem:[#allocation5 + $0x12c] ss:$48 sps:$4 sm:$0xff]   ;;  %v17621_v45 = vld [vmem:[#allocation8 + $0xff8] ss:$24 sps:$4 sm:$0xff]  }
 0x36a   :  { %v8481_v55 = vmul.f32 %v14980_v57, %v19163_v46  ;;  %v14984_v4 = vadd.f32 %v5802_v61, %v4838_v16  ;;  %v5804_v51 = vpop.f32.mrb[31].mxu0  ;;  %vm8287_vm12 = vcmp.gt.f32.partialorder %v14980_v57, 0.0  ;;  %7439 = vmatprep.subr.bf16.mxu0 %v17587_v23  ;;  %6859 = vmatpush1.bf16.msra.mxu1 %v17612_v39 }
 0x36b   :  { %v8482_v37 = vmul.f32 %v14982_v5, %v19163_v46  ;;  %v14986_v58 = vadd.f32 %v5804_v51, %v4840_v2  ;;  %vm8288_vm13 = vcmp.gt.f32.partialorder %v14982_v5, 0.0  ;;  %6712 = vmatmul.mubr.bf16.gmra.mrb[72].mxu1 %v18415_v22  ;;  %6860 = vmatprep.subr.bf16.mxu1 %v17617_v56  ;;  %v17626_v51 = vld [vmem:[#allocation8 + $0x102c] ss:$24 sps:$4 sm:$0xff]  }
 0x36c   :  { %vm8293_vm14 = vcmp.gt.f32.partialorder %v14984_v4, 0.0  ;;  %v8487_v1 = vmul.f32 %v14984_v4, %v19163_v46  ;;  %7291 = vmatmul.mubr.bf16.gmra.mrb[72].mxu0 %v18416_v62  ;;  %6721 = vmatprep.mubr.bf16.mxu1 %v18417_v50  ;;  %v8673_v19 = vsel %vm8287_vm12, %v14980_v57, %v8481_v55  ;;  %v14993_v57 = vadd.f32 %v19086_v52, %v19154_v10  ;;  %v17596_v56 = vld [vmem:[#allocation8 + $0x764] ss:$24 sps:$4 sm:$0xff]  }
 0x36d   :  { %vm8294_vm15 = vcmp.gt.f32.partialorder %v14986_v58, 0.0  ;;  %v8488_v18 = vmul.f32 %v14986_v58, %v19163_v46  ;;  %7300 = vmatprep.mubr.bf16.mxu0 %v18418_v38  ;;  %7440 = vmatpush1.bf16.msra.mxu0 %v17585_v14  ;;  %v8674_v11 = vsel %vm8288_vm13, %v14982_v5, %v8482_v37  ;;  %v17624_v37 = vld [vmem:[#allocation8 + $0x1028] ss:$24 sps:$4 sm:$0xff]   ;;  %v18421_v62 = vld [vmem:[#allocation5 + $0x1a4] ss:$48 sps:$4 sm:$0xff]  }
 0x36e   :  { %v8679_v7 = vsel %vm8293_vm14, %v14984_v4, %v8487_v1  ;;  %7441 = vmatprep.subr.bf16.mxu0 %v17590_v24  ;;  %6861 = vmatpush1.bf16.msra.mxu1 %v17615_v42  ;;  %v17591_v4 = vld [vmem:[#allocation8 + $0x730] ss:$24 sps:$4 sm:$0xff]   ;;  %v17632_v42 = vld [vmem:[#allocation8 + $0x105c] ss:$24 sps:$4 sm:$0xff]   ;;  %v14995_v1 = vadd.f32 %v19088_v54, %v19150_v29 }
 0x36f   :  { %v5808_v21 = vpop.f32.mrb[32].mxu0  ;;  %v8680_v23 = vsel %vm8294_vm15, %v14986_v58, %v8488_v18  ;;  %v19311_v39 = vpack.c.bf16 %v8679_v7, %v8673_v19  ;;  %6862 = vmatprep.subr.bf16.mxu1 %v17623_v9  ;;  %v18419_v58 = vld [vmem:[#allocation5 + $0x140] ss:$48 sps:$4 sm:$0xff]   ;;  %v18420_v24 = vld [vmem:[#allocation5 + $0x128] ss:$48 sps:$4 sm:$0xff]  }
 0x370   :  { %v14988_v25 = vadd.f32 %v14987_v44, %v5808_v21  ;;  %v5810_v6 = vpop.f32.mrb[33].mxu0  ;;  %v19315_v16 = vpack.c.bf16 %v8680_v23, %v8674_v11  ;;  %v18422_v9 = vld [vmem:[#allocation5 + $0x18c] ss:$48 sps:$4 sm:$0xff]   ;;  %v14997_v44 = vadd.f32 %v19090_v27, %v19154_v10  ;;  %v17594_v18 = vld [vmem:[#allocation8 + $0x760] ss:$24 sps:$4 sm:$0xff]   ;;  %v14999_v27 = vadd.f32 %v19092_v20, %v19150_v29 }
 0x371   :  { %v14990_v43 = vadd.f32 %v14989_v33, %v5810_v6  ;;  %v5812_v2 = vpop.f32.mrb[34].mxu0  ;;  %7442 = vmatpush1.bf16.msra.mxu0 %v17588_v60  ;;  %v17602_v54 = vld [vmem:[#allocation8 + $0x794] ss:$24 sps:$4 sm:$0xff]   ;;  %v17630_v60 = vld [vmem:[#allocation8 + $0x1058] ss:$24 sps:$4 sm:$0xff]   ;;  %v15001_v23 = vadd.f32 %v19094_v28, %v19154_v10 }
 0x372   :  { %v8493_v61 = vmul.f32 %v14988_v25, %v19163_v46  ;;  %v14992_v5 = vadd.f32 %v14991_v48, %v5812_v2  ;;  %v5814_v55 = vpop.f32.mrb[35].mxu0  ;;  %vm8299_vm0 = vcmp.gt.f32.partialorder %v14988_v25, 0.0  ;;  %7443 = vmatprep.subr.bf16.mxu0 %v17593_v34  ;;  %6863 = vmatpush1.bf16.msra.mxu1 %v17621_v45  ;;  %v17600_v2 = vld [vmem:[#allocation8 + $0x790] ss:$24 sps:$4 sm:$0xff]  }
 0x373   :  { %v8494_v63 = vmul.f32 %v14990_v43, %v19163_v46  ;;  %v14994_v14 = vadd.f32 %v14993_v57, %v5814_v55  ;;  %vm8300_vm1 = vcmp.gt.f32.partialorder %v14990_v43, 0.0  ;;  %6722 = vmatmul.mubr.bf16.gmra.mrb[76].mxu1 %v18419_v58  ;;  %6864 = vmatprep.subr.bf16.mxu1 %v17626_v51  ;;  %v17611_v55 = vld [vmem:[#allocation8 + $0x7c4] ss:$24 sps:$4 sm:$0xff]   ;;  %v18423_v51 = vld [vmem:[#allocation5 + $0x1a0] ss:$48 sps:$4 sm:$0xff]  }
 0x374   :  { %vm8305_vm2 = vcmp.gt.f32.partialorder %v14992_v5, 0.0  ;;  %v8499_v52 = vmul.f32 %v14992_v5, %v19163_v46  ;;  %7301 = vmatmul.mubr.bf16.gmra.mrb[76].mxu0 %v18420_v24  ;;  %6731 = vmatprep.mubr.bf16.mxu1 %v18421_v62  ;;  %v8685_v50 = vsel %vm8299_vm0, %v14988_v25, %v8493_v61  ;;  %v17635_v61 = vld [vmem:[#allocation8 + $0x108c] ss:$24 sps:$4 sm:$0xff]   ;;  %v15005_v24 = vadd.f32 %v19098_v40, %v19154_v10 }
 0x375   :  { %vm8306_vm3 = vcmp.gt.f32.partialorder %v14994_v14, 0.0  ;;  %v8500_v22 = vmul.f32 %v14994_v14, %v19163_v46  ;;  %7310 = vmatprep.mubr.bf16.mxu0 %v18422_v9  ;;  %7444 = vmatpush1.bf16.msra.mxu0 %v17591_v4  ;;  %v8686_v19 = vsel %vm8300_vm1, %v14990_v43, %v8494_v63  ;;  %v17633_v4 = vld [vmem:[#allocation8 + $0x1088] ss:$24 sps:$4 sm:$0xff]   ;;  %v18426_v58 = vld [vmem:[#allocation5 + $0x1ec] ss:$48 sps:$4 sm:$0xff]   ;;  %v15007_v40 = vadd.f32 %v19100_v53, %v19150_v29 }
 0x376   :  { %v8691_v38 = vsel %vm8305_vm2, %v14992_v5, %v8499_v52  ;;  %7445 = vmatprep.subr.bf16.mxu0 %v17596_v56  ;;  %6865 = vmatpush1.bf16.msra.mxu1 %v17624_v37  ;;  %v18424_v63 = vld [vmem:[#allocation5 + $0x188] ss:$48 sps:$4 sm:$0xff]   ;;  %v15003_v56 = vadd.f32 %v19096_v3, %v19150_v29  ;;  %v18425_v52 = vld [vmem:[#allocation5 + $0x204] ss:$48 sps:$4 sm:$0xff]  }
 0x377   :  { %v5818_v33 = vpop.f32.mrb[36].mxu0  ;;  %v8692_v7 = vsel %vm8306_vm3, %v14994_v14, %v8500_v22  ;;  %v19331_v21 = vpack.c.bf16 %v8691_v38, %v8685_v50  ;;  %6866 = vmatprep.subr.bf16.mxu1 %v17632_v42  ;;  %v17641_v14 = vld [vmem:[#allocation8 + $0x10bc] ss:$24 sps:$4 sm:$0xff]   ;;  %v17609_v42 = vld [vmem:[#allocation8 + $0x7c0] ss:$24 sps:$4 sm:$0xff]  }
 0x378   :  { %v14996_v34 = vadd.f32 %v14995_v1, %v5818_v33  ;;  %v5820_v45 = vpop.f32.mrb[37].mxu0  ;;  %v19335_v11 = vpack.c.bf16 %v8692_v7, %v8686_v19  ;;  %v17620_v3 = vld [vmem:[#allocation8 + $0x7f4] ss:$24 sps:$4 sm:$0xff]   ;;  %v17639_v9 = vld [vmem:[#allocation8 + $0x10b8] ss:$24 sps:$4 sm:$0xff]  }
 0x379   :  { %20751 = vst [vmem:[#allocation39_spill] sm:$0xff] %v19331_v21  ;;  %v14998_v48 = vadd.f32 %v14997_v44, %v5820_v45  ;;  %v5822_v25 = vpop.f32.mrb[38].mxu0  ;;  %7446 = vmatpush1.bf16.msra.mxu0 %v17594_v18 }
 0x37a   :  { %v8505_v6 = vmul.f32 %v14996_v34, %v19163_v46  ;;  %v15000_v57 = vadd.f32 %v14999_v27, %v5822_v25  ;;  %v5824_v43 = vpop.f32.mrb[39].mxu0  ;;  %vm8311_vm4 = vcmp.gt.f32.partialorder %v14996_v34, 0.0  ;;  %7447 = vmatprep.subr.bf16.mxu0 %v17602_v54  ;;  %6867 = vmatpush1.bf16.msra.mxu1 %v17630_v60  ;;  %v15009_v60 = vadd.f32 %v19102_v59, %v19154_v10 }
 0x37b   :  { %v8506_v20 = vmul.f32 %v14998_v48, %v19163_v46  ;;  %v15002_v5 = vadd.f32 %v15001_v23, %v5824_v43  ;;  %vm8312_vm5 = vcmp.gt.f32.partialorder %v14998_v48, 0.0  ;;  %6732 = vmatmul.mubr.bf16.gmra.mrb[80].mxu1 %v18423_v51  ;;  %6868 = vmatprep.subr.bf16.mxu1 %v17635_v61  ;;  %v17618_v23 = vld [vmem:[#allocation8 + $0x7f0] ss:$24 sps:$4 sm:$0xff]   ;;  %v17650_v61 = vld [vmem:[#allocation8 + $0x111c] ss:$24 sps:$4 sm:$0xff]  }
 0x37c   :  { %vm8317_vm6 = vcmp.gt.f32.partialorder %v15000_v57, 0.0  ;;  %v8511_v28 = vmul.f32 %v15000_v57, %v19163_v46  ;;  %7311 = vmatmul.mubr.bf16.gmra.mrb[80].mxu0 %v18424_v63  ;;  %6741 = vmatprep.mubr.bf16.mxu1 %v18425_v52  ;;  %v8697_v1 = vsel %vm8311_vm4, %v14996_v34, %v8505_v6  ;;  %v17629_v6 = vld [vmem:[#allocation8 + $0x824] ss:$24 sps:$4 sm:$0xff]   ;;  %v18427_v43 = vld [vmem:[#allocation5 + $0x200] ss:$48 sps:$4 sm:$0xff]  }
 0x37d   :  { %vm8318_vm7 = vcmp.gt.f32.partialorder %v15002_v5, 0.0  ;;  %v8512_v37 = vmul.f32 %v15002_v5, %v19163_v46  ;;  %7320 = vmatprep.mubr.bf16.mxu0 %v18426_v58  ;;  %7448 = vmatpush1.bf16.msra.mxu0 %v17600_v2  ;;  %v8698_v44 = vsel %vm8312_vm5, %v14998_v48, %v8506_v20  ;;  %v17644_v48 = vld [vmem:[#allocation8 + $0x10ec] ss:$24 sps:$4 sm:$0xff]   ;;  %v18428_v2 = vld [vmem:[#allocation5 + $0x1e8] ss:$48 sps:$4 sm:$0xff]   ;;  %v15011_v20 = vadd.f32 %v19104_v49, %v19150_v29 }
 0x37e   :  { %v8703_v22 = vsel %vm8317_vm6, %v15000_v57, %v8511_v28  ;;  %7449 = vmatprep.subr.bf16.mxu0 %v17611_v55  ;;  %6869 = vmatpush1.bf16.msra.mxu1 %v17633_v4  ;;  %v17642_v57 = vld [vmem:[#allocation8 + $0x10e8] ss:$24 sps:$4 sm:$0xff]   ;;  %v18429_v55 = vld [vmem:[#allocation5 + $0x264] ss:$48 sps:$4 sm:$0xff]   ;;  %v18430_v4 = vld [vmem:[#allocation5 + $0x24c] ss:$48 sps:$4 sm:$0xff]  }
 0x37f   :  { %v5828_v62 = vpop.f32.mrb[40].mxu0  ;;  %v8704_v18 = vsel %vm8318_vm7, %v15002_v5, %v8512_v37  ;;  %v19351_v50 = vpack.c.bf16 %v8703_v22, %v8697_v1  ;;  %6870 = vmatprep.subr.bf16.mxu1 %v17641_v14  ;;  %v20754_v28 = vld [vmem:[#allocation19_spill] sm:$0xff]  ;;  %v17627_v63 = vld [vmem:[#allocation8 + $0x820] ss:$24 sps:$4 sm:$0xff]  }
 0x380   :  { %v15004_v38 = vadd.f32 %v15003_v56, %v5828_v62  ;;  %v5830_v33 = vpop.f32.mrb[41].mxu0  ;;  %v19355_v54 = vpack.c.bf16 %v8704_v18, %v8698_v44  ;;  %v15013_v51 = vadd.f32 %v20754_v28, %v19154_v10  ;;  %v17638_v49 = vld [vmem:[#allocation8 + $0x854] ss:$24 sps:$4 sm:$0xff]   ;;  %v17648_v52 = vld [vmem:[#allocation8 + $0x1118] ss:$24 sps:$4 sm:$0xff]   ;;  %v20758_v44 = vld [vmem:[#allocation21_spill] sm:$0xff] }
 0x381   :  { %20752 = vst [vmem:[#allocation40_spill] sm:$0xff] %v19351_v50  ;;  %v15006_v19 = vadd.f32 %v15005_v24, %v5830_v33  ;;  %v5832_v7 = vpop.f32.mrb[42].mxu0  ;;  %7450 = vmatpush1.bf16.msra.mxu0 %v17609_v42  ;;  %v20756_v1 = vld [vmem:[#allocation20_spill] sm:$0xff]  ;;  %v15017_v18 = vadd.f32 %v20758_v44, %v19154_v10 }
 0x382   :  { %20753 = vst [vmem:[#allocation41_spill] sm:$0xff] %v19355_v54  ;;  %v8517_v27 = vmul.f32 %v15004_v38, %v19163_v46  ;;  %v15008_v34 = vadd.f32 %v15007_v40, %v5832_v7  ;;  %v5834_v45 = vpop.f32.mrb[43].mxu0  ;;  %vm8323_vm8 = vcmp.gt.f32.partialorder %v15004_v38, 0.0  ;;  %7451 = vmatprep.subr.bf16.mxu0 %v17620_v3  ;;  %6871 = vmatpush1.bf16.msra.mxu1 %v17639_v9  ;;  %v17636_v7 = vld [vmem:[#allocation8 + $0x850] ss:$24 sps:$4 sm:$0xff]  }
 0x383   :  { %v8518_v53 = vmul.f32 %v15006_v19, %v19163_v46  ;;  %v15010_v25 = vadd.f32 %v15009_v60, %v5834_v45  ;;  %vm8324_vm9 = vcmp.gt.f32.partialorder %v15006_v19, 0.0  ;;  %6742 = vmatmul.mubr.bf16.gmra.mrb[84].mxu1 %v18427_v43  ;;  %6872 = vmatprep.subr.bf16.mxu1 %v17644_v48  ;;  %v15015_v22 = vadd.f32 %v20756_v1, %v19150_v29  ;;  %v17651_v48 = vld [vmem:[#allocation8 + $0x1148] ss:$24 sps:$4 sm:$0xff]  }
 0x384   :  { %vm8329_vm10 = vcmp.gt.f32.partialorder %v15008_v34, 0.0  ;;  %v8523_v59 = vmul.f32 %v15008_v34, %v19163_v46  ;;  %7321 = vmatmul.mubr.bf16.gmra.mrb[84].mxu0 %v18428_v2  ;;  %6751 = vmatprep.mubr.bf16.mxu1 %v18429_v55  ;;  %v8709_v14 = vsel %vm8323_vm8, %v15004_v38, %v8517_v27  ;;  %v17653_v27 = vld [vmem:[#allocation8 + $0x114c] ss:$24 sps:$4 sm:$0xff]  }
 0x385   :  { %vm8330_vm11 = vcmp.gt.f32.partialorder %v15010_v25, 0.0  ;;  %v8524_v5 = vmul.f32 %v15010_v25, %v19163_v46  ;;  %7330 = vmatprep.mubr.bf16.mxu0 %v18430_v4  ;;  %7452 = vmatpush1.bf16.msra.mxu0 %v17618_v23  ;;  %v8710_v58 = vsel %vm8324_vm9, %v15006_v19, %v8518_v53  ;;  %v17647_v23 = vld [vmem:[#allocation8 + $0x884] ss:$24 sps:$4 sm:$0xff]   ;;  %v17645_v4 = vld [vmem:[#allocation8 + $0x880] ss:$24 sps:$4 sm:$0xff]  }
 0x386   :  { %v8715_v56 = vsel %vm8329_vm10, %v15008_v34, %v8523_v59  ;;  %7453 = vmatprep.subr.bf16.mxu0 %v17629_v6  ;;  %6873 = vmatpush1.bf16.msra.mxu1 %v17642_v57  ;;  %v18432_v6 = vld [vmem:[#allocation5 + $0x248] ss:$48 sps:$4 sm:$0xff]   ;;  %v17659_v57 = vld [vmem:[#allocation8 + $0x117c] ss:$24 sps:$4 sm:$0xff]  }
 0x387   :  { %v5838_v37 = vpop.f32.mrb[44].mxu0  ;;  %v8716_v24 = vsel %vm8330_vm11, %v15010_v25, %v8524_v5  ;;  %v19371_v42 = vpack.c.bf16 %v8715_v56, %v8709_v14  ;;  %6874 = vmatprep.subr.bf16.mxu1 %v17650_v61  ;;  %v18431_v25 = vld [vmem:[#allocation5 + $0x260] ss:$48 sps:$4 sm:$0xff]   ;;  %v20759_v59 = vld [vmem:[#allocation22_spill] sm:$0xff]  ;;  %v17656_v14 = vld [vmem:[#allocation8 + $0x8b4] ss:$24 sps:$4 sm:$0xff]  }
 0x388   :  { %v15012_v62 = vadd.f32 %v15011_v20, %v5838_v37  ;;  %v5840_v3 = vpop.f32.mrb[45].mxu0  ;;  %v19375_v9 = vpack.c.bf16 %v8716_v24, %v8710_v58  ;;  %v15019_v43 = vadd.f32 %v20759_v59, %v19150_v29  ;;  %v18433_v61 = vld [vmem:[#allocation5 + $0x2c4] ss:$48 sps:$4 sm:$0xff]   ;;  %v18434_v20 = vld [vmem:[#allocation5 + $0x2ac] ss:$48 sps:$4 sm:$0xff]  }
 0x389   :  { %20755 = vst [vmem:[#allocation19_spill] sm:$0xff] %v19371_v42  ;;  %v15014_v40 = vadd.f32 %v15013_v51, %v5840_v3  ;;  %v5842_v38 = vpop.f32.mrb[46].mxu0  ;;  %7454 = vmatpush1.bf16.msra.mxu0 %v17627_v63  ;;  %v20760_v5 = vld [vmem:[#allocation23_spill] sm:$0xff]  ;;  %v20762_v58 = vld [vmem:[#allocation24_spill] sm:$0xff]  ;;  %v20764_v3 = vld [vmem:[#allocation25_spill] sm:$0xff] }
 0x38a   :  { %20757 = vst [vmem:[#allocation20_spill] sm:$0xff] %v19375_v9  ;;  %v8529_v33 = vmul.f32 %v15012_v62, %v19163_v46  ;;  %v15016_v60 = vadd.f32 %v15015_v22, %v5842_v38  ;;  %v5844_v19 = vpop.f32.mrb[47].mxu0  ;;  %vm8335_vm12 = vcmp.gt.f32.partialorder %v15012_v62, 0.0  ;;  %7455 = vmatprep.subr.bf16.mxu0 %v17638_v49  ;;  %6875 = vmatpush1.bf16.msra.mxu1 %v17648_v52  ;;  %v17657_v56 = vld [vmem:[#allocation8 + $0x1178] ss:$24 sps:$4 sm:$0xff]  }
 0x38b   :  { %v8530_v34 = vmul.f32 %v15014_v40, %v19163_v46  ;;  %v15018_v45 = vadd.f32 %v15017_v18, %v5844_v19  ;;  %vm8336_vm13 = vcmp.gt.f32.partialorder %v15014_v40, 0.0  ;;  %6752 = vmatmul.mubr.bf16.gmra.mrb[88].mxu1 %v18431_v25  ;;  %v15021_v55 = vadd.f32 %v20760_v5, %v19154_v10  ;;  %6876 = vmatprep.subr.bf16.mxu1 %v17653_v27  ;;  %v17654_v19 = vld [vmem:[#allocation8 + $0x8b0] ss:$24 sps:$4 sm:$0xff]  }
 0x38c   :  { %vm8341_vm14 = vcmp.gt.f32.partialorder %v15016_v60, 0.0  ;;  %v8535_v53 = vmul.f32 %v15016_v60, %v19163_v46  ;;  %7331 = vmatmul.mubr.bf16.gmra.mrb[88].mxu0 %v18432_v6  ;;  %6761 = vmatprep.mubr.bf16.mxu1 %v18433_v61  ;;  %v8721_v28 = vsel %vm8335_vm12, %v15012_v62, %v8529_v33  ;;  %v15023_v24 = vadd.f32 %v20762_v58, %v19150_v29  ;;  %v18436_v25 = vld [vmem:[#allocation5 + $0x2a8] ss:$48 sps:$4 sm:$0xff]   ;;  %v17668_v6 = vld [vmem:[#allocation8 + $0x11dc] ss:$24 sps:$4 sm:$0xff]  }
 0x38d   :  { %vm8342_vm15 = vcmp.gt.f32.partialorder %v15018_v45, 0.0  ;;  %v8536_v2 = vmul.f32 %v15018_v45, %v19163_v46  ;;  %7340 = vmatprep.mubr.bf16.mxu0 %v18434_v20  ;;  %7456 = vmatpush1.bf16.msra.mxu0 %v17636_v7  ;;  %v8722_v37 = vsel %vm8336_vm13, %v15014_v40, %v8530_v34  ;;  %v15025_v44 = vadd.f32 %v20764_v3, %v19154_v10  ;;  %v17662_v7 = vld [vmem:[#allocation8 + $0x11ac] ss:$24 sps:$4 sm:$0xff]   ;;  %v20768_v58 = vld [vmem:[#allocation28_spill] sm:$0xff] }
 0x38e   :  { %v8727_v51 = vsel %vm8341_vm14, %v15016_v60, %v8535_v53  ;;  %7457 = vmatprep.subr.bf16.mxu0 %v17647_v23  ;;  %6877 = vmatpush1.bf16.msra.mxu1 %v17651_v48  ;;  %v17665_v23 = vld [vmem:[#allocation8 + $0x8e4] ss:$24 sps:$4 sm:$0xff]   ;;  %v18435_v53 = vld [vmem:[#allocation5 + $0x2c0] ss:$48 sps:$4 sm:$0xff]  }
 0x38f   :  { %v5848_v63 = vpop.f32.mrb[48].mxu0  ;;  %v8728_v49 = vsel %vm8342_vm15, %v15018_v45, %v8536_v2  ;;  %v19391_v52 = vpack.c.bf16 %v8727_v51, %v8721_v28  ;;  %6878 = vmatprep.subr.bf16.mxu1 %v17659_v57  ;;  %v17660_v45 = vld [vmem:[#allocation8 + $0x11a8] ss:$24 sps:$4 sm:$0xff]   ;;  %v18437_v2 = vld [vmem:[#allocation5 + $0x324] ss:$48 sps:$4 sm:$0xff]   ;;  %v20766_v20 = vld [vmem:[#allocation27_spill] sm:$0xff] }
 0x390   :  { %v15020_v1 = vadd.f32 %v15019_v43, %v5848_v63  ;;  %v5850_v22 = vpop.f32.mrb[49].mxu0  ;;  %v19395_v62 = vpack.c.bf16 %v8728_v49, %v8722_v37  ;;  %v20765_v57 = vld [vmem:[#allocation26_spill] sm:$0xff]  ;;  %v18438_v61 = vld [vmem:[#allocation5 + $0x30c] ss:$48 sps:$4 sm:$0xff]   ;;  %v15029_v5 = vadd.f32 %v20766_v20, %v19154_v10  ;;  %v17666_v63 = vld [vmem:[#allocation8 + $0x11d8] ss:$24 sps:$4 sm:$0xff]  }
 0x391   :  { %20761 = vst [vmem:[#allocation21_spill] sm:$0xff] %v19391_v52  ;;  %v15022_v18 = vadd.f32 %v15021_v55, %v5850_v22  ;;  %v5852_v38 = vpop.f32.mrb[50].mxu0  ;;  %7458 = vmatpush1.bf16.msra.mxu0 %v17645_v4  ;;  %v15027_v59 = vadd.f32 %v20765_v57, %v19150_v29  ;;  %v17663_v55 = vld [vmem:[#allocation8 + $0x8e0] ss:$24 sps:$4 sm:$0xff]   ;;  %v20771_v57 = vld [vmem:[#allocation30_spill] sm:$0xff] }
 0x392   :  { %20763 = vst [vmem:[#allocation22_spill] sm:$0xff] %v19395_v62  ;;  %v8541_v33 = vmul.f32 %v15020_v1, %v19163_v46  ;;  %v15024_v40 = vadd.f32 %v15023_v24, %v5852_v38  ;;  %v5854_v60 = vpop.f32.mrb[51].mxu0  ;;  %vm8347_vm0 = vcmp.gt.f32.partialorder %v15020_v1, 0.0  ;;  %7459 = vmatprep.subr.bf16.mxu0 %v17656_v14  ;;  %6879 = vmatpush1.bf16.msra.mxu1 %v17657_v56  ;;  %v17671_v14 = vld [vmem:[#allocation8 + $0x914] ss:$24 sps:$4 sm:$0xff]  }
 0x393   :  { %v8542_v27 = vmul.f32 %v15022_v18, %v19163_v46  ;;  %v15026_v34 = vadd.f32 %v15025_v44, %v5854_v60  ;;  %vm8348_vm1 = vcmp.gt.f32.partialorder %v15022_v18, 0.0  ;;  %6762 = vmatmul.mubr.bf16.gmra.mrb[92].mxu1 %v18435_v53  ;;  %6880 = vmatprep.subr.bf16.mxu1 %v17662_v7  ;;  %v15031_v24 = vadd.f32 %v20768_v58, %v19150_v29  ;;  %v20770_v44 = vld [vmem:[#allocation29_spill] sm:$0xff] }
 0x394   :  { %vm8353_vm2 = vcmp.gt.f32.partialorder %v15024_v40, 0.0  ;;  %v8547_v48 = vmul.f32 %v15024_v40, %v19163_v46  ;;  %7341 = vmatmul.mubr.bf16.gmra.mrb[92].mxu0 %v18436_v25  ;;  %6771 = vmatprep.mubr.bf16.mxu1 %v18437_v2  ;;  %v8733_v4 = vsel %vm8347_vm0, %v15020_v1, %v8541_v33  ;;  %v15033_v38 = vadd.f32 %v20770_v44, %v19154_v10  ;;  %v17698_v7 = vld [vmem:[#allocation11 + $0x4] ss:$24 sps:$4 sm:$0xff]  }
 0x395   :  { %vm8354_vm3 = vcmp.gt.f32.partialorder %v15026_v34, 0.0  ;;  %v8548_v43 = vmul.f32 %v15026_v34, %v19163_v46  ;;  %7350 = vmatprep.mubr.bf16.mxu0 %v18438_v61  ;;  %7460 = vmatpush1.bf16.msra.mxu0 %v17654_v19  ;;  %v8734_v56 = vsel %vm8348_vm1, %v15022_v18, %v8542_v27  ;;  %v18441_v25 = vld [vmem:[#allocation5 + $0x384] ss:$48 sps:$4 sm:$0xff]   ;;  %v20772_v61 = vld [vmem:[#allocation31_spill] sm:$0xff]  ;;  %v20776_v58 = vld [vmem:[#allocation33_spill] sm:$0xff] }
 0x396   :  { %v8739_v28 = vsel %vm8353_vm2, %v15024_v40, %v8547_v48  ;;  %7461 = vmatprep.subr.bf16.mxu0 %v17665_v23  ;;  %6881 = vmatpush1.bf16.msra.mxu1 %v17660_v45  ;;  %v18439_v23 = vld [vmem:[#allocation5 + $0x320] ss:$48 sps:$4 sm:$0xff]   ;;  %v18440_v48 = vld [vmem:[#allocation5 + $0x308] ss:$48 sps:$4 sm:$0xff]   ;;  %v15037_v20 = vadd.f32 %v20772_v61, %v19154_v10 }
 0x397   :  { %v5858_v51 = vpop.f32.mrb[52].mxu0  ;;  %v8740_v37 = vsel %vm8354_vm3, %v15026_v34, %v8548_v43  ;;  %v19411_v49 = vpack.c.bf16 %v8739_v28, %v8733_v4  ;;  %6882 = vmatprep.subr.bf16.mxu1 %v17668_v6  ;;  %v18442_v6 = vld [vmem:[#allocation5 + $0x36c] ss:$48 sps:$4 sm:$0xff]  }
 0x398   :  { %v15028_v22 = vadd.f32 %v15027_v59, %v5858_v51  ;;  %v5860_v3 = vpop.f32.mrb[53].mxu0  ;;  %v19415_v1 = vpack.c.bf16 %v8740_v37, %v8734_v56  ;;  %v15035_v59 = vadd.f32 %v20771_v57, %v19150_v29  ;;  %v20774_v51 = vld [vmem:[#allocation32_spill] sm:$0xff] }
 0x399   :  { %20767 = vst [vmem:[#allocation23_spill] sm:$0xff] %v19411_v49  ;;  %v15030_v33 = vadd.f32 %v15029_v5, %v5860_v3  ;;  %v5862_v40 = vpop.f32.mrb[54].mxu0  ;;  %7462 = vmatpush1.bf16.msra.mxu0 %v17663_v55 }
 0x39a   :  { %20769 = vst [vmem:[#allocation24_spill] sm:$0xff] %v19415_v1  ;;  %v8553_v60 = vmul.f32 %v15028_v22, %v19163_v46  ;;  %v15032_v18 = vadd.f32 %v15031_v24, %v5862_v40  ;;  %v5864_v19 = vpop.f32.mrb[55].mxu0  ;;  %vm8359_vm4 = vcmp.gt.f32.partialorder %v15028_v22, 0.0  ;;  %6883 = vmatpush1.bf16.msra.mxu1 %v17666_v63  ;;  %7624 = vmatprep.subr.bf16.mxu0 %v17671_v14 }
 0x39b   :  { %v8554_v27 = vmul.f32 %v15030_v33, %v19163_v46  ;;  %v15034_v34 = vadd.f32 %v15033_v38, %v5864_v19  ;;  %vm8360_vm5 = vcmp.gt.f32.partialorder %v15030_v33, 0.0  ;;  %6772 = vmatmul.mubr.bf16.gmra.mrb[96].mxu1 %v18439_v23  ;;  %10637 = vmatprep.subr.bf16.mxu1 %v17698_v7  ;;  %v15039_v63 = vadd.f32 %v20774_v51, %v19150_v29  ;;  %v18443_v19 = vld [vmem:[#allocation5 + $0x380] ss:$48 sps:$4 sm:$0xff]   ;;  %v18444_v7 = vld [vmem:[#allocation5 + $0x368] ss:$48 sps:$4 sm:$0xff]  }
 0x39c   :  { %vm8365_vm6 = vcmp.gt.f32.partialorder %v15032_v18, 0.0  ;;  %v8559_v45 = vmul.f32 %v15032_v18, %v19163_v46  ;;  %7351 = vmatmul.mubr.bf16.gmra.mrb[96].mxu0 %v18440_v48  ;;  %6781 = vmatprep.mubr.bf16.mxu1 %v18441_v25  ;;  %v8745_v43 = vsel %vm8359_vm4, %v15028_v22, %v8553_v60  ;;  %v15041_v24 = vadd.f32 %v20776_v58, %v19154_v10  ;;  %v20777_v23 = vld [vmem:[#allocation34_spill] sm:$0xff] }
 0x39d   :  { %vm8366_vm7 = vcmp.gt.f32.partialorder %v15034_v34, 0.0  ;;  %v8560_v53 = vmul.f32 %v15034_v34, %v19163_v46  ;;  %7360 = vmatprep.mubr.bf16.mxu0 %v18442_v6  ;;  %v8746_v55 = vsel %vm8360_vm5, %v15030_v33, %v8554_v27  ;;  %v15043_v48 = vadd.f32 %v20777_v23, %v19150_v29  ;;  %v20778_v6 = vld [vmem:[#allocation35_spill] sm:$0xff] }
 0x39e   :  { %v8751_v2 = vsel %vm8365_vm6, %v15032_v18, %v8559_v45  ;;  %v18446_v45 = vld [vmem:[#allocation5 + $0x3cc] ss:$48 sps:$4 sm:$0xff]   ;;  %v15045_v57 = vadd.f32 %v20778_v6, %v19154_v10 }
 0x39f   :  { %v5868_v5 = vpop.f32.mrb[56].mxu0  ;;  %v8752_v4 = vsel %vm8366_vm7, %v15034_v34, %v8560_v53  ;;  %v19429_v28 = vpack.c.bf16 %v8751_v2, %v8745_v43  ;;  %v18445_v34 = vld [vmem:[#allocation5 + $0x3e4] ss:$48 sps:$4 sm:$0xff]   ;;  %v18454_v6 = vld [vmem:[#allocation5 + $0x48c] ss:$48 sps:$4 sm:$0xff]  }
 0x3a0   :  { %v15036_v14 = vadd.f32 %v15035_v59, %v5868_v5  ;;  %v5870_v56 = vpop.f32.mrb[57].mxu0  ;;  %v19433_v37 = vpack.c.bf16 %v8752_v4, %v8746_v55 }
 0x3a1   :  { %20773 = vst [vmem:[#allocation25_spill] sm:$0xff] %v19429_v28  ;;  %v15038_v22 = vadd.f32 %v15037_v20, %v5870_v56  ;;  %v5872_v3 = vpop.f32.mrb[58].mxu0  ;;  %v20780_v20 = vld [vmem:[#allocation36_spill] sm:$0xff] }
 0x3a2   :  { %20775 = vst [vmem:[#allocation26_spill] sm:$0xff] %v19433_v37  ;;  %v8565_v44 = vmul.f32 %v15036_v14, %v19163_v46  ;;  %v15040_v38 = vadd.f32 %v15039_v63, %v5872_v3  ;;  %v5874_v40 = vpop.f32.mrb[59].mxu0  ;;  %vm8371_vm8 = vcmp.gt.f32.partialorder %v15036_v14, 0.0  ;;  %v15047_v5 = vadd.f32 %v20780_v20, %v19150_v29  ;;  %v20782_v63 = vld [vmem:[#allocation37_spill] sm:$0xff] }
 0x3a3   :  { %v8566_v33 = vmul.f32 %v15038_v22, %v19163_v46  ;;  %v15042_v60 = vadd.f32 %v15041_v24, %v5874_v40  ;;  %vm8372_vm9 = vcmp.gt.f32.partialorder %v15038_v22, 0.0  ;;  %6782 = vmatmul.mubr.bf16.gmra.mrb[100].mxu1 %v18443_v19  ;;  %v18447_v40 = vld [vmem:[#allocation5 + $0x3e0] ss:$48 sps:$4 sm:$0xff]  }
 0x3a4   :  { %vm8377_vm10 = vcmp.gt.f32.partialorder %v15040_v38, 0.0  ;;  %v8571_v18 = vmul.f32 %v15040_v38, %v19163_v46  ;;  %7361 = vmatmul.mubr.bf16.gmra.mrb[100].mxu0 %v18444_v7  ;;  %6791 = vmatprep.mubr.bf16.mxu1 %v18445_v34  ;;  %v8757_v53 = vsel %vm8371_vm8, %v15036_v14, %v8565_v44  ;;  %v15049_v14 = vadd.f32 %v20782_v63, %v19154_v10  ;;  %v18459_v20 = vld [vmem:[#allocation5 + $0x500] ss:$48 sps:$4 sm:$0xff]  }
 0x3a5   :  { %vm8378_vm11 = vcmp.gt.f32.partialorder %v15042_v60, 0.0  ;;  %v8572_v27 = vmul.f32 %v15042_v60, %v19163_v46  ;;  %7370 = vmatprep.mubr.bf16.mxu0 %v18446_v45  ;;  %v8758_v43 = vsel %vm8372_vm9, %v15038_v22, %v8566_v33  ;;  %v18448_v33 = vld [vmem:[#allocation5 + $0x3c8] ss:$48 sps:$4 sm:$0xff]   ;;  %v18463_v63 = vld [vmem:[#allocation5 + $0x560] ss:$48 sps:$4 sm:$0xff]  }
 0x3a6   :  { %v8763_v25 = vsel %vm8377_vm10, %v15040_v38, %v8571_v18  ;;  %v18450_v18 = vld [vmem:[#allocation5 + $0x42c] ss:$48 sps:$4 sm:$0xff]  }
 0x3a7   :  { %v5878_v59 = vpop.f32.mrb[60].mxu0  ;;  %v8764_v2 = vsel %vm8378_vm11, %v15042_v60, %v8572_v27  ;;  %v19447_v61 = vpack.c.bf16 %v8763_v25, %v8757_v53  ;;  %v18449_v60 = vld [vmem:[#allocation5 + $0x444] ss:$48 sps:$4 sm:$0xff]   ;;  %v18452_v53 = vld [vmem:[#allocation5 + $0x428] ss:$48 sps:$4 sm:$0xff]  }
 0x3a8   :  { %v15044_v55 = vadd.f32 %v15043_v48, %v5878_v59  ;;  %v5880_v4 = vpop.f32.mrb[61].mxu0  ;;  %v19451_v51 = vpack.c.bf16 %v8764_v2, %v8758_v43  ;;  %v18451_v48 = vld [vmem:[#allocation5 + $0x440] ss:$48 sps:$4 sm:$0xff]   ;;  %v18453_v25 = vld [vmem:[#allocation5 + $0x4a4] ss:$48 sps:$4 sm:$0xff]  }
 0x3a9   :  { %20779 = vst [vmem:[#allocation27_spill] sm:$0xff] %v19447_v61  ;;  %v15046_v56 = vadd.f32 %v15045_v57, %v5880_v4  ;;  %v5882_v58 = vpop.f32.mrb[62].mxu0  ;;  %v18455_v57 = vld [vmem:[#allocation5 + $0x4a0] ss:$48 sps:$4 sm:$0xff]   ;;  %v18456_v59 = vld [vmem:[#allocation5 + $0x488] ss:$48 sps:$4 sm:$0xff]  }
 0x3aa   :  { %20781 = vst [vmem:[#allocation28_spill] sm:$0xff] %v19451_v51  ;;  %v8577_v24 = vmul.f32 %v15044_v55, %v19163_v46  ;;  %v15048_v3 = vadd.f32 %v15047_v5, %v5882_v58  ;;  %v5884_v44 = vpop.f32.mrb[63].mxu0  ;;  %vm8383_vm12 = vcmp.gt.f32.partialorder %v15044_v55, 0.0  ;;  %v18457_v43 = vld [vmem:[#allocation5 + $0x504] ss:$48 sps:$4 sm:$0xff]  }
 0x3ab   :  { %v8578_v22 = vmul.f32 %v15046_v56, %v19163_v46  ;;  %v15050_v38 = vadd.f32 %v15049_v14, %v5884_v44  ;;  %vm8384_vm13 = vcmp.gt.f32.partialorder %v15046_v56, 0.0  ;;  %6792 = vmatmul.mubr.bf16.gmra.mrb[104].mxu1 %v18447_v40  ;;  %v18458_v2 = vld [vmem:[#allocation5 + $0x4ec] ss:$48 sps:$4 sm:$0xff]   ;;  %v18460_v5 = vld [vmem:[#allocation5 + $0x4e8] ss:$48 sps:$4 sm:$0xff]  }
 0x3ac   :  { %vm8389_vm14 = vcmp.gt.f32.partialorder %v15048_v3, 0.0  ;;  %v8583_v29 = vmul.f32 %v15048_v3, %v19163_v46  ;;  %7371 = vmatmul.mubr.bf16.gmra.mrb[104].mxu0 %v18448_v33  ;;  %6801 = vmatprep.mubr.bf16.mxu1 %v18449_v60  ;;  %v8769_v19 = vsel %vm8383_vm12, %v15044_v55, %v8577_v24  ;;  %v18461_v55 = vld [vmem:[#allocation5 + $0x564] ss:$48 sps:$4 sm:$0xff]   ;;  %v18462_v4 = vld [vmem:[#allocation5 + $0x54c] ss:$48 sps:$4 sm:$0xff]  }
 0x3ad   :  { %vm8390_vm15 = vcmp.gt.f32.partialorder %v15050_v38, 0.0  ;;  %v8584_v10 = vmul.f32 %v15050_v38, %v19163_v46  ;;  %7380 = vmatprep.mubr.bf16.mxu0 %v18450_v18  ;;  %v8770_v27 = vsel %vm8384_vm13, %v15046_v56, %v8578_v22  ;;  %v18464_v14 = vld [vmem:[#allocation5 + $0x548] ss:$48 sps:$4 sm:$0xff]   ;;  %v18465_v56 = vld [vmem:[#allocation5 + $0x5c4] ss:$48 sps:$4 sm:$0xff]  }
 0x3ae   :  { %v8775_v7 = vsel %vm8389_vm14, %v15048_v3, %v8583_v29  ;;  %v18466_v58 = vld [vmem:[#allocation5 + $0x5ac] ss:$48 sps:$4 sm:$0xff]   ;;  %v18467_v24 = vld [vmem:[#allocation5 + $0x5c0] ss:$48 sps:$4 sm:$0xff]   ;;  %v18468_v3 = vld [vmem:[#allocation5 + $0x5a8] ss:$48 sps:$4 sm:$0xff]  }
 0x3af   :  { %v8776_v34 = vsel %vm8390_vm15, %v15050_v38, %v8584_v10  ;;  %v19460_v45 = vpack.c.bf16 %v8775_v7, %v8769_v19  ;;  %v18469_v44 = vld [vmem:[#allocation5 + $0x2c] ss:$48 sps:$4 sm:$0xff]   ;;  %v18470_v22 = vld [vmem:[#allocation5 + $0x14] ss:$48 sps:$4 sm:$0xff]   ;;  %v17669_v38 = vld [vmem:[#allocation8 + $0x910] ss:$24 sps:$4 sm:$0xff]  }
 0x3b0   :  { %v19462_v23 = vpack.c.bf16 %v8776_v34, %v8770_v27  ;;  %v17674_v29 = vld [vmem:[#allocation8 + $0x944] ss:$24 sps:$4 sm:$0xff]   ;;  %v18471_v33 = vld [vmem:[#allocation5 + $0x28] ss:$48 sps:$4 sm:$0xff]   ;;  %v18472_v10 = vld [vmem:[#allocation5 + $0x10] ss:$48 sps:$4 sm:$0xff]  }
 0x3b1   :  { %20783 = vst [vmem:[#allocation29_spill] sm:$0xff] %v19460_v45  ;;  %v17696_v40 = vld [vmem:[#allocation11] ss:$24 sps:$4 sm:$0xff]   ;;  %v17701_v60 = vld [vmem:[#allocation11 + $0x34] ss:$24 sps:$4 sm:$0xff]  }
 0x3b2   :  { %20784 = vst [vmem:[#allocation30_spill] sm:$0xff] %v19462_v23  ;;  %v18473_v18 = vld [vmem:[#allocation5 + $0x8c] ss:$48 sps:$4 sm:$0xff]   ;;  %v17672_v19 = vld [vmem:[#allocation8 + $0x940] ss:$24 sps:$4 sm:$0xff]  }
 0x3b3   :  { %6802 = vmatmul.mubr.bf16.gmra.mrb[108].mxu1 %v18451_v48  ;;  %v18474_v7 = vld [vmem:[#allocation5 + $0x74] ss:$48 sps:$4 sm:$0xff]   ;;  %v17675_v48 = vld [vmem:[#allocation8 + $0x970] ss:$24 sps:$4 sm:$0xff]  }
 0x3b4   :  { %7381 = vmatmul.mubr.bf16.gmra.mrb[108].mxu0 %v18452_v53  ;;  %6811 = vmatprep.mubr.bf16.mxu1 %v18453_v25  ;;  %v17677_v27 = vld [vmem:[#allocation8 + $0x974] ss:$24 sps:$4 sm:$0xff]   ;;  %v17680_v25 = vld [vmem:[#allocation8 + $0x9a4] ss:$24 sps:$4 sm:$0xff]  }
 0x3b5   :  { %7390 = vmatprep.mubr.bf16.mxu0 %v18454_v6  ;;  %v17699_v34 = vld [vmem:[#allocation11 + $0x30] ss:$24 sps:$4 sm:$0xff]   ;;  %v17707_v53 = vld [vmem:[#allocation11 + $0x64] ss:$24 sps:$4 sm:$0xff]   ;;  %v17705_v6 = vld [vmem:[#allocation11 + $0x60] ss:$24 sps:$4 sm:$0xff]  }
 0x3bb   :  { %6812 = vmatmul.mubr.bf16.gmra.mrb[112].mxu1 %v18455_v57  ;;  %v18475_v57 = vld [vmem:[#allocation5 + $0x88] ss:$48 sps:$4 sm:$0xff]  }
 0x3bc   :  { %7391 = vmatmul.mubr.bf16.gmra.mrb[112].mxu0 %v18456_v59  ;;  %6821 = vmatprep.mubr.bf16.mxu1 %v18457_v43  ;;  %v18476_v59 = vld [vmem:[#allocation5 + $0x70] ss:$48 sps:$4 sm:$0xff]  }
 0x3bd   :  { %7400 = vmatprep.mubr.bf16.mxu0 %v18458_v2  ;;  %v17710_v43 = vld [vmem:[#allocation11 + $0x94] ss:$24 sps:$4 sm:$0xff]  }
 0x3be   :  { %v18477_v2 = vld [vmem:[#allocation5 + $0xec] ss:$48 sps:$4 sm:$0xff]  }
 0x3c3   :  { %6822 = vmatmul.mubr.bf16.gmra.mrb[116].mxu1 %v18459_v20  ;;  %v18478_v20 = vld [vmem:[#allocation5 + $0xd4] ss:$48 sps:$4 sm:$0xff]  }
 0x3c4   :  { %7401 = vmatmul.mubr.bf16.gmra.mrb[116].mxu0 %v18460_v5  ;;  %6831 = vmatprep.mubr.bf16.mxu1 %v18461_v55  ;;  %v17678_v5 = vld [vmem:[#allocation8 + $0x9a0] ss:$24 sps:$4 sm:$0xff]   ;;  %v17683_v55 = vld [vmem:[#allocation8 + $0x9d4] ss:$24 sps:$4 sm:$0xff]  }
 0x3c5   :  { %7410 = vmatprep.mubr.bf16.mxu0 %v18462_v4  ;;  %v17708_v4 = vld [vmem:[#allocation11 + $0x90] ss:$24 sps:$4 sm:$0xff]  }
 0x3cb   :  { %6832 = vmatmul.mubr.bf16.gmra.mrb[120].mxu1 %v18463_v63  ;;  %v17681_v63 = vld [vmem:[#allocation8 + $0x9d0] ss:$24 sps:$4 sm:$0xff]  }
 0x3cc   :  { %7411 = vmatmul.mubr.bf16.gmra.mrb[120].mxu0 %v18464_v14  ;;  %6841 = vmatprep.mubr.bf16.mxu1 %v18465_v56  ;;  %v17716_v14 = vld [vmem:[#allocation11 + $0xc4] ss:$24 sps:$4 sm:$0xff]  }
 0x3cd   :  { %7420 = vmatprep.mubr.bf16.mxu0 %v18466_v58  ;;  %v17686_v56 = vld [vmem:[#allocation8 + $0xa04] ss:$24 sps:$4 sm:$0xff]  }
 0x3ce   :  { %v17714_v58 = vld [vmem:[#allocation11 + $0xc0] ss:$24 sps:$4 sm:$0xff]  }
 0x3d3   :  { %6842 = vmatmul.mubr.bf16.gmra.mrb[124].mxu1 %v18467_v24  ;;  %v18479_v24 = vld [vmem:[#allocation5 + $0xe8] ss:$48 sps:$4 sm:$0xff]  }
 0x3d4   :  { %7421 = vmatmul.mubr.bf16.gmra.mrb[124].mxu0 %v18468_v3  ;;  %6884 = vmatprep.mubr.bf16.mxu1 %v18469_v44  ;;  %v18480_v3 = vld [vmem:[#allocation5 + $0xd0] ss:$48 sps:$4 sm:$0xff]  }
 0x3d5   :  { %7463 = vmatprep.mubr.bf16.mxu0 %v18470_v22  ;;  %v17719_v44 = vld [vmem:[#allocation11 + $0xf4] ss:$24 sps:$4 sm:$0xff]  }
 0x3d6   :  { %v18481_v22 = vld [vmem:[#allocation5 + $0x14c] ss:$48 sps:$4 sm:$0xff]  }
 0x3db   :  { %6885 = vmatmul.mubr.bf16.vlgmr.msra.gmra.mrb[64].mxu1 %v18471_v33  ;;  %v17717_v33 = vld [vmem:[#allocation11 + $0xf0] ss:$24 sps:$4 sm:$0xff]  }
 0x3dc   :  { %7464 = vmatmul.mubr.bf16.vlgmr.msra.gmra.mrb[64].mxu0 %v18472_v10  ;;  %6894 = vmatprep.mubr.bf16.mxu1 %v18473_v18  ;;  %v17687_v10 = vld [vmem:[#allocation8 + $0xa30] ss:$24 sps:$4 sm:$0xff]   ;;  %v17692_v18 = vld [vmem:[#allocation8 + $0xa64] ss:$24 sps:$4 sm:$0xff]  }
 0x3dd   :  { %7625 = vmatpush1.bf16.msra.mxu0 %v17669_v38  ;;  %7473 = vmatprep.mubr.bf16.mxu0 %v18474_v7  ;;  %v18482_v38 = vld [vmem:[#allocation5 + $0x134] ss:$48 sps:$4 sm:$0xff]   ;;  %v18483_v7 = vld [vmem:[#allocation5 + $0x148] ss:$48 sps:$4 sm:$0xff]  }
 0x3de   :  { %7626 = vmatprep.subr.bf16.mxu0 %v17674_v29  ;;  %10638 = vmatpush1.bf16.msra.mxu1 %v17696_v40  ;;  %v17684_v29 = vld [vmem:[#allocation8 + $0xa00] ss:$24 sps:$4 sm:$0xff]   ;;  %v17689_v40 = vld [vmem:[#allocation8 + $0xa34] ss:$24 sps:$4 sm:$0xff]  }
 0x3df   :  { %10639 = vmatprep.subr.bf16.mxu1 %v17701_v60  ;;  %v17725_v60 = vld [vmem:[#allocation11 + $0x124] ss:$24 sps:$4 sm:$0xff]  }
 0x3e1   :  { %7627 = vmatpush1.bf16.msra.mxu0 %v17672_v19  ;;  %v17723_v19 = vld [vmem:[#allocation11 + $0x120] ss:$24 sps:$4 sm:$0xff]  }
 0x3e2   :  { %7628 = vmatprep.subr.bf16.mxu0 %v17677_v27  ;;  %10640 = vmatpush1.bf16.msra.mxu1 %v17699_v34  ;;  %v18484_v27 = vld [vmem:[#allocation5 + $0x130] ss:$48 sps:$4 sm:$0xff]  }
 0x3e3   :  { %6895 = vmatmul.mubr.bf16.gmra.mrb[68].mxu1 %v18475_v57  ;;  %10641 = vmatprep.subr.bf16.mxu1 %v17707_v53  ;;  %v17728_v34 = vld [vmem:[#allocation11 + $0x154] ss:$24 sps:$4 sm:$0xff]   ;;  %v17726_v57 = vld [vmem:[#allocation11 + $0x150] ss:$24 sps:$4 sm:$0xff]  }
 0x3e4   :  { %7474 = vmatmul.mubr.bf16.gmra.mrb[68].mxu0 %v18476_v59  ;;  %6904 = vmatprep.mubr.bf16.mxu1 %v18477_v2  ;;  %v18486_v53 = vld [vmem:[#allocation5 + $0x194] ss:$48 sps:$4 sm:$0xff]   ;;  %v17693_v59 = vld [vmem:[#allocation8 + $0xa90] ss:$24 sps:$4 sm:$0xff]  }
 0x3e5   :  { %7483 = vmatprep.mubr.bf16.mxu0 %v18478_v20  ;;  %7629 = vmatpush1.bf16.msra.mxu0 %v17675_v48  ;;  %v18485_v48 = vld [vmem:[#allocation5 + $0x1ac] ss:$48 sps:$4 sm:$0xff]  }
 0x3e6   :  { %7630 = vmatprep.subr.bf16.mxu0 %v17680_v25  ;;  %10642 = vmatpush1.bf16.msra.mxu1 %v17705_v6  ;;  %v17690_v25 = vld [vmem:[#allocation8 + $0xa60] ss:$24 sps:$4 sm:$0xff]   ;;  %v17695_v6 = vld [vmem:[#allocation8 + $0xa94] ss:$24 sps:$4 sm:$0xff]   ;;  %v17704_v2 = vld [vmem:[#allocation8 + $0xac4] ss:$24 sps:$4 sm:$0xff]  }
 0x3e7   :  { %10643 = vmatprep.subr.bf16.mxu1 %v17710_v43  ;;  %v17734_v43 = vld [vmem:[#allocation11 + $0x184] ss:$24 sps:$4 sm:$0xff]   ;;  %v17732_v20 = vld [vmem:[#allocation11 + $0x180] ss:$24 sps:$4 sm:$0xff]  }
 0x3e9   :  { %7631 = vmatpush1.bf16.msra.mxu0 %v17678_v5  ;;  %v18487_v5 = vld [vmem:[#allocation5 + $0x1a8] ss:$48 sps:$4 sm:$0xff]  }
 0x3ea   :  { %7632 = vmatprep.subr.bf16.mxu0 %v17683_v55  ;;  %10644 = vmatpush1.bf16.msra.mxu1 %v17708_v4  ;;  %v18488_v55 = vld [vmem:[#allocation5 + $0x190] ss:$48 sps:$4 sm:$0xff]  }
 0x3eb   :  { %6905 = vmatmul.mubr.bf16.gmra.mrb[72].mxu1 %v18479_v24  ;;  %10645 = vmatprep.subr.bf16.mxu1 %v17716_v14  ;;  %v17737_v4 = vld [vmem:[#allocation11 + $0x1b4] ss:$24 sps:$4 sm:$0xff]   ;;  %v17735_v24 = vld [vmem:[#allocation11 + $0x1b0] ss:$24 sps:$4 sm:$0xff]  }
 0x3ec   :  { %7484 = vmatmul.mubr.bf16.gmra.mrb[72].mxu0 %v18480_v3  ;;  %6914 = vmatprep.mubr.bf16.mxu1 %v18481_v22  ;;  %v18490_v14 = vld [vmem:[#allocation5 + $0x1f4] ss:$48 sps:$4 sm:$0xff]   ;;  %v17711_v3 = vld [vmem:[#allocation8 + $0xaf0] ss:$24 sps:$4 sm:$0xff]  }
 0x3ed   :  { %7493 = vmatprep.mubr.bf16.mxu0 %v18482_v38  ;;  %7633 = vmatpush1.bf16.msra.mxu0 %v17681_v63  ;;  %v18489_v63 = vld [vmem:[#allocation5 + $0x20c] ss:$48 sps:$4 sm:$0xff]  }
 0x3ee   :  { %7634 = vmatprep.subr.bf16.mxu0 %v17686_v56  ;;  %10646 = vmatpush1.bf16.msra.mxu1 %v17714_v58  ;;  %v17702_v56 = vld [vmem:[#allocation8 + $0xac0] ss:$24 sps:$4 sm:$0xff]   ;;  %v17713_v58 = vld [vmem:[#allocation8 + $0xaf4] ss:$24 sps:$4 sm:$0xff]   ;;  %v17722_v22 = vld [vmem:[#allocation8 + $0xb24] ss:$24 sps:$4 sm:$0xff]  }
 0x3ef   :  { %10647 = vmatprep.subr.bf16.mxu1 %v17719_v44  ;;  %v17743_v44 = vld [vmem:[#allocation11 + $0x1e4] ss:$24 sps:$4 sm:$0xff]   ;;  %v17741_v38 = vld [vmem:[#allocation11 + $0x1e0] ss:$24 sps:$4 sm:$0xff]  }
 0x3f1   :  { %7635 = vmatpush1.bf16.msra.mxu0 %v17684_v29  ;;  %v18491_v29 = vld [vmem:[#allocation5 + $0x208] ss:$48 sps:$4 sm:$0xff]  }
 0x3f2   :  { %7636 = vmatprep.subr.bf16.mxu0 %v17689_v40  ;;  %10648 = vmatpush1.bf16.msra.mxu1 %v17717_v33  ;;  %v18492_v40 = vld [vmem:[#allocation5 + $0x1f0] ss:$48 sps:$4 sm:$0xff]  }
 0x3f3   :  { %6915 = vmatmul.mubr.bf16.gmra.mrb[76].mxu1 %v18483_v7  ;;  %10649 = vmatprep.subr.bf16.mxu1 %v17725_v60  ;;  %v17746_v33 = vld [vmem:[#allocation11 + $0x214] ss:$24 sps:$4 sm:$0xff]   ;;  %v17744_v7 = vld [vmem:[#allocation11 + $0x210] ss:$24 sps:$4 sm:$0xff]  }
 0x3f4   :  { %7494 = vmatmul.mubr.bf16.gmra.mrb[76].mxu0 %v18484_v27  ;;  %6924 = vmatprep.mubr.bf16.mxu1 %v18485_v48  ;;  %v18494_v60 = vld [vmem:[#allocation5 + $0x254] ss:$48 sps:$4 sm:$0xff]   ;;  %v17729_v27 = vld [vmem:[#allocation8 + $0xb50] ss:$24 sps:$4 sm:$0xff]  }
 0x3f5   :  { %7503 = vmatprep.mubr.bf16.mxu0 %v18486_v53  ;;  %7637 = vmatpush1.bf16.msra.mxu0 %v17687_v10  ;;  %v18493_v10 = vld [vmem:[#allocation5 + $0x26c] ss:$48 sps:$4 sm:$0xff]  }
 0x3f6   :  { %7638 = vmatprep.subr.bf16.mxu0 %v17692_v18  ;;  %10650 = vmatpush1.bf16.msra.mxu1 %v17723_v19  ;;  %v17720_v18 = vld [vmem:[#allocation8 + $0xb20] ss:$24 sps:$4 sm:$0xff]   ;;  %v17731_v19 = vld [vmem:[#allocation8 + $0xb54] ss:$24 sps:$4 sm:$0xff]   ;;  %v17740_v48 = vld [vmem:[#allocation8 + $0xb84] ss:$24 sps:$4 sm:$0xff]  }
 0x3f7   :  { %10651 = vmatprep.subr.bf16.mxu1 %v17728_v34  ;;  %v17752_v34 = vld [vmem:[#allocation11 + $0x244] ss:$24 sps:$4 sm:$0xff]   ;;  %v17750_v53 = vld [vmem:[#allocation11 + $0x240] ss:$24 sps:$4 sm:$0xff]  }
 0x3f9   :  { %7639 = vmatpush1.bf16.msra.mxu0 %v17690_v25  ;;  %v18495_v25 = vld [vmem:[#allocation5 + $0x268] ss:$48 sps:$4 sm:$0xff]  }
 0x3fa   :  { %7640 = vmatprep.subr.bf16.mxu0 %v17695_v6  ;;  %10652 = vmatpush1.bf16.msra.mxu1 %v17726_v57  ;;  %v18496_v6 = vld [vmem:[#allocation5 + $0x250] ss:$48 sps:$4 sm:$0xff]  }
 0x3fb   :  { %6925 = vmatmul.mubr.bf16.gmra.mrb[80].mxu1 %v18487_v5  ;;  %10653 = vmatprep.subr.bf16.mxu1 %v17734_v43  ;;  %v17755_v57 = vld [vmem:[#allocation11 + $0x274] ss:$24 sps:$4 sm:$0xff]   ;;  %v17753_v5 = vld [vmem:[#allocation11 + $0x270] ss:$24 sps:$4 sm:$0xff]  }
 0x3fc   :  { %7504 = vmatmul.mubr.bf16.gmra.mrb[80].mxu0 %v18488_v55  ;;  %6934 = vmatprep.mubr.bf16.mxu1 %v18489_v63  ;;  %v18498_v43 = vld [vmem:[#allocation5 + $0x2b4] ss:$48 sps:$4 sm:$0xff]   ;;  %v17747_v55 = vld [vmem:[#allocation8 + $0xbb0] ss:$24 sps:$4 sm:$0xff]  }
 0x3fd   :  { %7513 = vmatprep.mubr.bf16.mxu0 %v18490_v14  ;;  %7641 = vmatpush1.bf16.msra.mxu0 %v17693_v59  ;;  %v18497_v59 = vld [vmem:[#allocation5 + $0x2cc] ss:$48 sps:$4 sm:$0xff]  }
 0x3fe   :  { %7642 = vmatprep.subr.bf16.mxu0 %v17704_v2  ;;  %10654 = vmatpush1.bf16.msra.mxu1 %v17732_v20  ;;  %v17738_v2 = vld [vmem:[#allocation8 + $0xb80] ss:$24 sps:$4 sm:$0xff]   ;;  %v17749_v20 = vld [vmem:[#allocation8 + $0xbb4] ss:$24 sps:$4 sm:$0xff]   ;;  %v17758_v63 = vld [vmem:[#allocation8 + $0xbe4] ss:$24 sps:$4 sm:$0xff]  }
 0x3ff   :  { %10655 = vmatprep.subr.bf16.mxu1 %v17737_v4  ;;  %v17761_v4 = vld [vmem:[#allocation11 + $0x2a4] ss:$24 sps:$4 sm:$0xff]   ;;  %v17759_v14 = vld [vmem:[#allocation11 + $0x2a0] ss:$24 sps:$4 sm:$0xff]  }
 0x401   :  { %7643 = vmatpush1.bf16.msra.mxu0 %v17702_v56  ;;  %v18499_v56 = vld [vmem:[#allocation5 + $0x2c8] ss:$48 sps:$4 sm:$0xff]  }
 0x402   :  { %7644 = vmatprep.subr.bf16.mxu0 %v17713_v58  ;;  %10656 = vmatpush1.bf16.msra.mxu1 %v17735_v24  ;;  %v18500_v58 = vld [vmem:[#allocation5 + $0x2b0] ss:$48 sps:$4 sm:$0xff]  }
 0x403   :  { %6935 = vmatmul.mubr.bf16.gmra.mrb[84].mxu1 %v18491_v29  ;;  %10657 = vmatprep.subr.bf16.mxu1 %v17743_v44  ;;  %v17764_v24 = vld [vmem:[#allocation11 + $0x2d4] ss:$24 sps:$4 sm:$0xff]  }
 0x404   :  { %7514 = vmatmul.mubr.bf16.gmra.mrb[84].mxu0 %v18492_v40  ;;  %6944 = vmatprep.mubr.bf16.mxu1 %v18493_v10  ;;  %v18502_v44 = vld [vmem:[#allocation5 + $0x314] ss:$48 sps:$4 sm:$0xff]   ;;  %v18504_v10 = vld [vmem:[#allocation5 + $0x310] ss:$48 sps:$4 sm:$0xff]  }
 0x405   :  { %7523 = vmatprep.mubr.bf16.mxu0 %v18494_v60  ;;  %7645 = vmatpush1.bf16.msra.mxu0 %v17711_v3  ;;  %v18501_v3 = vld [vmem:[#allocation5 + $0x32c] ss:$48 sps:$4 sm:$0xff]  }
 0x406   :  { %7646 = vmatprep.subr.bf16.mxu0 %v17722_v22  ;;  %10658 = vmatpush1.bf16.msra.mxu1 %v17741_v38  ;;  %v17756_v22 = vld [vmem:[#allocation8 + $0xbe0] ss:$24 sps:$4 sm:$0xff]   ;;  %v17767_v29 = vld [vmem:[#allocation8 + $0xc14] ss:$24 sps:$4 sm:$0xff]  }
 0x407   :  { %10659 = vmatprep.subr.bf16.mxu1 %v17746_v33  ;;  %v17762_v38 = vld [vmem:[#allocation11 + $0x2d0] ss:$24 sps:$4 sm:$0xff]   ;;  %v17794_v40 = vld [vmem:[#allocation11 + $0x304] ss:$24 sps:$4 sm:$0xff]  }
 0x408   :  { %v18503_v33 = vld [vmem:[#allocation5 + $0x328] ss:$48 sps:$4 sm:$0xff]   ;;  %v18505_v60 = vld [vmem:[#allocation5 + $0x38c] ss:$48 sps:$4 sm:$0xff]  }
 0x409   :  { %7647 = vmatpush1.bf16.msra.mxu0 %v17720_v18  ;;  %v18506_v18 = vld [vmem:[#allocation5 + $0x374] ss:$48 sps:$4 sm:$0xff]  }
 0x40a   :  { %7648 = vmatprep.subr.bf16.mxu0 %v17731_v19  ;;  %10660 = vmatpush1.bf16.msra.mxu1 %v17744_v7  ;;  %v18507_v19 = vld [vmem:[#allocation5 + $0x388] ss:$48 sps:$4 sm:$0xff]   ;;  %v18508_v7 = vld [vmem:[#allocation5 + $0x370] ss:$48 sps:$4 sm:$0xff]  }
 0x40b   :  { %6945 = vmatmul.mubr.bf16.gmra.mrb[88].mxu1 %v18495_v25  ;;  %10661 = vmatprep.subr.bf16.mxu1 %v17752_v34  ;;  %v18510_v34 = vld [vmem:[#allocation5 + $0x3d4] ss:$48 sps:$4 sm:$0xff]   ;;  %v18513_v25 = vld [vmem:[#allocation5 + $0x44c] ss:$48 sps:$4 sm:$0xff]  }
 0x40c   :  { %7524 = vmatmul.mubr.bf16.gmra.mrb[88].mxu0 %v18496_v6  ;;  %6954 = vmatprep.mubr.bf16.mxu1 %v18497_v59  ;;  %v18514_v6 = vld [vmem:[#allocation5 + $0x434] ss:$48 sps:$4 sm:$0xff]   ;;  %v18516_v59 = vld [vmem:[#allocation5 + $0x430] ss:$48 sps:$4 sm:$0xff]  }
 0x40d   :  { %7533 = vmatprep.mubr.bf16.mxu0 %v18498_v43  ;;  %7649 = vmatpush1.bf16.msra.mxu0 %v17729_v27  ;;  %v18509_v27 = vld [vmem:[#allocation5 + $0x3ec] ss:$48 sps:$4 sm:$0xff]  }
 0x40e   :  { %7650 = vmatprep.subr.bf16.mxu0 %v17740_v48  ;;  %10662 = vmatpush1.bf16.msra.mxu1 %v17750_v53  ;;  %v18511_v48 = vld [vmem:[#allocation5 + $0x3e8] ss:$48 sps:$4 sm:$0xff]   ;;  %v18512_v53 = vld [vmem:[#allocation5 + $0x3d0] ss:$48 sps:$4 sm:$0xff]   ;;  %v18517_v43 = vld [vmem:[#allocation5 + $0x4ac] ss:$48 sps:$4 sm:$0xff]  }
 0x40f   :  { %10663 = vmatprep.subr.bf16.mxu1 %v17755_v57  ;;  %v18515_v57 = vld [vmem:[#allocation5 + $0x448] ss:$48 sps:$4 sm:$0xff]  }
 0x411   :  { %7651 = vmatpush1.bf16.msra.mxu0 %v17738_v2  ;;  %v18518_v2 = vld [vmem:[#allocation5 + $0x494] ss:$48 sps:$4 sm:$0xff]  }
 0x412   :  { %7652 = vmatprep.subr.bf16.mxu0 %v17749_v20  ;;  %10664 = vmatpush1.bf16.msra.mxu1 %v17753_v5  ;;  %v18519_v20 = vld [vmem:[#allocation5 + $0x4a8] ss:$48 sps:$4 sm:$0xff]   ;;  %v18520_v5 = vld [vmem:[#allocation5 + $0x490] ss:$48 sps:$4 sm:$0xff]  }
 0x413   :  { %6955 = vmatmul.mubr.bf16.gmra.mrb[92].mxu1 %v18499_v56  ;;  %10665 = vmatprep.subr.bf16.mxu1 %v17761_v4  ;;  %v18522_v4 = vld [vmem:[#allocation5 + $0x4f4] ss:$48 sps:$4 sm:$0xff]   ;;  %v18525_v56 = vld [vmem:[#allocation5 + $0x56c] ss:$48 sps:$4 sm:$0xff]  }
 0x414   :  { %7534 = vmatmul.mubr.bf16.gmra.mrb[92].mxu0 %v18500_v58  ;;  %6964 = vmatprep.mubr.bf16.mxu1 %v18501_v3  ;;  %v18526_v58 = vld [vmem:[#allocation5 + $0x554] ss:$48 sps:$4 sm:$0xff]   ;;  %v18528_v3 = vld [vmem:[#allocation5 + $0x550] ss:$48 sps:$4 sm:$0xff]  }
 0x415   :  { %7543 = vmatprep.mubr.bf16.mxu0 %v18502_v44  ;;  %7653 = vmatpush1.bf16.msra.mxu0 %v17747_v55  ;;  %v18521_v55 = vld [vmem:[#allocation5 + $0x50c] ss:$48 sps:$4 sm:$0xff]  }
 0x416   :  { %7654 = vmatprep.subr.bf16.mxu0 %v17758_v63  ;;  %10666 = vmatpush1.bf16.msra.mxu1 %v17759_v14  ;;  %v18523_v63 = vld [vmem:[#allocation5 + $0x508] ss:$48 sps:$4 sm:$0xff]   ;;  %v18524_v14 = vld [vmem:[#allocation5 + $0x4f0] ss:$48 sps:$4 sm:$0xff]   ;;  %v18529_v44 = vld [vmem:[#allocation5 + $0x5cc] ss:$48 sps:$4 sm:$0xff]  }
 0x417   :  { %10667 = vmatprep.subr.bf16.mxu1 %v17764_v24  ;;  %v18527_v24 = vld [vmem:[#allocation5 + $0x568] ss:$48 sps:$4 sm:$0xff]  }
 0x419   :  { %7655 = vmatpush1.bf16.msra.mxu0 %v17756_v22  ;;  %v18530_v22 = vld [vmem:[#allocation5 + $0x5b4] ss:$48 sps:$4 sm:$0xff]  }
 0x41a   :  { %10668 = vmatpush1.bf16.msra.mxu1 %v17762_v38  ;;  %7817 = vmatprep.subr.bf16.mxu0 %v17767_v29  ;;  %v18531_v38 = vld [vmem:[#allocation5 + $0x5c8] ss:$48 sps:$4 sm:$0xff]   ;;  %v18532_v29 = vld [vmem:[#allocation5 + $0x5b0] ss:$48 sps:$4 sm:$0xff]  }
 0x41b   :  { %6965 = vmatmul.mubr.bf16.gmra.mrb[96].mxu1 %v18503_v33  ;;  %10830 = vmatprep.subr.bf16.mxu1 %v17794_v40  ;;  %v18533_v40 = vld [vmem:[#allocation5 + $0x1c] ss:$48 sps:$4 sm:$0xff]   ;;  %v17765_v33 = vld [vmem:[#allocation8 + $0xc10] ss:$24 sps:$4 sm:$0xff]  }
 0x41c   :  { %7544 = vmatmul.mubr.bf16.gmra.mrb[96].mxu0 %v18504_v10  ;;  %6974 = vmatprep.mubr.bf16.mxu1 %v18505_v60  ;;  %v17770_v10 = vld [vmem:[#allocation8 + $0xc44] ss:$24 sps:$4 sm:$0xff]  }
 0x41d   :  { %7553 = vmatprep.mubr.bf16.mxu0 %v18506_v18  ;;  %v17792_v60 = vld [vmem:[#allocation11 + $0x300] ss:$24 sps:$4 sm:$0xff]  }
 0x41e   :  { %v18534_v18 = vld [vmem:[#allocation5 + $0x18] ss:$48 sps:$4 sm:$0xff]  }
 0x423   :  { %6975 = vmatmul.mubr.bf16.gmra.mrb[100].mxu1 %v18507_v19  ;;  %v17797_v19 = vld [vmem:[#allocation11 + $0x334] ss:$24 sps:$4 sm:$0xff]  }
 0x424   :  { %7554 = vmatmul.mubr.bf16.gmra.mrb[100].mxu0 %v18508_v7  ;;  %6984 = vmatprep.mubr.bf16.mxu1 %v18509_v27  ;;  %v17768_v7 = vld [vmem:[#allocation8 + $0xc40] ss:$24 sps:$4 sm:$0xff]   ;;  %v18535_v27 = vld [vmem:[#allocation5 + $0x7c] ss:$48 sps:$4 sm:$0xff]  }
 0x425   :  { %7563 = vmatprep.mubr.bf16.mxu0 %v18510_v34  ;;  %v17773_v34 = vld [vmem:[#allocation8 + $0xc74] ss:$24 sps:$4 sm:$0xff]  }
 0x42b   :  { %6985 = vmatmul.mubr.bf16.gmra.mrb[104].mxu1 %v18511_v48  ;;  %v17795_v48 = vld [vmem:[#allocation11 + $0x330] ss:$24 sps:$4 sm:$0xff]  }
 0x42c   :  { %7564 = vmatmul.mubr.bf16.gmra.mrb[104].mxu0 %v18512_v53  ;;  %6994 = vmatprep.mubr.bf16.mxu1 %v18513_v25  ;;  %v17771_v53 = vld [vmem:[#allocation8 + $0xc70] ss:$24 sps:$4 sm:$0xff]  }
 0x42d   :  { %7573 = vmatprep.mubr.bf16.mxu0 %v18514_v6  ;;  %v17803_v25 = vld [vmem:[#allocation11 + $0x364] ss:$24 sps:$4 sm:$0xff]  }
 0x42e   :  { %v17776_v6 = vld [vmem:[#allocation8 + $0xca4] ss:$24 sps:$4 sm:$0xff]  }
 0x433   :  { %6995 = vmatmul.mubr.bf16.gmra.mrb[108].mxu1 %v18515_v57  ;;  %v17801_v57 = vld [vmem:[#allocation11 + $0x360] ss:$24 sps:$4 sm:$0xff]  }
 0x434   :  { %7574 = vmatmul.mubr.bf16.gmra.mrb[108].mxu0 %v18516_v59  ;;  %7004 = vmatprep.mubr.bf16.mxu1 %v18517_v43  ;;  %v18536_v59 = vld [vmem:[#allocation5 + $0x78] ss:$48 sps:$4 sm:$0xff]  }
 0x435   :  { %7583 = vmatprep.mubr.bf16.mxu0 %v18518_v2  ;;  %v17806_v43 = vld [vmem:[#allocation11 + $0x394] ss:$24 sps:$4 sm:$0xff]  }
 0x436   :  { %v18537_v2 = vld [vmem:[#allocation5 + $0xdc] ss:$48 sps:$4 sm:$0xff]  }
 0x43b   :  { %7005 = vmatmul.mubr.bf16.gmra.mrb[112].mxu1 %v18519_v20  ;;  %v17774_v20 = vld [vmem:[#allocation8 + $0xca0] ss:$24 sps:$4 sm:$0xff]  }
 0x43c   :  { %7584 = vmatmul.mubr.bf16.gmra.mrb[112].mxu0 %v18520_v5  ;;  %7014 = vmatprep.mubr.bf16.mxu1 %v18521_v55  ;;  %v17779_v5 = vld [vmem:[#allocation8 + $0xcd4] ss:$24 sps:$4 sm:$0xff]  }
 0x43d   :  { %7593 = vmatprep.mubr.bf16.mxu0 %v18522_v4  ;;  %v17804_v55 = vld [vmem:[#allocation11 + $0x390] ss:$24 sps:$4 sm:$0xff]  }
 0x43e   :  { %v17777_v4 = vld [vmem:[#allocation8 + $0xcd0] ss:$24 sps:$4 sm:$0xff]  }
 0x443   :  { %7015 = vmatmul.mubr.bf16.gmra.mrb[116].mxu1 %v18523_v63  ;;  %v17812_v63 = vld [vmem:[#allocation11 + $0x3c4] ss:$24 sps:$4 sm:$0xff]  }
 0x444   :  { %7594 = vmatmul.mubr.bf16.gmra.mrb[116].mxu0 %v18524_v14  ;;  %7024 = vmatprep.mubr.bf16.mxu1 %v18525_v56  ;;  %v17782_v14 = vld [vmem:[#allocation8 + $0xd04] ss:$24 sps:$4 sm:$0xff]  }
 0x445   :  { %7603 = vmatprep.mubr.bf16.mxu0 %v18526_v58  ;;  %v17810_v56 = vld [vmem:[#allocation11 + $0x3c0] ss:$24 sps:$4 sm:$0xff]  }
 0x446   :  { %v18538_v58 = vld [vmem:[#allocation5 + $0xd8] ss:$48 sps:$4 sm:$0xff]  }
 0x44b   :  { %7025 = vmatmul.mubr.bf16.gmra.mrb[120].mxu1 %v18527_v24  ;;  %v17815_v24 = vld [vmem:[#allocation11 + $0x3f4] ss:$24 sps:$4 sm:$0xff]  }
 0x44c   :  { %7604 = vmatmul.mubr.bf16.gmra.mrb[120].mxu0 %v18528_v3  ;;  %7034 = vmatprep.mubr.bf16.mxu1 %v18529_v44  ;;  %v18539_v3 = vld [vmem:[#allocation5 + $0x13c] ss:$48 sps:$4 sm:$0xff]   ;;  %v17780_v44 = vld [vmem:[#allocation8 + $0xd00] ss:$24 sps:$4 sm:$0xff]  }
 0x44d   :  { %7613 = vmatprep.mubr.bf16.mxu0 %v18530_v22  ;;  %v17785_v22 = vld [vmem:[#allocation8 + $0xd34] ss:$24 sps:$4 sm:$0xff]  }
 0x453   :  { %7035 = vmatmul.mubr.bf16.gmra.mrb[124].mxu1 %v18531_v38  ;;  %v17813_v38 = vld [vmem:[#allocation11 + $0x3f0] ss:$24 sps:$4 sm:$0xff]  }
 0x454   :  { %7614 = vmatmul.mubr.bf16.gmra.mrb[124].mxu0 %v18532_v29  ;;  %10669 = vmatprep.mubr.bf16.mxu1 %v19183_v15  ;;  %v17783_v29 = vld [vmem:[#allocation8 + $0xd30] ss:$24 sps:$4 sm:$0xff]  }
 0x455   :  { %7656 = vmatprep.mubr.bf16.mxu0 %v18533_v40  ;;  %v17821_v40 = vld [vmem:[#allocation11 + $0x424] ss:$24 sps:$4 sm:$0xff]  }
 0x45b   :  { %10670 = vmatmul.mubr.bf16.vlgmr.msra.gmra.mrb[128].mxu1 %v19178_v26 }
 0x45c   :  { %7657 = vmatmul.mubr.bf16.vlgmr.msra.gmra.mrb[64].mxu0 %v18534_v18  ;;  %10679 = vmatprep.mubr.bf16.mxu1 %v19201_v8  ;;  %v17824_v18 = vld [vmem:[#allocation11 + $0x454] ss:$24 sps:$4 sm:$0xff]  }
 0x45d   :  { %7818 = vmatpush1.bf16.msra.mxu0 %v17765_v33  ;;  %7666 = vmatprep.mubr.bf16.mxu0 %v18535_v27  ;;  %v17788_v33 = vld [vmem:[#allocation8 + $0xd64] ss:$24 sps:$4 sm:$0xff]   ;;  %v17791_v27 = vld [vmem:[#allocation8 + $0xd94] ss:$24 sps:$4 sm:$0xff]  }
 0x45e   :  { %7819 = vmatprep.subr.bf16.mxu0 %v17770_v10  ;;  %10831 = vmatpush1.bf16.msra.mxu1 %v17792_v60  ;;  %v17819_v10 = vld [vmem:[#allocation11 + $0x420] ss:$24 sps:$4 sm:$0xff]  }
 0x45f   :  { %10832 = vmatprep.subr.bf16.mxu1 %v17797_v19  ;;  %v18540_v60 = vld [vmem:[#allocation5 + $0x138] ss:$48 sps:$4 sm:$0xff]   ;;  %v18541_v19 = vld [vmem:[#allocation5 + $0x19c] ss:$48 sps:$4 sm:$0xff]  }
 0x461   :  { %7820 = vmatpush1.bf16.msra.mxu0 %v17768_v7  ;;  %v17786_v7 = vld [vmem:[#allocation8 + $0xd60] ss:$24 sps:$4 sm:$0xff]  }
 0x462   :  { %7821 = vmatprep.subr.bf16.mxu0 %v17773_v34  ;;  %10833 = vmatpush1.bf16.msra.mxu1 %v17795_v48  ;;  %v17822_v34 = vld [vmem:[#allocation11 + $0x450] ss:$24 sps:$4 sm:$0xff]  }
 0x463   :  { %10680 = vmatmul.mubr.bf16.gmra.mrb[132].mxu1 %v19197_v41  ;;  %10834 = vmatprep.subr.bf16.mxu1 %v17803_v25  ;;  %v17789_v48 = vld [vmem:[#allocation8 + $0xd90] ss:$24 sps:$4 sm:$0xff]   ;;  %v17800_v25 = vld [vmem:[#allocation8 + $0xdc4] ss:$24 sps:$4 sm:$0xff]  }
 0x464   :  { %7667 = vmatmul.mubr.bf16.gmra.mrb[68].mxu0 %v18536_v59  ;;  %10689 = vmatprep.mubr.bf16.mxu1 %v19219_v36  ;;  %v17833_v59 = vld [vmem:[#allocation11 + $0x4b4] ss:$24 sps:$4 sm:$0xff]  }
 0x465   :  { %7676 = vmatprep.mubr.bf16.mxu0 %v18537_v2  ;;  %7822 = vmatpush1.bf16.msra.mxu0 %v17771_v53  ;;  %v17830_v53 = vld [vmem:[#allocation11 + $0x484] ss:$24 sps:$4 sm:$0xff]  }
 0x466   :  { %7823 = vmatprep.subr.bf16.mxu0 %v17776_v6  ;;  %10835 = vmatpush1.bf16.msra.mxu1 %v17801_v57  ;;  %v17828_v6 = vld [vmem:[#allocation11 + $0x480] ss:$24 sps:$4 sm:$0xff]  }
 0x467   :  { %10836 = vmatprep.subr.bf16.mxu1 %v17806_v43  ;;  %v18542_v57 = vld [vmem:[#allocation5 + $0x198] ss:$48 sps:$4 sm:$0xff]   ;;  %v18543_v43 = vld [vmem:[#allocation5 + $0x1fc] ss:$48 sps:$4 sm:$0xff]  }
 0x468   :  { %v17798_v2 = vld [vmem:[#allocation8 + $0xdc0] ss:$24 sps:$4 sm:$0xff]  }
 0x469   :  { %7824 = vmatpush1.bf16.msra.mxu0 %v17774_v20  ;;  %v17809_v20 = vld [vmem:[#allocation8 + $0xdf4] ss:$24 sps:$4 sm:$0xff]  }
 0x46a   :  { %7825 = vmatprep.subr.bf16.mxu0 %v17779_v5  ;;  %10837 = vmatpush1.bf16.msra.mxu1 %v17804_v55  ;;  %v17831_v5 = vld [vmem:[#allocation11 + $0x4b0] ss:$24 sps:$4 sm:$0xff]  }
 0x46b   :  { %10690 = vmatmul.mubr.bf16.gmra.mrb[136].mxu1 %v19215_v17  ;;  %10838 = vmatprep.subr.bf16.mxu1 %v17812_v63  ;;  %v17807_v55 = vld [vmem:[#allocation8 + $0xdf0] ss:$24 sps:$4 sm:$0xff]   ;;  %v17818_v63 = vld [vmem:[#allocation8 + $0xe24] ss:$24 sps:$4 sm:$0xff]  }
 0x46c   :  { %7677 = vmatmul.mubr.bf16.gmra.mrb[72].mxu0 %v18538_v58  ;;  %10699 = vmatprep.mubr.bf16.mxu1 %v19237_v13  ;;  %v17842_v58 = vld [vmem:[#allocation11 + $0x514] ss:$24 sps:$4 sm:$0xff]  }
 0x46d   :  { %7686 = vmatprep.mubr.bf16.mxu0 %v18539_v3  ;;  %7826 = vmatpush1.bf16.msra.mxu0 %v17777_v4  ;;  %v17839_v4 = vld [vmem:[#allocation11 + $0x4e4] ss:$24 sps:$4 sm:$0xff]  }
 0x46e   :  { %7827 = vmatprep.subr.bf16.mxu0 %v17782_v14  ;;  %10839 = vmatpush1.bf16.msra.mxu1 %v17810_v56  ;;  %v17837_v14 = vld [vmem:[#allocation11 + $0x4e0] ss:$24 sps:$4 sm:$0xff]  }
 0x46f   :  { %10840 = vmatprep.subr.bf16.mxu1 %v17815_v24  ;;  %v18544_v56 = vld [vmem:[#allocation5 + $0x1f8] ss:$48 sps:$4 sm:$0xff]   ;;  %v18545_v24 = vld [vmem:[#allocation5 + $0x25c] ss:$48 sps:$4 sm:$0xff]  }
 0x470   :  { %v17816_v3 = vld [vmem:[#allocation8 + $0xe20] ss:$24 sps:$4 sm:$0xff]  }
 0x471   :  { %7828 = vmatpush1.bf16.msra.mxu0 %v17780_v44  ;;  %v17827_v44 = vld [vmem:[#allocation8 + $0xe54] ss:$24 sps:$4 sm:$0xff]  }
 0x472   :  { %7829 = vmatprep.subr.bf16.mxu0 %v17785_v22  ;;  %10841 = vmatpush1.bf16.msra.mxu1 %v17813_v38  ;;  %v17840_v22 = vld [vmem:[#allocation11 + $0x510] ss:$24 sps:$4 sm:$0xff]  }
 0x473   :  { %10700 = vmatmul.mubr.bf16.gmra.mrb[140].mxu1 %v19233_v31  ;;  %10842 = vmatprep.subr.bf16.mxu1 %v17821_v40  ;;  %v17825_v38 = vld [vmem:[#allocation8 + $0xe50] ss:$24 sps:$4 sm:$0xff]   ;;  %v17836_v40 = vld [vmem:[#allocation8 + $0xe84] ss:$24 sps:$4 sm:$0xff]  }
 0x474   :  { %7687 = vmatmul.mubr.bf16.gmra.mrb[76].mxu0 %v18540_v60  ;;  %10709 = vmatprep.mubr.bf16.mxu1 %v19255_v47  ;;  %v17851_v60 = vld [vmem:[#allocation11 + $0x574] ss:$24 sps:$4 sm:$0xff]  }
 0x475   :  { %7696 = vmatprep.mubr.bf16.mxu0 %v18541_v19  ;;  %7830 = vmatpush1.bf16.msra.mxu0 %v17783_v29  ;;  %v17848_v29 = vld [vmem:[#allocation11 + $0x544] ss:$24 sps:$4 sm:$0xff]  }
 0x476   :  { %7831 = vmatprep.subr.bf16.mxu0 %v17788_v33  ;;  %10843 = vmatpush1.bf16.msra.mxu1 %v17819_v10  ;;  %v17846_v33 = vld [vmem:[#allocation11 + $0x540] ss:$24 sps:$4 sm:$0xff]  }
 0x477   :  { %10844 = vmatprep.subr.bf16.mxu1 %v17824_v18  ;;  %v18546_v10 = vld [vmem:[#allocation5 + $0x258] ss:$48 sps:$4 sm:$0xff]   ;;  %v18547_v18 = vld [vmem:[#allocation5 + $0x2bc] ss:$48 sps:$4 sm:$0xff]  }
 0x478   :  { %v17834_v19 = vld [vmem:[#allocation8 + $0xe80] ss:$24 sps:$4 sm:$0xff]  }
 0x479   :  { %7832 = vmatpush1.bf16.msra.mxu0 %v17786_v7  ;;  %v17845_v7 = vld [vmem:[#allocation8 + $0xeb4] ss:$24 sps:$4 sm:$0xff]  }
 0x47a   :  { %7833 = vmatprep.subr.bf16.mxu0 %v17791_v27  ;;  %10845 = vmatpush1.bf16.msra.mxu1 %v17822_v34  ;;  %v17849_v27 = vld [vmem:[#allocation11 + $0x570] ss:$24 sps:$4 sm:$0xff]  }
 0x47b   :  { %10710 = vmatmul.mubr.bf16.gmra.mrb[144].mxu1 %v19251_v12  ;;  %10846 = vmatprep.subr.bf16.mxu1 %v17830_v53  ;;  %v17843_v34 = vld [vmem:[#allocation8 + $0xeb0] ss:$24 sps:$4 sm:$0xff]   ;;  %v17854_v53 = vld [vmem:[#allocation8 + $0xee4] ss:$24 sps:$4 sm:$0xff]  }
 0x47c   :  { %7697 = vmatmul.mubr.bf16.gmra.mrb[80].mxu0 %v18542_v57  ;;  %10719 = vmatprep.mubr.bf16.mxu1 %v19275_v30  ;;  %v17860_v57 = vld [vmem:[#allocation11 + $0x5d4] ss:$24 sps:$4 sm:$0xff]  }
 0x47d   :  { %7706 = vmatprep.mubr.bf16.mxu0 %v18543_v43  ;;  %7834 = vmatpush1.bf16.msra.mxu0 %v17789_v48  ;;  %v17857_v48 = vld [vmem:[#allocation11 + $0x5a4] ss:$24 sps:$4 sm:$0xff]  }
 0x47e   :  { %7835 = vmatprep.subr.bf16.mxu0 %v17800_v25  ;;  %10847 = vmatpush1.bf16.msra.mxu1 %v17828_v6  ;;  %v17855_v25 = vld [vmem:[#allocation11 + $0x5a0] ss:$24 sps:$4 sm:$0xff]  }
 0x47f   :  { %10848 = vmatprep.subr.bf16.mxu1 %v17833_v59  ;;  %v18548_v6 = vld [vmem:[#allocation5 + $0x2b8] ss:$48 sps:$4 sm:$0xff]   ;;  %v18549_v59 = vld [vmem:[#allocation5 + $0x31c] ss:$48 sps:$4 sm:$0xff]  }
 0x480   :  { %v17852_v43 = vld [vmem:[#allocation8 + $0xee0] ss:$24 sps:$4 sm:$0xff]  }
 0x481   :  { %7836 = vmatpush1.bf16.msra.mxu0 %v17798_v2  ;;  %v17858_v2 = vld [vmem:[#allocation11 + $0x5d0] ss:$24 sps:$4 sm:$0xff]  }
 0x482   :  { %7837 = vmatprep.subr.bf16.mxu0 %v17809_v20  ;;  %10849 = vmatpush1.bf16.msra.mxu1 %v17831_v5  ;;  %v17863_v20 = vld [vmem:[#allocation8 + $0xf14] ss:$24 sps:$4 sm:$0xff]   ;;  %v18550_v5 = vld [vmem:[#allocation5 + $0x318] ss:$48 sps:$4 sm:$0xff]  }
 0x483   :  { %10720 = vmatmul.mubr.bf16.gmra.mrb[148].mxu1 %v19271_v0  ;;  %10850 = vmatprep.subr.bf16.mxu1 %v17839_v4  ;;  %v18552_v4 = vld [vmem:[#allocation5 + $0x378] ss:$48 sps:$4 sm:$0xff]  }
 0x484   :  { %7707 = vmatmul.mubr.bf16.gmra.mrb[84].mxu0 %v18544_v56  ;;  %10729 = vmatprep.mubr.bf16.mxu1 %v19295_v35 }
 0x485   :  { %7716 = vmatprep.mubr.bf16.mxu0 %v18545_v24  ;;  %7838 = vmatpush1.bf16.msra.mxu0 %v17807_v55  ;;  %v18551_v55 = vld [vmem:[#allocation5 + $0x37c] ss:$48 sps:$4 sm:$0xff]   ;;  %v18554_v24 = vld [vmem:[#allocation5 + $0x3d8] ss:$48 sps:$4 sm:$0xff]  }
 0x486   :  { %7839 = vmatprep.subr.bf16.mxu0 %v17818_v63  ;;  %10851 = vmatpush1.bf16.msra.mxu1 %v17837_v14  ;;  %v18553_v63 = vld [vmem:[#allocation5 + $0x3dc] ss:$48 sps:$4 sm:$0xff]   ;;  %v20785_v14 = vld [vmem:[#allocation38_spill] sm:$0xff] }
 0x487   :  { %10852 = vmatprep.subr.bf16.mxu1 %v17842_v58  ;;  %v20631_v56 = vsub.s32 2, %v20785_v14  ;;  %v20630_v58 = vsub.s32 3, %v20785_v14 }
 0x489   :  { %7840 = vmatpush1.bf16.msra.mxu0 %v17816_v3  ;;  %v18555_v3 = vld [vmem:[#allocation10] sm:$0x3f] }
 0x48a   :  { %7841 = vmatprep.subr.bf16.mxu0 %v17827_v44  ;;  %10853 = vmatpush1.bf16.msra.mxu1 %v17840_v22  ;;  %v19490_v44 = vrot.slane %v18555_v3, %v20631_v56  ;;  %v19495_v22 = vrot.slane %v18555_v3, %v20630_v58 }
 0x48b   :  { %10730 = vmatmul.mubr.bf16.gmra.mrb[152].mxu1 %v19291_v32  ;;  %10854 = vmatprep.subr.bf16.mxu1 %v17848_v29 }
 0x48c   :  { %7717 = vmatmul.mubr.bf16.gmra.mrb[88].mxu0 %v18546_v10  ;;  %10739 = vmatprep.mubr.bf16.mxu1 %v19315_v16 }
 0x48d   :  { %7726 = vmatprep.mubr.bf16.mxu0 %v18547_v18  ;;  %7842 = vmatpush1.bf16.msra.mxu0 %v17825_v38  ;;  %v18556_v38 = vld [vmem:[#allocation5 + $0x43c] ss:$48 sps:$4 sm:$0xff]  }
 0x48e   :  { %7843 = vmatprep.subr.bf16.mxu0 %v17836_v40  ;;  %10855 = vmatpush1.bf16.msra.mxu1 %v17846_v33 }
 0x48f   :  { %10856 = vmatprep.subr.bf16.mxu1 %v17851_v60 }
 0x491   :  { %7844 = vmatpush1.bf16.msra.mxu0 %v17834_v19 }
 0x492   :  { %7845 = vmatprep.subr.bf16.mxu0 %v17845_v7  ;;  %10857 = vmatpush1.bf16.msra.mxu1 %v17849_v27 }
 0x493   :  { %10740 = vmatmul.mubr.bf16.gmra.mrb[156].mxu1 %v19311_v39  ;;  %10858 = vmatprep.subr.bf16.mxu1 %v17857_v48 }
 0x494   :  { %7727 = vmatmul.mubr.bf16.gmra.mrb[92].mxu0 %v18548_v6  ;;  %10749 = vmatprep.mubr.bf16.mxu1 %v19335_v11  ;;  %v18558_v6 = vld [vmem:[#allocation5 + $0x49c] ss:$48 sps:$4 sm:$0xff]  }
 0x495   :  { %7736 = vmatprep.mubr.bf16.mxu0 %v18549_v59  ;;  %7846 = vmatpush1.bf16.msra.mxu0 %v17843_v34 }
 0x496   :  { %7847 = vmatprep.subr.bf16.mxu0 %v17854_v53  ;;  %10859 = vmatpush1.bf16.msra.mxu1 %v17855_v25  ;;  %v18557_v53 = vld [vmem:[#allocation5 + $0x438] ss:$48 sps:$4 sm:$0xff]  }
 0x497   :  { %10860 = vmatprep.subr.bf16.mxu1 %v17860_v57 }
 0x499   :  { %7848 = vmatpush1.bf16.msra.mxu0 %v17852_v43 }
 0x49a   :  { %10861 = vmatpush1.bf16.msra.mxu1 %v17858_v2  ;;  %8010 = vmatprep.subr.bf16.mxu0 %v17863_v20 }
 0x49b   :  { %10750 = vmatmul.mubr.bf16.gmra.mrb[160].mxu1 %v19331_v21 }
 0x49c   :  { %7737 = vmatmul.mubr.bf16.gmra.mrb[96].mxu0 %v18550_v5  ;;  %10759 = vmatprep.mubr.bf16.mxu1 %v19355_v54 }
 0x49d   :  { %7746 = vmatprep.mubr.bf16.mxu0 %v18551_v55 }
 0x4a3   :  { %10760 = vmatmul.mubr.bf16.gmra.mrb[164].mxu1 %v19351_v50 }
 0x4a4   :  { %7747 = vmatmul.mubr.bf16.gmra.mrb[100].mxu0 %v18552_v4  ;;  %10769 = vmatprep.mubr.bf16.mxu1 %v19375_v9 }
 0x4a5   :  { %7756 = vmatprep.mubr.bf16.mxu0 %v18553_v63 }
 0x4ab   :  { %10770 = vmatmul.mubr.bf16.gmra.mrb[168].mxu1 %v19371_v42 }
 0x4ac   :  { %7757 = vmatmul.mubr.bf16.gmra.mrb[104].mxu0 %v18554_v24  ;;  %10779 = vmatprep.mubr.bf16.mxu1 %v19395_v62 }
 0x4ad   :  { %7766 = vmatprep.mubr.bf16.mxu0 %v18556_v38 }
 0x4ae   :  { %v6886_v29 = vpop.f32.mrb[64].mxu1 }
 0x4af   :  { %v15051_v40 = vadd.f32 %v6886_v29, %v19490_v44  ;;  %v6888_v33 = vpop.f32.mrb[65].mxu1 }
 0x4b0   :  { %v15052_v10 = vadd.f32 %v6888_v33, %v19495_v22  ;;  %v6890_v60 = vpop.f32.mrb[66].mxu1 }
 0x4b1   :  { %v8399_v18 = vmul.f32 %v15051_v40, %v19163_v46  ;;  %v15053_v19 = vadd.f32 %v6890_v60, %v19490_v44  ;;  %v6892_v7 = vpop.f32.mrb[67].mxu1  ;;  %vm8205_vm0 = vcmp.gt.f32.partialorder %v15051_v40, 0.0 }
 0x4b2   :  { %v8400_v27 = vmul.f32 %v15052_v10, %v19163_v46  ;;  %v15054_v34 = vadd.f32 %v6892_v7, %v19495_v22  ;;  %vm8206_vm1 = vcmp.gt.f32.partialorder %v15052_v10, 0.0  ;;  %v18560_v7 = vld [vmem:[#allocation5 + $0x4fc] ss:$48 sps:$4 sm:$0xff]  }
 0x4b3   :  { %vm8211_vm2 = vcmp.gt.f32.partialorder %v15053_v19, 0.0  ;;  %v8405_v48 = vmul.f32 %v15053_v19, %v19163_v46  ;;  %10780 = vmatmul.mubr.bf16.gmra.mrb[172].mxu1 %v19391_v52  ;;  %v8591_v57 = vsel %vm8205_vm0, %v15051_v40, %v8399_v18  ;;  %v18559_v18 = vld [vmem:[#allocation5 + $0x498] ss:$48 sps:$4 sm:$0xff]  }
 0x4b4   :  { %7767 = vmatmul.mubr.bf16.gmra.mrb[108].mxu0 %v18557_v53  ;;  %vm8212_vm3 = vcmp.gt.f32.partialorder %v15054_v34, 0.0  ;;  %v8406_v25 = vmul.f32 %v15054_v34, %v19163_v46  ;;  %10789 = vmatprep.mubr.bf16.mxu1 %v19415_v1  ;;  %v8592_v20 = vsel %vm8206_vm1, %v15052_v10, %v8400_v27 }
 0x4b5   :  { %7776 = vmatprep.mubr.bf16.mxu0 %v18558_v6  ;;  %v8597_v59 = vsel %vm8211_vm2, %v15053_v19, %v8405_v48 }
 0x4b6   :  { %v19507_v43 = vpack.c.bf16 %v8597_v59, %v8591_v57  ;;  %v6896_v2 = vpop.f32.mrb[68].mxu1  ;;  %v8598_v5 = vsel %vm8212_vm3, %v15054_v34, %v8406_v25 }
 0x4b7   :  { %v15055_v55 = vadd.f32 %v6896_v2, %v19490_v44  ;;  %v6898_v4 = vpop.f32.mrb[69].mxu1  ;;  %v19510_v63 = vpack.c.bf16 %v8598_v5, %v8592_v20 }
 0x4b8   :  { %20786 = vst [vmem:[#allocation31_spill] sm:$0xff] %v19507_v43  ;;  %v15056_v24 = vadd.f32 %v6898_v4, %v19495_v22  ;;  %v6900_v3 = vpop.f32.mrb[70].mxu1 }
 0x4b9   :  { %20787 = vst [vmem:[#allocation32_spill] sm:$0xff] %v19510_v63  ;;  %v8411_v38 = vmul.f32 %v15055_v55, %v19163_v46  ;;  %v15057_v29 = vadd.f32 %v6900_v3, %v19490_v44  ;;  %v6902_v33 = vpop.f32.mrb[71].mxu1  ;;  %vm8217_vm4 = vcmp.gt.f32.partialorder %v15055_v55, 0.0 }
 0x4ba   :  { %v8412_v40 = vmul.f32 %v15056_v24, %v19163_v46  ;;  %v15058_v60 = vadd.f32 %v6902_v33, %v19495_v22  ;;  %vm8218_vm5 = vcmp.gt.f32.partialorder %v15056_v24, 0.0 }
 0x4bb   :  { %vm8223_vm6 = vcmp.gt.f32.partialorder %v15057_v29, 0.0  ;;  %v8417_v10 = vmul.f32 %v15057_v29, %v19163_v46  ;;  %10790 = vmatmul.mubr.bf16.gmra.mrb[176].mxu1 %v19411_v49  ;;  %v8603_v27 = vsel %vm8217_vm4, %v15055_v55, %v8411_v38 }
 0x4bc   :  { %7777 = vmatmul.mubr.bf16.gmra.mrb[112].mxu0 %v18559_v18  ;;  %vm8224_vm7 = vcmp.gt.f32.partialorder %v15058_v60, 0.0  ;;  %v8418_v19 = vmul.f32 %v15058_v60, %v19163_v46  ;;  %10799 = vmatprep.mubr.bf16.mxu1 %v19433_v37  ;;  %v8604_v53 = vsel %vm8218_vm5, %v15056_v24, %v8412_v40 }
 0x4bd   :  { %7786 = vmatprep.mubr.bf16.mxu0 %v18560_v7  ;;  %v8609_v34 = vsel %vm8223_vm6, %v15057_v29, %v8417_v10  ;;  %v18561_v29 = vld [vmem:[#allocation5 + $0x4f8] ss:$48 sps:$4 sm:$0xff]  }
 0x4be   :  { %v6906_v48 = vpop.f32.mrb[72].mxu1  ;;  %v8610_v25 = vsel %vm8224_vm7, %v15058_v60, %v8418_v19  ;;  %v19521_v6 = vpack.c.bf16 %v8609_v34, %v8603_v27  ;;  %v18562_v60 = vld [vmem:[#allocation5 + $0x55c] ss:$48 sps:$4 sm:$0xff]  }
 0x4bf   :  { %v15059_v57 = vadd.f32 %v6906_v48, %v19490_v44  ;;  %v6908_v59 = vpop.f32.mrb[73].mxu1  ;;  %v19524_v2 = vpack.c.bf16 %v8610_v25, %v8604_v53 }
 0x4c0   :  { %20788 = vst [vmem:[#allocation33_spill] sm:$0xff] %v19521_v6  ;;  %v15060_v20 = vadd.f32 %v6908_v59, %v19495_v22  ;;  %v6910_v5 = vpop.f32.mrb[74].mxu1 }
 0x4c1   :  { %20789 = vst [vmem:[#allocation34_spill] sm:$0xff] %v19524_v2  ;;  %v8423_v4 = vmul.f32 %v15059_v57, %v19163_v46  ;;  %v15061_v3 = vadd.f32 %v6910_v5, %v19490_v44  ;;  %v6912_v33 = vpop.f32.mrb[75].mxu1  ;;  %vm8229_vm8 = vcmp.gt.f32.partialorder %v15059_v57, 0.0 }
 0x4c2   :  { %v8424_v55 = vmul.f32 %v15060_v20, %v19163_v46  ;;  %v15062_v24 = vadd.f32 %v6912_v33, %v19495_v22  ;;  %vm8230_vm9 = vcmp.gt.f32.partialorder %v15060_v20, 0.0 }
 0x4c3   :  { %vm8235_vm10 = vcmp.gt.f32.partialorder %v15061_v3, 0.0  ;;  %v8429_v38 = vmul.f32 %v15061_v3, %v19163_v46  ;;  %10800 = vmatmul.mubr.bf16.gmra.mrb[180].mxu1 %v19429_v28  ;;  %v8615_v10 = vsel %vm8229_vm8, %v15059_v57, %v8423_v4 }
 0x4c4   :  { %7787 = vmatmul.mubr.bf16.gmra.mrb[116].mxu0 %v18561_v29  ;;  %vm8236_vm11 = vcmp.gt.f32.partialorder %v15062_v24, 0.0  ;;  %v8430_v40 = vmul.f32 %v15062_v24, %v19163_v46  ;;  %10809 = vmatprep.mubr.bf16.mxu1 %v19451_v51  ;;  %v8616_v7 = vsel %vm8230_vm9, %v15060_v20, %v8424_v55 }
 0x4c5   :  { %7796 = vmatprep.mubr.bf16.mxu0 %v18562_v60  ;;  %v8621_v18 = vsel %vm8235_vm10, %v15061_v3, %v8429_v38  ;;  %v18563_v3 = vld [vmem:[#allocation5 + $0x558] ss:$48 sps:$4 sm:$0xff]  }
 0x4c6   :  { %v6916_v19 = vpop.f32.mrb[76].mxu1  ;;  %v8622_v27 = vsel %vm8236_vm11, %v15062_v24, %v8430_v40  ;;  %v19535_v34 = vpack.c.bf16 %v8621_v18, %v8615_v10  ;;  %v18564_v24 = vld [vmem:[#allocation5 + $0x5bc] ss:$48 sps:$4 sm:$0xff]  }
 0x4c7   :  { %v15063_v48 = vadd.f32 %v6916_v19, %v19490_v44  ;;  %v6918_v53 = vpop.f32.mrb[77].mxu1  ;;  %v19538_v25 = vpack.c.bf16 %v8622_v27, %v8616_v7 }
 0x4c8   :  { %20790 = vst [vmem:[#allocation35_spill] sm:$0xff] %v19535_v34  ;;  %v15064_v59 = vadd.f32 %v6918_v53, %v19495_v22  ;;  %v6920_v5 = vpop.f32.mrb[78].mxu1 }
 0x4c9   :  { %20791 = vst [vmem:[#allocation36_spill] sm:$0xff] %v19538_v25  ;;  %v8435_v33 = vmul.f32 %v15063_v48, %v19163_v46  ;;  %v15065_v29 = vadd.f32 %v6920_v5, %v19490_v44  ;;  %v6922_v60 = vpop.f32.mrb[79].mxu1  ;;  %vm8241_vm12 = vcmp.gt.f32.partialorder %v15063_v48, 0.0 }
 0x4ca   :  { %v8436_v57 = vmul.f32 %v15064_v59, %v19163_v46  ;;  %v15066_v20 = vadd.f32 %v6922_v60, %v19495_v22  ;;  %vm8242_vm13 = vcmp.gt.f32.partialorder %v15064_v59, 0.0 }
 0x4cb   :  { %vm8247_vm14 = vcmp.gt.f32.partialorder %v15065_v29, 0.0  ;;  %v8441_v4 = vmul.f32 %v15065_v29, %v19163_v46  ;;  %10810 = vmatmul.mubr.bf16.gmra.mrb[184].mxu1 %v19447_v61  ;;  %v8627_v38 = vsel %vm8241_vm12, %v15063_v48, %v8435_v33 }
 0x4cc   :  { %7797 = vmatmul.mubr.bf16.gmra.mrb[120].mxu0 %v18563_v3  ;;  %vm8248_vm15 = vcmp.gt.f32.partialorder %v15066_v20, 0.0  ;;  %v8442_v55 = vmul.f32 %v15066_v20, %v19163_v46  ;;  %10819 = vmatprep.mubr.bf16.mxu1 %v19462_v23  ;;  %v8628_v18 = vsel %vm8242_vm13, %v15064_v59, %v8436_v57 }
 0x4cd   :  { %7806 = vmatprep.mubr.bf16.mxu0 %v18564_v24  ;;  %v8633_v40 = vsel %vm8247_vm14, %v15065_v29, %v8441_v4  ;;  %v18565_v29 = vld [vmem:[#allocation5 + $0x5b8] ss:$48 sps:$4 sm:$0xff]  }
 0x4ce   :  { %v6926_v10 = vpop.f32.mrb[80].mxu1  ;;  %v8634_v19 = vsel %vm8248_vm15, %v15066_v20, %v8442_v55  ;;  %v19549_v7 = vpack.c.bf16 %v8633_v40, %v8627_v38  ;;  %v18566_v20 = vld [vmem:[#allocation5 + $0x24] ss:$48 sps:$4 sm:$0xff]  }
 0x4cf   :  { %v15067_v27 = vadd.f32 %v6926_v10, %v19490_v44  ;;  %v6928_v53 = vpop.f32.mrb[81].mxu1  ;;  %v19552_v5 = vpack.c.bf16 %v8634_v19, %v8628_v18 }
 0x4d0   :  { %20792 = vst [vmem:[#allocation37_spill] sm:$0xff] %v19549_v7  ;;  %v15068_v60 = vadd.f32 %v6928_v53, %v19495_v22  ;;  %v6930_v3 = vpop.f32.mrb[82].mxu1 }
 0x4d1   :  { %20793 = vst [vmem:[#allocation42_spill] sm:$0xff] %v19552_v5  ;;  %v8447_v58 = vmul.f32 %v15067_v27, %v19163_v46  ;;  %v15069_v56 = vadd.f32 %v6930_v3, %v19490_v44  ;;  %v6932_v24 = vpop.f32.mrb[83].mxu1  ;;  %vm8253_vm0 = vcmp.gt.f32.partialorder %v15067_v27, 0.0 }
 0x4d2   :  { %v8448_v48 = vmul.f32 %v15068_v60, %v19163_v46  ;;  %v15070_v59 = vadd.f32 %v6932_v24, %v19495_v22  ;;  %vm8254_vm1 = vcmp.gt.f32.partialorder %v15068_v60, 0.0 }
 0x4d3   :  { %vm8259_vm2 = vcmp.gt.f32.partialorder %v15069_v56, 0.0  ;;  %v8453_v33 = vmul.f32 %v15069_v56, %v19163_v46  ;;  %10820 = vmatmul.mubr.bf16.gmra.mrb[188].mxu1 %v19460_v45  ;;  %v8639_v4 = vsel %vm8253_vm0, %v15067_v27, %v8447_v58  ;;  %v17861_v45 = vld [vmem:[#allocation8 + $0xf10] ss:$24 sps:$4 sm:$0xff]  }
 0x4d4   :  { %7807 = vmatmul.mubr.bf16.gmra.mrb[124].mxu0 %v18565_v29  ;;  %vm8260_vm3 = vcmp.gt.f32.partialorder %v15070_v59, 0.0  ;;  %v8454_v57 = vmul.f32 %v15070_v59, %v19163_v46  ;;  %10862 = vmatprep.mubr.bf16.mxu1 %v19510_v63  ;;  %v8640_v40 = vsel %vm8254_vm1, %v15068_v60, %v8448_v48 }
 0x4d5   :  { %7849 = vmatprep.mubr.bf16.mxu0 %v18566_v20  ;;  %v8645_v55 = vsel %vm8259_vm2, %v15069_v56, %v8453_v33  ;;  %v17866_v56 = vld [vmem:[#allocation8 + $0xf44] ss:$24 sps:$4 sm:$0xff]  }
 0x4d6   :  { %v6936_v38 = vpop.f32.mrb[84].mxu1  ;;  %v8646_v10 = vsel %vm8260_vm3, %v15070_v59, %v8454_v57  ;;  %v19563_v18 = vpack.c.bf16 %v8645_v55, %v8639_v4  ;;  %v18567_v59 = vld [vmem:[#allocation5 + $0x20] ss:$48 sps:$4 sm:$0xff]   ;;  %v18568_v4 = vld [vmem:[#allocation5 + $0x84] ss:$48 sps:$4 sm:$0xff]  }
 0x4d7   :  { %v15071_v19 = vadd.f32 %v6936_v38, %v19490_v44  ;;  %v6938_v53 = vpop.f32.mrb[85].mxu1  ;;  %v19566_v3 = vpack.c.bf16 %v8646_v10, %v8640_v40  ;;  %v17864_v57 = vld [vmem:[#allocation8 + $0xf40] ss:$24 sps:$4 sm:$0xff]   ;;  %v17869_v55 = vld [vmem:[#allocation8 + $0xf74] ss:$24 sps:$4 sm:$0xff]  }
 0x4d8   :  { %20794 = vst [vmem:[#allocation43_spill] sm:$0xff] %v19563_v18  ;;  %v15072_v24 = vadd.f32 %v6938_v53, %v19495_v22  ;;  %v6940_v29 = vpop.f32.mrb[86].mxu1 }
 0x4d9   :  { %20795 = vst [vmem:[#allocation44_spill] sm:$0xff] %v19566_v3  ;;  %v8459_v63 = vmul.f32 %v15071_v19, %v19163_v46  ;;  %v15073_v20 = vadd.f32 %v6940_v29, %v19490_v44  ;;  %v6942_v58 = vpop.f32.mrb[87].mxu1  ;;  %vm8265_vm4 = vcmp.gt.f32.partialorder %v15071_v19, 0.0 }
 0x4da   :  { %v8460_v27 = vmul.f32 %v15072_v24, %v19163_v46  ;;  %v15074_v60 = vadd.f32 %v6942_v58, %v19495_v22  ;;  %vm8266_vm5 = vcmp.gt.f32.partialorder %v15072_v24, 0.0 }
 0x4db   :  { %vm8271_vm6 = vcmp.gt.f32.partialorder %v15073_v20, 0.0  ;;  %v8465_v48 = vmul.f32 %v15073_v20, %v19163_v46  ;;  %10863 = vmatmul.mubr.bf16.vlgmr.msra.gmra.mrb[128].mxu1 %v19507_v43  ;;  %v8651_v38 = vsel %vm8265_vm4, %v15071_v19, %v8459_v63 }
 0x4dc   :  { %7850 = vmatmul.mubr.bf16.vlgmr.msra.gmra.mrb[64].mxu0 %v18567_v59  ;;  %vm8272_vm7 = vcmp.gt.f32.partialorder %v15074_v60, 0.0  ;;  %v8466_v33 = vmul.f32 %v15074_v60, %v19163_v46  ;;  %10872 = vmatprep.mubr.bf16.mxu1 %v19524_v2  ;;  %v8652_v53 = vsel %vm8266_vm5, %v15072_v24, %v8460_v27 }
 0x4dd   :  { %8011 = vmatpush1.bf16.msra.mxu0 %v17861_v45  ;;  %7859 = vmatprep.mubr.bf16.mxu0 %v18568_v4  ;;  %v8657_v40 = vsel %vm8271_vm6, %v15073_v20, %v8465_v48  ;;  %v17867_v20 = vld [vmem:[#allocation8 + $0xf70] ss:$24 sps:$4 sm:$0xff]  }
 0x4de   :  { %8012 = vmatprep.subr.bf16.mxu0 %v17866_v56  ;;  %v6946_v10 = vpop.f32.mrb[88].mxu1  ;;  %v8658_v29 = vsel %vm8272_vm7, %v15074_v60, %v8466_v33  ;;  %v19579_v58 = vpack.c.bf16 %v8657_v40, %v8651_v38  ;;  %v17872_v60 = vld [vmem:[#allocation8 + $0xfa4] ss:$24 sps:$4 sm:$0xff]   ;;  %v17875_v40 = vld [vmem:[#allocation8 + $0xfd4] ss:$24 sps:$4 sm:$0xff]  }
 0x4df   :  { %v15075_v59 = vadd.f32 %v6946_v10, %v19490_v44  ;;  %v6948_v43 = vpop.f32.mrb[89].mxu1  ;;  %v19582_v45 = vpack.c.bf16 %v8658_v29, %v8652_v53  ;;  %v18570_v33 = vld [vmem:[#allocation5 + $0xe4] ss:$48 sps:$4 sm:$0xff]  }
 0x4e0   :  { %20796 = vst [vmem:[#allocation45_spill] sm:$0xff] %v19579_v58  ;;  %v15076_v2 = vadd.f32 %v6948_v43, %v19495_v22  ;;  %v6950_v23 = vpop.f32.mrb[90].mxu1  ;;  %v18569_v43 = vld [vmem:[#allocation5 + $0x80] ss:$48 sps:$4 sm:$0xff]  }
 0x4e1   :  { %20797 = vst [vmem:[#allocation46_spill] sm:$0xff] %v19582_v45  ;;  %8013 = vmatpush1.bf16.msra.mxu0 %v17864_v57  ;;  %v8471_v56 = vmul.f32 %v15075_v59, %v19163_v46  ;;  %v15077_v63 = vadd.f32 %v6950_v23, %v19490_v44  ;;  %v6952_v19 = vpop.f32.mrb[91].mxu1  ;;  %vm8277_vm8 = vcmp.gt.f32.partialorder %v15075_v59, 0.0  ;;  %v17870_v57 = vld [vmem:[#allocation8 + $0xfa0] ss:$24 sps:$4 sm:$0xff]  }
 0x4e2   :  { %8014 = vmatprep.subr.bf16.mxu0 %v17869_v55  ;;  %v8472_v24 = vmul.f32 %v15076_v2, %v19163_v46  ;;  %v15078_v27 = vadd.f32 %v6952_v19, %v19495_v22  ;;  %vm8278_vm9 = vcmp.gt.f32.partialorder %v15076_v2, 0.0 }
 0x4e3   :  { %vm8283_vm10 = vcmp.gt.f32.partialorder %v15077_v63, 0.0  ;;  %v8477_v48 = vmul.f32 %v15077_v63, %v19163_v46  ;;  %10873 = vmatmul.mubr.bf16.gmra.mrb[132].mxu1 %v19521_v6  ;;  %v8663_v4 = vsel %vm8277_vm8, %v15075_v59, %v8471_v56 }
 0x4e4   :  { %7860 = vmatmul.mubr.bf16.gmra.mrb[68].mxu0 %v18569_v43  ;;  %vm8284_vm11 = vcmp.gt.f32.partialorder %v15078_v27, 0.0  ;;  %v8478_v23 = vmul.f32 %v15078_v27, %v19163_v46  ;;  %10882 = vmatprep.mubr.bf16.mxu1 %v19538_v25  ;;  %v8664_v10 = vsel %vm8278_vm9, %v15076_v2, %v8472_v24 }
 0x4e5   :  { %7869 = vmatprep.mubr.bf16.mxu0 %v18570_v33  ;;  %8015 = vmatpush1.bf16.msra.mxu0 %v17867_v20  ;;  %v8669_v55 = vsel %vm8283_vm10, %v15077_v63, %v8477_v48  ;;  %v17873_v63 = vld [vmem:[#allocation8 + $0xfd0] ss:$24 sps:$4 sm:$0xff]  }
 0x4e6   :  { %v6956_v38 = vpop.f32.mrb[92].mxu1  ;;  %8016 = vmatprep.subr.bf16.mxu0 %v17872_v60  ;;  %v8670_v53 = vsel %vm8284_vm11, %v15078_v27, %v8478_v23  ;;  %v19595_v29 = vpack.c.bf16 %v8669_v55, %v8663_v4  ;;  %v17878_v27 = vld [vmem:[#allocation8 + $0x1004] ss:$24 sps:$4 sm:$0xff]   ;;  %v18571_v48 = vld [vmem:[#allocation5 + $0xe0] ss:$48 sps:$4 sm:$0xff]  }
 0x4e7   :  { %v15079_v19 = vadd.f32 %v6956_v38, %v19490_v44  ;;  %v6958_v43 = vpop.f32.mrb[93].mxu1  ;;  %v19598_v6 = vpack.c.bf16 %v8670_v53, %v8664_v10  ;;  %v17876_v4 = vld [vmem:[#allocation8 + $0x1000] ss:$24 sps:$4 sm:$0xff]   ;;  %v17881_v10 = vld [vmem:[#allocation8 + $0x1034] ss:$24 sps:$4 sm:$0xff]  }
 0x4e8   :  { %20798 = vst [vmem:[#allocation47_spill] sm:$0xff] %v19595_v29  ;;  %v15080_v33 = vadd.f32 %v6958_v43, %v19495_v22  ;;  %v6960_v20 = vpop.f32.mrb[94].mxu1 }
 0x4e9   :  { %20799 = vst [vmem:[#allocation48_spill] sm:$0xff] %v19598_v6  ;;  %v8483_v25 = vmul.f32 %v15079_v19, %v19163_v46  ;;  %v15081_v59 = vadd.f32 %v6960_v20, %v19490_v44  ;;  %v6962_v56 = vpop.f32.mrb[95].mxu1  ;;  %8017 = vmatpush1.bf16.msra.mxu0 %v17870_v57  ;;  %vm8289_vm12 = vcmp.gt.f32.partialorder %v15079_v19, 0.0  ;;  %v18572_v57 = vld [vmem:[#allocation5 + $0x144] ss:$48 sps:$4 sm:$0xff]  }
 0x4ea   :  { %v8484_v2 = vmul.f32 %v15080_v33, %v19163_v46  ;;  %v15082_v24 = vadd.f32 %v6962_v56, %v19495_v22  ;;  %8018 = vmatprep.subr.bf16.mxu0 %v17875_v40  ;;  %vm8290_vm13 = vcmp.gt.f32.partialorder %v15080_v33, 0.0 }
 0x4eb   :  { %vm8295_vm14 = vcmp.gt.f32.partialorder %v15081_v59, 0.0  ;;  %v8489_v60 = vmul.f32 %v15081_v59, %v19163_v46  ;;  %10883 = vmatmul.mubr.bf16.gmra.mrb[136].mxu1 %v19535_v34  ;;  %v8675_v55 = vsel %vm8289_vm12, %v15079_v19, %v8483_v25 }
 0x4ec   :  { %7870 = vmatmul.mubr.bf16.gmra.mrb[72].mxu0 %v18571_v48  ;;  %vm8296_vm15 = vcmp.gt.f32.partialorder %v15082_v24, 0.0  ;;  %v8490_v23 = vmul.f32 %v15082_v24, %v19163_v46  ;;  %10892 = vmatprep.mubr.bf16.mxu1 %v19552_v5  ;;  %v8676_v53 = vsel %vm8290_vm13, %v15080_v33, %v8484_v2 }
 0x4ed   :  { %7879 = vmatprep.mubr.bf16.mxu0 %v18572_v57  ;;  %8019 = vmatpush1.bf16.msra.mxu0 %v17873_v63  ;;  %v8681_v38 = vsel %vm8295_vm14, %v15081_v59, %v8489_v60  ;;  %v17879_v59 = vld [vmem:[#allocation8 + $0x1030] ss:$24 sps:$4 sm:$0xff]  }
 0x4ee   :  { %v6966_v40 = vpop.f32.mrb[96].mxu1  ;;  %8020 = vmatprep.subr.bf16.mxu0 %v17878_v27  ;;  %v8682_v43 = vsel %vm8296_vm15, %v15082_v24, %v8490_v23  ;;  %v19611_v20 = vpack.c.bf16 %v8681_v38, %v8675_v55  ;;  %v17884_v24 = vld [vmem:[#allocation8 + $0x1064] ss:$24 sps:$4 sm:$0xff]   ;;  %v18573_v60 = vld [vmem:[#allocation5 + $0x140] ss:$48 sps:$4 sm:$0xff]  }
 0x4ef   :  { %v15083_v56 = vadd.f32 %v6966_v40, %v19490_v44  ;;  %v6968_v48 = vpop.f32.mrb[97].mxu1  ;;  %v19614_v34 = vpack.c.bf16 %v8682_v43, %v8676_v53  ;;  %v17882_v55 = vld [vmem:[#allocation8 + $0x1060] ss:$24 sps:$4 sm:$0xff]  }
 0x4f0   :  { %20800 = vst [vmem:[#allocation49_spill] sm:$0xff] %v19611_v20  ;;  %v15084_v57 = vadd.f32 %v6968_v48, %v19495_v22  ;;  %v6970_v63 = vpop.f32.mrb[98].mxu1  ;;  %v17887_v48 = vld [vmem:[#allocation8 + $0x1094] ss:$24 sps:$4 sm:$0xff]  }
 0x4f1   :  { %20801 = vst [vmem:[#allocation50_spill] sm:$0xff] %v19614_v34  ;;  %v8495_v5 = vmul.f32 %v15083_v56, %v19163_v46  ;;  %v15085_v25 = vadd.f32 %v6970_v63, %v19490_v44  ;;  %v6972_v19 = vpop.f32.mrb[99].mxu1  ;;  %8021 = vmatpush1.bf16.msra.mxu0 %v17876_v4  ;;  %vm8301_vm0 = vcmp.gt.f32.partialorder %v15083_v56, 0.0  ;;  %v18574_v4 = vld [vmem:[#allocation5 + $0x1a4] ss:$48 sps:$4 sm:$0xff]  }
 0x4f2   :  { %v8496_v33 = vmul.f32 %v15084_v57, %v19163_v46  ;;  %v15086_v2 = vadd.f32 %v6972_v19, %v19495_v22  ;;  %8022 = vmatprep.subr.bf16.mxu0 %v17881_v10  ;;  %vm8302_vm1 = vcmp.gt.f32.partialorder %v15084_v57, 0.0 }
 0x4f3   :  { %vm8307_vm2 = vcmp.gt.f32.partialorder %v15085_v25, 0.0  ;;  %v8501_v27 = vmul.f32 %v15085_v25, %v19163_v46  ;;  %10893 = vmatmul.mubr.bf16.gmra.mrb[140].mxu1 %v19549_v7  ;;  %v8687_v38 = vsel %vm8301_vm0, %v15083_v56, %v8495_v5 }
 0x4f4   :  { %7880 = vmatmul.mubr.bf16.gmra.mrb[76].mxu0 %v18573_v60  ;;  %vm8308_vm3 = vcmp.gt.f32.partialorder %v15086_v2, 0.0  ;;  %v8502_v23 = vmul.f32 %v15086_v2, %v19163_v46  ;;  %10902 = vmatprep.mubr.bf16.mxu1 %v19566_v3  ;;  %v8688_v53 = vsel %vm8302_vm1, %v15084_v57, %v8496_v33 }
 0x4f5   :  { %7889 = vmatprep.mubr.bf16.mxu0 %v18574_v4  ;;  %8023 = vmatpush1.bf16.msra.mxu0 %v17879_v59  ;;  %v8693_v40 = vsel %vm8307_vm2, %v15085_v25, %v8501_v27  ;;  %v17885_v25 = vld [vmem:[#allocation8 + $0x1090] ss:$24 sps:$4 sm:$0xff]  }
 0x4f6   :  { %v6976_v10 = vpop.f32.mrb[100].mxu1  ;;  %8024 = vmatprep.subr.bf16.mxu0 %v17884_v24  ;;  %v8694_v43 = vsel %vm8308_vm3, %v15086_v2, %v8502_v23  ;;  %v19627_v63 = vpack.c.bf16 %v8693_v40, %v8687_v38  ;;  %v17890_v2 = vld [vmem:[#allocation8 + $0x10c4] ss:$24 sps:$4 sm:$0xff]   ;;  %v18575_v27 = vld [vmem:[#allocation5 + $0x1a0] ss:$48 sps:$4 sm:$0xff]  }
 0x4f7   :  { %v15087_v19 = vadd.f32 %v6976_v10, %v19490_v44  ;;  %v6978_v60 = vpop.f32.mrb[101].mxu1  ;;  %v19630_v7 = vpack.c.bf16 %v8694_v43, %v8688_v53  ;;  %v17888_v38 = vld [vmem:[#allocation8 + $0x10c0] ss:$24 sps:$4 sm:$0xff]  }
 0x4f8   :  { %20802 = vst [vmem:[#allocation51_spill] sm:$0xff] %v19627_v63  ;;  %v15088_v4 = vadd.f32 %v6978_v60, %v19495_v22  ;;  %v6980_v59 = vpop.f32.mrb[102].mxu1 }
 0x4f9   :  { %20803 = vst [vmem:[#allocation52_spill] sm:$0xff] %v19630_v7  ;;  %v8507_v3 = vmul.f32 %v15087_v19, %v19163_v46  ;;  %v15089_v5 = vadd.f32 %v6980_v59, %v19490_v44  ;;  %v6982_v56 = vpop.f32.mrb[103].mxu1  ;;  %8025 = vmatpush1.bf16.msra.mxu0 %v17882_v55  ;;  %vm8313_vm4 = vcmp.gt.f32.partialorder %v15087_v19, 0.0  ;;  %v18576_v55 = vld [vmem:[#allocation5 + $0x204] ss:$48 sps:$4 sm:$0xff]  }
 0x4fa   :  { %v8508_v57 = vmul.f32 %v15088_v4, %v19163_v46  ;;  %v15090_v33 = vadd.f32 %v6982_v56, %v19495_v22  ;;  %8026 = vmatprep.subr.bf16.mxu0 %v17887_v48  ;;  %vm8314_vm5 = vcmp.gt.f32.partialorder %v15088_v4, 0.0  ;;  %v17893_v59 = vld [vmem:[#allocation8 + $0x10f4] ss:$24 sps:$4 sm:$0xff]  }
 0x4fb   :  { %vm8319_vm6 = vcmp.gt.f32.partialorder %v15089_v5, 0.0  ;;  %v8513_v24 = vmul.f32 %v15089_v5, %v19163_v46  ;;  %10903 = vmatmul.mubr.bf16.gmra.mrb[144].mxu1 %v19563_v18  ;;  %v8699_v40 = vsel %vm8313_vm4, %v15087_v19, %v8507_v3 }
 0x4fc   :  { %7890 = vmatmul.mubr.bf16.gmra.mrb[80].mxu0 %v18575_v27  ;;  %vm8320_vm7 = vcmp.gt.f32.partialorder %v15090_v33, 0.0  ;;  %v8514_v23 = vmul.f32 %v15090_v33, %v19163_v46  ;;  %10912 = vmatprep.mubr.bf16.mxu1 %v19582_v45  ;;  %v8700_v43 = vsel %vm8314_vm5, %v15088_v4, %v8508_v57  ;;  %v17891_v4 = vld [vmem:[#allocation8 + $0x10f0] ss:$24 sps:$4 sm:$0xff]  }
 0x4fd   :  { %7899 = vmatprep.mubr.bf16.mxu0 %v18576_v55  ;;  %8027 = vmatpush1.bf16.msra.mxu0 %v17885_v25  ;;  %v8705_v10 = vsel %vm8319_vm6, %v15089_v5, %v8513_v24  ;;  %v18577_v24 = vld [vmem:[#allocation5 + $0x200] ss:$48 sps:$4 sm:$0xff]  }
 0x4fe   :  { %v6986_v53 = vpop.f32.mrb[104].mxu1  ;;  %v8706_v48 = vsel %vm8320_vm7, %v15090_v33, %v8514_v23  ;;  %8028 = vmatprep.subr.bf16.mxu0 %v17890_v2  ;;  %v19643_v60 = vpack.c.bf16 %v8705_v10, %v8699_v40  ;;  %v17896_v33 = vld [vmem:[#allocation8 + $0x1124] ss:$24 sps:$4 sm:$0xff]  }
 0x4ff   :  { %v15091_v56 = vadd.f32 %v6986_v53, %v19490_v44  ;;  %v6988_v27 = vpop.f32.mrb[105].mxu1  ;;  %v19646_v18 = vpack.c.bf16 %v8706_v48, %v8700_v43  ;;  %v17894_v53 = vld [vmem:[#allocation8 + $0x1120] ss:$24 sps:$4 sm:$0xff]  }
 0x500   :  { %20804 = vst [vmem:[#allocation53_spill] sm:$0xff] %v19643_v60  ;;  %v15092_v55 = vadd.f32 %v6988_v27, %v19495_v22  ;;  %v6990_v25 = vpop.f32.mrb[106].mxu1 }
 0x501   :  { %20805 = vst [vmem:[#allocation54_spill] sm:$0xff] %v19646_v18  ;;  %v8519_v45 = vmul.f32 %v15091_v56, %v19163_v46  ;;  %v15093_v3 = vadd.f32 %v6990_v25, %v19490_v44  ;;  %v6992_v19 = vpop.f32.mrb[107].mxu1  ;;  %8029 = vmatpush1.bf16.msra.mxu0 %v17888_v38  ;;  %vm8325_vm8 = vcmp.gt.f32.partialorder %v15091_v56, 0.0  ;;  %v18578_v38 = vld [vmem:[#allocation5 + $0x264] ss:$48 sps:$4 sm:$0xff]  }
 0x502   :  { %v8520_v5 = vmul.f32 %v15092_v55, %v19163_v46  ;;  %v15094_v57 = vadd.f32 %v6992_v19, %v19495_v22  ;;  %8030 = vmatprep.subr.bf16.mxu0 %v17893_v59  ;;  %vm8326_vm9 = vcmp.gt.f32.partialorder %v15092_v55, 0.0  ;;  %v17899_v25 = vld [vmem:[#allocation8 + $0x1154] ss:$24 sps:$4 sm:$0xff]  }
 0x503   :  { %vm8331_vm10 = vcmp.gt.f32.partialorder %v15093_v3, 0.0  ;;  %v8525_v2 = vmul.f32 %v15093_v3, %v19163_v46  ;;  %10913 = vmatmul.mubr.bf16.gmra.mrb[148].mxu1 %v19579_v58  ;;  %v8711_v40 = vsel %vm8325_vm8, %v15091_v56, %v8519_v45 }
 0x504   :  { %7900 = vmatmul.mubr.bf16.gmra.mrb[84].mxu0 %v18577_v24  ;;  %vm8332_vm11 = vcmp.gt.f32.partialorder %v15094_v57, 0.0  ;;  %v8526_v23 = vmul.f32 %v15094_v57, %v19163_v46  ;;  %10922 = vmatprep.mubr.bf16.mxu1 %v19598_v6  ;;  %v8712_v48 = vsel %vm8326_vm9, %v15092_v55, %v8520_v5  ;;  %v17897_v55 = vld [vmem:[#allocation8 + $0x1150] ss:$24 sps:$4 sm:$0xff]  }
 0x505   :  { %7909 = vmatprep.mubr.bf16.mxu0 %v18578_v38  ;;  %v8717_v10 = vsel %vm8331_vm10, %v15093_v3, %v8525_v2  ;;  %8031 = vmatpush1.bf16.msra.mxu0 %v17891_v4  ;;  %v18579_v2 = vld [vmem:[#allocation5 + $0x260] ss:$48 sps:$4 sm:$0xff]  }
 0x506   :  { %v6996_v43 = vpop.f32.mrb[108].mxu1  ;;  %v8718_v59 = vsel %vm8332_vm11, %v15094_v57, %v8526_v23  ;;  %v19659_v27 = vpack.c.bf16 %v8717_v10, %v8711_v40  ;;  %8032 = vmatprep.subr.bf16.mxu0 %v17896_v33  ;;  %v17902_v57 = vld [vmem:[#allocation8 + $0x1184] ss:$24 sps:$4 sm:$0xff]  }
 0x507   :  { %v15095_v19 = vadd.f32 %v6996_v43, %v19490_v44  ;;  %v6998_v24 = vpop.f32.mrb[109].mxu1  ;;  %v19662_v58 = vpack.c.bf16 %v8718_v59, %v8712_v48  ;;  %v18580_v23 = vld [vmem:[#allocation5 + $0x2c4] ss:$48 sps:$4 sm:$0xff]  }
 0x508   :  { %v15096_v38 = vadd.f32 %v6998_v24, %v19495_v22  ;;  %v7000_v6 = vpop.f32.mrb[110].mxu1  ;;  %v17905_v24 = vld [vmem:[#allocation8 + $0x11b4] ss:$24 sps:$4 sm:$0xff]  }
 0x509   :  { %20806 = vst [vmem:[#allocation55_spill] sm:$0xff] %v19662_v58  ;;  %v8531_v45 = vmul.f32 %v15095_v19, %v19163_v46  ;;  %v15097_v56 = vadd.f32 %v7000_v6, %v19490_v44  ;;  %v7002_v3 = vpop.f32.mrb[111].mxu1  ;;  %8033 = vmatpush1.bf16.msra.mxu0 %v17894_v53  ;;  %vm8337_vm12 = vcmp.gt.f32.partialorder %v15095_v19, 0.0  ;;  %v17900_v53 = vld [vmem:[#allocation8 + $0x1180] ss:$24 sps:$4 sm:$0xff]  }
 0x50a   :  { %v8532_v4 = vmul.f32 %v15096_v38, %v19163_v46  ;;  %v15098_v5 = vadd.f32 %v7002_v3, %v19495_v22  ;;  %8034 = vmatprep.subr.bf16.mxu0 %v17899_v25  ;;  %vm8338_vm13 = vcmp.gt.f32.partialorder %v15096_v38, 0.0 }
 0x50b   :  { %vm8343_vm14 = vcmp.gt.f32.partialorder %v15097_v56, 0.0  ;;  %v8537_v33 = vmul.f32 %v15097_v56, %v19163_v46  ;;  %10923 = vmatmul.mubr.bf16.gmra.mrb[152].mxu1 %v19595_v29  ;;  %v8723_v40 = vsel %vm8337_vm12, %v15095_v19, %v8531_v45 }
 0x50c   :  { %7910 = vmatmul.mubr.bf16.gmra.mrb[88].mxu0 %v18579_v2  ;;  %vm8344_vm15 = vcmp.gt.f32.partialorder %v15098_v5, 0.0  ;;  %v8538_v6 = vmul.f32 %v15098_v5, %v19163_v46  ;;  %10932 = vmatprep.mubr.bf16.mxu1 %v19614_v34  ;;  %v8724_v48 = vsel %vm8338_vm13, %v15096_v38, %v8532_v4  ;;  %v17903_v38 = vld [vmem:[#allocation8 + $0x11b0] ss:$24 sps:$4 sm:$0xff]  }
 0x50d   :  { %7919 = vmatprep.mubr.bf16.mxu0 %v18580_v23  ;;  %v8729_v10 = vsel %vm8343_vm14, %v15097_v56, %v8537_v33  ;;  %8035 = vmatpush1.bf16.msra.mxu0 %v17897_v55  ;;  %v18581_v33 = vld [vmem:[#allocation5 + $0x2c0] ss:$48 sps:$4 sm:$0xff]  }
 0x50e   :  { %v7006_v43 = vpop.f32.mrb[112].mxu1  ;;  %v8730_v59 = vsel %vm8344_vm15, %v15098_v5, %v8538_v6  ;;  %v19675_v25 = vpack.c.bf16 %v8729_v10, %v8723_v40  ;;  %8036 = vmatprep.subr.bf16.mxu0 %v17902_v57  ;;  %v17908_v5 = vld [vmem:[#allocation8 + $0x11e4] ss:$24 sps:$4 sm:$0xff]  }
 0x50f   :  { %v15099_v3 = vadd.f32 %v7006_v43, %v19490_v44  ;;  %v7008_v2 = vpop.f32.mrb[113].mxu1  ;;  %v19678_v29 = vpack.c.bf16 %v8730_v59, %v8724_v48  ;;  %v18582_v6 = vld [vmem:[#allocation5 + $0x324] ss:$48 sps:$4 sm:$0xff]  }
 0x510   :  { %v15100_v23 = vadd.f32 %v7008_v2, %v19495_v22  ;;  %v7010_v34 = vpop.f32.mrb[114].mxu1 }
 0x511   :  { %v8543_v19 = vmul.f32 %v15099_v3, %v19163_v46  ;;  %v15101_v45 = vadd.f32 %v7010_v34, %v19490_v44  ;;  %v7012_v56 = vpop.f32.mrb[115].mxu1  ;;  %8037 = vmatpush1.bf16.msra.mxu0 %v17900_v53  ;;  %vm8349_vm0 = vcmp.gt.f32.partialorder %v15099_v3, 0.0  ;;  %v17906_v53 = vld [vmem:[#allocation8 + $0x11e0] ss:$24 sps:$4 sm:$0xff]  }
 0x512   :  { %v8544_v55 = vmul.f32 %v15100_v23, %v19163_v46  ;;  %v15102_v4 = vadd.f32 %v7012_v56, %v19495_v22  ;;  %8038 = vmatprep.subr.bf16.mxu0 %v17905_v24  ;;  %vm8350_vm1 = vcmp.gt.f32.partialorder %v15100_v23, 0.0 }
 0x513   :  { %vm8355_vm2 = vcmp.gt.f32.partialorder %v15101_v45, 0.0  ;;  %v8549_v57 = vmul.f32 %v15101_v45, %v19163_v46  ;;  %10933 = vmatmul.mubr.bf16.gmra.mrb[156].mxu1 %v19611_v20  ;;  %v8735_v40 = vsel %vm8349_vm0, %v15099_v3, %v8543_v19 }
 0x514   :  { %7920 = vmatmul.mubr.bf16.gmra.mrb[92].mxu0 %v18581_v33  ;;  %vm8356_vm3 = vcmp.gt.f32.partialorder %v15102_v4, 0.0  ;;  %v8550_v34 = vmul.f32 %v15102_v4, %v19163_v46  ;;  %10942 = vmatprep.mubr.bf16.mxu1 %v19630_v7  ;;  %v8736_v48 = vsel %vm8350_vm1, %v15100_v23, %v8544_v55 }
 0x515   :  { %7929 = vmatprep.mubr.bf16.mxu0 %v18582_v6  ;;  %v8741_v10 = vsel %vm8355_vm2, %v15101_v45, %v8549_v57  ;;  %8039 = vmatpush1.bf16.msra.mxu0 %v17903_v38  ;;  %v17911_v38 = vld [vmem:[#allocation11 + $0x14] ss:$24 sps:$4 sm:$0xff]  }
 0x516   :  { %v7016_v43 = vpop.f32.mrb[116].mxu1  ;;  %v8742_v59 = vsel %vm8356_vm3, %v15102_v4, %v8550_v34  ;;  %v19691_v24 = vpack.c.bf16 %v8741_v10, %v8735_v40  ;;  %8040 = vmatprep.subr.bf16.mxu0 %v17908_v5  ;;  %v18583_v5 = vld [vmem:[#allocation5 + $0x320] ss:$48 sps:$4 sm:$0xff]   ;;  %v18584_v34 = vld [vmem:[#allocation5 + $0x384] ss:$48 sps:$4 sm:$0xff]  }
 0x517   :  { %v15103_v2 = vadd.f32 %v7016_v43, %v19490_v44  ;;  %v7018_v56 = vpop.f32.mrb[117].mxu1  ;;  %v19694_v33 = vpack.c.bf16 %v8742_v59, %v8736_v48 }
 0x518   :  { %v15104_v7 = vadd.f32 %v7018_v56, %v19495_v22  ;;  %v7020_v6 = vpop.f32.mrb[118].mxu1 }
 0x519   :  { %v8555_v3 = vmul.f32 %v15103_v2, %v19163_v46  ;;  %v15105_v19 = vadd.f32 %v7020_v6, %v19490_v44  ;;  %v7022_v45 = vpop.f32.mrb[119].mxu1  ;;  %8041 = vmatpush1.bf16.msra.mxu0 %v17906_v53  ;;  %vm8361_vm4 = vcmp.gt.f32.partialorder %v15103_v2, 0.0 }
 0x51a   :  { %v8556_v23 = vmul.f32 %v15104_v7, %v19163_v46  ;;  %v15106_v55 = vadd.f32 %v7022_v45, %v19495_v22  ;;  %vm8362_vm5 = vcmp.gt.f32.partialorder %v15104_v7, 0.0  ;;  %11795 = vmatprep.subr.bf16.mxu0 %v17911_v38  ;;  %v18585_v38 = vld [vmem:[#allocation5 + $0x380] ss:$48 sps:$4 sm:$0xff]  }
 0x51b   :  { %vm8367_vm6 = vcmp.gt.f32.partialorder %v15105_v19, 0.0  ;;  %v8561_v4 = vmul.f32 %v15105_v19, %v19163_v46  ;;  %10943 = vmatmul.mubr.bf16.gmra.mrb[160].mxu1 %v19627_v63  ;;  %v8747_v40 = vsel %vm8361_vm4, %v15103_v2, %v8555_v3 }
 0x51c   :  { %7930 = vmatmul.mubr.bf16.gmra.mrb[96].mxu0 %v18583_v5  ;;  %vm8368_vm7 = vcmp.gt.f32.partialorder %v15106_v55, 0.0  ;;  %v8562_v57 = vmul.f32 %v15106_v55, %v19163_v46  ;;  %10952 = vmatprep.mubr.bf16.mxu1 %v19646_v18  ;;  %v8748_v43 = vsel %vm8362_vm5, %v15104_v7, %v8556_v23 }
 0x51d   :  { %7939 = vmatprep.mubr.bf16.mxu0 %v18584_v34  ;;  %v8753_v10 = vsel %vm8367_vm6, %v15105_v19, %v8561_v4 }
 0x51e   :  { %v7026_v53 = vpop.f32.mrb[120].mxu1  ;;  %v8754_v48 = vsel %vm8368_vm7, %v15106_v55, %v8562_v57  ;;  %v19705_v59 = vpack.c.bf16 %v8753_v10, %v8747_v40 }
 0x51f   :  { %v15107_v56 = vadd.f32 %v7026_v53, %v19490_v44  ;;  %v7028_v6 = vpop.f32.mrb[121].mxu1  ;;  %v19708_v45 = vpack.c.bf16 %v8754_v48, %v8748_v43 }
 0x520   :  { %v15108_v5 = vadd.f32 %v7028_v6, %v19495_v22  ;;  %v7030_v63 = vpop.f32.mrb[122].mxu1 }
 0x521   :  { %v8567_v18 = vmul.f32 %v15107_v56, %v19163_v46  ;;  %v15109_v34 = vadd.f32 %v7030_v63, %v19490_v44  ;;  %v7032_v2 = vpop.f32.mrb[123].mxu1  ;;  %vm8373_vm8 = vcmp.gt.f32.partialorder %v15107_v56, 0.0  ;;  %v18586_v63 = vld [vmem:[#allocation5 + $0x3e4] ss:$48 sps:$4 sm:$0xff]  }
 0x522   :  { %v8568_v3 = vmul.f32 %v15108_v5, %v19163_v46  ;;  %v15110_v7 = vadd.f32 %v7032_v2, %v19495_v22  ;;  %vm8374_vm9 = vcmp.gt.f32.partialorder %v15108_v5, 0.0 }
 0x523   :  { %vm8379_vm10 = vcmp.gt.f32.partialorder %v15109_v34, 0.0  ;;  %v8573_v19 = vmul.f32 %v15109_v34, %v19163_v46  ;;  %10953 = vmatmul.mubr.bf16.gmra.mrb[164].mxu1 %v19643_v60  ;;  %v8759_v55 = vsel %vm8373_vm8, %v15107_v56, %v8567_v18 }
 0x524   :  { %7940 = vmatmul.mubr.bf16.gmra.mrb[100].mxu0 %v18585_v38  ;;  %vm8380_vm11 = vcmp.gt.f32.partialorder %v15110_v7, 0.0  ;;  %v8574_v23 = vmul.f32 %v15110_v7, %v19163_v46  ;;  %10962 = vmatprep.mubr.bf16.mxu1 %v19662_v58  ;;  %v8760_v40 = vsel %vm8374_vm9, %v15108_v5, %v8568_v3 }
 0x525   :  { %7949 = vmatprep.mubr.bf16.mxu0 %v18586_v63  ;;  %v8765_v4 = vsel %vm8379_vm10, %v15109_v34, %v8573_v19  ;;  %v18587_v34 = vld [vmem:[#allocation5 + $0x3e0] ss:$48 sps:$4 sm:$0xff]  }
 0x526   :  { %v7036_v57 = vpop.f32.mrb[124].mxu1  ;;  %v8766_v10 = vsel %vm8380_vm11, %v15110_v7, %v8574_v23  ;;  %v19719_v53 = vpack.c.bf16 %v8765_v4, %v8759_v55 }
 0x527   :  { %v15111_v43 = vadd.f32 %v7036_v57, %v19490_v44  ;;  %v7038_v48 = vpop.f32.mrb[125].mxu1  ;;  %v19722_v6 = vpack.c.bf16 %v8766_v10, %v8760_v40  ;;  %v18589_v57 = vld [vmem:[#allocation5 + $0x440] ss:$48 sps:$4 sm:$0xff]   ;;  %v18590_v40 = vld [vmem:[#allocation5 + $0x4a4] ss:$48 sps:$4 sm:$0xff]  }
 0x528   :  { %v15112_v2 = vadd.f32 %v7038_v48, %v19495_v22  ;;  %v7040_v38 = vpop.f32.mrb[126].mxu1  ;;  %v17933_v10 = vld [vmem:[#allocation11 + $0x600] ss:$24 sps:$4 sm:$0xff]   ;;  %v17935_v48 = vld [vmem:[#allocation11 + $0x604] ss:$24 sps:$4 sm:$0xff]  }
 0x529   :  { %v8579_v60 = vmul.f32 %v15111_v43, %v19163_v46  ;;  %v15113_v58 = vadd.f32 %v7040_v38, %v19490_v44  ;;  %v7042_v63 = vpop.f32.mrb[127].mxu1  ;;  %vm8385_vm12 = vcmp.gt.f32.partialorder %v15111_v43, 0.0  ;;  %v18588_v44 = vld [vmem:[#allocation5 + $0x444] ss:$48 sps:$4 sm:$0xff]   ;;  %11023 = vmatprep.subr.bf16.mxu1 %v17935_v48  ;;  %v18593_v38 = vld [vmem:[#allocation5 + $0x500] ss:$48 sps:$4 sm:$0xff]  }
 0x52a   :  { %v8580_v18 = vmul.f32 %v15112_v2, %v19163_v46  ;;  %v15114_v56 = vadd.f32 %v7042_v63, %v19495_v22  ;;  %vm8386_vm13 = vcmp.gt.f32.partialorder %v15112_v2, 0.0  ;;  %11024 = vmatpush1.bf16.msra.mxu1 %v17933_v10  ;;  %v18594_v63 = vld [vmem:[#allocation5 + $0x564] ss:$48 sps:$4 sm:$0xff]   ;;  %v18599_v10 = vld [vmem:[#allocation5 + $0x28] ss:$48 sps:$4 sm:$0xff]  }
 0x52b   :  { %vm8391_vm14 = vcmp.gt.f32.partialorder %v15113_v58, 0.0  ;;  %v8585_v5 = vmul.f32 %v15113_v58, %v19163_v46  ;;  %10963 = vmatmul.mubr.bf16.gmra.mrb[168].mxu1 %v19659_v27  ;;  %v8771_v7 = vsel %vm8385_vm12, %v15111_v43, %v8579_v60  ;;  %v18591_v60 = vld [vmem:[#allocation5 + $0x4a0] ss:$48 sps:$4 sm:$0xff]   ;;  %v18600_v48 = vld [vmem:[#allocation5 + $0x8c] ss:$48 sps:$4 sm:$0xff]  }
 0x52c   :  { %7950 = vmatmul.mubr.bf16.gmra.mrb[104].mxu0 %v18587_v34  ;;  %vm8392_vm15 = vcmp.gt.f32.partialorder %v15114_v56, 0.0  ;;  %v8586_v3 = vmul.f32 %v15114_v56, %v19163_v46  ;;  %10972 = vmatprep.mubr.bf16.mxu1 %v19678_v29  ;;  %v8772_v23 = vsel %vm8386_vm13, %v15112_v2, %v8580_v18  ;;  %v17942_v43 = vld [vmem:[#allocation11 + $0x630] ss:$24 sps:$4 sm:$0xff]   ;;  %v17944_v2 = vld [vmem:[#allocation11 + $0x634] ss:$24 sps:$4 sm:$0xff]  }
 0x52d   :  { %7959 = vmatprep.mubr.bf16.mxu0 %v18588_v44  ;;  %v8777_v19 = vsel %vm8391_vm14, %v15113_v58, %v8585_v5  ;;  %v18592_v58 = vld [vmem:[#allocation5 + $0x504] ss:$48 sps:$4 sm:$0xff]   ;;  %11025 = vmatprep.subr.bf16.mxu1 %v17944_v2  ;;  %v18595_v5 = vld [vmem:[#allocation5 + $0x560] ss:$48 sps:$4 sm:$0xff]  }
 0x52e   :  { %v8778_v55 = vsel %vm8392_vm15, %v15114_v56, %v8586_v3  ;;  %v19733_v22 = vpack.c.bf16 %v8777_v19, %v8771_v7  ;;  %11026 = vmatpush1.bf16.msra.mxu1 %v17942_v43  ;;  %v17951_v18 = vld [vmem:[#allocation11 + $0x660] ss:$24 sps:$4 sm:$0xff]   ;;  %v17953_v56 = vld [vmem:[#allocation11 + $0x664] ss:$24 sps:$4 sm:$0xff]   ;;  %v17960_v3 = vld [vmem:[#allocation11 + $0x690] ss:$24 sps:$4 sm:$0xff]  }
 0x52f   :  { %v19735_v4 = vpack.c.bf16 %v8778_v55, %v8772_v23  ;;  %11027 = vmatprep.subr.bf16.mxu1 %v17953_v56  ;;  %v18596_v34 = vld [vmem:[#allocation5 + $0x5c4] ss:$48 sps:$4 sm:$0xff]   ;;  %v18597_v7 = vld [vmem:[#allocation5 + $0x5c0] ss:$48 sps:$4 sm:$0xff]   ;;  %v18598_v19 = vld [vmem:[#allocation5 + $0x2c] ss:$48 sps:$4 sm:$0xff]  }
 0x530   :  { %v17962_v44 = vld [vmem:[#allocation11 + $0x694] ss:$24 sps:$4 sm:$0xff]   ;;  %v17969_v23 = vld [vmem:[#allocation11 + $0x6c0] ss:$24 sps:$4 sm:$0xff]   ;;  %v17971_v55 = vld [vmem:[#allocation11 + $0x6c4] ss:$24 sps:$4 sm:$0xff]  }
 0x531   :  { %v17974_v43 = vld [vmem:[#allocation11 + $0x6f4] ss:$24 sps:$4 sm:$0xff]  }
 0x532   :  { %11028 = vmatpush1.bf16.msra.mxu1 %v17951_v18  ;;  %v17917_v2 = vld [vmem:[#allocation11 + $0x74] ss:$24 sps:$4 sm:$0xff]  }
 0x533   :  { %10973 = vmatmul.mubr.bf16.gmra.mrb[172].mxu1 %v19675_v25  ;;  %11029 = vmatprep.subr.bf16.mxu1 %v17962_v44  ;;  %v18601_v18 = vld [vmem:[#allocation5 + $0x88] ss:$48 sps:$4 sm:$0xff]   ;;  %v18602_v56 = vld [vmem:[#allocation5 + $0xec] ss:$48 sps:$4 sm:$0xff]  }
 0x534   :  { %7960 = vmatmul.mubr.bf16.gmra.mrb[108].mxu0 %v18589_v57  ;;  %10982 = vmatprep.mubr.bf16.mxu1 %v19694_v33  ;;  %v17909_v57 = vld [vmem:[#allocation11 + $0x10] ss:$24 sps:$4 sm:$0xff]   ;;  %v17923_v44 = vld [vmem:[#allocation11 + $0xd4] ss:$24 sps:$4 sm:$0xff]  }
 0x535   :  { %7969 = vmatprep.mubr.bf16.mxu0 %v18590_v40  ;;  %v17914_v40 = vld [vmem:[#allocation11 + $0x44] ss:$24 sps:$4 sm:$0xff]  }
 0x536   :  { %11030 = vmatpush1.bf16.msra.mxu1 %v17960_v3  ;;  %v17977_v3 = vld [vmem:[#allocation11 + $0x724] ss:$24 sps:$4 sm:$0xff]  }
 0x537   :  { %11031 = vmatprep.subr.bf16.mxu1 %v17971_v55  ;;  %v18604_v55 = vld [vmem:[#allocation5 + $0x14c] ss:$48 sps:$4 sm:$0xff]  }
 0x53a   :  { %11032 = vmatpush1.bf16.msra.mxu1 %v17969_v23  ;;  %v18603_v23 = vld [vmem:[#allocation5 + $0xe8] ss:$48 sps:$4 sm:$0xff]  }
 0x53b   :  { %10983 = vmatmul.mubr.bf16.gmra.mrb[176].mxu1 %v19691_v24  ;;  %11033 = vmatprep.subr.bf16.mxu1 %v17974_v43  ;;  %v18605_v43 = vld [vmem:[#allocation5 + $0x148] ss:$48 sps:$4 sm:$0xff]  }
 0x53c   :  { %7970 = vmatmul.mubr.bf16.gmra.mrb[112].mxu0 %v18591_v60  ;;  %10992 = vmatprep.mubr.bf16.mxu1 %v19708_v45  ;;  %v17912_v60 = vld [vmem:[#allocation11 + $0x40] ss:$24 sps:$4 sm:$0xff]  }
 0x53d   :  { %7979 = vmatprep.mubr.bf16.mxu0 %v18592_v58  ;;  %v17972_v58 = vld [vmem:[#allocation11 + $0x6f0] ss:$24 sps:$4 sm:$0xff]  }
 0x53e   :  { %11034 = vmatpush1.bf16.msra.mxu1 %v17972_v58  ;;  %v17932_v58 = vld [vmem:[#allocation11 + $0x164] ss:$24 sps:$4 sm:$0xff]  }
 0x53f   :  { %11035 = vmatprep.subr.bf16.mxu1 %v17977_v3  ;;  %v18607_v3 = vld [vmem:[#allocation5 + $0x1a8] ss:$48 sps:$4 sm:$0xff]  }
 0x543   :  { %10993 = vmatmul.mubr.bf16.gmra.mrb[180].mxu1 %v19705_v59 }
 0x544   :  { %7980 = vmatmul.mubr.bf16.gmra.mrb[116].mxu0 %v18593_v38  ;;  %11002 = vmatprep.mubr.bf16.mxu1 %v19722_v6  ;;  %v17915_v38 = vld [vmem:[#allocation11 + $0x70] ss:$24 sps:$4 sm:$0xff]  }
 0x545   :  { %7989 = vmatprep.mubr.bf16.mxu0 %v18594_v63  ;;  %v17920_v63 = vld [vmem:[#allocation11 + $0xa4] ss:$24 sps:$4 sm:$0xff]  }
 0x54b   :  { %11003 = vmatmul.mubr.bf16.gmra.mrb[184].mxu1 %v19719_v53 }
 0x54c   :  { %7990 = vmatmul.mubr.bf16.gmra.mrb[120].mxu0 %v18595_v5  ;;  %11012 = vmatprep.mubr.bf16.mxu1 %v19735_v4  ;;  %v17918_v5 = vld [vmem:[#allocation11 + $0xa0] ss:$24 sps:$4 sm:$0xff]  }
 0x54d   :  { %7999 = vmatprep.mubr.bf16.mxu0 %v18596_v34  ;;  %v17975_v34 = vld [vmem:[#allocation11 + $0x720] ss:$24 sps:$4 sm:$0xff]  }
 0x54e   :  { %11036 = vmatpush1.bf16.msra.mxu1 %v17975_v34  ;;  %v17941_v34 = vld [vmem:[#allocation11 + $0x1c4] ss:$24 sps:$4 sm:$0xff]  }
 0x553   :  { %11013 = vmatmul.mubr.bf16.gmra.mrb[188].mxu1 %v19733_v22 }
 0x554   :  { %8000 = vmatmul.mubr.bf16.gmra.mrb[124].mxu0 %v18597_v7  ;;  %v17921_v7 = vld [vmem:[#allocation11 + $0xd0] ss:$24 sps:$4 sm:$0xff]  }
 0x555   :  { %8042 = vmatprep.mubr.bf16.mxu0 %v18598_v19  ;;  %v17926_v19 = vld [vmem:[#allocation11 + $0x104] ss:$24 sps:$4 sm:$0xff]  }
 0x55c   :  { %8043 = vmatmul.mubr.bf16.vlgmr.msra.gmra.mrb[64].mxu0 %v18599_v10  ;;  %v17980_v10 = vld [vmem:[#allocation11 + $0x754] ss:$24 sps:$4 sm:$0xff]  }
 0x55d   :  { %8052 = vmatprep.mubr.bf16.mxu0 %v18600_v48  ;;  %11796 = vmatpush1.bf16.msra.mxu0 %v17909_v57  ;;  %v17924_v57 = vld [vmem:[#allocation11 + $0x100] ss:$24 sps:$4 sm:$0xff]   ;;  %v17929_v48 = vld [vmem:[#allocation11 + $0x134] ss:$24 sps:$4 sm:$0xff]  }
 0x55e   :  { %11797 = vmatprep.subr.bf16.mxu0 %v17914_v40  ;;  %v17978_v40 = vld [vmem:[#allocation11 + $0x750] ss:$24 sps:$4 sm:$0xff]   ;;  %11037 = vmatprep.subr.bf16.mxu1 %v17980_v10 }
 0x55f   :  { %11038 = vmatpush1.bf16.msra.mxu1 %v17978_v40  ;;  %v17950_v40 = vld [vmem:[#allocation11 + $0x224] ss:$24 sps:$4 sm:$0xff]  }
 0x560   :  { %v18609_v10 = vld [vmem:[#allocation5 + $0x208] ss:$48 sps:$4 sm:$0xff]  }
 0x561   :  { %11798 = vmatpush1.bf16.msra.mxu0 %v17912_v60  ;;  %v17927_v60 = vld [vmem:[#allocation11 + $0x130] ss:$24 sps:$4 sm:$0xff]  }
 0x562   :  { %11799 = vmatprep.subr.bf16.mxu0 %v17917_v2  ;;  %v18606_v2 = vld [vmem:[#allocation5 + $0x1ac] ss:$48 sps:$4 sm:$0xff]  }
 0x564   :  { %8053 = vmatmul.mubr.bf16.gmra.mrb[68].mxu0 %v18601_v18  ;;  %v17983_v18 = vld [vmem:[#allocation11 + $0x784] ss:$24 sps:$4 sm:$0xff]  }
 0x565   :  { %8062 = vmatprep.mubr.bf16.mxu0 %v18602_v56  ;;  %11800 = vmatpush1.bf16.msra.mxu0 %v17915_v38  ;;  %v17930_v38 = vld [vmem:[#allocation11 + $0x160] ss:$24 sps:$4 sm:$0xff]   ;;  %v17938_v56 = vld [vmem:[#allocation11 + $0x194] ss:$24 sps:$4 sm:$0xff]  }
 0x566   :  { %11801 = vmatprep.subr.bf16.mxu0 %v17920_v63  ;;  %v17981_v63 = vld [vmem:[#allocation11 + $0x780] ss:$24 sps:$4 sm:$0xff]   ;;  %11039 = vmatprep.subr.bf16.mxu1 %v17983_v18 }
 0x567   :  { %11040 = vmatpush1.bf16.msra.mxu1 %v17981_v63  ;;  %v17959_v63 = vld [vmem:[#allocation11 + $0x284] ss:$24 sps:$4 sm:$0xff]  }
 0x568   :  { %v18611_v18 = vld [vmem:[#allocation5 + $0x268] ss:$48 sps:$4 sm:$0xff]  }
 0x569   :  { %11802 = vmatpush1.bf16.msra.mxu0 %v17918_v5  ;;  %v17936_v5 = vld [vmem:[#allocation11 + $0x190] ss:$24 sps:$4 sm:$0xff]  }
 0x56a   :  { %11803 = vmatprep.subr.bf16.mxu0 %v17923_v44  ;;  %v18608_v44 = vld [vmem:[#allocation5 + $0x20c] ss:$48 sps:$4 sm:$0xff]  }
 0x56c   :  { %8063 = vmatmul.mubr.bf16.gmra.mrb[72].mxu0 %v18603_v23  ;;  %v17986_v23 = vld [vmem:[#allocation11 + $0x7b4] ss:$24 sps:$4 sm:$0xff]  }
 0x56d   :  { %8072 = vmatprep.mubr.bf16.mxu0 %v18604_v55  ;;  %11804 = vmatpush1.bf16.msra.mxu0 %v17921_v7  ;;  %v17939_v7 = vld [vmem:[#allocation11 + $0x1c0] ss:$24 sps:$4 sm:$0xff]   ;;  %v17947_v55 = vld [vmem:[#allocation11 + $0x1f4] ss:$24 sps:$4 sm:$0xff]  }
 0x56e   :  { %11805 = vmatprep.subr.bf16.mxu0 %v17926_v19  ;;  %v17984_v19 = vld [vmem:[#allocation11 + $0x7b0] ss:$24 sps:$4 sm:$0xff]   ;;  %11041 = vmatprep.subr.bf16.mxu1 %v17986_v23 }
 0x56f   :  { %11042 = vmatpush1.bf16.msra.mxu1 %v17984_v19  ;;  %v17968_v19 = vld [vmem:[#allocation11 + $0x2e4] ss:$24 sps:$4 sm:$0xff]  }
 0x570   :  { %v18613_v23 = vld [vmem:[#allocation5 + $0x2c8] ss:$48 sps:$4 sm:$0xff]  }
 0x571   :  { %11806 = vmatpush1.bf16.msra.mxu0 %v17924_v57  ;;  %v17945_v57 = vld [vmem:[#allocation11 + $0x1f0] ss:$24 sps:$4 sm:$0xff]  }
 0x572   :  { %11807 = vmatprep.subr.bf16.mxu0 %v17929_v48  ;;  %v18610_v48 = vld [vmem:[#allocation5 + $0x26c] ss:$48 sps:$4 sm:$0xff]  }
 0x574   :  { %8073 = vmatmul.mubr.bf16.gmra.mrb[76].mxu0 %v18605_v43  ;;  %v17989_v43 = vld [vmem:[#allocation11 + $0x7e4] ss:$24 sps:$4 sm:$0xff]  }
 0x575   :  { %8082 = vmatprep.mubr.bf16.mxu0 %v18606_v2  ;;  %11808 = vmatpush1.bf16.msra.mxu0 %v17927_v60  ;;  %v17948_v60 = vld [vmem:[#allocation11 + $0x220] ss:$24 sps:$4 sm:$0xff]   ;;  %v17956_v2 = vld [vmem:[#allocation11 + $0x254] ss:$24 sps:$4 sm:$0xff]  }
 0x576   :  { %11809 = vmatprep.subr.bf16.mxu0 %v17932_v58  ;;  %v17987_v58 = vld [vmem:[#allocation11 + $0x7e0] ss:$24 sps:$4 sm:$0xff]   ;;  %11043 = vmatprep.subr.bf16.mxu1 %v17989_v43  ;;  %v18002_v43 = vld [vmem:[#allocation11 + $0x870] ss:$24 sps:$4 sm:$0xff]  }
 0x577   :  { %11044 = vmatpush1.bf16.msra.mxu1 %v17987_v58  ;;  %v18616_v58 = vld [vmem:[#allocation5 + $0x38c] ss:$48 sps:$4 sm:$0xff]  }
 0x579   :  { %11810 = vmatpush1.bf16.msra.mxu0 %v17930_v38  ;;  %v17954_v38 = vld [vmem:[#allocation11 + $0x250] ss:$24 sps:$4 sm:$0xff]  }
 0x57a   :  { %11811 = vmatprep.subr.bf16.mxu0 %v17938_v56  ;;  %v18612_v56 = vld [vmem:[#allocation5 + $0x2cc] ss:$48 sps:$4 sm:$0xff]  }
 0x57c   :  { %8083 = vmatmul.mubr.bf16.gmra.mrb[80].mxu0 %v18607_v3  ;;  %v17992_v3 = vld [vmem:[#allocation11 + $0x814] ss:$24 sps:$4 sm:$0xff]  }
 0x57d   :  { %8092 = vmatprep.mubr.bf16.mxu0 %v18608_v44  ;;  %11812 = vmatpush1.bf16.msra.mxu0 %v17936_v5  ;;  %v17957_v5 = vld [vmem:[#allocation11 + $0x280] ss:$24 sps:$4 sm:$0xff]   ;;  %v17965_v44 = vld [vmem:[#allocation11 + $0x2b4] ss:$24 sps:$4 sm:$0xff]  }
 0x57e   :  { %11813 = vmatprep.subr.bf16.mxu0 %v17941_v34  ;;  %v17990_v34 = vld [vmem:[#allocation11 + $0x810] ss:$24 sps:$4 sm:$0xff]   ;;  %11045 = vmatprep.subr.bf16.mxu1 %v17992_v3 }
 0x57f   :  { %11046 = vmatpush1.bf16.msra.mxu1 %v17990_v34  ;;  %v18620_v34 = vld [vmem:[#allocation5 + $0x44c] ss:$48 sps:$4 sm:$0xff]   ;;  %v18621_v3 = vld [vmem:[#allocation5 + $0x448] ss:$48 sps:$4 sm:$0xff]  }
 0x581   :  { %11814 = vmatpush1.bf16.msra.mxu0 %v17939_v7  ;;  %v17963_v7 = vld [vmem:[#allocation11 + $0x2b0] ss:$24 sps:$4 sm:$0xff]  }
 0x582   :  { %11815 = vmatprep.subr.bf16.mxu0 %v17947_v55  ;;  %v18614_v55 = vld [vmem:[#allocation5 + $0x32c] ss:$48 sps:$4 sm:$0xff]  }
 0x584   :  { %8093 = vmatmul.mubr.bf16.gmra.mrb[84].mxu0 %v18609_v10  ;;  %v17995_v10 = vld [vmem:[#allocation11 + $0x844] ss:$24 sps:$4 sm:$0xff]  }
 0x585   :  { %8102 = vmatprep.mubr.bf16.mxu0 %v18610_v48  ;;  %11816 = vmatpush1.bf16.msra.mxu0 %v17945_v57  ;;  %v17966_v57 = vld [vmem:[#allocation11 + $0x2e0] ss:$24 sps:$4 sm:$0xff]   ;;  %v17998_v48 = vld [vmem:[#allocation11 + $0x314] ss:$24 sps:$4 sm:$0xff]  }
 0x586   :  { %11817 = vmatprep.subr.bf16.mxu0 %v17950_v40  ;;  %v17993_v40 = vld [vmem:[#allocation11 + $0x840] ss:$24 sps:$4 sm:$0xff]   ;;  %11047 = vmatprep.subr.bf16.mxu1 %v17995_v10 }
 0x587   :  { %11048 = vmatpush1.bf16.msra.mxu1 %v17993_v40  ;;  %v18625_v40 = vld [vmem:[#allocation5 + $0x508] ss:$48 sps:$4 sm:$0xff]   ;;  %v18626_v10 = vld [vmem:[#allocation5 + $0x56c] ss:$48 sps:$4 sm:$0xff]  }
 0x589   :  { %11818 = vmatpush1.bf16.msra.mxu0 %v17948_v60  ;;  %v18615_v60 = vld [vmem:[#allocation5 + $0x328] ss:$48 sps:$4 sm:$0xff]  }
 0x58a   :  { %11819 = vmatprep.subr.bf16.mxu0 %v17956_v2  ;;  %v18004_v2 = vld [vmem:[#allocation11 + $0x874] ss:$24 sps:$4 sm:$0xff]  }
 0x58b   :  { %11049 = vmatprep.subr.bf16.mxu1 %v18004_v2  ;;  %v18001_v2 = vld [vmem:[#allocation11 + $0x344] ss:$24 sps:$4 sm:$0xff]  }
 0x58c   :  { %8103 = vmatmul.mubr.bf16.gmra.mrb[88].mxu0 %v18611_v18  ;;  %11050 = vmatpush1.bf16.msra.mxu1 %v18002_v43  ;;  %v18011_v18 = vld [vmem:[#allocation11 + $0x8a0] ss:$24 sps:$4 sm:$0xff]   ;;  %v17996_v43 = vld [vmem:[#allocation11 + $0x310] ss:$24 sps:$4 sm:$0xff]  }
 0x58d   :  { %8112 = vmatprep.mubr.bf16.mxu0 %v18612_v56  ;;  %11820 = vmatpush1.bf16.msra.mxu0 %v17954_v38  ;;  %v18617_v38 = vld [vmem:[#allocation5 + $0x388] ss:$48 sps:$4 sm:$0xff]  }
 0x58e   :  { %11821 = vmatprep.subr.bf16.mxu0 %v17959_v63  ;;  %v18618_v63 = vld [vmem:[#allocation5 + $0x3ec] ss:$48 sps:$4 sm:$0xff]  }
 0x58f   :  { %v18013_v56 = vld [vmem:[#allocation11 + $0x8a4] ss:$24 sps:$4 sm:$0xff]  }
 0x590   :  { %11051 = vmatprep.subr.bf16.mxu1 %v18013_v56  ;;  %v18010_v56 = vld [vmem:[#allocation11 + $0x3a4] ss:$24 sps:$4 sm:$0xff]  }
 0x591   :  { %11822 = vmatpush1.bf16.msra.mxu0 %v17957_v5  ;;  %11052 = vmatpush1.bf16.msra.mxu1 %v18011_v18  ;;  %v18619_v5 = vld [vmem:[#allocation5 + $0x3e8] ss:$48 sps:$4 sm:$0xff]  }
 0x592   :  { %11823 = vmatprep.subr.bf16.mxu0 %v17965_v44  ;;  %v18622_v44 = vld [vmem:[#allocation5 + $0x4ac] ss:$48 sps:$4 sm:$0xff]  }
 0x593   :  { %v18005_v18 = vld [vmem:[#allocation11 + $0x370] ss:$24 sps:$4 sm:$0xff]  }
 0x594   :  { %8113 = vmatmul.mubr.bf16.gmra.mrb[92].mxu0 %v18613_v23  ;;  %v18623_v23 = vld [vmem:[#allocation5 + $0x4a8] ss:$48 sps:$4 sm:$0xff]  }
 0x595   :  { %8122 = vmatprep.mubr.bf16.mxu0 %v18614_v55  ;;  %11824 = vmatpush1.bf16.msra.mxu0 %v17963_v7  ;;  %v18022_v7 = vld [vmem:[#allocation11 + $0x8d4] ss:$24 sps:$4 sm:$0xff]  }
 0x596   :  { %11825 = vmatprep.subr.bf16.mxu0 %v17968_v19  ;;  %v18020_v19 = vld [vmem:[#allocation11 + $0x8d0] ss:$24 sps:$4 sm:$0xff]   ;;  %11053 = vmatprep.subr.bf16.mxu1 %v18022_v7  ;;  %v18017_v7 = vld [vmem:[#allocation11 + $0x400] ss:$24 sps:$4 sm:$0xff]  }
 0x597   :  { %11054 = vmatpush1.bf16.msra.mxu1 %v18020_v19  ;;  %v18624_v55 = vld [vmem:[#allocation5 + $0x50c] ss:$48 sps:$4 sm:$0xff]  }
 0x598   :  { %v18025_v19 = vld [vmem:[#allocation11 + $0x434] ss:$24 sps:$4 sm:$0xff]  }
 0x599   :  { %11826 = vmatpush1.bf16.msra.mxu0 %v17966_v57  ;;  %v18031_v57 = vld [vmem:[#allocation11 + $0xc] ss:$24 sps:$4 sm:$0xff]  }
 0x59a   :  { %11988 = vmatprep.subr.bf16.mxu0 %v17998_v48  ;;  %11216 = vmatprep.subr.bf16.mxu1 %v18031_v57  ;;  %v18627_v48 = vld [vmem:[#allocation5 + $0x568] ss:$48 sps:$4 sm:$0xff]  }
 0x59b   :  { %v18026_v57 = vld [vmem:[#allocation11 + $0x460] ss:$24 sps:$4 sm:$0xff]  }
 0x59c   :  { %8123 = vmatmul.mubr.bf16.gmra.mrb[96].mxu0 %v18615_v60  ;;  %v18628_v60 = vld [vmem:[#allocation5 + $0x5cc] ss:$48 sps:$4 sm:$0xff]  }
 0x59d   :  { %8132 = vmatprep.mubr.bf16.mxu0 %v18616_v58  ;;  %v18629_v58 = vld [vmem:[#allocation5 + $0x5c8] ss:$48 sps:$4 sm:$0xff]  }
 0x5a4   :  { %8133 = vmatmul.mubr.bf16.gmra.mrb[100].mxu0 %v18617_v38  ;;  %v17999_v38 = vld [vmem:[#allocation11 + $0x340] ss:$24 sps:$4 sm:$0xff]  }
 0x5a5   :  { %8142 = vmatprep.mubr.bf16.mxu0 %v18618_v63  ;;  %v18007_v63 = vld [vmem:[#allocation11 + $0x374] ss:$24 sps:$4 sm:$0xff]  }
 0x5ac   :  { %8143 = vmatmul.mubr.bf16.gmra.mrb[104].mxu0 %v18619_v5  ;;  %v18008_v5 = vld [vmem:[#allocation11 + $0x3a0] ss:$24 sps:$4 sm:$0xff]  }
 0x5ad   :  { %8152 = vmatprep.mubr.bf16.mxu0 %v18620_v34  ;;  %v18016_v34 = vld [vmem:[#allocation11 + $0x3d4] ss:$24 sps:$4 sm:$0xff]  }
 0x5b4   :  { %8153 = vmatmul.mubr.bf16.gmra.mrb[108].mxu0 %v18621_v3  ;;  %v18014_v3 = vld [vmem:[#allocation11 + $0x3d0] ss:$24 sps:$4 sm:$0xff]  }
 0x5b5   :  { %8162 = vmatprep.mubr.bf16.mxu0 %v18622_v44  ;;  %v18019_v44 = vld [vmem:[#allocation11 + $0x404] ss:$24 sps:$4 sm:$0xff]  }
 0x5bc   :  { %8163 = vmatmul.mubr.bf16.gmra.mrb[112].mxu0 %v18623_v23  ;;  %v18023_v23 = vld [vmem:[#allocation11 + $0x430] ss:$24 sps:$4 sm:$0xff]  }
 0x5bd   :  { %8172 = vmatprep.mubr.bf16.mxu0 %v18624_v55  ;;  %v18028_v55 = vld [vmem:[#allocation11 + $0x464] ss:$24 sps:$4 sm:$0xff]  }
 0x5c4   :  { %8173 = vmatmul.mubr.bf16.gmra.mrb[116].mxu0 %v18625_v40  ;;  %v18034_v40 = vld [vmem:[#allocation11 + $0x494] ss:$24 sps:$4 sm:$0xff]  }
 0x5c5   :  { %8182 = vmatprep.mubr.bf16.mxu0 %v18626_v10  ;;  %v18032_v10 = vld [vmem:[#allocation11 + $0x490] ss:$24 sps:$4 sm:$0xff]  }
 0x5cc   :  { %8183 = vmatmul.mubr.bf16.gmra.mrb[120].mxu0 %v18627_v48  ;;  %v18037_v48 = vld [vmem:[#allocation11 + $0x4c4] ss:$24 sps:$4 sm:$0xff]  }
 0x5cd   :  { %8192 = vmatprep.mubr.bf16.mxu0 %v18628_v60  ;;  %v18035_v60 = vld [vmem:[#allocation11 + $0x4c0] ss:$24 sps:$4 sm:$0xff]  }
 0x5d4   :  { %8193 = vmatmul.mubr.bf16.gmra.mrb[124].mxu0 %v18629_v58  ;;  %v18043_v58 = vld [vmem:[#allocation11 + $0x4f4] ss:$24 sps:$4 sm:$0xff]  }
 0x5d5   :  { %11827 = vmatprep.mubr.bf16.mxu0 %v19183_v15 }
 0x5dc   :  { %11828 = vmatmul.mubr.bf16.vlgmr.msra.gmra.mrb[128].mxu0 %v19178_v26 }
 0x5dd   :  { %11837 = vmatprep.mubr.bf16.mxu0 %v19201_v8  ;;  %11989 = vmatpush1.bf16.msra.mxu0 %v17996_v43  ;;  %v18041_v43 = vld [vmem:[#allocation11 + $0x4f0] ss:$24 sps:$4 sm:$0xff]  }
 0x5de   :  { %11990 = vmatprep.subr.bf16.mxu0 %v18001_v2  ;;  %v18046_v2 = vld [vmem:[#allocation11 + $0x524] ss:$24 sps:$4 sm:$0xff]  }
 0x5e1   :  { %11991 = vmatpush1.bf16.msra.mxu0 %v17999_v38  ;;  %v18044_v38 = vld [vmem:[#allocation11 + $0x520] ss:$24 sps:$4 sm:$0xff]  }
 0x5e2   :  { %11992 = vmatprep.subr.bf16.mxu0 %v18007_v63  ;;  %v18052_v63 = vld [vmem:[#allocation11 + $0x554] ss:$24 sps:$4 sm:$0xff]  }
 0x5e4   :  { %11838 = vmatmul.mubr.bf16.gmra.mrb[132].mxu0 %v19197_v41 }
 0x5e5   :  { %11847 = vmatprep.mubr.bf16.mxu0 %v19219_v36  ;;  %11993 = vmatpush1.bf16.msra.mxu0 %v18005_v18  ;;  %v18050_v18 = vld [vmem:[#allocation11 + $0x550] ss:$24 sps:$4 sm:$0xff]  }
 0x5e6   :  { %11994 = vmatprep.subr.bf16.mxu0 %v18010_v56  ;;  %v18055_v56 = vld [vmem:[#allocation11 + $0x584] ss:$24 sps:$4 sm:$0xff]  }
 0x5e9   :  { %11995 = vmatpush1.bf16.msra.mxu0 %v18008_v5  ;;  %v18053_v5 = vld [vmem:[#allocation11 + $0x580] ss:$24 sps:$4 sm:$0xff]  }
 0x5ea   :  { %11996 = vmatprep.subr.bf16.mxu0 %v18016_v34  ;;  %v18061_v34 = vld [vmem:[#allocation11 + $0x5b4] ss:$24 sps:$4 sm:$0xff]  }
 0x5ec   :  { %11848 = vmatmul.mubr.bf16.gmra.mrb[136].mxu0 %v19215_v17 }
 0x5ed   :  { %11857 = vmatprep.mubr.bf16.mxu0 %v19237_v13  ;;  %11997 = vmatpush1.bf16.msra.mxu0 %v18014_v3  ;;  %v18059_v3 = vld [vmem:[#allocation11 + $0x5b0] ss:$24 sps:$4 sm:$0xff]  }
 0x5ee   :  { %11998 = vmatprep.subr.bf16.mxu0 %v18019_v44  ;;  %v18064_v44 = vld [vmem:[#allocation11 + $0x5e4] ss:$24 sps:$4 sm:$0xff]  }
 0x5f1   :  { %11999 = vmatpush1.bf16.msra.mxu0 %v18017_v7  ;;  %v18062_v7 = vld [vmem:[#allocation11 + $0x5e0] ss:$24 sps:$4 sm:$0xff]  }
 0x5f2   :  { %12000 = vmatprep.subr.bf16.mxu0 %v18025_v19  ;;  %v18094_v19 = vld [vmem:[#allocation11 + $0x614] ss:$24 sps:$4 sm:$0xff]  }
 0x5f4   :  { %11858 = vmatmul.mubr.bf16.gmra.mrb[140].mxu0 %v19233_v31 }
 0x5f5   :  { %11867 = vmatprep.mubr.bf16.mxu0 %v19255_v47  ;;  %12001 = vmatpush1.bf16.msra.mxu0 %v18023_v23  ;;  %v20677_v23 = vsub.s32 4, %v20785_v14 }
 0x5f6   :  { %12002 = vmatprep.subr.bf16.mxu0 %v18028_v55  ;;  %v20676_v55 = vsub.s32 5, %v20785_v14  ;;  %v18040_v14 = vld [vmem:[#allocation11 + $0x3c] ss:$24 sps:$4 sm:$0xff]  }
 0x5f9   :  { %12003 = vmatpush1.bf16.msra.mxu0 %v18026_v57  ;;  %v18630_v57 = vld [vmem:[#allocation10] sm:$0x3f] }
 0x5fa   :  { %12004 = vmatprep.subr.bf16.mxu0 %v18034_v40  ;;  %v19772_v40 = vrot.slane %v18630_v57, %v20677_v23  ;;  %v18029_v23 = vld [vmem:[#allocation11 + $0x8] ss:$24 sps:$4 sm:$0xff]  }
 0x5fc   :  { %11868 = vmatmul.mubr.bf16.gmra.mrb[144].mxu0 %v19251_v12 }
 0x5fd   :  { %11877 = vmatprep.mubr.bf16.mxu0 %v19275_v30  ;;  %12005 = vmatpush1.bf16.msra.mxu0 %v18032_v10  ;;  %v19777_v10 = vrot.slane %v18630_v57, %v20676_v55 }
 0x5fe   :  { %12006 = vmatprep.subr.bf16.mxu0 %v18037_v48 }
 0x601   :  { %12007 = vmatpush1.bf16.msra.mxu0 %v18035_v60 }
 0x602   :  { %12008 = vmatprep.subr.bf16.mxu0 %v18043_v58 }
 0x604   :  { %11878 = vmatmul.mubr.bf16.gmra.mrb[148].mxu0 %v19271_v0 }
 0x605   :  { %11887 = vmatprep.mubr.bf16.mxu0 %v19295_v35  ;;  %12009 = vmatpush1.bf16.msra.mxu0 %v18041_v43 }
 0x606   :  { %12010 = vmatprep.subr.bf16.mxu0 %v18046_v2 }
 0x609   :  { %12011 = vmatpush1.bf16.msra.mxu0 %v18044_v38 }
 0x60a   :  { %12012 = vmatprep.subr.bf16.mxu0 %v18052_v63 }
 0x60c   :  { %11888 = vmatmul.mubr.bf16.gmra.mrb[152].mxu0 %v19291_v32 }
 0x60d   :  { %11897 = vmatprep.mubr.bf16.mxu0 %v19315_v16  ;;  %12013 = vmatpush1.bf16.msra.mxu0 %v18050_v18 }
 0x60e   :  { %12014 = vmatprep.subr.bf16.mxu0 %v18055_v56 }
 0x611   :  { %12015 = vmatpush1.bf16.msra.mxu0 %v18053_v5 }
 0x612   :  { %12016 = vmatprep.subr.bf16.mxu0 %v18061_v34 }
 0x614   :  { %11898 = vmatmul.mubr.bf16.gmra.mrb[156].mxu0 %v19311_v39 }
 0x615   :  { %11907 = vmatprep.mubr.bf16.mxu0 %v19335_v11  ;;  %12017 = vmatpush1.bf16.msra.mxu0 %v18059_v3 }
 0x616   :  { %12018 = vmatprep.subr.bf16.mxu0 %v18064_v44 }
 0x619   :  { %12019 = vmatpush1.bf16.msra.mxu0 %v18062_v7 }
 0x61a   :  { %12181 = vmatprep.subr.bf16.mxu0 %v18094_v19 }
 0x61c   :  { %11908 = vmatmul.mubr.bf16.gmra.mrb[160].mxu0 %v19331_v21 }
 0x61d   :  { %11917 = vmatprep.mubr.bf16.mxu0 %v19355_v54 }
 0x624   :  { %11918 = vmatmul.mubr.bf16.gmra.mrb[164].mxu0 %v19351_v50 }
 0x625   :  { %11927 = vmatprep.mubr.bf16.mxu0 %v19375_v9 }
 0x62c   :  { %11928 = vmatmul.mubr.bf16.gmra.mrb[168].mxu0 %v19371_v42 }
 0x62d   :  { %11937 = vmatprep.mubr.bf16.mxu0 %v19395_v62 }
 0x62f   :  { %v8044_v48 = vpop.f32.mrb[64].mxu0 }
 0x630   :  { %v15115_v60 = vadd.f32 %v8044_v48, %v19772_v40  ;;  %v8046_v58 = vpop.f32.mrb[65].mxu0 }
 0x631   :  { %v15116_v43 = vadd.f32 %v8046_v58, %v19777_v10  ;;  %v8048_v2 = vpop.f32.mrb[66].mxu0 }
 0x632   :  { %v8401_v38 = vmul.f32 %v15115_v60, %v19163_v46  ;;  %v15117_v63 = vadd.f32 %v8048_v2, %v19772_v40  ;;  %v8050_v18 = vpop.f32.mrb[67].mxu0  ;;  %vm8207_vm0 = vcmp.gt.f32.partialorder %v15115_v60, 0.0 }
 0x633   :  { %v8402_v56 = vmul.f32 %v15116_v43, %v19163_v46  ;;  %v15118_v5 = vadd.f32 %v8050_v18, %v19777_v10  ;;  %vm8208_vm1 = vcmp.gt.f32.partialorder %v15116_v43, 0.0 }
 0x634   :  { %vm8213_vm2 = vcmp.gt.f32.partialorder %v15117_v63, 0.0  ;;  %v8407_v34 = vmul.f32 %v15117_v63, %v19163_v46  ;;  %11938 = vmatmul.mubr.bf16.gmra.mrb[172].mxu0 %v19391_v52  ;;  %v8593_v44 = vsel %vm8207_vm0, %v15115_v60, %v8401_v38 }
 0x635   :  { %vm8214_vm3 = vcmp.gt.f32.partialorder %v15118_v5, 0.0  ;;  %v8408_v3 = vmul.f32 %v15118_v5, %v19163_v46  ;;  %11947 = vmatprep.mubr.bf16.mxu0 %v19415_v1  ;;  %v8594_v48 = vsel %vm8208_vm1, %v15116_v43, %v8402_v56 }
 0x636   :  { %v8599_v7 = vsel %vm8213_vm2, %v15117_v63, %v8407_v34  ;;  %v18049_v34 = vld [vmem:[#allocation11 + $0x6c] ss:$24 sps:$4 sm:$0xff]  }
 0x637   :  { %v19789_v19 = vpack.c.bf16 %v8599_v7, %v8593_v44  ;;  %v8054_v57 = vpop.f32.mrb[68].mxu0  ;;  %v8600_v58 = vsel %vm8214_vm3, %v15118_v5, %v8408_v3  ;;  %v18038_v5 = vld [vmem:[#allocation11 + $0x38] ss:$24 sps:$4 sm:$0xff]  }
 0x638   :  { %v15119_v2 = vadd.f32 %v8054_v57, %v19772_v40  ;;  %v8056_v18 = vpop.f32.mrb[69].mxu0  ;;  %v19792_v55 = vpack.c.bf16 %v8600_v58, %v8594_v48 }
 0x639   :  { %v15120_v52 = vadd.f32 %v8056_v18, %v19777_v10  ;;  %v8058_v62 = vpop.f32.mrb[70].mxu0 }
 0x63a   :  { %v8413_v42 = vmul.f32 %v15119_v2, %v19163_v46  ;;  %v15121_v60 = vadd.f32 %v8058_v62, %v19772_v40  ;;  %v8060_v38 = vpop.f32.mrb[71].mxu0  ;;  %11055 = vmatprep.mubr.bf16.mxu1 %v19792_v55  ;;  %vm8219_vm4 = vcmp.gt.f32.partialorder %v15119_v2, 0.0 }
 0x63b   :  { %v8414_v43 = vmul.f32 %v15120_v52, %v19163_v46  ;;  %v15122_v63 = vadd.f32 %v8060_v38, %v19777_v10  ;;  %11056 = vmatmul.mubr.bf16.vlgmr.msra.gmra.mrb[128].mxu1 %v19789_v19  ;;  %vm8220_vm5 = vcmp.gt.f32.partialorder %v15120_v52, 0.0 }
 0x63c   :  { %vm8225_vm6 = vcmp.gt.f32.partialorder %v15121_v60, 0.0  ;;  %v8419_v56 = vmul.f32 %v15121_v60, %v19163_v46  ;;  %11217 = vmatpush1.bf16.msra.mxu1 %v18029_v23  ;;  %11948 = vmatmul.mubr.bf16.gmra.mrb[176].mxu0 %v19411_v49  ;;  %v8605_v3 = vsel %vm8219_vm4, %v15119_v2, %v8413_v42  ;;  %v18047_v49 = vld [vmem:[#allocation11 + $0x68] ss:$24 sps:$4 sm:$0xff]  }
 0x63d   :  { %vm8226_vm7 = vcmp.gt.f32.partialorder %v15122_v63, 0.0  ;;  %v8420_v62 = vmul.f32 %v15122_v63, %v19163_v46  ;;  %11957 = vmatprep.mubr.bf16.mxu0 %v19433_v37  ;;  %11218 = vmatprep.subr.bf16.mxu1 %v18040_v14  ;;  %v8606_v57 = vsel %vm8220_vm5, %v15120_v52, %v8414_v43  ;;  %v18058_v14 = vld [vmem:[#allocation11 + $0x9c] ss:$24 sps:$4 sm:$0xff]  }
 0x63e   :  { %v8611_v44 = vsel %vm8225_vm6, %v15121_v60, %v8419_v56  ;;  %v18056_v56 = vld [vmem:[#allocation11 + $0x98] ss:$24 sps:$4 sm:$0xff]  }
 0x63f   :  { %v8064_v7 = vpop.f32.mrb[72].mxu0  ;;  %v8612_v48 = vsel %vm8226_vm7, %v15122_v63, %v8420_v62  ;;  %v19805_v58 = vpack.c.bf16 %v8611_v44, %v8605_v3 }
 0x640   :  { %v15123_v18 = vadd.f32 %v8064_v7, %v19772_v40  ;;  %v8066_v23 = vpop.f32.mrb[73].mxu0  ;;  %v19808_v38 = vpack.c.bf16 %v8612_v48, %v8606_v57  ;;  %11219 = vmatpush1.bf16.msra.mxu1 %v18038_v5  ;;  %v18067_v5 = vld [vmem:[#allocation11 + $0xcc] ss:$24 sps:$4 sm:$0xff]  }
 0x641   :  { %v15124_v1 = vadd.f32 %v8066_v23, %v19777_v10  ;;  %v8068_v9 = vpop.f32.mrb[74].mxu0  ;;  %11220 = vmatprep.subr.bf16.mxu1 %v18049_v34 }
 0x642   :  { %v8425_v42 = vmul.f32 %v15123_v18, %v19163_v46  ;;  %v15125_v2 = vadd.f32 %v8068_v9, %v19772_v40  ;;  %v8070_v52 = vpop.f32.mrb[75].mxu0  ;;  %11065 = vmatprep.mubr.bf16.mxu1 %v19808_v38  ;;  %vm8231_vm8 = vcmp.gt.f32.partialorder %v15123_v18, 0.0 }
 0x643   :  { %v8426_v60 = vmul.f32 %v15124_v1, %v19163_v46  ;;  %v15126_v43 = vadd.f32 %v8070_v52, %v19777_v10  ;;  %11066 = vmatmul.mubr.bf16.gmra.mrb[132].mxu1 %v19805_v58  ;;  %vm8232_vm9 = vcmp.gt.f32.partialorder %v15124_v1, 0.0 }
 0x644   :  { %vm8237_vm10 = vcmp.gt.f32.partialorder %v15125_v2, 0.0  ;;  %v8431_v63 = vmul.f32 %v15125_v2, %v19163_v46  ;;  %11958 = vmatmul.mubr.bf16.gmra.mrb[180].mxu0 %v19429_v28  ;;  %11221 = vmatpush1.bf16.msra.mxu1 %v18047_v49  ;;  %v8617_v62 = vsel %vm8231_vm8, %v15123_v18, %v8425_v42  ;;  %v18065_v49 = vld [vmem:[#allocation11 + $0xc8] ss:$24 sps:$4 sm:$0xff]  }
 0x645   :  { %vm8238_vm11 = vcmp.gt.f32.partialorder %v15126_v43, 0.0  ;;  %v8432_v9 = vmul.f32 %v15126_v43, %v19163_v46  ;;  %11967 = vmatprep.mubr.bf16.mxu0 %v19451_v51  ;;  %11222 = vmatprep.subr.bf16.mxu1 %v18058_v14  ;;  %v8618_v44 = vsel %vm8232_vm9, %v15124_v1, %v8426_v60  ;;  %v18070_v14 = vld [vmem:[#allocation11 + $0xfc] ss:$24 sps:$4 sm:$0xff]  }
 0x646   :  { %v8623_v34 = vsel %vm8237_vm10, %v15125_v2, %v8431_v63  ;;  %v18068_v63 = vld [vmem:[#allocation11 + $0xf8] ss:$24 sps:$4 sm:$0xff]  }
 0x647   :  { %v8074_v3 = vpop.f32.mrb[76].mxu0  ;;  %v8624_v7 = vsel %vm8238_vm11, %v15126_v43, %v8432_v9  ;;  %v19821_v57 = vpack.c.bf16 %v8623_v34, %v8617_v62  ;;  %v18073_v9 = vld [vmem:[#allocation11 + $0x12c] ss:$24 sps:$4 sm:$0xff]  }
 0x648   :  { %v15127_v48 = vadd.f32 %v8074_v3, %v19772_v40  ;;  %v8076_v23 = vpop.f32.mrb[77].mxu0  ;;  %v19824_v52 = vpack.c.bf16 %v8624_v7, %v8618_v44  ;;  %11223 = vmatpush1.bf16.msra.mxu1 %v18056_v56  ;;  %v20807_v56 = vld [vmem:[#allocation30_spill] sm:$0xff] }
 0x649   :  { %v15128_v28 = vadd.f32 %v8076_v23, %v19777_v10  ;;  %v8078_v37 = vpop.f32.mrb[78].mxu0  ;;  %11224 = vmatprep.subr.bf16.mxu1 %v18067_v5 }
 0x64a   :  { %v8437_v18 = vmul.f32 %v15127_v48, %v19163_v46  ;;  %v15129_v42 = vadd.f32 %v8078_v37, %v19772_v40  ;;  %v8080_v1 = vpop.f32.mrb[79].mxu0  ;;  %11075 = vmatprep.mubr.bf16.mxu1 %v19824_v52  ;;  %vm8243_vm12 = vcmp.gt.f32.partialorder %v15127_v48, 0.0 }
 0x64b   :  { %v8438_v2 = vmul.f32 %v15128_v28, %v19163_v46  ;;  %v15130_v60 = vadd.f32 %v8080_v1, %v19777_v10  ;;  %11076 = vmatmul.mubr.bf16.gmra.mrb[136].mxu1 %v19821_v57  ;;  %vm8244_vm13 = vcmp.gt.f32.partialorder %v15128_v28, 0.0 }
 0x64c   :  { %vm8249_vm14 = vcmp.gt.f32.partialorder %v15129_v42, 0.0  ;;  %v8443_v43 = vmul.f32 %v15129_v42, %v19163_v46  ;;  %11968 = vmatmul.mubr.bf16.gmra.mrb[184].mxu0 %v19447_v61  ;;  %11225 = vmatpush1.bf16.msra.mxu1 %v18065_v49  ;;  %v8629_v5 = vsel %vm8243_vm12, %v15127_v48, %v8437_v18  ;;  %v18071_v49 = vld [vmem:[#allocation11 + $0x128] ss:$24 sps:$4 sm:$0xff]  }
 0x64d   :  { %vm8250_vm15 = vcmp.gt.f32.partialorder %v15130_v60, 0.0  ;;  %v8444_v37 = vmul.f32 %v15130_v60, %v19163_v46  ;;  %11977 = vmatprep.mubr.bf16.mxu0 %v20807_v56  ;;  %11226 = vmatprep.subr.bf16.mxu1 %v18070_v14  ;;  %v8630_v3 = vsel %vm8244_vm13, %v15128_v28, %v8438_v2  ;;  %v18076_v14 = vld [vmem:[#allocation11 + $0x15c] ss:$24 sps:$4 sm:$0xff]  }
 0x64e   :  { %v8635_v62 = vsel %vm8249_vm14, %v15129_v42, %v8443_v43  ;;  %v20809_v43 = vld [vmem:[#allocation29_spill] sm:$0xff] }
 0x64f   :  { %v8084_v34 = vpop.f32.mrb[80].mxu0  ;;  %v8636_v44 = vsel %vm8250_vm15, %v15130_v60, %v8444_v37  ;;  %v19837_v7 = vpack.c.bf16 %v8635_v62, %v8629_v5  ;;  %v20810_v37 = vld [vmem:[#allocation32_spill] sm:$0xff] }
 0x650   :  { %v15131_v23 = vadd.f32 %v8084_v34, %v19772_v40  ;;  %v8086_v1 = vpop.f32.mrb[81].mxu0  ;;  %v19840_v61 = vpack.c.bf16 %v8636_v44, %v8630_v3  ;;  %11227 = vmatpush1.bf16.msra.mxu1 %v18068_v63  ;;  %v18074_v63 = vld [vmem:[#allocation11 + $0x158] ss:$24 sps:$4 sm:$0xff]  }
 0x651   :  { %20808 = vst [vmem:[#allocation56_spill] sm:$0xff] %v19837_v7  ;;  %v15132_v51 = vadd.f32 %v8086_v1, %v19777_v10  ;;  %v8088_v50 = vpop.f32.mrb[82].mxu0  ;;  %11228 = vmatprep.subr.bf16.mxu1 %v18073_v9  ;;  %v18079_v9 = vld [vmem:[#allocation11 + $0x18c] ss:$24 sps:$4 sm:$0xff]  }
 0x652   :  { %v8449_v48 = vmul.f32 %v15131_v23, %v19163_v46  ;;  %v15133_v18 = vadd.f32 %v8088_v50, %v19772_v40  ;;  %v8090_v28 = vpop.f32.mrb[83].mxu0  ;;  %11085 = vmatprep.mubr.bf16.mxu1 %v19840_v61  ;;  %vm8255_vm0 = vcmp.gt.f32.partialorder %v15131_v23, 0.0 }
 0x653   :  { %v8450_v42 = vmul.f32 %v15132_v51, %v19163_v46  ;;  %v15134_v2 = vadd.f32 %v8090_v28, %v19777_v10  ;;  %11086 = vmatmul.mubr.bf16.gmra.mrb[140].mxu1 %v19837_v7  ;;  %vm8256_vm1 = vcmp.gt.f32.partialorder %v15132_v51, 0.0 }
 0x654   :  { %vm8261_vm2 = vcmp.gt.f32.partialorder %v15133_v18, 0.0  ;;  %v8455_v60 = vmul.f32 %v15133_v18, %v19163_v46  ;;  %11978 = vmatmul.mubr.bf16.gmra.mrb[188].mxu0 %v20809_v43  ;;  %11229 = vmatpush1.bf16.msra.mxu1 %v18071_v49  ;;  %v8641_v5 = vsel %vm8255_vm0, %v15131_v23, %v8449_v48  ;;  %v18077_v49 = vld [vmem:[#allocation11 + $0x188] ss:$24 sps:$4 sm:$0xff]  }
 0x655   :  { %vm8262_vm3 = vcmp.gt.f32.partialorder %v15134_v2, 0.0  ;;  %v8456_v50 = vmul.f32 %v15134_v2, %v19163_v46  ;;  %12020 = vmatprep.mubr.bf16.mxu0 %v20810_v37  ;;  %11230 = vmatprep.subr.bf16.mxu1 %v18076_v14  ;;  %v8642_v3 = vsel %vm8256_vm1, %v15132_v51, %v8450_v42  ;;  %v18082_v14 = vld [vmem:[#allocation11 + $0x1bc] ss:$24 sps:$4 sm:$0xff]  }
 0x656   :  { %v8647_v62 = vsel %vm8261_vm2, %v15133_v18, %v8455_v60  ;;  %v18092_v18 = vld [vmem:[#allocation11 + $0x610] ss:$24 sps:$4 sm:$0xff]   ;;  %v18097_v60 = vld [vmem:[#allocation11 + $0x644] ss:$24 sps:$4 sm:$0xff]  }
 0x657   :  { %v8094_v34 = vpop.f32.mrb[84].mxu0  ;;  %v8648_v44 = vsel %vm8262_vm3, %v15134_v2, %v8456_v50  ;;  %v19853_v1 = vpack.c.bf16 %v8647_v62, %v8641_v5  ;;  %v18085_v5 = vld [vmem:[#allocation11 + $0x1ec] ss:$24 sps:$4 sm:$0xff]  }
 0x658   :  { %v15135_v28 = vadd.f32 %v8094_v34, %v19772_v40  ;;  %v8096_v56 = vpop.f32.mrb[85].mxu0  ;;  %v19856_v43 = vpack.c.bf16 %v8648_v44, %v8642_v3  ;;  %11231 = vmatpush1.bf16.msra.mxu1 %v18074_v63  ;;  %v20813_v63 = vld [vmem:[#allocation31_spill] sm:$0xff]  ;;  %v18095_v3 = vld [vmem:[#allocation11 + $0x640] ss:$24 sps:$4 sm:$0xff]  }
 0x659   :  { %20811 = vst [vmem:[#allocation57_spill] sm:$0xff] %v19853_v1  ;;  %v15136_v54 = vadd.f32 %v8096_v56, %v19777_v10  ;;  %v8098_v21 = vpop.f32.mrb[86].mxu0  ;;  %11232 = vmatprep.subr.bf16.mxu1 %v18079_v9  ;;  %v20814_v9 = vld [vmem:[#allocation34_spill] sm:$0xff] }
 0x65a   :  { %20812 = vst [vmem:[#allocation58_spill] sm:$0xff] %v19856_v43  ;;  %v8461_v23 = vmul.f32 %v15135_v28, %v19163_v46  ;;  %v15137_v48 = vadd.f32 %v8098_v21, %v19772_v40  ;;  %v8100_v51 = vpop.f32.mrb[87].mxu0  ;;  %11095 = vmatprep.mubr.bf16.mxu1 %v19856_v43  ;;  %vm8267_vm4 = vcmp.gt.f32.partialorder %v15135_v28, 0.0  ;;  %v18080_v21 = vld [vmem:[#allocation11 + $0x1b8] ss:$24 sps:$4 sm:$0xff]  }
 0x65b   :  { %v8462_v42 = vmul.f32 %v15136_v54, %v19163_v46  ;;  %v15138_v2 = vadd.f32 %v8100_v51, %v19777_v10  ;;  %11096 = vmatmul.mubr.bf16.gmra.mrb[144].mxu1 %v19853_v1  ;;  %vm8268_vm5 = vcmp.gt.f32.partialorder %v15136_v54, 0.0 }
 0x65c   :  { %vm8273_vm6 = vcmp.gt.f32.partialorder %v15137_v48, 0.0  ;;  %v8467_v56 = vmul.f32 %v15137_v48, %v19163_v46  ;;  %12021 = vmatmul.mubr.bf16.vlgmr.msra.gmra.mrb[128].mxu0 %v20813_v63  ;;  %11233 = vmatpush1.bf16.msra.mxu1 %v18077_v49  ;;  %v8653_v62 = vsel %vm8267_vm4, %v15135_v28, %v8461_v23  ;;  %v18103_v49 = vld [vmem:[#allocation11 + $0x674] ss:$24 sps:$4 sm:$0xff]  }
 0x65d   :  { %vm8274_vm7 = vcmp.gt.f32.partialorder %v15138_v2, 0.0  ;;  %v8468_v50 = vmul.f32 %v15138_v2, %v19163_v46  ;;  %12030 = vmatprep.mubr.bf16.mxu0 %v20814_v9  ;;  %11234 = vmatprep.subr.bf16.mxu1 %v18082_v14  ;;  %v8654_v51 = vsel %vm8268_vm5, %v15136_v54, %v8462_v42  ;;  %v18083_v14 = vld [vmem:[#allocation11 + $0x1e8] ss:$24 sps:$4 sm:$0xff]  }
 0x65e   :  { %v8659_v34 = vsel %vm8273_vm6, %v15137_v48, %v8467_v56  ;;  %12182 = vmatpush1.bf16.msra.mxu0 %v18092_v18  ;;  %v18088_v48 = vld [vmem:[#allocation11 + $0x21c] ss:$24 sps:$4 sm:$0xff]  }
 0x65f   :  { %v8104_v44 = vpop.f32.mrb[88].mxu0  ;;  %v8660_v37 = vsel %vm8274_vm7, %v15138_v2, %v8468_v50  ;;  %v19871_v1 = vpack.c.bf16 %v8659_v34, %v8653_v62  ;;  %12183 = vmatprep.subr.bf16.mxu0 %v18097_v60  ;;  %v18101_v2 = vld [vmem:[#allocation11 + $0x670] ss:$24 sps:$4 sm:$0xff]   ;;  %v18091_v34 = vld [vmem:[#allocation11 + $0x24c] ss:$24 sps:$4 sm:$0xff]  }
 0x660   :  { %v15139_v63 = vadd.f32 %v8104_v44, %v19772_v40  ;;  %v8106_v43 = vpop.f32.mrb[89].mxu0  ;;  %v19874_v7 = vpack.c.bf16 %v8660_v37, %v8654_v51  ;;  %11235 = vmatpush1.bf16.msra.mxu1 %v18080_v21  ;;  %v20817_v21 = vld [vmem:[#allocation33_spill] sm:$0xff]  ;;  %v20818_v62 = vld [vmem:[#allocation36_spill] sm:$0xff] }
 0x661   :  { %20815 = vst [vmem:[#allocation59_spill] sm:$0xff] %v19871_v1  ;;  %v15140_v28 = vadd.f32 %v8106_v43, %v19777_v10  ;;  %v8108_v23 = vpop.f32.mrb[90].mxu0  ;;  %11236 = vmatprep.subr.bf16.mxu1 %v18085_v5  ;;  %v18106_v43 = vld [vmem:[#allocation11 + $0x6a4] ss:$24 sps:$4 sm:$0xff]   ;;  %v18086_v50 = vld [vmem:[#allocation11 + $0x218] ss:$24 sps:$4 sm:$0xff]  }
 0x662   :  { %20816 = vst [vmem:[#allocation60_spill] sm:$0xff] %v19874_v7  ;;  %v8473_v18 = vmul.f32 %v15139_v63, %v19163_v46  ;;  %v15141_v54 = vadd.f32 %v8108_v23, %v19772_v40  ;;  %v8110_v42 = vpop.f32.mrb[91].mxu0  ;;  %11105 = vmatprep.mubr.bf16.mxu1 %v19874_v7  ;;  %12184 = vmatpush1.bf16.msra.mxu0 %v18095_v3  ;;  %vm8279_vm8 = vcmp.gt.f32.partialorder %v15139_v63, 0.0  ;;  %v18104_v51 = vld [vmem:[#allocation11 + $0x6a0] ss:$24 sps:$4 sm:$0xff]  }
 0x663   :  { %v8474_v37 = vmul.f32 %v15140_v28, %v19163_v46  ;;  %v15142_v60 = vadd.f32 %v8110_v42, %v19777_v10  ;;  %11106 = vmatmul.mubr.bf16.gmra.mrb[148].mxu1 %v19871_v1  ;;  %12185 = vmatprep.subr.bf16.mxu0 %v18103_v49  ;;  %vm8280_vm9 = vcmp.gt.f32.partialorder %v15140_v28, 0.0 }
 0x664   :  { %vm8285_vm10 = vcmp.gt.f32.partialorder %v15141_v54, 0.0  ;;  %v8479_v56 = vmul.f32 %v15141_v54, %v19163_v46  ;;  %12031 = vmatmul.mubr.bf16.gmra.mrb[132].mxu0 %v20817_v21  ;;  %11237 = vmatpush1.bf16.msra.mxu1 %v18083_v14  ;;  %v8665_v3 = vsel %vm8279_vm8, %v15139_v63, %v8473_v18  ;;  %v18112_v14 = vld [vmem:[#allocation11 + $0x6d4] ss:$24 sps:$4 sm:$0xff]  }
 0x665   :  { %vm8286_vm11 = vcmp.gt.f32.partialorder %v15142_v60, 0.0  ;;  %v8480_v5 = vmul.f32 %v15142_v60, %v19163_v46  ;;  %12040 = vmatprep.mubr.bf16.mxu0 %v20818_v62  ;;  %11238 = vmatprep.subr.bf16.mxu1 %v18088_v48  ;;  %v8666_v23 = vsel %vm8280_vm9, %v15140_v28, %v8474_v37  ;;  %v18089_v48 = vld [vmem:[#allocation11 + $0x248] ss:$24 sps:$4 sm:$0xff]  }
 0x666   :  { %v8671_v44 = vsel %vm8285_vm10, %v15141_v54, %v8479_v56  ;;  %12186 = vmatpush1.bf16.msra.mxu0 %v18101_v2  ;;  %v18100_v54 = vld [vmem:[#allocation11 + $0x27c] ss:$24 sps:$4 sm:$0xff]  }
 0x667   :  { %v8114_v49 = vpop.f32.mrb[92].mxu0  ;;  %v8672_v42 = vsel %vm8286_vm11, %v15142_v60, %v8480_v5  ;;  %v19889_v9 = vpack.c.bf16 %v8671_v44, %v8665_v3  ;;  %12187 = vmatprep.subr.bf16.mxu0 %v18106_v43  ;;  %v18110_v60 = vld [vmem:[#allocation11 + $0x6d0] ss:$24 sps:$4 sm:$0xff]   ;;  %v20822_v44 = vld [vmem:[#allocation42_spill] sm:$0xff] }
 0x668   :  { %v15143_v21 = vadd.f32 %v8114_v49, %v19772_v40  ;;  %v8116_v1 = vpop.f32.mrb[93].mxu0  ;;  %v19892_v7 = vpack.c.bf16 %v8672_v42, %v8666_v23  ;;  %11239 = vmatpush1.bf16.msra.mxu1 %v18086_v50  ;;  %v20821_v5 = vld [vmem:[#allocation35_spill] sm:$0xff]  ;;  %v18113_v42 = vld [vmem:[#allocation11 + $0x700] ss:$24 sps:$4 sm:$0xff]  }
 0x669   :  { %20819 = vst [vmem:[#allocation61_spill] sm:$0xff] %v19889_v9  ;;  %v15144_v63 = vadd.f32 %v8116_v1, %v19777_v10  ;;  %v8118_v18 = vpop.f32.mrb[94].mxu0  ;;  %11240 = vmatprep.subr.bf16.mxu1 %v18091_v34  ;;  %v18115_v1 = vld [vmem:[#allocation11 + $0x704] ss:$24 sps:$4 sm:$0xff]   ;;  %v18098_v34 = vld [vmem:[#allocation11 + $0x278] ss:$24 sps:$4 sm:$0xff]  }
 0x66a   :  { %20820 = vst [vmem:[#allocation62_spill] sm:$0xff] %v19892_v7  ;;  %v8485_v2 = vmul.f32 %v15143_v21, %v19163_v46  ;;  %v15145_v28 = vadd.f32 %v8118_v18, %v19772_v40  ;;  %v8120_v37 = vpop.f32.mrb[95].mxu0  ;;  %11115 = vmatprep.mubr.bf16.mxu1 %v19892_v7  ;;  %12188 = vmatpush1.bf16.msra.mxu0 %v18104_v51  ;;  %vm8291_vm12 = vcmp.gt.f32.partialorder %v15143_v21, 0.0  ;;  %v18109_v51 = vld [vmem:[#allocation11 + $0x2ac] ss:$24 sps:$4 sm:$0xff]  }
 0x66b   :  { %v8486_v43 = vmul.f32 %v15144_v63, %v19163_v46  ;;  %v15146_v56 = vadd.f32 %v8120_v37, %v19777_v10  ;;  %11116 = vmatmul.mubr.bf16.gmra.mrb[152].mxu1 %v19889_v9  ;;  %12189 = vmatprep.subr.bf16.mxu0 %v18112_v14  ;;  %vm8292_vm13 = vcmp.gt.f32.partialorder %v15144_v63, 0.0 }
 0x66c   :  { %vm8297_vm14 = vcmp.gt.f32.partialorder %v15145_v28, 0.0  ;;  %v8491_v50 = vmul.f32 %v15145_v28, %v19163_v46  ;;  %12041 = vmatmul.mubr.bf16.gmra.mrb[136].mxu0 %v20821_v5  ;;  %11241 = vmatpush1.bf16.msra.mxu1 %v18089_v48  ;;  %v8677_v49 = vsel %vm8291_vm12, %v15143_v21, %v8485_v2  ;;  %v18121_v48 = vld [vmem:[#allocation11 + $0x734] ss:$24 sps:$4 sm:$0xff]  }
 0x66d   :  { %vm8298_vm15 = vcmp.gt.f32.partialorder %v15146_v56, 0.0  ;;  %v8492_v3 = vmul.f32 %v15146_v56, %v19163_v46  ;;  %12050 = vmatprep.mubr.bf16.mxu0 %v20822_v44  ;;  %11242 = vmatprep.subr.bf16.mxu1 %v18100_v54  ;;  %v8678_v18 = vsel %vm8292_vm13, %v15144_v63, %v8486_v43  ;;  %v18107_v54 = vld [vmem:[#allocation11 + $0x2a8] ss:$24 sps:$4 sm:$0xff]  }
 0x66e   :  { %v8683_v23 = vsel %vm8297_vm14, %v15145_v28, %v8491_v50  ;;  %12190 = vmatpush1.bf16.msra.mxu0 %v18110_v60  ;;  %v18118_v28 = vld [vmem:[#allocation11 + $0x2dc] ss:$24 sps:$4 sm:$0xff]  }
 0x66f   :  { %v8124_v14 = vpop.f32.mrb[96].mxu0  ;;  %v8684_v37 = vsel %vm8298_vm15, %v15146_v56, %v8492_v3  ;;  %v19907_v62 = vpack.c.bf16 %v8683_v23, %v8677_v49  ;;  %12191 = vmatprep.subr.bf16.mxu0 %v18115_v1  ;;  %v18119_v56 = vld [vmem:[#allocation11 + $0x730] ss:$24 sps:$4 sm:$0xff]   ;;  %v20825_v3 = vld [vmem:[#allocation37_spill] sm:$0xff] }
 0x670   :  { %v15147_v5 = vadd.f32 %v8124_v14, %v19772_v40  ;;  %v8126_v9 = vpop.f32.mrb[97].mxu0  ;;  %v19910_v7 = vpack.c.bf16 %v8684_v37, %v8678_v18  ;;  %11243 = vmatpush1.bf16.msra.mxu1 %v18098_v34  ;;  %v20826_v23 = vld [vmem:[#allocation44_spill] sm:$0xff]  ;;  %v18122_v37 = vld [vmem:[#allocation11 + $0x760] ss:$24 sps:$4 sm:$0xff]  }
 0x671   :  { %20823 = vst [vmem:[#allocation63_spill] sm:$0xff] %v19907_v62  ;;  %v15148_v21 = vadd.f32 %v8126_v9, %v19777_v10  ;;  %v8128_v2 = vpop.f32.mrb[98].mxu0  ;;  %11244 = vmatprep.subr.bf16.mxu1 %v18109_v51  ;;  %v18124_v9 = vld [vmem:[#allocation11 + $0x764] ss:$24 sps:$4 sm:$0xff]   ;;  %v18116_v51 = vld [vmem:[#allocation11 + $0x2d8] ss:$24 sps:$4 sm:$0xff]  }
 0x672   :  { %20824 = vst [vmem:[#allocation64_spill] sm:$0xff] %v19910_v7  ;;  %v8497_v60 = vmul.f32 %v15147_v5, %v19163_v46  ;;  %v15149_v63 = vadd.f32 %v8128_v2, %v19772_v40  ;;  %v8130_v43 = vpop.f32.mrb[99].mxu0  ;;  %11125 = vmatprep.mubr.bf16.mxu1 %v19910_v7  ;;  %12192 = vmatpush1.bf16.msra.mxu0 %v18113_v42  ;;  %vm8303_vm0 = vcmp.gt.f32.partialorder %v15147_v5, 0.0  ;;  %v18127_v42 = vld [vmem:[#allocation11 + $0x30c] ss:$24 sps:$4 sm:$0xff]  }
 0x673   :  { %v8498_v1 = vmul.f32 %v15148_v21, %v19163_v46  ;;  %v15150_v50 = vadd.f32 %v8130_v43, %v19777_v10  ;;  %11126 = vmatmul.mubr.bf16.gmra.mrb[156].mxu1 %v19907_v62  ;;  %12193 = vmatprep.subr.bf16.mxu0 %v18121_v48  ;;  %vm8304_vm1 = vcmp.gt.f32.partialorder %v15148_v21, 0.0 }
 0x674   :  { %vm8309_vm2 = vcmp.gt.f32.partialorder %v15149_v63, 0.0  ;;  %v8503_v34 = vmul.f32 %v15149_v63, %v19163_v46  ;;  %12051 = vmatmul.mubr.bf16.gmra.mrb[140].mxu0 %v20825_v3  ;;  %11245 = vmatpush1.bf16.msra.mxu1 %v18107_v54  ;;  %v8689_v14 = vsel %vm8303_vm0, %v15147_v5, %v8497_v60  ;;  %v18130_v54 = vld [vmem:[#allocation11 + $0x794] ss:$24 sps:$4 sm:$0xff]  }
 0x675   :  { %vm8310_vm3 = vcmp.gt.f32.partialorder %v15150_v50, 0.0  ;;  %v8504_v49 = vmul.f32 %v15150_v50, %v19163_v46  ;;  %12060 = vmatprep.mubr.bf16.mxu0 %v20826_v23  ;;  %11246 = vmatprep.subr.bf16.mxu1 %v18118_v28  ;;  %v8690_v2 = vsel %vm8304_vm1, %v15148_v21, %v8498_v1 }
 0x676   :  { %v8695_v18 = vsel %vm8309_vm2, %v15149_v63, %v8503_v34  ;;  %12194 = vmatpush1.bf16.msra.mxu0 %v18119_v56  ;;  %v18128_v56 = vld [vmem:[#allocation11 + $0x790] ss:$24 sps:$4 sm:$0xff]  }
 0x677   :  { %v8134_v48 = vpop.f32.mrb[100].mxu0  ;;  %v8696_v43 = vsel %vm8310_vm3, %v15150_v50, %v8504_v49  ;;  %v19925_v44 = vpack.c.bf16 %v8695_v18, %v8689_v14  ;;  %12195 = vmatprep.subr.bf16.mxu0 %v18124_v9  ;;  %v20828_v34 = vld [vmem:[#allocation43_spill] sm:$0xff]  ;;  %v20829_v49 = vld [vmem:[#allocation46_spill] sm:$0xff] }
 0x678   :  { %v15151_v3 = vadd.f32 %v8134_v48, %v19772_v40  ;;  %v8136_v62 = vpop.f32.mrb[101].mxu0  ;;  %v19928_v7 = vpack.c.bf16 %v8696_v43, %v8690_v2  ;;  %11247 = vmatpush1.bf16.msra.mxu1 %v18116_v51  ;;  %v18131_v18 = vld [vmem:[#allocation11 + $0x7c0] ss:$24 sps:$4 sm:$0xff]  }
 0x679   :  { %20827 = vst [vmem:[#allocation65_spill] sm:$0xff] %v19925_v44  ;;  %v15152_v28 = vadd.f32 %v8136_v62, %v19777_v10  ;;  %v8138_v5 = vpop.f32.mrb[102].mxu0  ;;  %11409 = vmatprep.subr.bf16.mxu1 %v18127_v42  ;;  %v18133_v62 = vld [vmem:[#allocation11 + $0x7c4] ss:$24 sps:$4 sm:$0xff]  }
 0x67a   :  { %v8509_v60 = vmul.f32 %v15151_v3, %v19163_v46  ;;  %v15153_v63 = vadd.f32 %v8138_v5, %v19772_v40  ;;  %v8140_v21 = vpop.f32.mrb[103].mxu0  ;;  %11135 = vmatprep.mubr.bf16.mxu1 %v19928_v7  ;;  %12196 = vmatpush1.bf16.msra.mxu0 %v18122_v37  ;;  %vm8315_vm4 = vcmp.gt.f32.partialorder %v15151_v3, 0.0 }
 0x67b   :  { %v8510_v1 = vmul.f32 %v15152_v28, %v19163_v46  ;;  %v15154_v50 = vadd.f32 %v8140_v21, %v19777_v10  ;;  %11136 = vmatmul.mubr.bf16.gmra.mrb[160].mxu1 %v19925_v44  ;;  %12197 = vmatprep.subr.bf16.mxu0 %v18130_v54  ;;  %vm8316_vm5 = vcmp.gt.f32.partialorder %v15152_v28, 0.0  ;;  %v18139_v54 = vld [vmem:[#allocation11 + $0x7f4] ss:$24 sps:$4 sm:$0xff]  }
 0x67c   :  { %vm8321_vm6 = vcmp.gt.f32.partialorder %v15153_v63, 0.0  ;;  %v8515_v9 = vmul.f32 %v15153_v63, %v19163_v46  ;;  %12061 = vmatmul.mubr.bf16.gmra.mrb[144].mxu0 %v20828_v34  ;;  %v8701_v42 = vsel %vm8315_vm4, %v15151_v3, %v8509_v60 }
 0x67d   :  { %vm8322_vm7 = vcmp.gt.f32.partialorder %v15154_v50, 0.0  ;;  %v8516_v51 = vmul.f32 %v15154_v50, %v19163_v46  ;;  %12070 = vmatprep.mubr.bf16.mxu0 %v20829_v49  ;;  %v8702_v48 = vsel %vm8316_vm5, %v15152_v28, %v8510_v1  ;;  %v18137_v28 = vld [vmem:[#allocation11 + $0x7f0] ss:$24 sps:$4 sm:$0xff]  }
 0x67e   :  { %v8707_v14 = vsel %vm8321_vm6, %v15153_v63, %v8515_v9  ;;  %12198 = vmatpush1.bf16.msra.mxu0 %v18128_v56  ;;  %v20832_v9 = vld [vmem:[#allocation45_spill] sm:$0xff] }
 0x67f   :  { %v8144_v37 = vpop.f32.mrb[104].mxu0  ;;  %v8708_v2 = vsel %vm8322_vm7, %v15154_v50, %v8516_v51  ;;  %v19941_v43 = vpack.c.bf16 %v8707_v14, %v8701_v42  ;;  %12199 = vmatprep.subr.bf16.mxu0 %v18133_v62  ;;  %v18142_v50 = vld [vmem:[#allocation11 + $0x824] ss:$24 sps:$4 sm:$0xff]   ;;  %v20833_v51 = vld [vmem:[#allocation48_spill] sm:$0xff] }
 0x680   :  { %v15155_v5 = vadd.f32 %v8144_v37, %v19772_v40  ;;  %v8146_v21 = vpop.f32.mrb[105].mxu0  ;;  %v19944_v34 = vpack.c.bf16 %v8708_v2, %v8702_v48 }
 0x681   :  { %20830 = vst [vmem:[#allocation66_spill] sm:$0xff] %v19941_v43  ;;  %v15156_v23 = vadd.f32 %v8146_v21, %v19777_v10  ;;  %v8148_v44 = vpop.f32.mrb[106].mxu0  ;;  %v18148_v21 = vld [vmem:[#allocation11 + $0x854] ss:$24 sps:$4 sm:$0xff]  }
 0x682   :  { %20831 = vst [vmem:[#allocation67_spill] sm:$0xff] %v19944_v34  ;;  %v8521_v3 = vmul.f32 %v15155_v5, %v19163_v46  ;;  %v15157_v60 = vadd.f32 %v8148_v44, %v19772_v40  ;;  %v8150_v63 = vpop.f32.mrb[107].mxu0  ;;  %11145 = vmatprep.mubr.bf16.mxu1 %v19944_v34  ;;  %12200 = vmatpush1.bf16.msra.mxu0 %v18131_v18  ;;  %vm8327_vm8 = vcmp.gt.f32.partialorder %v15155_v5, 0.0  ;;  %v18140_v18 = vld [vmem:[#allocation11 + $0x820] ss:$24 sps:$4 sm:$0xff]  }
 0x683   :  { %v8522_v56 = vmul.f32 %v15156_v23, %v19163_v46  ;;  %v15158_v1 = vadd.f32 %v8150_v63, %v19777_v10  ;;  %11146 = vmatmul.mubr.bf16.gmra.mrb[164].mxu1 %v19941_v43  ;;  %12201 = vmatprep.subr.bf16.mxu0 %v18139_v54  ;;  %vm8328_vm9 = vcmp.gt.f32.partialorder %v15156_v23, 0.0 }
 0x684   :  { %vm8333_vm10 = vcmp.gt.f32.partialorder %v15157_v60, 0.0  ;;  %v8527_v62 = vmul.f32 %v15157_v60, %v19163_v46  ;;  %12071 = vmatmul.mubr.bf16.gmra.mrb[148].mxu0 %v20832_v9  ;;  %v8713_v42 = vsel %vm8327_vm8, %v15155_v5, %v8521_v3 }
 0x685   :  { %vm8334_vm11 = vcmp.gt.f32.partialorder %v15158_v1, 0.0  ;;  %v8528_v44 = vmul.f32 %v15158_v1, %v19163_v46  ;;  %12080 = vmatprep.mubr.bf16.mxu0 %v20833_v51  ;;  %v8714_v48 = vsel %vm8328_vm9, %v15156_v23, %v8522_v56  ;;  %v18146_v23 = vld [vmem:[#allocation11 + $0x850] ss:$24 sps:$4 sm:$0xff]  }
 0x686   :  { %v8719_v14 = vsel %vm8333_vm10, %v15157_v60, %v8527_v62  ;;  %12202 = vmatpush1.bf16.msra.mxu0 %v18137_v28  ;;  %v20837_v62 = vld [vmem:[#allocation50_spill] sm:$0xff] }
 0x687   :  { %v8154_v37 = vpop.f32.mrb[108].mxu0  ;;  %v8720_v2 = vsel %vm8334_vm11, %v15158_v1, %v8528_v44  ;;  %v19957_v54 = vpack.c.bf16 %v8719_v14, %v8713_v42  ;;  %12203 = vmatprep.subr.bf16.mxu0 %v18142_v50  ;;  %v18151_v1 = vld [vmem:[#allocation11 + $0x884] ss:$24 sps:$4 sm:$0xff]   ;;  %v18149_v14 = vld [vmem:[#allocation11 + $0x880] ss:$24 sps:$4 sm:$0xff]  }
 0x688   :  { %v15159_v63 = vadd.f32 %v8154_v37, %v19772_v40  ;;  %v8156_v49 = vpop.f32.mrb[109].mxu0  ;;  %v19960_v9 = vpack.c.bf16 %v8720_v2, %v8714_v48  ;;  %v20836_v50 = vld [vmem:[#allocation47_spill] sm:$0xff] }
 0x689   :  { %20834 = vst [vmem:[#allocation68_spill] sm:$0xff] %v19957_v54  ;;  %v15160_v43 = vadd.f32 %v8156_v49, %v19777_v10  ;;  %v8158_v34 = vpop.f32.mrb[110].mxu0 }
 0x68a   :  { %20835 = vst [vmem:[#allocation69_spill] sm:$0xff] %v19960_v9  ;;  %v8533_v5 = vmul.f32 %v15159_v63, %v19163_v46  ;;  %v15161_v3 = vadd.f32 %v8158_v34, %v19772_v40  ;;  %v8160_v60 = vpop.f32.mrb[111].mxu0  ;;  %11155 = vmatprep.mubr.bf16.mxu1 %v19960_v9  ;;  %12204 = vmatpush1.bf16.msra.mxu0 %v18140_v18  ;;  %vm8339_vm12 = vcmp.gt.f32.partialorder %v15159_v63, 0.0 }
 0x68b   :  { %v8534_v28 = vmul.f32 %v15160_v43, %v19163_v46  ;;  %v15162_v56 = vadd.f32 %v8160_v60, %v19777_v10  ;;  %11156 = vmatmul.mubr.bf16.gmra.mrb[168].mxu1 %v19957_v54  ;;  %12205 = vmatprep.subr.bf16.mxu0 %v18148_v21  ;;  %vm8340_vm13 = vcmp.gt.f32.partialorder %v15160_v43, 0.0  ;;  %v18157_v21 = vld [vmem:[#allocation11 + $0x8b4] ss:$24 sps:$4 sm:$0xff]  }
 0x68c   :  { %vm8345_vm14 = vcmp.gt.f32.partialorder %v15161_v3, 0.0  ;;  %v8539_v49 = vmul.f32 %v15161_v3, %v19163_v46  ;;  %12081 = vmatmul.mubr.bf16.gmra.mrb[152].mxu0 %v20836_v50  ;;  %v8725_v44 = vsel %vm8339_vm12, %v15159_v63, %v8533_v5 }
 0x68d   :  { %vm8346_vm15 = vcmp.gt.f32.partialorder %v15162_v56, 0.0  ;;  %v8540_v34 = vmul.f32 %v15162_v56, %v19163_v46  ;;  %12090 = vmatprep.mubr.bf16.mxu0 %v20837_v62  ;;  %v8726_v37 = vsel %vm8340_vm13, %v15160_v43, %v8534_v28  ;;  %v18155_v43 = vld [vmem:[#allocation11 + $0x8b0] ss:$24 sps:$4 sm:$0xff]  }
 0x68e   :  { %v8731_v42 = vsel %vm8345_vm14, %v15161_v3, %v8539_v49  ;;  %12206 = vmatpush1.bf16.msra.mxu0 %v18146_v23 }
 0x68f   :  { %v8164_v18 = vpop.f32.mrb[112].mxu0  ;;  %v8732_v48 = vsel %vm8346_vm15, %v15162_v56, %v8540_v34  ;;  %v19973_v2 = vpack.c.bf16 %v8731_v42, %v8725_v44  ;;  %12207 = vmatprep.subr.bf16.mxu0 %v18151_v1  ;;  %v18160_v56 = vld [vmem:[#allocation11 + $0x8e4] ss:$24 sps:$4 sm:$0xff]   ;;  %v20839_v1 = vld [vmem:[#allocation52_spill] sm:$0xff]  ;;  %v18158_v44 = vld [vmem:[#allocation11 + $0x8e0] ss:$24 sps:$4 sm:$0xff]  }
 0x690   :  { %v15163_v60 = vadd.f32 %v8164_v18, %v19772_v40  ;;  %v8166_v51 = vpop.f32.mrb[113].mxu0  ;;  %v19976_v50 = vpack.c.bf16 %v8732_v48, %v8726_v37 }
 0x691   :  { %20838 = vst [vmem:[#allocation70_spill] sm:$0xff] %v19973_v2  ;;  %v15164_v54 = vadd.f32 %v8166_v51, %v19777_v10  ;;  %v8168_v9 = vpop.f32.mrb[114].mxu0 }
 0x692   :  { %v8545_v63 = vmul.f32 %v15163_v60, %v19163_v46  ;;  %v15165_v5 = vadd.f32 %v8168_v9, %v19772_v40  ;;  %v8170_v3 = vpop.f32.mrb[115].mxu0  ;;  %11165 = vmatprep.mubr.bf16.mxu1 %v19976_v50  ;;  %12208 = vmatpush1.bf16.msra.mxu0 %v18149_v14  ;;  %vm8351_vm0 = vcmp.gt.f32.partialorder %v15163_v60, 0.0 }
 0x693   :  { %v8546_v23 = vmul.f32 %v15164_v54, %v19163_v46  ;;  %v15166_v28 = vadd.f32 %v8170_v3, %v19777_v10  ;;  %11166 = vmatmul.mubr.bf16.gmra.mrb[172].mxu1 %v19973_v2  ;;  %12209 = vmatprep.subr.bf16.mxu0 %v18157_v21  ;;  %vm8352_vm1 = vcmp.gt.f32.partialorder %v15164_v54, 0.0 }
 0x694   :  { %vm8357_vm2 = vcmp.gt.f32.partialorder %v15165_v5, 0.0  ;;  %v8551_v51 = vmul.f32 %v15165_v5, %v19163_v46  ;;  %12091 = vmatmul.mubr.bf16.gmra.mrb[156].mxu0 %v19611_v20  ;;  %v8737_v49 = vsel %vm8351_vm0, %v15163_v60, %v8545_v63 }
 0x695   :  { %vm8358_vm3 = vcmp.gt.f32.partialorder %v15166_v28, 0.0  ;;  %v8552_v9 = vmul.f32 %v15166_v28, %v19163_v46  ;;  %12100 = vmatprep.mubr.bf16.mxu0 %v20839_v1  ;;  %v8738_v14 = vsel %vm8352_vm1, %v15164_v54, %v8546_v23  ;;  %v20842_v23 = vld [vmem:[#allocation51_spill] sm:$0xff] }
 0x696   :  { %v8743_v34 = vsel %vm8357_vm2, %v15165_v5, %v8551_v51  ;;  %12210 = vmatpush1.bf16.msra.mxu0 %v18155_v43 }
 0x697   :  { %v8174_v42 = vpop.f32.mrb[116].mxu0  ;;  %v8744_v18 = vsel %vm8358_vm3, %v15166_v28, %v8552_v9  ;;  %v19989_v37 = vpack.c.bf16 %v8743_v34, %v8737_v49  ;;  %12211 = vmatprep.subr.bf16.mxu0 %v18160_v56  ;;  %v20843_v28 = vld [vmem:[#allocation54_spill] sm:$0xff] }
 0x698   :  { %v15167_v48 = vadd.f32 %v8174_v42, %v19772_v40  ;;  %v8176_v21 = vpop.f32.mrb[117].mxu0  ;;  %v19992_v3 = vpack.c.bf16 %v8744_v18, %v8738_v14 }
 0x699   :  { %20840 = vst [vmem:[#allocation71_spill] sm:$0xff] %v19989_v37  ;;  %v15168_v20 = vadd.f32 %v8176_v21, %v19777_v10  ;;  %v8178_v62 = vpop.f32.mrb[118].mxu0 }
 0x69a   :  { %20841 = vst [vmem:[#allocation72_spill] sm:$0xff] %v19992_v3  ;;  %v8557_v1 = vmul.f32 %v15167_v48, %v19163_v46  ;;  %v15169_v60 = vadd.f32 %v8178_v62, %v19772_v40  ;;  %v8180_v63 = vpop.f32.mrb[119].mxu0  ;;  %11175 = vmatprep.mubr.bf16.mxu1 %v19992_v3  ;;  %12212 = vmatpush1.bf16.msra.mxu0 %v18158_v44  ;;  %vm8363_vm4 = vcmp.gt.f32.partialorder %v15167_v48, 0.0 }
 0x69b   :  { %v8558_v54 = vmul.f32 %v15168_v20, %v19163_v46  ;;  %v15170_v5 = vadd.f32 %v8180_v63, %v19777_v10  ;;  %11176 = vmatmul.mubr.bf16.gmra.mrb[176].mxu1 %v19989_v37  ;;  %vm8364_vm5 = vcmp.gt.f32.partialorder %v15168_v20, 0.0 }
 0x69c   :  { %vm8369_vm6 = vcmp.gt.f32.partialorder %v15169_v60, 0.0  ;;  %v8563_v43 = vmul.f32 %v15169_v60, %v19163_v46  ;;  %12101 = vmatmul.mubr.bf16.gmra.mrb[160].mxu0 %v20842_v23  ;;  %v8749_v56 = vsel %vm8363_vm4, %v15167_v48, %v8557_v1 }
 0x69d   :  { %vm8370_vm7 = vcmp.gt.f32.partialorder %v15170_v5, 0.0  ;;  %v8564_v62 = vmul.f32 %v15170_v5, %v19163_v46  ;;  %12110 = vmatprep.mubr.bf16.mxu0 %v20843_v28  ;;  %v8750_v49 = vsel %vm8364_vm5, %v15168_v20, %v8558_v54 }
 0x69e   :  { %v8755_v51 = vsel %vm8369_vm6, %v15169_v60, %v8563_v43  ;;  %v20846_v60 = vld [vmem:[#allocation53_spill] sm:$0xff] }
 0x69f   :  { %v8184_v9 = vpop.f32.mrb[120].mxu0  ;;  %v8756_v34 = vsel %vm8370_vm7, %v15170_v5, %v8564_v62  ;;  %v20005_v44 = vpack.c.bf16 %v8755_v51, %v8749_v56  ;;  %v20847_v5 = vld [vmem:[#allocation55_spill] sm:$0xff] }
 0x6a0   :  { %v15171_v42 = vadd.f32 %v8184_v9, %v19772_v40  ;;  %v8186_v14 = vpop.f32.mrb[121].mxu0  ;;  %v20008_v18 = vpack.c.bf16 %v8756_v34, %v8750_v49 }
 0x6a1   :  { %20844 = vst [vmem:[#allocation73_spill] sm:$0xff] %v20005_v44  ;;  %v15172_v21 = vadd.f32 %v8186_v14, %v19777_v10  ;;  %v8188_v63 = vpop.f32.mrb[122].mxu0 }
 0x6a2   :  { %20845 = vst [vmem:[#allocation74_spill] sm:$0xff] %v20008_v18  ;;  %v8569_v23 = vmul.f32 %v15171_v42, %v19163_v46  ;;  %v15173_v37 = vadd.f32 %v8188_v63, %v19772_v40  ;;  %v8190_v28 = vpop.f32.mrb[123].mxu0  ;;  %11185 = vmatprep.mubr.bf16.mxu1 %v20008_v18  ;;  %vm8375_vm8 = vcmp.gt.f32.partialorder %v15171_v42, 0.0 }
 0x6a3   :  { %v8570_v20 = vmul.f32 %v15172_v21, %v19163_v46  ;;  %v15174_v1 = vadd.f32 %v8190_v28, %v19777_v10  ;;  %11186 = vmatmul.mubr.bf16.gmra.mrb[180].mxu1 %v20005_v44  ;;  %vm8376_vm9 = vcmp.gt.f32.partialorder %v15172_v21, 0.0 }
 0x6a4   :  { %vm8381_vm10 = vcmp.gt.f32.partialorder %v15173_v37, 0.0  ;;  %v8575_v48 = vmul.f32 %v15173_v37, %v19163_v46  ;;  %12111 = vmatmul.mubr.bf16.gmra.mrb[164].mxu0 %v20846_v60  ;;  %v8761_v43 = vsel %vm8375_vm8, %v15171_v42, %v8569_v23 }
 0x6a5   :  { %vm8382_vm11 = vcmp.gt.f32.partialorder %v15174_v1, 0.0  ;;  %v8576_v54 = vmul.f32 %v15174_v1, %v19163_v46  ;;  %12120 = vmatprep.mubr.bf16.mxu0 %v20847_v5  ;;  %v8762_v51 = vsel %vm8376_vm9, %v15172_v21, %v8570_v20 }
 0x6a6   :  { %v8767_v62 = vsel %vm8381_vm10, %v15173_v37, %v8575_v48 }
 0x6a7   :  { %v8194_v56 = vpop.f32.mrb[124].mxu0  ;;  %v8768_v9 = vsel %vm8382_vm11, %v15174_v1, %v8576_v54  ;;  %v20021_v49 = vpack.c.bf16 %v8767_v62, %v8761_v43  ;;  %v18136_v54 = vld [vmem:[#allocation11 + $0x33c] ss:$24 sps:$4 sm:$0xff]   ;;  %v18161_v43 = vld [vmem:[#allocation11 + $0x3c8] ss:$24 sps:$4 sm:$0xff]  }
 0x6a8   :  { %v15175_v28 = vadd.f32 %v8194_v56, %v19772_v40  ;;  %v8196_v34 = vpop.f32.mrb[125].mxu0  ;;  %v20024_v14 = vpack.c.bf16 %v8768_v9, %v8762_v51  ;;  %v18166_v62 = vld [vmem:[#allocation11 + $0x3fc] ss:$24 sps:$4 sm:$0xff]   ;;  %v18167_v56 = vld [vmem:[#allocation11 + $0x428] ss:$24 sps:$4 sm:$0xff]  }
 0x6a9   :  { %v15176_v63 = vadd.f32 %v8196_v34, %v19777_v10  ;;  %v8198_v60 = vpop.f32.mrb[126].mxu0  ;;  %v18172_v51 = vld [vmem:[#allocation11 + $0x45c] ss:$24 sps:$4 sm:$0xff]   ;;  %v18173_v9 = vld [vmem:[#allocation11 + $0x488] ss:$24 sps:$4 sm:$0xff]  }
 0x6aa   :  { %v8581_v44 = vmul.f32 %v15175_v28, %v19163_v46  ;;  %v15177_v18 = vadd.f32 %v8198_v60, %v19772_v40  ;;  %v8200_v5 = vpop.f32.mrb[127].mxu0  ;;  %11195 = vmatprep.mubr.bf16.mxu1 %v20024_v14  ;;  %vm8387_vm12 = vcmp.gt.f32.partialorder %v15175_v28, 0.0  ;;  %v18179_v34 = vld [vmem:[#allocation11 + $0x4e8] ss:$24 sps:$4 sm:$0xff]  }
 0x6ab   :  { %v8582_v37 = vmul.f32 %v15176_v63, %v19163_v46  ;;  %v15178_v23 = vadd.f32 %v8200_v5, %v19777_v10  ;;  %11196 = vmatmul.mubr.bf16.gmra.mrb[184].mxu1 %v20021_v49  ;;  %vm8388_vm13 = vcmp.gt.f32.partialorder %v15176_v63, 0.0  ;;  %v18154_v5 = vld [vmem:[#allocation11 + $0x39c] ss:$24 sps:$4 sm:$0xff]  }
 0x6ac   :  { %vm8393_vm14 = vcmp.gt.f32.partialorder %v15177_v18, 0.0  ;;  %v8587_v42 = vmul.f32 %v15177_v18, %v19163_v46  ;;  %12121 = vmatmul.mubr.bf16.gmra.mrb[168].mxu0 %v19659_v27  ;;  %v8773_v40 = vsel %vm8387_vm12, %v15175_v28, %v8581_v44  ;;  %v18134_v44 = vld [vmem:[#allocation11 + $0x338] ss:$24 sps:$4 sm:$0xff]   ;;  %v18178_v28 = vld [vmem:[#allocation11 + $0x4bc] ss:$24 sps:$4 sm:$0xff]  }
 0x6ad   :  { %vm8394_vm15 = vcmp.gt.f32.partialorder %v15178_v23, 0.0  ;;  %v8588_v21 = vmul.f32 %v15178_v23, %v19163_v46  ;;  %12130 = vmatprep.mubr.bf16.mxu0 %v19678_v29  ;;  %v8774_v1 = vsel %vm8388_vm13, %v15176_v63, %v8582_v37  ;;  %v18125_v46 = vld [vmem:[#allocation11 + $0x308] ss:$24 sps:$4 sm:$0xff]   ;;  %v18184_v63 = vld [vmem:[#allocation11 + $0x51c] ss:$24 sps:$4 sm:$0xff]  }
 0x6ae   :  { %v8779_v20 = vsel %vm8393_vm14, %v15177_v18, %v8587_v42  ;;  %v18145_v18 = vld [vmem:[#allocation11 + $0x36c] ss:$24 sps:$4 sm:$0xff]   ;;  %v18185_v37 = vld [vmem:[#allocation11 + $0x548] ss:$24 sps:$4 sm:$0xff]  }
 0x6af   :  { %v8780_v48 = vsel %vm8394_vm15, %v15178_v23, %v8588_v21  ;;  %v20037_v60 = vpack.c.bf16 %v8779_v20, %v8773_v40  ;;  %v18190_v23 = vld [vmem:[#allocation11 + $0x57c] ss:$24 sps:$4 sm:$0xff]   ;;  %v18191_v42 = vld [vmem:[#allocation11 + $0x5a8] ss:$24 sps:$4 sm:$0xff]  }
 0x6b0   :  { %v20039_v10 = vpack.c.bf16 %v8780_v48, %v8774_v1  ;;  %v18196_v21 = vld [vmem:[#allocation11 + $0x5dc] ss:$24 sps:$4 sm:$0xff]   ;;  %v20852_v1 = vld [vmem:[#allocation39_spill] sm:$0xff] }
 0x6b1   :  { %20848 = vst [vmem:[#allocation75_spill] sm:$0xff] %v20037_v60  ;;  %v20850_v40 = vld [vmem:[#allocation56_spill] sm:$0xff]  ;;  %v20851_v20 = vld [vmem:[#allocation58_spill] sm:$0xff]  ;;  %v20853_v48 = vld [vmem:[#allocation41_spill] sm:$0xff] }
 0x6b2   :  { %20849 = vst [vmem:[#allocation76_spill] sm:$0xff] %v20039_v10  ;;  %11205 = vmatprep.mubr.bf16.mxu1 %v20039_v10 }
 0x6b3   :  { %11206 = vmatmul.mubr.bf16.gmra.mrb[188].mxu1 %v20037_v60 }
 0x6b4   :  { %11248 = vmatprep.mubr.bf16.mxu1 %v19183_v15  ;;  %12131 = vmatmul.mubr.bf16.gmra.mrb[172].mxu0 %v19675_v25  ;;  %v18143_v15 = vld [vmem:[#allocation11 + $0x368] ss:$24 sps:$4 sm:$0xff]  }
 0x6b5   :  { %12140 = vmatprep.mubr.bf16.mxu0 %v19694_v33 }
 0x6bb   :  { %11249 = vmatmul.mubr.bf16.vlgmr.msra.gmra.mrb[192].mxu1 %v19178_v26  ;;  %v18152_v26 = vld [vmem:[#allocation11 + $0x398] ss:$24 sps:$4 sm:$0xff]  }
 0x6bc   :  { %11258 = vmatprep.mubr.bf16.mxu1 %v19201_v8  ;;  %11410 = vmatpush1.bf16.msra.mxu1 %v18125_v46  ;;  %v18163_v8 = vld [vmem:[#allocation11 + $0x3cc] ss:$24 sps:$4 sm:$0xff]   ;;  %v20854_v46 = vld [vmem:[#allocation57_spill] sm:$0xff] }
 0x6bd   :  { %12141 = vmatmul.mubr.bf16.gmra.mrb[176].mxu0 %v19691_v24  ;;  %11411 = vmatprep.subr.bf16.mxu1 %v18136_v54  ;;  %v20855_v54 = vld [vmem:[#allocation60_spill] sm:$0xff] }
 0x6be   :  { %12150 = vmatprep.mubr.bf16.mxu0 %v19708_v45 }
 0x6c0   :  { %11412 = vmatpush1.bf16.msra.mxu1 %v18134_v44  ;;  %v20858_v44 = vld [vmem:[#allocation59_spill] sm:$0xff] }
 0x6c1   :  { %11413 = vmatprep.subr.bf16.mxu1 %v18145_v18  ;;  %v20859_v18 = vld [vmem:[#allocation62_spill] sm:$0xff] }
 0x6c3   :  { %11259 = vmatmul.mubr.bf16.gmra.mrb[196].mxu1 %v19197_v41  ;;  %v18164_v41 = vld [vmem:[#allocation11 + $0x3f8] ss:$24 sps:$4 sm:$0xff]  }
 0x6c4   :  { %11268 = vmatprep.mubr.bf16.mxu1 %v19219_v36  ;;  %11414 = vmatpush1.bf16.msra.mxu1 %v18143_v15  ;;  %v18169_v36 = vld [vmem:[#allocation11 + $0x42c] ss:$24 sps:$4 sm:$0xff]  }
 0x6c5   :  { %12151 = vmatmul.mubr.bf16.gmra.mrb[180].mxu0 %v19705_v59  ;;  %11415 = vmatprep.subr.bf16.mxu1 %v18154_v5  ;;  %v20086_v15 = vld [vmem:[#allocation13] sm:$0x3f]  ;;  %v20860_v5 = vld [vmem:[#allocation19_spill] sm:$0xff] }
 0x6c6   :  { %12160 = vmatprep.mubr.bf16.mxu0 %v19722_v6 }
 0x6c8   :  { %11416 = vmatpush1.bf16.msra.mxu1 %v18152_v26  ;;  %v20861_v26 = vld [vmem:[#allocation38_spill] sm:$0xff] }
 0x6c9   :  { %11417 = vmatprep.subr.bf16.mxu1 %v18163_v8  ;;  %v20862_v8 = vsub.s32 0, %v20861_v26 }
 0x6cb   :  { %11269 = vmatmul.mubr.bf16.gmra.mrb[200].mxu1 %v19215_v17  ;;  %v18170_v17 = vld [vmem:[#allocation11 + $0x458] ss:$24 sps:$4 sm:$0xff]  }
 0x6cc   :  { %11278 = vmatprep.mubr.bf16.mxu1 %v19237_v13  ;;  %11418 = vmatpush1.bf16.msra.mxu1 %v18161_v43  ;;  %v18175_v13 = vld [vmem:[#allocation11 + $0x48c] ss:$24 sps:$4 sm:$0xff]   ;;  %v20092_v43 = vrot.slane %v20086_v15, %v20862_v8 }
 0x6cd   :  { %12161 = vmatmul.mubr.bf16.gmra.mrb[184].mxu0 %v19719_v53  ;;  %11419 = vmatprep.subr.bf16.mxu1 %v18166_v62  ;;  %v20863_v62 = vld [vmem:[#allocation22_spill] sm:$0xff] }
 0x6ce   :  { %12170 = vmatprep.mubr.bf16.mxu0 %v19735_v4 }
 0x6d0   :  { %11420 = vmatpush1.bf16.msra.mxu1 %v18164_v41  ;;  %v20864_v41 = vsub.s32 1, %v20861_v26 }
 0x6d1   :  { %11421 = vmatprep.subr.bf16.mxu1 %v18169_v36 }
 0x6d2   :  { %v20098_v36 = vrot.slane %v20086_v15, %v20864_v41 }
 0x6d3   :  { %11279 = vmatmul.mubr.bf16.gmra.mrb[204].mxu1 %v19233_v31  ;;  %v18176_v31 = vld [vmem:[#allocation11 + $0x4b8] ss:$24 sps:$4 sm:$0xff]  }
 0x6d4   :  { %11288 = vmatprep.mubr.bf16.mxu1 %v19255_v47  ;;  %11422 = vmatpush1.bf16.msra.mxu1 %v18167_v56  ;;  %v18181_v47 = vld [vmem:[#allocation11 + $0x4ec] ss:$24 sps:$4 sm:$0xff]   ;;  %v20865_v56 = vld [vmem:[#allocation61_spill] sm:$0xff] }
 0x6d5   :  { %12171 = vmatmul.mubr.bf16.gmra.mrb[188].mxu0 %v19733_v22  ;;  %11423 = vmatprep.subr.bf16.mxu1 %v18172_v51  ;;  %v20866_v51 = vld [vmem:[#allocation64_spill] sm:$0xff] }
 0x6d6   :  { %12213 = vmatprep.mubr.bf16.mxu0 %v19792_v55 }
 0x6d8   :  { %11424 = vmatpush1.bf16.msra.mxu1 %v18170_v17 }
 0x6d9   :  { %11425 = vmatprep.subr.bf16.mxu1 %v18175_v13  ;;  %v20105_v13 = vstv %s20619_s1  ;;  %s18781_s1 = smov [#allocation14]  }
 0x6da   :  { %s13629_s20 = sshll.u32 %s18781_s1, 4  ;;  %s13630_s20 = int_to_ptr.vmem [resolvable:$true] %s13629_s20 }
 0x6db   :  { %11289 = vmatmul.mubr.bf16.gmra.mrb[208].mxu1 %v19251_v12  ;;  %v18182_v12 = vld [vmem:[#allocation11 + $0x518] ss:$24 sps:$4 sm:$0xff]   ;;  %s18742_s21 = scalar_lea.vmem %s13630_s20, 12288  ;;  %p18747_p13 = scmp.lt.s32.totalorder %s13630_s20, %s13630_s20 }
 0x6dc   :  { %11298 = vmatprep.mubr.bf16.mxu1 %v19275_v30  ;;  %11426 = vmatpush1.bf16.msra.mxu1 %v18173_v9  ;;  %v18187_v30 = vld [vmem:[#allocation11 + $0x54c] ss:$24 sps:$4 sm:$0xff]   ;;  %p18743_p12 = scmp.ne.s32.totalorder %s13630_s20, %s18742_s21  ;;  %p18748_p0 = scmp.lt.s32.totalorder %s18742_s21, %s18742_s21 }
 0x6dd   :  { %12214 = vmatmul.mubr.bf16.vlgmr.msra.gmra.mrb[128].mxu0 %v19789_v19  ;;  %11427 = vmatprep.subr.bf16.mxu1 %v18178_v28 }
 0x6de   :  { %12223 = vmatprep.mubr.bf16.mxu0 %v19808_v38  ;;  %p18749_p1 = por %p18748_p0, %p18747_p13 }
 0x6e0   :  { %11428 = vmatpush1.bf16.msra.mxu1 %v18176_v31  ;;  %p18750_p2 = pnand %p18749_p1, %p18743_p12 }
 0x6e1   :  { %11429 = vmatprep.subr.bf16.mxu1 %v18181_v47 }
 0x6e3   :  { %11299 = vmatmul.mubr.bf16.gmra.mrb[212].mxu1 %v19271_v0  ;;  %v18188_v0 = vld [vmem:[#allocation11 + $0x578] ss:$24 sps:$4 sm:$0xff]  }
 0x6e4   :  { %11308 = vmatprep.mubr.bf16.mxu1 %v19295_v35  ;;  %11430 = vmatpush1.bf16.msra.mxu1 %v18179_v34  ;;  %v18193_v35 = vld [vmem:[#allocation11 + $0x5ac] ss:$24 sps:$4 sm:$0xff]  }
 0x6e5   :  { %12224 = vmatmul.mubr.bf16.gmra.mrb[132].mxu0 %v19805_v58  ;;  %11431 = vmatprep.subr.bf16.mxu1 %v18184_v63 }
 0x6e6   :  { %12233 = vmatprep.mubr.bf16.mxu0 %v19824_v52 }
 0x6e8   :  { %11432 = vmatpush1.bf16.msra.mxu1 %v18182_v12 }
 0x6e9   :  { %11433 = vmatprep.subr.bf16.mxu1 %v18187_v30 }
 0x6eb   :  { %11309 = vmatmul.mubr.bf16.gmra.mrb[216].mxu1 %v19291_v32  ;;  %v18194_v32 = vld [vmem:[#allocation11 + $0x5d8] ss:$24 sps:$4 sm:$0xff]  }
 0x6ec   :  { %11318 = vmatprep.mubr.bf16.mxu1 %v19315_v16  ;;  %11434 = vmatpush1.bf16.msra.mxu1 %v18185_v37  ;;  %v18199_v16 = vld [vmem:[#allocation11 + $0x60c] ss:$24 sps:$4 sm:$0xff]  }
 0x6ed   :  { %12234 = vmatmul.mubr.bf16.gmra.mrb[136].mxu0 %v19821_v57  ;;  %11435 = vmatprep.subr.bf16.mxu1 %v18190_v23 }
 0x6ee   :  { %12243 = vmatprep.mubr.bf16.mxu0 %v19840_v61 }
 0x6f0   :  { %11436 = vmatpush1.bf16.msra.mxu1 %v18188_v0 }
 0x6f1   :  { %11437 = vmatprep.subr.bf16.mxu1 %v18193_v35  ;;  %v20867_v35 = vld [vmem:[#allocation21_spill] sm:$0xff] }
 0x6f3   :  { %11319 = vmatmul.mubr.bf16.gmra.mrb[220].mxu1 %v19311_v39  ;;  %v20856_v39 = vld [vmem:[#allocation40_spill] sm:$0xff] }
 0x6f4   :  { %11328 = vmatprep.mubr.bf16.mxu1 %v19335_v11  ;;  %11438 = vmatpush1.bf16.msra.mxu1 %v18191_v42  ;;  %v20857_v11 = vld [vmem:[#allocation20_spill] sm:$0xff] }
 0x6f5   :  { %12244 = vmatmul.mubr.bf16.gmra.mrb[140].mxu0 %v20850_v40  ;;  %11439 = vmatprep.subr.bf16.mxu1 %v18196_v21 }
 0x6f6   :  { %12253 = vmatprep.mubr.bf16.mxu0 %v20851_v20 }
 0x6f8   :  { %11440 = vmatpush1.bf16.msra.mxu1 %v18194_v32  ;;  %v20868_v32 = vld [vmem:[#allocation24_spill] sm:$0xff] }
 0x6f9   :  { %11602 = vmatprep.subr.bf16.mxu1 %v18199_v16 }
 0x6fb   :  { %11329 = vmatmul.mubr.bf16.gmra.mrb[224].mxu1 %v20852_v1 }
 0x6fc   :  { %11338 = vmatprep.mubr.bf16.mxu1 %v20853_v48  ;;  %v20869_v48 = vld [vmem:[#allocation63_spill] sm:$0xff] }
 0x6fd   :  { %12254 = vmatmul.mubr.bf16.gmra.mrb[144].mxu0 %v20854_v46 }
 0x6fe   :  { %12263 = vmatprep.mubr.bf16.mxu0 %v20855_v54 }
 0x703   :  { %11339 = vmatmul.mubr.bf16.gmra.mrb[228].mxu1 %v20856_v39 }
 0x704   :  { %11348 = vmatprep.mubr.bf16.mxu1 %v20857_v11 }
 0x705   :  { %12264 = vmatmul.mubr.bf16.gmra.mrb[148].mxu0 %v20858_v44 }
 0x706   :  { %12273 = vmatprep.mubr.bf16.mxu0 %v20859_v18 }
 0x70b   :  { %11349 = vmatmul.mubr.bf16.gmra.mrb[232].mxu1 %v20860_v5 }
 0x70c   :  { %11358 = vmatprep.mubr.bf16.mxu1 %v20863_v62 }
 0x70d   :  { %12274 = vmatmul.mubr.bf16.gmra.mrb[152].mxu0 %v20865_v56 }
 0x70e   :  { %12283 = vmatprep.mubr.bf16.mxu0 %v20866_v51  ;;  %v11057_v17 = vpop.f32.mrb[128].mxu1 }
 0x70f   :  { %v15179_v9 = vadd.f32 %v11057_v17, %v20092_v43  ;;  %v11059_v28 = vpop.f32.mrb[129].mxu1 }
 0x710   :  { %v15180_v31 = vadd.f32 %v11059_v28, %v20098_v36  ;;  %v11061_v47 = vpop.f32.mrb[130].mxu1 }
 0x711   :  { %vm12374_vm0 = vcmp.gt.f32.partialorder %v15179_v9, 0.0  ;;  %v12568_v34 = vmul.f32 %v15179_v9, %v20105_v13  ;;  %v15181_v63 = vadd.f32 %v11061_v47, %v20092_v43  ;;  %v11063_v12 = vpop.f32.mrb[131].mxu1 }
 0x712   :  { %vm12375_vm1 = vcmp.gt.f32.partialorder %v15180_v31, 0.0  ;;  %v12569_v30 = vmul.f32 %v15180_v31, %v20105_v13  ;;  %v15182_v37 = vadd.f32 %v11063_v12, %v20098_v36 }
 0x713   :  { %v12760_v23 = vsel %vm12374_vm0, %v15179_v9, %v12568_v34  ;;  %vm12380_vm2 = vcmp.gt.f32.partialorder %v15181_v63, 0.0  ;;  %v12574_v0 = vmul.f32 %v15181_v63, %v20105_v13  ;;  %11359 = vmatmul.mubr.bf16.gmra.mrb[236].mxu1 %v20867_v35 }
 0x714   :  { %v12761_v42 = vsel %vm12375_vm1, %v15180_v31, %v12569_v30  ;;  %vm12381_vm3 = vcmp.gt.f32.partialorder %v15182_v37, 0.0  ;;  %v12575_v21 = vmul.f32 %v15182_v37, %v20105_v13  ;;  %11368 = vmatprep.mubr.bf16.mxu1 %v20868_v32  ;;  %v20870_v30 = vld [vmem:[#allocation23_spill] sm:$0xff] }
 0x715   :  { %v14795_v16 = vpack.c.bf16 %v12761_v42, %v12760_v23  ;;  %v12766_v1 = vsel %vm12380_vm2, %v15181_v63, %v12574_v0  ;;  %12284 = vmatmul.mubr.bf16.gmra.mrb[156].mxu0 %v20869_v48  ;;  %v20871_v0 = vld [vmem:[#allocation26_spill] sm:$0xff] }
 0x716   :  { %v12767_v39 = vsel %vm12381_vm3, %v15182_v37, %v12575_v21  ;;  %12293 = vmatprep.mubr.bf16.mxu0 %v19928_v7  ;;  %v11067_v11 = vpop.f32.mrb[132].mxu1  ;;  %v20872_v21 = vld [vmem:[#allocation65_spill] sm:$0xff] }
 0x717   :  { %13528 = vst [vmem:[#allocation14] sm:$0xff] %v14795_v16  ;;  %v14798_v5 = vpack.c.bf16 %v12767_v39, %v12766_v1  ;;  %v15183_v8 = vadd.f32 %v11067_v11, %v20092_v43  ;;  %v11069_v62 = vpop.f32.mrb[133].mxu1  ;;  %v20873_v16 = vld [vmem:[#allocation67_spill] sm:$0xff] }
 0x718   :  { %v15184_v41 = vadd.f32 %v11069_v62, %v20098_v36  ;;  %v11071_v17 = vpop.f32.mrb[134].mxu1 }
 0x719   :  { %13531 = vst [vmem:[#allocation14 + $0x18] sm:$0xff] %v14798_v5  ;;  %vm12386_vm4 = vcmp.gt.f32.partialorder %v15183_v8, 0.0  ;;  %v12580_v9 = vmul.f32 %v15183_v8, %v20105_v13  ;;  %v15185_v28 = vadd.f32 %v11071_v17, %v20092_v43  ;;  %v11073_v31 = vpop.f32.mrb[135].mxu1 }
 0x71a   :  { %vm12387_vm5 = vcmp.gt.f32.partialorder %v15184_v41, 0.0  ;;  %v12581_v47 = vmul.f32 %v15184_v41, %v20105_v13  ;;  %v15186_v34 = vadd.f32 %v11073_v31, %v20098_v36 }
 0x71b   :  { %v12772_v63 = vsel %vm12386_vm4, %v15183_v8, %v12580_v9  ;;  %vm12392_vm6 = vcmp.gt.f32.partialorder %v15185_v28, 0.0  ;;  %v12586_v12 = vmul.f32 %v15185_v28, %v20105_v13  ;;  %11369 = vmatmul.mubr.bf16.gmra.mrb[240].mxu1 %v20870_v30 }
 0x71c   :  { %v12773_v37 = vsel %vm12387_vm5, %v15184_v41, %v12581_v47  ;;  %vm12393_vm7 = vcmp.gt.f32.partialorder %v15186_v34, 0.0  ;;  %v12587_v23 = vmul.f32 %v15186_v34, %v20105_v13  ;;  %11378 = vmatprep.mubr.bf16.mxu1 %v20871_v0 }
 0x71d   :  { %v14801_v35 = vpack.c.bf16 %v12773_v37, %v12772_v63  ;;  %v12778_v42 = vsel %vm12392_vm6, %v15185_v28, %v12586_v12  ;;  %12294 = vmatmul.mubr.bf16.gmra.mrb[160].mxu0 %v20872_v21  ;;  %v20874_v63 = vld [vmem:[#allocation25_spill] sm:$0xff]  ;;  %v20875_v37 = vld [vmem:[#allocation28_spill] sm:$0xff] }
 0x71e   :  { %v12779_v32 = vsel %vm12393_vm7, %v15186_v34, %v12587_v23  ;;  %12303 = vmatprep.mubr.bf16.mxu0 %v20873_v16  ;;  %v11077_v1 = vpop.f32.mrb[136].mxu1 }
 0x71f   :  { %13534 = vst [vmem:[#allocation14 + $0x30] sm:$0xff] %v14801_v35  ;;  %v14804_v39 = vpack.c.bf16 %v12779_v32, %v12778_v42  ;;  %v15187_v11 = vadd.f32 %v11077_v1, %v20092_v43  ;;  %v11079_v5 = vpop.f32.mrb[137].mxu1  ;;  %v20876_v35 = vld [vmem:[#allocation66_spill] sm:$0xff]  ;;  %v20877_v32 = vld [vmem:[#allocation69_spill] sm:$0xff] }
 0x720   :  { %v15188_v8 = vadd.f32 %v11079_v5, %v20098_v36  ;;  %v11081_v62 = vpop.f32.mrb[138].mxu1 }
 0x721   :  { %13537 = vst [vmem:[#allocation14 + $0x48] sm:$0xff] %v14804_v39  ;;  %vm12398_vm8 = vcmp.gt.f32.partialorder %v15187_v11, 0.0  ;;  %v12592_v41 = vmul.f32 %v15187_v11, %v20105_v13  ;;  %v15189_v17 = vadd.f32 %v11081_v62, %v20092_v43  ;;  %v11083_v9 = vpop.f32.mrb[139].mxu1 }
 0x722   :  { %vm12399_vm9 = vcmp.gt.f32.partialorder %v15188_v8, 0.0  ;;  %v12593_v28 = vmul.f32 %v15188_v8, %v20105_v13  ;;  %v15190_v31 = vadd.f32 %v11083_v9, %v20098_v36 }
 0x723   :  { %v12784_v47 = vsel %vm12398_vm8, %v15187_v11, %v12592_v41  ;;  %vm12404_vm10 = vcmp.gt.f32.partialorder %v15189_v17, 0.0  ;;  %v12598_v34 = vmul.f32 %v15189_v17, %v20105_v13  ;;  %11379 = vmatmul.mubr.bf16.gmra.mrb[244].mxu1 %v20874_v63  ;;  %v20878_v63 = vld [vmem:[#allocation27_spill] sm:$0xff] }
 0x724   :  { %v12785_v12 = vsel %vm12399_vm9, %v15188_v8, %v12593_v28  ;;  %vm12405_vm11 = vcmp.gt.f32.partialorder %v15190_v31, 0.0  ;;  %v12599_v30 = vmul.f32 %v15190_v31, %v20105_v13  ;;  %11388 = vmatprep.mubr.bf16.mxu1 %v20875_v37  ;;  %v20879_v37 = vld [vmem:[#allocation30_spill] sm:$0xff] }
 0x725   :  { %v14807_v23 = vpack.c.bf16 %v12785_v12, %v12784_v47  ;;  %v12790_v0 = vsel %vm12404_vm10, %v15189_v17, %v12598_v34  ;;  %12304 = vmatmul.mubr.bf16.gmra.mrb[164].mxu0 %v20876_v35 }
 0x726   :  { %v12791_v42 = vsel %vm12405_vm11, %v15190_v31, %v12599_v30  ;;  %12313 = vmatprep.mubr.bf16.mxu0 %v20877_v32  ;;  %v11087_v1 = vpop.f32.mrb[140].mxu1 }
 0x727   :  { %13540 = vst [vmem:[#allocation14 + $0x60] sm:$0xff] %v14807_v23  ;;  %v14810_v39 = vpack.c.bf16 %v12791_v42, %v12790_v0  ;;  %v15191_v11 = vadd.f32 %v11087_v1, %v20092_v43  ;;  %v11089_v5 = vpop.f32.mrb[141].mxu1  ;;  %v20880_v42 = vld [vmem:[#allocation68_spill] sm:$0xff] }
 0x728   :  { %v15192_v8 = vadd.f32 %v11089_v5, %v20098_v36  ;;  %v11091_v62 = vpop.f32.mrb[142].mxu1 }
 0x729   :  { %13543 = vst [vmem:[#allocation14 + $0x78] sm:$0xff] %v14810_v39  ;;  %vm12410_vm12 = vcmp.gt.f32.partialorder %v15191_v11, 0.0  ;;  %v12604_v41 = vmul.f32 %v15191_v11, %v20105_v13  ;;  %v15193_v17 = vadd.f32 %v11091_v62, %v20092_v43  ;;  %v11093_v9 = vpop.f32.mrb[143].mxu1 }
 0x72a   :  { %vm12411_vm13 = vcmp.gt.f32.partialorder %v15192_v8, 0.0  ;;  %v12605_v28 = vmul.f32 %v15192_v8, %v20105_v13  ;;  %v15194_v31 = vadd.f32 %v11093_v9, %v20098_v36 }
 0x72b   :  { %v12796_v47 = vsel %vm12410_vm12, %v15191_v11, %v12604_v41  ;;  %vm12416_vm14 = vcmp.gt.f32.partialorder %v15193_v17, 0.0  ;;  %v12610_v34 = vmul.f32 %v15193_v17, %v20105_v13  ;;  %11389 = vmatmul.mubr.bf16.gmra.mrb[248].mxu1 %v20878_v63 }
 0x72c   :  { %v12797_v12 = vsel %vm12411_vm13, %v15192_v8, %v12605_v28  ;;  %vm12417_vm15 = vcmp.gt.f32.partialorder %v15194_v31, 0.0  ;;  %v12611_v30 = vmul.f32 %v15194_v31, %v20105_v13  ;;  %11398 = vmatprep.mubr.bf16.mxu1 %v20879_v37 }
 0x72d   :  { %v14813_v23 = vpack.c.bf16 %v12797_v12, %v12796_v47  ;;  %v12802_v0 = vsel %vm12416_vm14, %v15193_v17, %v12610_v34  ;;  %12314 = vmatmul.mubr.bf16.gmra.mrb[168].mxu0 %v20880_v42  ;;  %v20881_v12 = vld [vmem:[#allocation29_spill] sm:$0xff] }
 0x72e   :  { %v12803_v1 = vsel %vm12417_vm15, %v15194_v31, %v12611_v30  ;;  %12323 = vmatprep.mubr.bf16.mxu0 %v19976_v50  ;;  %v11097_v39 = vpop.f32.mrb[144].mxu1 }
 0x72f   :  { %13546 = vst [vmem:[#allocation14 + $0x90] sm:$0xff] %v14813_v23  ;;  %v14816_v11 = vpack.c.bf16 %v12803_v1, %v12802_v0  ;;  %v15195_v5 = vadd.f32 %v11097_v39, %v20092_v43  ;;  %v11099_v62 = vpop.f32.mrb[145].mxu1  ;;  %v20882_v23 = vld [vmem:[#allocation32_spill] sm:$0xff] }
 0x730   :  { %v15196_v8 = vadd.f32 %v11099_v62, %v20098_v36  ;;  %v11101_v41 = vpop.f32.mrb[146].mxu1 }
 0x731   :  { %13549 = vst [vmem:[#allocation14 + $0xa8] sm:$0xff] %v14816_v11  ;;  %vm12422_vm0 = vcmp.gt.f32.partialorder %v15195_v5, 0.0  ;;  %v12616_v9 = vmul.f32 %v15195_v5, %v20105_v13  ;;  %v15197_v17 = vadd.f32 %v11101_v41, %v20092_v43  ;;  %v11103_v28 = vpop.f32.mrb[147].mxu1 }
 0x732   :  { %vm12423_vm1 = vcmp.gt.f32.partialorder %v15196_v8, 0.0  ;;  %v12617_v31 = vmul.f32 %v15196_v8, %v20105_v13  ;;  %v15198_v47 = vadd.f32 %v11103_v28, %v20098_v36  ;;  %v18197_v28 = vld [vmem:[#allocation11 + $0x608] ss:$24 sps:$4 sm:$0xff]  }
 0x733   :  { %v12808_v34 = vsel %vm12422_vm0, %v15195_v5, %v12616_v9  ;;  %vm12428_vm2 = vcmp.gt.f32.partialorder %v15197_v17, 0.0  ;;  %v12622_v63 = vmul.f32 %v15197_v17, %v20105_v13  ;;  %11399 = vmatmul.mubr.bf16.gmra.mrb[252].mxu1 %v20881_v12 }
 0x734   :  { %v12809_v30 = vsel %vm12423_vm1, %v15196_v8, %v12617_v31  ;;  %vm12429_vm3 = vcmp.gt.f32.partialorder %v15198_v47, 0.0  ;;  %v12623_v37 = vmul.f32 %v15198_v47, %v20105_v13  ;;  %11441 = vmatprep.mubr.bf16.mxu1 %v20882_v23  ;;  %v20883_v23 = vld [vmem:[#allocation31_spill] sm:$0xff] }
 0x735   :  { %v14819_v0 = vpack.c.bf16 %v12809_v30, %v12808_v34  ;;  %v12814_v1 = vsel %vm12428_vm2, %v15197_v17, %v12622_v63  ;;  %12324 = vmatmul.mubr.bf16.gmra.mrb[172].mxu0 %v19973_v2 }
 0x736   :  { %v12815_v39 = vsel %vm12429_vm3, %v15198_v47, %v12623_v37  ;;  %12333 = vmatprep.mubr.bf16.mxu0 %v19992_v3  ;;  %v11107_v11 = vpop.f32.mrb[148].mxu1  ;;  %v18202_v47 = vld [vmem:[#allocation11 + $0x63c] ss:$24 sps:$4 sm:$0xff]  }
 0x737   :  { %13552 = vst [vmem:[#allocation14 + $0xc0] sm:$0xff] %v14819_v0  ;;  %v14822_v5 = vpack.c.bf16 %v12815_v39, %v12814_v1  ;;  %v15199_v62 = vadd.f32 %v11107_v11, %v20092_v43  ;;  %v11109_v41 = vpop.f32.mrb[149].mxu1  ;;  %v20884_v39 = vld [vmem:[#allocation34_spill] sm:$0xff]  ;;  %v18200_v11 = vld [vmem:[#allocation11 + $0x638] ss:$24 sps:$4 sm:$0xff]  }
 0x738   :  { %v15200_v8 = vadd.f32 %v11109_v41, %v20098_v36  ;;  %v11111_v9 = vpop.f32.mrb[150].mxu1 }
 0x739   :  { %13555 = vst [vmem:[#allocation14 + $0xd8] sm:$0xff] %v14822_v5  ;;  %vm12434_vm4 = vcmp.gt.f32.partialorder %v15199_v62, 0.0  ;;  %v12628_v31 = vmul.f32 %v15199_v62, %v20105_v13  ;;  %v15201_v17 = vadd.f32 %v11111_v9, %v20092_v43  ;;  %v11113_v34 = vpop.f32.mrb[151].mxu1  ;;  %v20885_v9 = vld [vmem:[#allocation71_spill] sm:$0xff] }
 0x73a   :  { %vm12435_vm5 = vcmp.gt.f32.partialorder %v15200_v8, 0.0  ;;  %v12629_v63 = vmul.f32 %v15200_v8, %v20105_v13  ;;  %v15202_v12 = vadd.f32 %v11113_v34, %v20098_v36  ;;  %v18205_v34 = vld [vmem:[#allocation11 + $0x66c] ss:$24 sps:$4 sm:$0xff]  }
 0x73b   :  { %v12820_v30 = vsel %vm12434_vm4, %v15199_v62, %v12628_v31  ;;  %vm12440_vm6 = vcmp.gt.f32.partialorder %v15201_v17, 0.0  ;;  %v12634_v37 = vmul.f32 %v15201_v17, %v20105_v13  ;;  %11442 = vmatmul.mubr.bf16.vlgmr.msra.gmra.mrb[192].mxu1 %v20883_v23  ;;  %v20886_v31 = vld [vmem:[#allocation74_spill] sm:$0xff] }
 0x73c   :  { %v12821_v0 = vsel %vm12435_vm5, %v15200_v8, %v12629_v63  ;;  %vm12441_vm7 = vcmp.gt.f32.partialorder %v15202_v12, 0.0  ;;  %v12635_v1 = vmul.f32 %v15202_v12, %v20105_v13  ;;  %11451 = vmatprep.mubr.bf16.mxu1 %v20884_v39  ;;  %11603 = vmatpush1.bf16.msra.mxu1 %v18197_v28  ;;  %v18203_v28 = vld [vmem:[#allocation11 + $0x668] ss:$24 sps:$4 sm:$0xff]  }
 0x73d   :  { %v14825_v5 = vpack.c.bf16 %v12821_v0, %v12820_v30  ;;  %v12826_v41 = vsel %vm12440_vm6, %v15201_v17, %v12634_v37  ;;  %12334 = vmatmul.mubr.bf16.gmra.mrb[176].mxu0 %v20885_v9  ;;  %11604 = vmatprep.subr.bf16.mxu1 %v18202_v47  ;;  %v18208_v30 = vld [vmem:[#allocation11 + $0x69c] ss:$24 sps:$4 sm:$0xff]  }
 0x73e   :  { %v12827_v62 = vsel %vm12441_vm7, %v15202_v12, %v12635_v1  ;;  %12343 = vmatprep.mubr.bf16.mxu0 %v20886_v31  ;;  %v11117_v3 = vpop.f32.mrb[152].mxu1 }
 0x73f   :  { %13558 = vst [vmem:[#allocation14 + $0xf0] sm:$0xff] %v14825_v5  ;;  %v14828_v23 = vpack.c.bf16 %v12827_v62, %v12826_v41  ;;  %v15203_v8 = vadd.f32 %v11117_v3, %v20092_v43  ;;  %v11119_v63 = vpop.f32.mrb[153].mxu1  ;;  %v20888_v62 = vld [vmem:[#allocation36_spill] sm:$0xff] }
 0x740   :  { %v15204_v2 = vadd.f32 %v11119_v63, %v20098_v36  ;;  %v11121_v39 = vpop.f32.mrb[154].mxu1  ;;  %11605 = vmatpush1.bf16.msra.mxu1 %v18200_v11  ;;  %v20887_v11 = vld [vmem:[#allocation33_spill] sm:$0xff] }
 0x741   :  { %13561 = vst [vmem:[#allocation14 + $0x108] sm:$0xff] %v14828_v23  ;;  %vm12446_vm8 = vcmp.gt.f32.partialorder %v15203_v8, 0.0  ;;  %v12640_v17 = vmul.f32 %v15203_v8, %v20105_v13  ;;  %v15205_v47 = vadd.f32 %v11121_v39, %v20092_v43  ;;  %v11123_v12 = vpop.f32.mrb[155].mxu1  ;;  %11606 = vmatprep.subr.bf16.mxu1 %v18205_v34  ;;  %v18206_v34 = vld [vmem:[#allocation11 + $0x698] ss:$24 sps:$4 sm:$0xff]  }
 0x742   :  { %vm12447_vm9 = vcmp.gt.f32.partialorder %v15204_v2, 0.0  ;;  %v12641_v37 = vmul.f32 %v15204_v2, %v20105_v13  ;;  %v15206_v3 = vadd.f32 %v11123_v12, %v20098_v36  ;;  %v20889_v39 = vld [vmem:[#allocation73_spill] sm:$0xff]  ;;  %v18211_v12 = vld [vmem:[#allocation11 + $0x6cc] ss:$24 sps:$4 sm:$0xff]  }
 0x743   :  { %v12832_v0 = vsel %vm12446_vm8, %v15203_v8, %v12640_v17  ;;  %vm12452_vm10 = vcmp.gt.f32.partialorder %v15205_v47, 0.0  ;;  %v12646_v1 = vmul.f32 %v15205_v47, %v20105_v13  ;;  %11452 = vmatmul.mubr.bf16.gmra.mrb[196].mxu1 %v20887_v11 }
 0x744   :  { %v12833_v5 = vsel %vm12447_vm9, %v15204_v2, %v12641_v37  ;;  %vm12453_vm11 = vcmp.gt.f32.partialorder %v15206_v3, 0.0  ;;  %v12647_v41 = vmul.f32 %v15206_v3, %v20105_v13  ;;  %11461 = vmatprep.mubr.bf16.mxu1 %v20888_v62  ;;  %11607 = vmatpush1.bf16.msra.mxu1 %v18203_v28  ;;  %v18209_v28 = vld [vmem:[#allocation11 + $0x6c8] ss:$24 sps:$4 sm:$0xff]  }
 0x745   :  { %v14831_v23 = vpack.c.bf16 %v12833_v5, %v12832_v0  ;;  %v12838_v63 = vsel %vm12452_vm10, %v15205_v47, %v12646_v1  ;;  %12344 = vmatmul.mubr.bf16.gmra.mrb[180].mxu0 %v20889_v39  ;;  %11608 = vmatprep.subr.bf16.mxu1 %v18208_v30  ;;  %v18214_v0 = vld [vmem:[#allocation11 + $0x6fc] ss:$24 sps:$4 sm:$0xff]  }
 0x746   :  { %v12839_v8 = vsel %vm12453_vm11, %v15206_v3, %v12647_v41  ;;  %12353 = vmatprep.mubr.bf16.mxu0 %v20024_v14  ;;  %v11127_v17 = vpop.f32.mrb[156].mxu1 }
 0x747   :  { %13564 = vst [vmem:[#allocation14 + $0x120] sm:$0xff] %v14831_v23  ;;  %v14834_v11 = vpack.c.bf16 %v12839_v8, %v12838_v63  ;;  %v15207_v2 = vadd.f32 %v11127_v17, %v20092_v43  ;;  %v11129_v37 = vpop.f32.mrb[157].mxu1  ;;  %v20891_v17 = vld [vmem:[#allocation42_spill] sm:$0xff] }
 0x748   :  { %v15208_v31 = vadd.f32 %v11129_v37, %v20098_v36  ;;  %v11131_v62 = vpop.f32.mrb[158].mxu1  ;;  %11609 = vmatpush1.bf16.msra.mxu1 %v18206_v34  ;;  %v20890_v34 = vld [vmem:[#allocation35_spill] sm:$0xff] }
 0x749   :  { %13567 = vst [vmem:[#allocation14 + $0x138] sm:$0xff] %v14834_v11  ;;  %vm12458_vm12 = vcmp.gt.f32.partialorder %v15207_v2, 0.0  ;;  %v12652_v47 = vmul.f32 %v15207_v2, %v20105_v13  ;;  %v15209_v30 = vadd.f32 %v11131_v62, %v20092_v43  ;;  %v11133_v3 = vpop.f32.mrb[159].mxu1  ;;  %11610 = vmatprep.subr.bf16.mxu1 %v18211_v12  ;;  %v18212_v12 = vld [vmem:[#allocation11 + $0x6f8] ss:$24 sps:$4 sm:$0xff]  }
 0x74a   :  { %vm12459_vm13 = vcmp.gt.f32.partialorder %v15208_v31, 0.0  ;;  %v12653_v1 = vmul.f32 %v15208_v31, %v20105_v13  ;;  %v15210_v5 = vadd.f32 %v11133_v3, %v20098_v36  ;;  %v18217_v62 = vld [vmem:[#allocation11 + $0x72c] ss:$24 sps:$4 sm:$0xff]  }
 0x74b   :  { %v12844_v41 = vsel %vm12458_vm12, %v15207_v2, %v12652_v47  ;;  %vm12464_vm14 = vcmp.gt.f32.partialorder %v15209_v30, 0.0  ;;  %v12658_v23 = vmul.f32 %v15209_v30, %v20105_v13  ;;  %11462 = vmatmul.mubr.bf16.gmra.mrb[200].mxu1 %v20890_v34 }
 0x74c   :  { %v12845_v63 = vsel %vm12459_vm13, %v15208_v31, %v12653_v1  ;;  %vm12465_vm15 = vcmp.gt.f32.partialorder %v15210_v5, 0.0  ;;  %v12659_v8 = vmul.f32 %v15210_v5, %v20105_v13  ;;  %11471 = vmatprep.mubr.bf16.mxu1 %v20891_v17  ;;  %11611 = vmatpush1.bf16.msra.mxu1 %v18209_v28  ;;  %v18215_v28 = vld [vmem:[#allocation11 + $0x728] ss:$24 sps:$4 sm:$0xff]  }
 0x74d   :  { %v14837_v11 = vpack.c.bf16 %v12845_v63, %v12844_v41  ;;  %v12850_v37 = vsel %vm12464_vm14, %v15209_v30, %v12658_v23  ;;  %12354 = vmatmul.mubr.bf16.gmra.mrb[184].mxu0 %v20021_v49  ;;  %11612 = vmatprep.subr.bf16.mxu1 %v18214_v0  ;;  %v18220_v41 = vld [vmem:[#allocation11 + $0x75c] ss:$24 sps:$4 sm:$0xff]  }
 0x74e   :  { %v12851_v2 = vsel %vm12465_vm15, %v15210_v5, %v12659_v8  ;;  %12363 = vmatprep.mubr.bf16.mxu0 %v20039_v10  ;;  %v11137_v47 = vpop.f32.mrb[160].mxu1 }
 0x74f   :  { %13570 = vst [vmem:[#allocation14 + $0x150] sm:$0xff] %v14837_v11  ;;  %v14840_v3 = vpack.c.bf16 %v12851_v2, %v12850_v37  ;;  %v15211_v31 = vadd.f32 %v11137_v47, %v20092_v43  ;;  %v11139_v1 = vpop.f32.mrb[161].mxu1  ;;  %v20893_v47 = vld [vmem:[#allocation44_spill] sm:$0xff] }
 0x750   :  { %v15212_v34 = vadd.f32 %v11139_v1, %v20098_v36  ;;  %v11141_v17 = vpop.f32.mrb[162].mxu1  ;;  %11613 = vmatpush1.bf16.msra.mxu1 %v18212_v12  ;;  %v20892_v12 = vld [vmem:[#allocation37_spill] sm:$0xff] }
 0x751   :  { %13573 = vst [vmem:[#allocation14 + $0x168] sm:$0xff] %v14840_v3  ;;  %vm12470_vm0 = vcmp.gt.f32.partialorder %v15211_v31, 0.0  ;;  %v12664_v30 = vmul.f32 %v15211_v31, %v20105_v13  ;;  %v15213_v0 = vadd.f32 %v11141_v17, %v20092_v43  ;;  %v11143_v5 = vpop.f32.mrb[163].mxu1  ;;  %11614 = vmatprep.subr.bf16.mxu1 %v18217_v62  ;;  %v18218_v62 = vld [vmem:[#allocation11 + $0x758] ss:$24 sps:$4 sm:$0xff]  }
 0x752   :  { %vm12471_vm1 = vcmp.gt.f32.partialorder %v15212_v34, 0.0  ;;  %v12665_v23 = vmul.f32 %v15212_v34, %v20105_v13  ;;  %v15214_v63 = vadd.f32 %v11143_v5, %v20098_v36  ;;  %v18223_v17 = vld [vmem:[#allocation11 + $0x78c] ss:$24 sps:$4 sm:$0xff]  }
 0x753   :  { %v12856_v8 = vsel %vm12470_vm0, %v15211_v31, %v12664_v30  ;;  %vm12476_vm2 = vcmp.gt.f32.partialorder %v15213_v0, 0.0  ;;  %v12670_v11 = vmul.f32 %v15213_v0, %v20105_v13  ;;  %11472 = vmatmul.mubr.bf16.gmra.mrb[204].mxu1 %v20892_v12 }
 0x754   :  { %v12857_v37 = vsel %vm12471_vm1, %v15212_v34, %v12665_v23  ;;  %vm12477_vm3 = vcmp.gt.f32.partialorder %v15214_v63, 0.0  ;;  %v12671_v2 = vmul.f32 %v15214_v63, %v20105_v13  ;;  %11481 = vmatprep.mubr.bf16.mxu1 %v20893_v47  ;;  %11615 = vmatpush1.bf16.msra.mxu1 %v18215_v28  ;;  %v18221_v47 = vld [vmem:[#allocation11 + $0x788] ss:$24 sps:$4 sm:$0xff]  }
 0x755   :  { %v14843_v3 = vpack.c.bf16 %v12857_v37, %v12856_v8  ;;  %v12862_v1 = vsel %vm12476_vm2, %v15213_v0, %v12670_v11  ;;  %12364 = vmatmul.mubr.bf16.gmra.mrb[188].mxu0 %v20037_v60  ;;  %11616 = vmatprep.subr.bf16.mxu1 %v18220_v41 }
 0x756   :  { %v12863_v31 = vsel %vm12477_vm3, %v15214_v63, %v12671_v2  ;;  %v11147_v30 = vpop.f32.mrb[164].mxu1  ;;  %v18226_v63 = vld [vmem:[#allocation11 + $0x7bc] ss:$24 sps:$4 sm:$0xff]  }
 0x757   :  { %13576 = vst [vmem:[#allocation14 + $0x180] sm:$0xff] %v14843_v3  ;;  %v14846_v5 = vpack.c.bf16 %v12863_v31, %v12862_v1  ;;  %v15215_v12 = vadd.f32 %v11147_v30, %v20092_v43  ;;  %v11149_v34 = vpop.f32.mrb[165].mxu1  ;;  %v20895_v31 = vld [vmem:[#allocation46_spill] sm:$0xff] }
 0x758   :  { %v15216_v23 = vadd.f32 %v11149_v34, %v20098_v36  ;;  %v11151_v10 = vpop.f32.mrb[166].mxu1  ;;  %11617 = vmatpush1.bf16.msra.mxu1 %v18218_v62  ;;  %v20894_v62 = vld [vmem:[#allocation43_spill] sm:$0xff] }
 0x759   :  { %13579 = vst [vmem:[#allocation14 + $0x198] sm:$0xff] %v14846_v5  ;;  %vm12482_vm4 = vcmp.gt.f32.partialorder %v15215_v12, 0.0  ;;  %v12676_v28 = vmul.f32 %v15215_v12, %v20105_v13  ;;  %v15217_v0 = vadd.f32 %v11151_v10, %v20092_v43  ;;  %v11153_v41 = vpop.f32.mrb[167].mxu1  ;;  %11618 = vmatprep.subr.bf16.mxu1 %v18223_v17  ;;  %v18224_v10 = vld [vmem:[#allocation11 + $0x7b8] ss:$24 sps:$4 sm:$0xff]  }
 0x75a   :  { %vm12483_vm5 = vcmp.gt.f32.partialorder %v15216_v23, 0.0  ;;  %v12677_v8 = vmul.f32 %v15216_v23, %v20105_v13  ;;  %v15218_v11 = vadd.f32 %v11153_v41, %v20098_v36  ;;  %v18229_v5 = vld [vmem:[#allocation11 + $0x7ec] ss:$24 sps:$4 sm:$0xff]  }
 0x75b   :  { %v12868_v37 = vsel %vm12482_vm4, %v15215_v12, %v12676_v28  ;;  %vm12488_vm6 = vcmp.gt.f32.partialorder %v15217_v0, 0.0  ;;  %v12682_v2 = vmul.f32 %v15217_v0, %v20105_v13  ;;  %11482 = vmatmul.mubr.bf16.gmra.mrb[208].mxu1 %v20894_v62  ;;  %v18227_v62 = vld [vmem:[#allocation11 + $0x7e8] ss:$24 sps:$4 sm:$0xff]  }
 0x75c   :  { %v12869_v3 = vsel %vm12483_vm5, %v15216_v23, %v12677_v8  ;;  %vm12489_vm7 = vcmp.gt.f32.partialorder %v15218_v11, 0.0  ;;  %v12683_v1 = vmul.f32 %v15218_v11, %v20105_v13  ;;  %11491 = vmatprep.mubr.bf16.mxu1 %v20895_v31  ;;  %11619 = vmatpush1.bf16.msra.mxu1 %v18221_v47 }
 0x75d   :  { %v14849_v17 = vpack.c.bf16 %v12869_v3, %v12868_v37  ;;  %v12874_v30 = vsel %vm12488_vm6, %v15217_v0, %v12682_v2  ;;  %11620 = vmatprep.subr.bf16.mxu1 %v18226_v63 }
 0x75e   :  { %v12875_v34 = vsel %vm12489_vm7, %v15218_v11, %v12683_v1  ;;  %v11157_v41 = vpop.f32.mrb[168].mxu1  ;;  %v18232_v11 = vld [vmem:[#allocation11 + $0x81c] ss:$24 sps:$4 sm:$0xff]  }
 0x75f   :  { %13582 = vst [vmem:[#allocation14 + $0x1b0] sm:$0xff] %v14849_v17  ;;  %v14852_v12 = vpack.c.bf16 %v12875_v34, %v12874_v30  ;;  %v15219_v28 = vadd.f32 %v11157_v41, %v20092_v43  ;;  %v11159_v60 = vpop.f32.mrb[169].mxu1  ;;  %v20896_v1 = vld [vmem:[#allocation45_spill] sm:$0xff]  ;;  %v20897_v17 = vld [vmem:[#allocation48_spill] sm:$0xff] }
 0x760   :  { %v15220_v23 = vadd.f32 %v11159_v60, %v20098_v36  ;;  %v11161_v8 = vpop.f32.mrb[170].mxu1  ;;  %11621 = vmatpush1.bf16.msra.mxu1 %v18224_v10  ;;  %v18230_v30 = vld [vmem:[#allocation11 + $0x818] ss:$24 sps:$4 sm:$0xff]   ;;  %v18235_v41 = vld [vmem:[#allocation11 + $0x84c] ss:$24 sps:$4 sm:$0xff]  }
 0x761   :  { %13585 = vst [vmem:[#allocation14 + $0x1c8] sm:$0xff] %v14852_v12  ;;  %vm12494_vm8 = vcmp.gt.f32.partialorder %v15219_v28, 0.0  ;;  %v12688_v47 = vmul.f32 %v15219_v28, %v20105_v13  ;;  %v15221_v0 = vadd.f32 %v11161_v8, %v20092_v43  ;;  %v11163_v63 = vpop.f32.mrb[171].mxu1  ;;  %11622 = vmatprep.subr.bf16.mxu1 %v18229_v5 }
 0x762   :  { %vm12495_vm9 = vcmp.gt.f32.partialorder %v15220_v23, 0.0  ;;  %v12689_v37 = vmul.f32 %v15220_v23, %v20105_v13  ;;  %v15222_v2 = vadd.f32 %v11163_v63, %v20098_v36 }
 0x763   :  { %v12880_v3 = vsel %vm12494_vm8, %v15219_v28, %v12688_v47  ;;  %vm12500_vm10 = vcmp.gt.f32.partialorder %v15221_v0, 0.0  ;;  %v12694_v60 = vmul.f32 %v15221_v0, %v20105_v13  ;;  %11492 = vmatmul.mubr.bf16.gmra.mrb[212].mxu1 %v20896_v1  ;;  %v18233_v1 = vld [vmem:[#allocation11 + $0x848] ss:$24 sps:$4 sm:$0xff]  }
 0x764   :  { %v12881_v31 = vsel %vm12495_vm9, %v15220_v23, %v12689_v37  ;;  %vm12501_vm11 = vcmp.gt.f32.partialorder %v15222_v2, 0.0  ;;  %v12695_v10 = vmul.f32 %v15222_v2, %v20105_v13  ;;  %11501 = vmatprep.mubr.bf16.mxu1 %v20897_v17  ;;  %11623 = vmatpush1.bf16.msra.mxu1 %v18227_v62  ;;  %v20898_v17 = vld [vmem:[#allocation47_spill] sm:$0xff] }
 0x765   :  { %v14855_v5 = vpack.c.bf16 %v12881_v31, %v12880_v3  ;;  %v12886_v34 = vsel %vm12500_vm10, %v15221_v0, %v12694_v60  ;;  %11624 = vmatprep.subr.bf16.mxu1 %v18232_v11 }
 0x766   :  { %v12887_v12 = vsel %vm12501_vm11, %v15222_v2, %v12695_v10  ;;  %v11167_v8 = vpop.f32.mrb[172].mxu1  ;;  %v18238_v2 = vld [vmem:[#allocation11 + $0x87c] ss:$24 sps:$4 sm:$0xff]  }
 0x767   :  { %13588 = vst [vmem:[#allocation14 + $0x1e0] sm:$0xff] %v14855_v5  ;;  %v14858_v28 = vpack.c.bf16 %v12887_v12, %v12886_v34  ;;  %v15223_v47 = vadd.f32 %v11167_v8, %v20092_v43  ;;  %v11169_v63 = vpop.f32.mrb[173].mxu1  ;;  %v20899_v34 = vld [vmem:[#allocation50_spill] sm:$0xff] }
 0x768   :  { %v15224_v23 = vadd.f32 %v11169_v63, %v20098_v36  ;;  %v11171_v37 = vpop.f32.mrb[174].mxu1  ;;  %11625 = vmatpush1.bf16.msra.mxu1 %v18230_v30 }
 0x769   :  { %13591 = vst [vmem:[#allocation14 + $0x1f8] sm:$0xff] %v14858_v28  ;;  %vm12506_vm12 = vcmp.gt.f32.partialorder %v15223_v47, 0.0  ;;  %v12700_v62 = vmul.f32 %v15223_v47, %v20105_v13  ;;  %v15225_v0 = vadd.f32 %v11171_v37, %v20092_v43  ;;  %v11173_v11 = vpop.f32.mrb[175].mxu1  ;;  %11626 = vmatprep.subr.bf16.mxu1 %v18235_v41  ;;  %v18236_v41 = vld [vmem:[#allocation11 + $0x878] ss:$24 sps:$4 sm:$0xff]  }
 0x76a   :  { %vm12507_vm13 = vcmp.gt.f32.partialorder %v15224_v23, 0.0  ;;  %v12701_v3 = vmul.f32 %v15224_v23, %v20105_v13  ;;  %v15226_v60 = vadd.f32 %v11173_v11, %v20098_v36  ;;  %v18241_v28 = vld [vmem:[#allocation11 + $0x8ac] ss:$24 sps:$4 sm:$0xff]  }
 0x76b   :  { %v12892_v31 = vsel %vm12506_vm12, %v15223_v47, %v12700_v62  ;;  %vm12512_vm14 = vcmp.gt.f32.partialorder %v15225_v0, 0.0  ;;  %v12706_v10 = vmul.f32 %v15225_v0, %v20105_v13  ;;  %11502 = vmatmul.mubr.bf16.gmra.mrb[216].mxu1 %v20898_v17  ;;  %v18239_v17 = vld [vmem:[#allocation11 + $0x8a8] ss:$24 sps:$4 sm:$0xff]  }
 0x76c   :  { %v12893_v30 = vsel %vm12507_vm13, %v15224_v23, %v12701_v3  ;;  %vm12513_vm15 = vcmp.gt.f32.partialorder %v15226_v60, 0.0  ;;  %v12707_v5 = vmul.f32 %v15226_v60, %v20105_v13  ;;  %11511 = vmatprep.mubr.bf16.mxu1 %v20899_v34  ;;  %11627 = vmatpush1.bf16.msra.mxu1 %v18233_v1  ;;  %v20900_v34 = vld [vmem:[#allocation49_spill] sm:$0xff] }
 0x76d   :  { %v14861_v12 = vpack.c.bf16 %v12893_v30, %v12892_v31  ;;  %v12898_v8 = vsel %vm12512_vm14, %v15225_v0, %v12706_v10  ;;  %11628 = vmatprep.subr.bf16.mxu1 %v18238_v2 }
 0x76e   :  { %v12899_v63 = vsel %vm12513_vm15, %v15226_v60, %v12707_v5  ;;  %v11177_v37 = vpop.f32.mrb[176].mxu1  ;;  %v18244_v60 = vld [vmem:[#allocation11 + $0x8dc] ss:$24 sps:$4 sm:$0xff]  }
 0x76f   :  { %13594 = vst [vmem:[#allocation14 + $0x210] sm:$0xff] %v14861_v12  ;;  %v14864_v47 = vpack.c.bf16 %v12899_v63, %v12898_v8  ;;  %v15227_v62 = vadd.f32 %v11177_v37, %v20092_v43  ;;  %v11179_v11 = vpop.f32.mrb[177].mxu1  ;;  %v20901_v8 = vld [vmem:[#allocation52_spill] sm:$0xff] }
 0x770   :  { %v15228_v23 = vadd.f32 %v11179_v11, %v20098_v36  ;;  %v11181_v3 = vpop.f32.mrb[178].mxu1  ;;  %11629 = vmatpush1.bf16.msra.mxu1 %v18236_v41 }
 0x771   :  { %13597 = vst [vmem:[#allocation14 + $0x228] sm:$0xff] %v14864_v47  ;;  %vm12518_vm0 = vcmp.gt.f32.partialorder %v15227_v62, 0.0  ;;  %v12712_v1 = vmul.f32 %v15227_v62, %v20105_v13  ;;  %v15229_v0 = vadd.f32 %v11181_v3, %v20092_v43  ;;  %v11183_v2 = vpop.f32.mrb[179].mxu1  ;;  %11630 = vmatprep.subr.bf16.mxu1 %v18241_v28  ;;  %v18242_v28 = vld [vmem:[#allocation11 + $0x8d8] ss:$24 sps:$4 sm:$0xff]  }
 0x772   :  { %vm12519_vm1 = vcmp.gt.f32.partialorder %v15228_v23, 0.0  ;;  %v12713_v31 = vmul.f32 %v15228_v23, %v20105_v13  ;;  %v15230_v10 = vadd.f32 %v11183_v2, %v20098_v36 }
 0x773   :  { %v12904_v30 = vsel %vm12518_vm0, %v15227_v62, %v12712_v1  ;;  %vm12524_vm2 = vcmp.gt.f32.partialorder %v15229_v0, 0.0  ;;  %v12718_v5 = vmul.f32 %v15229_v0, %v20105_v13  ;;  %11512 = vmatmul.mubr.bf16.gmra.mrb[220].mxu1 %v20900_v34  ;;  %v20902_v34 = vld [vmem:[#allocation51_spill] sm:$0xff] }
 0x774   :  { %v12905_v41 = vsel %vm12519_vm1, %v15228_v23, %v12713_v31  ;;  %vm12525_vm3 = vcmp.gt.f32.partialorder %v15230_v10, 0.0  ;;  %v12719_v12 = vmul.f32 %v15230_v10, %v20105_v13  ;;  %11521 = vmatprep.mubr.bf16.mxu1 %v20901_v8  ;;  %11631 = vmatpush1.bf16.msra.mxu1 %v18239_v17  ;;  %v20903_v8 = vld [vmem:[#allocation54_spill] sm:$0xff] }
 0x775   :  { %v14867_v63 = vpack.c.bf16 %v12905_v41, %v12904_v30  ;;  %v12910_v37 = vsel %vm12524_vm2, %v15229_v0, %v12718_v5  ;;  %11632 = vmatprep.subr.bf16.mxu1 %v18244_v60 }
 0x776   :  { %v12911_v47 = vsel %vm12525_vm3, %v15230_v10, %v12719_v12  ;;  %v11187_v11 = vpop.f32.mrb[180].mxu1 }
 0x777   :  { %13600 = vst [vmem:[#allocation14 + $0x240] sm:$0xff] %v14867_v63  ;;  %v14870_v62 = vpack.c.bf16 %v12911_v47, %v12910_v37  ;;  %v15231_v3 = vadd.f32 %v11187_v11, %v20092_v43  ;;  %v11189_v1 = vpop.f32.mrb[181].mxu1 }
 0x778   :  { %v15232_v2 = vadd.f32 %v11189_v1, %v20098_v36  ;;  %v11191_v23 = vpop.f32.mrb[182].mxu1  ;;  %11633 = vmatpush1.bf16.msra.mxu1 %v18242_v28 }
 0x779   :  { %13603 = vst [vmem:[#allocation14 + $0x258] sm:$0xff] %v14870_v62  ;;  %vm12530_vm4 = vcmp.gt.f32.partialorder %v15231_v3, 0.0  ;;  %v12724_v31 = vmul.f32 %v15231_v3, %v20105_v13  ;;  %v15233_v17 = vadd.f32 %v11191_v23, %v20092_v43  ;;  %v11193_v30 = vpop.f32.mrb[183].mxu1 }
 0x77a   :  { %vm12531_vm5 = vcmp.gt.f32.partialorder %v15232_v2, 0.0  ;;  %v12725_v0 = vmul.f32 %v15232_v2, %v20105_v13  ;;  %v15234_v60 = vadd.f32 %v11193_v30, %v20098_v36 }
 0x77b   :  { %v12916_v10 = vsel %vm12530_vm4, %v15231_v3, %v12724_v31  ;;  %vm12536_vm6 = vcmp.gt.f32.partialorder %v15233_v17, 0.0  ;;  %v12730_v5 = vmul.f32 %v15233_v17, %v20105_v13  ;;  %11522 = vmatmul.mubr.bf16.gmra.mrb[224].mxu1 %v20902_v34 }
 0x77c   :  { %v12917_v41 = vsel %vm12531_vm5, %v15232_v2, %v12725_v0  ;;  %vm12537_vm7 = vcmp.gt.f32.partialorder %v15234_v60, 0.0  ;;  %v12731_v12 = vmul.f32 %v15234_v60, %v20105_v13  ;;  %11531 = vmatprep.mubr.bf16.mxu1 %v20903_v8 }
 0x77d   :  { %v14873_v28 = vpack.c.bf16 %v12917_v41, %v12916_v10  ;;  %v12922_v63 = vsel %vm12536_vm6, %v15233_v17, %v12730_v5  ;;  %v20904_v5 = vld [vmem:[#allocation53_spill] sm:$0xff] }
 0x77e   :  { %v12923_v37 = vsel %vm12537_vm7, %v15234_v60, %v12731_v12  ;;  %v11197_v47 = vpop.f32.mrb[184].mxu1  ;;  %v20905_v12 = vld [vmem:[#allocation55_spill] sm:$0xff] }
 0x77f   :  { %13606 = vst [vmem:[#allocation14 + $0x270] sm:$0xff] %v14873_v28  ;;  %v14876_v11 = vpack.c.bf16 %v12923_v37, %v12922_v63  ;;  %v15235_v62 = vadd.f32 %v11197_v47, %v20092_v43  ;;  %v11199_v3 = vpop.f32.mrb[185].mxu1 }
 0x780   :  { %v15236_v1 = vadd.f32 %v11199_v3, %v20098_v36  ;;  %v11201_v23 = vpop.f32.mrb[186].mxu1 }
 0x781   :  { %13609 = vst [vmem:[#allocation14 + $0x288] sm:$0xff] %v14876_v11  ;;  %vm12542_vm8 = vcmp.gt.f32.partialorder %v15235_v62, 0.0  ;;  %v12736_v2 = vmul.f32 %v15235_v62, %v20105_v13  ;;  %v15237_v31 = vadd.f32 %v11201_v23, %v20092_v43  ;;  %v11203_v30 = vpop.f32.mrb[187].mxu1 }
 0x782   :  { %vm12543_vm9 = vcmp.gt.f32.partialorder %v15236_v1, 0.0  ;;  %v12737_v17 = vmul.f32 %v15236_v1, %v20105_v13  ;;  %v15238_v0 = vadd.f32 %v11203_v30, %v20098_v36 }
 0x783   :  { %v12928_v60 = vsel %vm12542_vm8, %v15235_v62, %v12736_v2  ;;  %vm12548_vm10 = vcmp.gt.f32.partialorder %v15237_v31, 0.0  ;;  %v12742_v10 = vmul.f32 %v15237_v31, %v20105_v13  ;;  %11532 = vmatmul.mubr.bf16.gmra.mrb[228].mxu1 %v20904_v5 }
 0x784   :  { %v12929_v34 = vsel %vm12543_vm9, %v15236_v1, %v12737_v17  ;;  %vm12549_vm11 = vcmp.gt.f32.partialorder %v15238_v0, 0.0  ;;  %v12743_v41 = vmul.f32 %v15238_v0, %v20105_v13  ;;  %11541 = vmatprep.mubr.bf16.mxu1 %v20905_v12 }
 0x785   :  { %v14879_v8 = vpack.c.bf16 %v12929_v34, %v12928_v60  ;;  %v12934_v28 = vsel %vm12548_vm10, %v15237_v31, %v12742_v10 }
 0x786   :  { %v12935_v63 = vsel %vm12549_vm11, %v15238_v0, %v12743_v41  ;;  %v11207_v37 = vpop.f32.mrb[188].mxu1 }
 0x787   :  { %13612 = vst [vmem:[#allocation14 + $0x2a0] sm:$0xff] %v14879_v8  ;;  %v14882_v47 = vpack.c.bf16 %v12935_v63, %v12934_v28  ;;  %v15239_v11 = vadd.f32 %v11207_v37, %v20092_v43  ;;  %v11209_v62 = vpop.f32.mrb[189].mxu1 }
 0x788   :  { %v15240_v3 = vadd.f32 %v11209_v62, %v20098_v36  ;;  %v11211_v23 = vpop.f32.mrb[190].mxu1 }
 0x789   :  { %13615 = vst [vmem:[#allocation14 + $0x2b8] sm:$0xff] %v14882_v47  ;;  %vm12554_vm12 = vcmp.gt.f32.partialorder %v15239_v11, 0.0  ;;  %v12748_v1 = vmul.f32 %v15239_v11, %v20105_v13  ;;  %v15241_v2 = vadd.f32 %v11211_v23, %v20092_v43  ;;  %v11213_v30 = vpop.f32.mrb[191].mxu1 }
 0x78a   :  { %vm12555_vm13 = vcmp.gt.f32.partialorder %v15240_v3, 0.0  ;;  %v12749_v31 = vmul.f32 %v15240_v3, %v20105_v13  ;;  %v15242_v17 = vadd.f32 %v11213_v30, %v20098_v36 }
 0x78b   :  { %v12940_v0 = vsel %vm12554_vm12, %v15239_v11, %v12748_v1  ;;  %vm12560_vm14 = vcmp.gt.f32.partialorder %v15241_v2, 0.0  ;;  %v12754_v60 = vmul.f32 %v15241_v2, %v20105_v13  ;;  %11542 = vmatmul.mubr.bf16.gmra.mrb[232].mxu1 %v19659_v27 }
 0x78c   :  { %v12941_v10 = vsel %vm12555_vm13, %v15240_v3, %v12749_v31  ;;  %vm12561_vm15 = vcmp.gt.f32.partialorder %v15242_v17, 0.0  ;;  %v12755_v5 = vmul.f32 %v15242_v17, %v20105_v13  ;;  %11551 = vmatprep.mubr.bf16.mxu1 %v19678_v29  ;;  %v20906_v29 = vsub.s32 4, %v20861_v26 }
 0x78d   :  { %v14885_v34 = vpack.c.bf16 %v12941_v10, %v12940_v0  ;;  %v12946_v43 = vsel %vm12560_vm14, %v15241_v2, %v12754_v60 }
 0x78e   :  { %v12947_v41 = vsel %vm12561_vm15, %v15242_v17, %v12755_v5  ;;  %v20295_v27 = vrot.slane %v20086_v15, %v20906_v29 }
 0x78f   :  { %13618 = vst [vmem:[#allocation14 + $0x2d0] sm:$0xff] %v14885_v34  ;;  %v14888_v12 = vpack.c.bf16 %v12947_v41, %v12946_v43 }
 0x791   :  { %13621 = vst [vmem:[#allocation14 + $0x2e8] sm:$0xff] %v14888_v12 }
 0x793   :  { %11552 = vmatmul.mubr.bf16.gmra.mrb[236].mxu1 %v19675_v25  ;;  %v20297_v25 = vld [vmem:[#allocation13] sm:$0x3f] }
 0x794   :  { %11561 = vmatprep.mubr.bf16.mxu1 %v19694_v33  ;;  %v20907_v33 = vsub.s32 5, %v20861_v26 }
 0x79b   :  { %11562 = vmatmul.mubr.bf16.gmra.mrb[240].mxu1 %v19691_v24  ;;  %v20302_v24 = vrot.slane %v20297_v25, %v20907_v33 }
 0x79c   :  { %11571 = vmatprep.mubr.bf16.mxu1 %v19708_v45 }
 0x7a3   :  { %11572 = vmatmul.mubr.bf16.gmra.mrb[244].mxu1 %v19705_v59 }
 0x7a4   :  { %11581 = vmatprep.mubr.bf16.mxu1 %v19722_v6 }
 0x7ab   :  { %11582 = vmatmul.mubr.bf16.gmra.mrb[248].mxu1 %v19719_v53 }
 0x7ac   :  { %11591 = vmatprep.mubr.bf16.mxu1 %v19735_v4 }
 0x7b0   :  { %v12215_v45 = vpop.f32.mrb[128].mxu0 }
 0x7b1   :  { %v15307_v59 = vadd.f32 %v12215_v45, %v20295_v27  ;;  %v12217_v6 = vpop.f32.mrb[129].mxu0 }
 0x7b2   :  { %v15308_v53 = vadd.f32 %v12217_v6, %v20302_v24  ;;  %v12219_v36 = vpop.f32.mrb[130].mxu0 }
 0x7b3   :  { %vm12378_vm0 = vcmp.gt.f32.partialorder %v15307_v59, 0.0  ;;  %v12572_v4 = vmul.f32 %v15307_v59, %v20105_v13  ;;  %v15309_v15 = vadd.f32 %v12219_v36, %v20295_v27  ;;  %v12221_v8 = vpop.f32.mrb[131].mxu0  ;;  %11592 = vmatmul.mubr.bf16.gmra.mrb[252].mxu1 %v19733_v22 }
 0x7b4   :  { %vm12379_vm1 = vcmp.gt.f32.partialorder %v15308_v53, 0.0  ;;  %v12573_v28 = vmul.f32 %v15308_v53, %v20105_v13  ;;  %v15310_v63 = vadd.f32 %v12221_v8, %v20302_v24  ;;  %11634 = vmatprep.mubr.bf16.mxu1 %v19792_v55 }
 0x7b5   :  { %v12764_v37 = vsel %vm12378_vm0, %v15307_v59, %v12572_v4  ;;  %vm12384_vm2 = vcmp.gt.f32.partialorder %v15309_v15, 0.0  ;;  %v12578_v47 = vmul.f32 %v15309_v15, %v20105_v13 }
 0x7b6   :  { %v12765_v11 = vsel %vm12379_vm1, %v15308_v53, %v12573_v28  ;;  %vm12385_vm3 = vcmp.gt.f32.partialorder %v15310_v63, 0.0  ;;  %v12579_v62 = vmul.f32 %v15310_v63, %v20105_v13 }
 0x7b7   :  { %v14797_v3 = vpack.c.bf16 %v12765_v11, %v12764_v37  ;;  %v12770_v23 = vsel %vm12384_vm2, %v15309_v15, %v12578_v47 }
 0x7b8   :  { %v12771_v1 = vsel %vm12385_vm3, %v15310_v63, %v12579_v62  ;;  %v12225_v2 = vpop.f32.mrb[132].mxu0 }
 0x7b9   :  { %13530 = vst [vmem:[#allocation14 + $0x10] sm:$0xff] %v14797_v3  ;;  %v14800_v22 = vpack.c.bf16 %v12771_v1, %v12770_v23  ;;  %v15311_v30 = vadd.f32 %v12225_v2, %v20295_v27  ;;  %v12227_v31 = vpop.f32.mrb[133].mxu0 }
 0x7ba   :  { %v15312_v17 = vadd.f32 %v12227_v31, %v20302_v24  ;;  %v12229_v55 = vpop.f32.mrb[134].mxu0 }
 0x7bb   :  { %13533 = vst [vmem:[#allocation14 + $0x28] sm:$0xff] %v14800_v22  ;;  %vm12390_vm4 = vcmp.gt.f32.partialorder %v15311_v30, 0.0  ;;  %v12584_v0 = vmul.f32 %v15311_v30, %v20105_v13  ;;  %v15313_v60 = vadd.f32 %v12229_v55, %v20295_v27  ;;  %v12231_v10 = vpop.f32.mrb[135].mxu0  ;;  %11635 = vmatmul.mubr.bf16.vlgmr.msra.gmra.mrb[192].mxu1 %v19789_v19 }
 0x7bc   :  { %vm12391_vm5 = vcmp.gt.f32.partialorder %v15312_v17, 0.0  ;;  %v12585_v5 = vmul.f32 %v15312_v17, %v20105_v13  ;;  %v15314_v34 = vadd.f32 %v12231_v10, %v20302_v24  ;;  %11644 = vmatprep.mubr.bf16.mxu1 %v19808_v38 }
 0x7bd   :  { %v12776_v43 = vsel %vm12390_vm4, %v15311_v30, %v12584_v0  ;;  %vm12396_vm6 = vcmp.gt.f32.partialorder %v15313_v60, 0.0  ;;  %v12590_v41 = vmul.f32 %v15313_v60, %v20105_v13 }
 0x7be   :  { %v12777_v12 = vsel %vm12391_vm5, %v15312_v17, %v12585_v5  ;;  %vm12397_vm7 = vcmp.gt.f32.partialorder %v15314_v34, 0.0  ;;  %v12591_v29 = vmul.f32 %v15314_v34, %v20105_v13 }
 0x7bf   :  { %v14803_v33 = vpack.c.bf16 %v12777_v12, %v12776_v43  ;;  %v12782_v45 = vsel %vm12396_vm6, %v15313_v60, %v12590_v41 }
 0x7c0   :  { %v12783_v59 = vsel %vm12397_vm7, %v15314_v34, %v12591_v29  ;;  %v12235_v6 = vpop.f32.mrb[136].mxu0 }
 0x7c1   :  { %13536 = vst [vmem:[#allocation14 + $0x40] sm:$0xff] %v14803_v33  ;;  %v14806_v19 = vpack.c.bf16 %v12783_v59, %v12782_v45  ;;  %v15315_v53 = vadd.f32 %v12235_v6, %v20295_v27  ;;  %v12237_v36 = vpop.f32.mrb[137].mxu0 }
 0x7c2   :  { %v15316_v4 = vadd.f32 %v12237_v36, %v20302_v24  ;;  %v12239_v38 = vpop.f32.mrb[138].mxu0 }
 0x7c3   :  { %13539 = vst [vmem:[#allocation14 + $0x58] sm:$0xff] %v14806_v19  ;;  %vm12402_vm8 = vcmp.gt.f32.partialorder %v15315_v53, 0.0  ;;  %v12596_v15 = vmul.f32 %v15315_v53, %v20105_v13  ;;  %v15317_v8 = vadd.f32 %v12239_v38, %v20295_v27  ;;  %v12241_v28 = vpop.f32.mrb[139].mxu0  ;;  %11645 = vmatmul.mubr.bf16.gmra.mrb[196].mxu1 %v19805_v58 }
 0x7c4   :  { %vm12403_vm9 = vcmp.gt.f32.partialorder %v15316_v4, 0.0  ;;  %v12597_v63 = vmul.f32 %v15316_v4, %v20105_v13  ;;  %v15318_v37 = vadd.f32 %v12241_v28, %v20302_v24  ;;  %11654 = vmatprep.mubr.bf16.mxu1 %v19824_v52 }
 0x7c5   :  { %v12788_v47 = vsel %vm12402_vm8, %v15315_v53, %v12596_v15  ;;  %vm12408_vm10 = vcmp.gt.f32.partialorder %v15317_v8, 0.0  ;;  %v12602_v11 = vmul.f32 %v15317_v8, %v20105_v13 }
 0x7c6   :  { %v12789_v62 = vsel %vm12403_vm9, %v15316_v4, %v12597_v63  ;;  %vm12409_vm11 = vcmp.gt.f32.partialorder %v15318_v37, 0.0  ;;  %v12603_v3 = vmul.f32 %v15318_v37, %v20105_v13 }
 0x7c7   :  { %v14809_v23 = vpack.c.bf16 %v12789_v62, %v12788_v47  ;;  %v12794_v1 = vsel %vm12408_vm10, %v15317_v8, %v12602_v11 }
 0x7c8   :  { %v12795_v2 = vsel %vm12409_vm11, %v15318_v37, %v12603_v3  ;;  %v12245_v22 = vpop.f32.mrb[140].mxu0 }
 0x7c9   :  { %13542 = vst [vmem:[#allocation14 + $0x70] sm:$0xff] %v14809_v23  ;;  %v14812_v58 = vpack.c.bf16 %v12795_v2, %v12794_v1  ;;  %v15319_v30 = vadd.f32 %v12245_v22, %v20295_v27  ;;  %v12247_v31 = vpop.f32.mrb[141].mxu0 }
 0x7ca   :  { %v15320_v17 = vadd.f32 %v12247_v31, %v20302_v24  ;;  %v12249_v52 = vpop.f32.mrb[142].mxu0 }
 0x7cb   :  { %13545 = vst [vmem:[#allocation14 + $0x88] sm:$0xff] %v14812_v58  ;;  %vm12414_vm12 = vcmp.gt.f32.partialorder %v15319_v30, 0.0  ;;  %v12608_v55 = vmul.f32 %v15319_v30, %v20105_v13  ;;  %v15321_v0 = vadd.f32 %v12249_v52, %v20295_v27  ;;  %v12251_v60 = vpop.f32.mrb[143].mxu0  ;;  %11655 = vmatmul.mubr.bf16.gmra.mrb[200].mxu1 %v19821_v57 }
 0x7cc   :  { %vm12415_vm13 = vcmp.gt.f32.partialorder %v15320_v17, 0.0  ;;  %v12609_v10 = vmul.f32 %v15320_v17, %v20105_v13  ;;  %v15322_v5 = vadd.f32 %v12251_v60, %v20302_v24  ;;  %11664 = vmatprep.mubr.bf16.mxu1 %v19840_v61 }
 0x7cd   :  { %v12800_v34 = vsel %vm12414_vm12, %v15319_v30, %v12608_v55  ;;  %vm12420_vm14 = vcmp.gt.f32.partialorder %v15321_v0, 0.0  ;;  %v12614_v43 = vmul.f32 %v15321_v0, %v20105_v13 }
 0x7ce   :  { %v12801_v41 = vsel %vm12415_vm13, %v15320_v17, %v12609_v10  ;;  %vm12421_vm15 = vcmp.gt.f32.partialorder %v15322_v5, 0.0  ;;  %v12615_v12 = vmul.f32 %v15322_v5, %v20105_v13 }
 0x7cf   :  { %v14815_v29 = vpack.c.bf16 %v12801_v41, %v12800_v34  ;;  %v12806_v33 = vsel %vm12420_vm14, %v15321_v0, %v12614_v43 }
 0x7d0   :  { %v12807_v45 = vsel %vm12421_vm15, %v15322_v5, %v12615_v12  ;;  %v12255_v59 = vpop.f32.mrb[144].mxu0 }
 0x7d1   :  { %13548 = vst [vmem:[#allocation14 + $0xa0] sm:$0xff] %v14815_v29  ;;  %v14818_v57 = vpack.c.bf16 %v12807_v45, %v12806_v33  ;;  %v15323_v6 = vadd.f32 %v12255_v59, %v20295_v27  ;;  %v12257_v19 = vpop.f32.mrb[145].mxu0 }
 0x7d2   :  { %v15324_v53 = vadd.f32 %v12257_v19, %v20302_v24  ;;  %v12259_v61 = vpop.f32.mrb[146].mxu0 }
 0x7d3   :  { %13551 = vst [vmem:[#allocation14 + $0xb8] sm:$0xff] %v14818_v57  ;;  %vm12426_vm0 = vcmp.gt.f32.partialorder %v15323_v6, 0.0  ;;  %v12620_v36 = vmul.f32 %v15323_v6, %v20105_v13  ;;  %v15325_v4 = vadd.f32 %v12259_v61, %v20295_v27  ;;  %v12261_v38 = vpop.f32.mrb[147].mxu0  ;;  %11665 = vmatmul.mubr.bf16.gmra.mrb[204].mxu1 %v20850_v40 }
 0x7d4   :  { %vm12427_vm1 = vcmp.gt.f32.partialorder %v15324_v53, 0.0  ;;  %v12621_v15 = vmul.f32 %v15324_v53, %v20105_v13  ;;  %v15326_v8 = vadd.f32 %v12261_v38, %v20302_v24  ;;  %11674 = vmatprep.mubr.bf16.mxu1 %v20851_v20 }
 0x7d5   :  { %v12812_v28 = vsel %vm12426_vm0, %v15323_v6, %v12620_v36  ;;  %vm12432_vm2 = vcmp.gt.f32.partialorder %v15325_v4, 0.0  ;;  %v12626_v63 = vmul.f32 %v15325_v4, %v20105_v13 }
 0x7d6   :  { %v12813_v37 = vsel %vm12427_vm1, %v15324_v53, %v12621_v15  ;;  %vm12433_vm3 = vcmp.gt.f32.partialorder %v15326_v8, 0.0  ;;  %v12627_v47 = vmul.f32 %v15326_v8, %v20105_v13 }
 0x7d7   :  { %v14821_v11 = vpack.c.bf16 %v12813_v37, %v12812_v28  ;;  %v12818_v62 = vsel %vm12432_vm2, %v15325_v4, %v12626_v63 }
 0x7d8   :  { %v12819_v3 = vsel %vm12433_vm3, %v15326_v8, %v12627_v47  ;;  %v12265_v23 = vpop.f32.mrb[148].mxu0 }
 0x7d9   :  { %13554 = vst [vmem:[#allocation14 + $0xd0] sm:$0xff] %v14821_v11  ;;  %v14824_v40 = vpack.c.bf16 %v12819_v3, %v12818_v62  ;;  %v15327_v1 = vadd.f32 %v12265_v23, %v20295_v27  ;;  %v12267_v2 = vpop.f32.mrb[149].mxu0 }
 0x7da   :  { %v15328_v22 = vadd.f32 %v12267_v2, %v20302_v24  ;;  %v12269_v20 = vpop.f32.mrb[150].mxu0 }
 0x7db   :  { %13557 = vst [vmem:[#allocation14 + $0xe8] sm:$0xff] %v14824_v40  ;;  %vm12438_vm4 = vcmp.gt.f32.partialorder %v15327_v1, 0.0  ;;  %v12632_v58 = vmul.f32 %v15327_v1, %v20105_v13  ;;  %v15329_v30 = vadd.f32 %v12269_v20, %v20295_v27  ;;  %v12271_v31 = vpop.f32.mrb[151].mxu0  ;;  %11675 = vmatmul.mubr.bf16.gmra.mrb[208].mxu1 %v20854_v46 }
 0x7dc   :  { %vm12439_vm5 = vcmp.gt.f32.partialorder %v15328_v22, 0.0  ;;  %v12633_v17 = vmul.f32 %v15328_v22, %v20105_v13  ;;  %v15330_v52 = vadd.f32 %v12271_v31, %v20302_v24  ;;  %11684 = vmatprep.mubr.bf16.mxu1 %v20855_v54 }
 0x7dd   :  { %v12824_v55 = vsel %vm12438_vm4, %v15327_v1, %v12632_v58  ;;  %vm12444_vm6 = vcmp.gt.f32.partialorder %v15329_v30, 0.0  ;;  %v12638_v0 = vmul.f32 %v15329_v30, %v20105_v13 }
 0x7de   :  { %v12825_v60 = vsel %vm12439_vm5, %v15328_v22, %v12633_v17  ;;  %vm12445_vm7 = vcmp.gt.f32.partialorder %v15330_v52, 0.0  ;;  %v12639_v10 = vmul.f32 %v15330_v52, %v20105_v13 }
 0x7df   :  { %v14827_v5 = vpack.c.bf16 %v12825_v60, %v12824_v55  ;;  %v12830_v34 = vsel %vm12444_vm6, %v15329_v30, %v12638_v0 }
 0x7e0   :  { %v12831_v43 = vsel %vm12445_vm7, %v15330_v52, %v12639_v10  ;;  %v12275_v41 = vpop.f32.mrb[152].mxu0 }
 0x7e1   :  { %13560 = vst [vmem:[#allocation14 + $0x100] sm:$0xff] %v14827_v5  ;;  %v14830_v46 = vpack.c.bf16 %v12831_v43, %v12830_v34  ;;  %v15331_v12 = vadd.f32 %v12275_v41, %v20295_v27  ;;  %v12277_v29 = vpop.f32.mrb[153].mxu0 }
 0x7e2   :  { %v15332_v33 = vadd.f32 %v12277_v29, %v20302_v24  ;;  %v12279_v54 = vpop.f32.mrb[154].mxu0 }
 0x7e3   :  { %13563 = vst [vmem:[#allocation14 + $0x118] sm:$0xff] %v14830_v46  ;;  %vm12450_vm8 = vcmp.gt.f32.partialorder %v15331_v12, 0.0  ;;  %v12644_v45 = vmul.f32 %v15331_v12, %v20105_v13  ;;  %v15333_v59 = vadd.f32 %v12279_v54, %v20295_v27  ;;  %v12281_v57 = vpop.f32.mrb[155].mxu0  ;;  %11685 = vmatmul.mubr.bf16.gmra.mrb[212].mxu1 %v20858_v44 }
 0x7e4   :  { %vm12451_vm9 = vcmp.gt.f32.partialorder %v15332_v33, 0.0  ;;  %v12645_v6 = vmul.f32 %v15332_v33, %v20105_v13  ;;  %v15334_v19 = vadd.f32 %v12281_v57, %v20302_v24  ;;  %11694 = vmatprep.mubr.bf16.mxu1 %v20859_v18 }
 0x7e5   :  { %v12836_v53 = vsel %vm12450_vm8, %v15331_v12, %v12644_v45  ;;  %vm12456_vm10 = vcmp.gt.f32.partialorder %v15333_v59, 0.0  ;;  %v12650_v61 = vmul.f32 %v15333_v59, %v20105_v13 }
 0x7e6   :  { %v12837_v36 = vsel %vm12451_vm9, %v15332_v33, %v12645_v6  ;;  %vm12457_vm11 = vcmp.gt.f32.partialorder %v15334_v19, 0.0  ;;  %v12651_v4 = vmul.f32 %v15334_v19, %v20105_v13 }
 0x7e7   :  { %v14833_v38 = vpack.c.bf16 %v12837_v36, %v12836_v53  ;;  %v12842_v15 = vsel %vm12456_vm10, %v15333_v59, %v12650_v61 }
 0x7e8   :  { %v12843_v8 = vsel %vm12457_vm11, %v15334_v19, %v12651_v4  ;;  %v12285_v28 = vpop.f32.mrb[156].mxu0 }
 0x7e9   :  { %13566 = vst [vmem:[#allocation14 + $0x130] sm:$0xff] %v14833_v38  ;;  %v14836_v44 = vpack.c.bf16 %v12843_v8, %v12842_v15  ;;  %v15335_v63 = vadd.f32 %v12285_v28, %v20295_v27  ;;  %v12287_v37 = vpop.f32.mrb[157].mxu0 }
 0x7ea   :  { %v15336_v47 = vadd.f32 %v12287_v37, %v20302_v24  ;;  %v12289_v18 = vpop.f32.mrb[158].mxu0 }
 0x7eb   :  { %13569 = vst [vmem:[#allocation14 + $0x148] sm:$0xff] %v14836_v44  ;;  %vm12462_vm12 = vcmp.gt.f32.partialorder %v15335_v63, 0.0  ;;  %v12656_v11 = vmul.f32 %v15335_v63, %v20105_v13  ;;  %v15337_v62 = vadd.f32 %v12289_v18, %v20295_v27  ;;  %v12291_v3 = vpop.f32.mrb[159].mxu0  ;;  %11695 = vmatmul.mubr.bf16.gmra.mrb[216].mxu1 %v20865_v56 }
 0x7ec   :  { %vm12463_vm13 = vcmp.gt.f32.partialorder %v15336_v47, 0.0  ;;  %v12657_v23 = vmul.f32 %v15336_v47, %v20105_v13  ;;  %v15338_v40 = vadd.f32 %v12291_v3, %v20302_v24  ;;  %11704 = vmatprep.mubr.bf16.mxu1 %v20866_v51 }
 0x7ed   :  { %v12848_v1 = vsel %vm12462_vm12, %v15335_v63, %v12656_v11  ;;  %vm12468_vm14 = vcmp.gt.f32.partialorder %v15337_v62, 0.0  ;;  %v12662_v2 = vmul.f32 %v15337_v62, %v20105_v13 }
 0x7ee   :  { %v12849_v22 = vsel %vm12463_vm13, %v15336_v47, %v12657_v23  ;;  %vm12469_vm15 = vcmp.gt.f32.partialorder %v15338_v40, 0.0  ;;  %v12663_v20 = vmul.f32 %v15338_v40, %v20105_v13 }
 0x7ef   :  { %v14839_v58 = vpack.c.bf16 %v12849_v22, %v12848_v1  ;;  %v12854_v30 = vsel %vm12468_vm14, %v15337_v62, %v12662_v2 }
 0x7f0   :  { %v12855_v31 = vsel %vm12469_vm15, %v15338_v40, %v12663_v20  ;;  %v12295_v17 = vpop.f32.mrb[160].mxu0 }
 0x7f1   :  { %13572 = vst [vmem:[#allocation14 + $0x160] sm:$0xff] %v14839_v58  ;;  %v14842_v56 = vpack.c.bf16 %v12855_v31, %v12854_v30  ;;  %v15339_v52 = vadd.f32 %v12295_v17, %v20295_v27  ;;  %v12297_v55 = vpop.f32.mrb[161].mxu0 }
 0x7f2   :  { %v15340_v0 = vadd.f32 %v12297_v55, %v20302_v24  ;;  %v12299_v51 = vpop.f32.mrb[162].mxu0 }
 0x7f3   :  { %13575 = vst [vmem:[#allocation14 + $0x178] sm:$0xff] %v14842_v56  ;;  %vm12474_vm0 = vcmp.gt.f32.partialorder %v15339_v52, 0.0  ;;  %v12668_v60 = vmul.f32 %v15339_v52, %v20105_v13  ;;  %v15341_v10 = vadd.f32 %v12299_v51, %v20295_v27  ;;  %v12301_v5 = vpop.f32.mrb[163].mxu0  ;;  %11705 = vmatmul.mubr.bf16.gmra.mrb[220].mxu1 %v20869_v48 }
 0x7f4   :  { %vm12475_vm1 = vcmp.gt.f32.partialorder %v15340_v0, 0.0  ;;  %v12669_v34 = vmul.f32 %v15340_v0, %v20105_v13  ;;  %v15342_v43 = vadd.f32 %v12301_v5, %v20302_v24  ;;  %11714 = vmatprep.mubr.bf16.mxu1 %v19928_v7 }
 0x7f5   :  { %v12860_v41 = vsel %vm12474_vm0, %v15339_v52, %v12668_v60  ;;  %vm12480_vm2 = vcmp.gt.f32.partialorder %v15341_v10, 0.0  ;;  %v12674_v46 = vmul.f32 %v15341_v10, %v20105_v13 }
 0x7f6   :  { %v12861_v12 = vsel %vm12475_vm1, %v15340_v0, %v12669_v34  ;;  %vm12481_vm3 = vcmp.gt.f32.partialorder %v15342_v43, 0.0  ;;  %v12675_v29 = vmul.f32 %v15342_v43, %v20105_v13 }
 0x7f7   :  { %v14845_v33 = vpack.c.bf16 %v12861_v12, %v12860_v41  ;;  %v12866_v54 = vsel %vm12480_vm2, %v15341_v10, %v12674_v46 }
 0x7f8   :  { %v12867_v45 = vsel %vm12481_vm3, %v15342_v43, %v12675_v29  ;;  %v12305_v59 = vpop.f32.mrb[164].mxu0 }
 0x7f9   :  { %13578 = vst [vmem:[#allocation14 + $0x190] sm:$0xff] %v14845_v33  ;;  %v14848_v48 = vpack.c.bf16 %v12867_v45, %v12866_v54  ;;  %v15343_v57 = vadd.f32 %v12305_v59, %v20295_v27  ;;  %v12307_v6 = vpop.f32.mrb[165].mxu0 }
 0x7fa   :  { %v15344_v19 = vadd.f32 %v12307_v6, %v20302_v24  ;;  %v12309_v7 = vpop.f32.mrb[166].mxu0 }
 0x7fb   :  { %13581 = vst [vmem:[#allocation14 + $0x1a8] sm:$0xff] %v14848_v48  ;;  %vm12486_vm4 = vcmp.gt.f32.partialorder %v15343_v57, 0.0  ;;  %v12680_v53 = vmul.f32 %v15343_v57, %v20105_v13  ;;  %v15345_v61 = vadd.f32 %v12309_v7, %v20295_v27  ;;  %v12311_v36 = vpop.f32.mrb[167].mxu0  ;;  %11715 = vmatmul.mubr.bf16.gmra.mrb[224].mxu1 %v20872_v21 }
 0x7fc   :  { %vm12487_vm5 = vcmp.gt.f32.partialorder %v15344_v19, 0.0  ;;  %v12681_v4 = vmul.f32 %v15344_v19, %v20105_v13  ;;  %v15346_v38 = vadd.f32 %v12311_v36, %v20302_v24  ;;  %11724 = vmatprep.mubr.bf16.mxu1 %v20873_v16  ;;  %v20908_v36 = vld [vmem:[#allocation70_spill] sm:$0xff] }
 0x7fd   :  { %v12872_v15 = vsel %vm12486_vm4, %v15343_v57, %v12680_v53  ;;  %vm12492_vm6 = vcmp.gt.f32.partialorder %v15345_v61, 0.0  ;;  %v12686_v8 = vmul.f32 %v15345_v61, %v20105_v13 }
 0x7fe   :  { %v12873_v28 = vsel %vm12487_vm5, %v15344_v19, %v12681_v4  ;;  %vm12493_vm7 = vcmp.gt.f32.partialorder %v15346_v38, 0.0  ;;  %v12687_v44 = vmul.f32 %v15346_v38, %v20105_v13 }
 0x7ff   :  { %v14851_v63 = vpack.c.bf16 %v12873_v28, %v12872_v15  ;;  %v12878_v37 = vsel %vm12492_vm6, %v15345_v61, %v12686_v8  ;;  %v20909_v15 = vld [vmem:[#allocation72_spill] sm:$0xff] }
 0x800   :  { %v12879_v47 = vsel %vm12493_vm7, %v15346_v38, %v12687_v44  ;;  %v12315_v18 = vpop.f32.mrb[168].mxu0 }
 0x801   :  { %13584 = vst [vmem:[#allocation14 + $0x1c0] sm:$0xff] %v14851_v63  ;;  %v14854_v21 = vpack.c.bf16 %v12879_v47, %v12878_v37  ;;  %v15347_v11 = vadd.f32 %v12315_v18, %v20295_v27  ;;  %v12317_v62 = vpop.f32.mrb[169].mxu0 }
 0x802   :  { %v15348_v3 = vadd.f32 %v12317_v62, %v20302_v24  ;;  %v12319_v16 = vpop.f32.mrb[170].mxu0 }
 0x803   :  { %13587 = vst [vmem:[#allocation14 + $0x1d8] sm:$0xff] %v14854_v21  ;;  %vm12498_vm8 = vcmp.gt.f32.partialorder %v15347_v11, 0.0  ;;  %v12692_v23 = vmul.f32 %v15347_v11, %v20105_v13  ;;  %v15349_v40 = vadd.f32 %v12319_v16, %v20295_v27  ;;  %v12321_v1 = vpop.f32.mrb[171].mxu0  ;;  %11725 = vmatmul.mubr.bf16.gmra.mrb[228].mxu1 %v20876_v35 }
 0x804   :  { %vm12499_vm9 = vcmp.gt.f32.partialorder %v15348_v3, 0.0  ;;  %v12693_v2 = vmul.f32 %v15348_v3, %v20105_v13  ;;  %v15350_v22 = vadd.f32 %v12321_v1, %v20302_v24  ;;  %11734 = vmatprep.mubr.bf16.mxu1 %v20877_v32 }
 0x805   :  { %v12884_v20 = vsel %vm12498_vm8, %v15347_v11, %v12692_v23  ;;  %vm12504_vm10 = vcmp.gt.f32.partialorder %v15349_v40, 0.0  ;;  %v12698_v58 = vmul.f32 %v15349_v40, %v20105_v13 }
 0x806   :  { %v12885_v30 = vsel %vm12499_vm9, %v15348_v3, %v12693_v2  ;;  %vm12505_vm11 = vcmp.gt.f32.partialorder %v15350_v22, 0.0  ;;  %v12699_v31 = vmul.f32 %v15350_v22, %v20105_v13 }
 0x807   :  { %v14857_v17 = vpack.c.bf16 %v12885_v30, %v12884_v20  ;;  %v12890_v56 = vsel %vm12504_vm10, %v15349_v40, %v12698_v58  ;;  %v20910_v58 = vld [vmem:[#allocation74_spill] sm:$0xff] }
 0x808   :  { %v12891_v52 = vsel %vm12505_vm11, %v15350_v22, %v12699_v31  ;;  %v12325_v55 = vpop.f32.mrb[172].mxu0 }
 0x809   :  { %13590 = vst [vmem:[#allocation14 + $0x1f0] sm:$0xff] %v14857_v17  ;;  %v14860_v35 = vpack.c.bf16 %v12891_v52, %v12890_v56  ;;  %v15351_v0 = vadd.f32 %v12325_v55, %v20295_v27  ;;  %v12327_v51 = vpop.f32.mrb[173].mxu0 }
 0x80a   :  { %v15352_v60 = vadd.f32 %v12327_v51, %v20302_v24  ;;  %v12329_v32 = vpop.f32.mrb[174].mxu0 }
 0x80b   :  { %13593 = vst [vmem:[#allocation14 + $0x208] sm:$0xff] %v14860_v35  ;;  %vm12510_vm12 = vcmp.gt.f32.partialorder %v15351_v0, 0.0  ;;  %v12704_v10 = vmul.f32 %v15351_v0, %v20105_v13  ;;  %v15353_v5 = vadd.f32 %v12329_v32, %v20295_v27  ;;  %v12331_v34 = vpop.f32.mrb[175].mxu0  ;;  %11735 = vmatmul.mubr.bf16.gmra.mrb[232].mxu1 %v20880_v42 }
 0x80c   :  { %vm12511_vm13 = vcmp.gt.f32.partialorder %v15352_v60, 0.0  ;;  %v12705_v43 = vmul.f32 %v15352_v60, %v20105_v13  ;;  %v15354_v41 = vadd.f32 %v12331_v34, %v20302_v24  ;;  %11744 = vmatprep.mubr.bf16.mxu1 %v19976_v50 }
 0x80d   :  { %v12896_v46 = vsel %vm12510_vm12, %v15351_v0, %v12704_v10  ;;  %vm12516_vm14 = vcmp.gt.f32.partialorder %v15353_v5, 0.0  ;;  %v12710_v12 = vmul.f32 %v15353_v5, %v20105_v13 }
 0x80e   :  { %v12897_v29 = vsel %vm12511_vm13, %v15352_v60, %v12705_v43  ;;  %vm12517_vm15 = vcmp.gt.f32.partialorder %v15354_v41, 0.0  ;;  %v12711_v33 = vmul.f32 %v15354_v41, %v20105_v13 }
 0x80f   :  { %v14863_v54 = vpack.c.bf16 %v12897_v29, %v12896_v46  ;;  %v12902_v45 = vsel %vm12516_vm14, %v15353_v5, %v12710_v12 }
 0x810   :  { %v12903_v59 = vsel %vm12517_vm15, %v15354_v41, %v12711_v33  ;;  %v12335_v48 = vpop.f32.mrb[176].mxu0 }
 0x811   :  { %13596 = vst [vmem:[#allocation14 + $0x220] sm:$0xff] %v14863_v54  ;;  %v14866_v42 = vpack.c.bf16 %v12903_v59, %v12902_v45  ;;  %v15355_v57 = vadd.f32 %v12335_v48, %v20295_v27  ;;  %v12337_v6 = vpop.f32.mrb[177].mxu0 }
 0x812   :  { %v15356_v19 = vadd.f32 %v12337_v6, %v20302_v24  ;;  %v12339_v50 = vpop.f32.mrb[178].mxu0 }
 0x813   :  { %13599 = vst [vmem:[#allocation14 + $0x238] sm:$0xff] %v14866_v42  ;;  %vm12522_vm0 = vcmp.gt.f32.partialorder %v15355_v57, 0.0  ;;  %v12716_v7 = vmul.f32 %v15355_v57, %v20105_v13  ;;  %v15357_v53 = vadd.f32 %v12339_v50, %v20295_v27  ;;  %v12341_v61 = vpop.f32.mrb[179].mxu0  ;;  %11745 = vmatmul.mubr.bf16.gmra.mrb[236].mxu1 %v20908_v36 }
 0x814   :  { %vm12523_vm1 = vcmp.gt.f32.partialorder %v15356_v19, 0.0  ;;  %v12717_v4 = vmul.f32 %v15356_v19, %v20105_v13  ;;  %v15358_v38 = vadd.f32 %v12341_v61, %v20302_v24  ;;  %11754 = vmatprep.mubr.bf16.mxu1 %v20909_v15 }
 0x815   :  { %v12908_v8 = vsel %vm12522_vm0, %v15355_v57, %v12716_v7  ;;  %vm12528_vm2 = vcmp.gt.f32.partialorder %v15357_v53, 0.0  ;;  %v12722_v28 = vmul.f32 %v15357_v53, %v20105_v13 }
 0x816   :  { %v12909_v44 = vsel %vm12523_vm1, %v15356_v19, %v12717_v4  ;;  %vm12529_vm3 = vcmp.gt.f32.partialorder %v15358_v38, 0.0  ;;  %v12723_v63 = vmul.f32 %v15358_v38, %v20105_v13  ;;  %v20911_v4 = vld [vmem:[#allocation76_spill] sm:$0xff] }
 0x817   :  { %v14869_v37 = vpack.c.bf16 %v12909_v44, %v12908_v8  ;;  %v12914_v47 = vsel %vm12528_vm2, %v15357_v53, %v12722_v28 }
 0x818   :  { %v12915_v18 = vsel %vm12529_vm3, %v15358_v38, %v12723_v63  ;;  %v12345_v21 = vpop.f32.mrb[180].mxu0 }
 0x819   :  { %13602 = vst [vmem:[#allocation14 + $0x250] sm:$0xff] %v14869_v37  ;;  %v14872_v11 = vpack.c.bf16 %v12915_v18, %v12914_v47  ;;  %v15359_v62 = vadd.f32 %v12345_v21, %v20295_v27  ;;  %v12347_v3 = vpop.f32.mrb[181].mxu0  ;;  %v20912_v37 = vld [vmem:[#allocation75_spill] sm:$0xff]  ;;  %v20914_v18 = vsub.s32 3, %v20861_v26 }
 0x81a   :  { %v15360_v16 = vadd.f32 %v12347_v3, %v20302_v24  ;;  %v12349_v23 = vpop.f32.mrb[182].mxu0 }
 0x81b   :  { %13605 = vst [vmem:[#allocation14 + $0x268] sm:$0xff] %v14872_v11  ;;  %vm12534_vm4 = vcmp.gt.f32.partialorder %v15359_v62, 0.0  ;;  %v12728_v40 = vmul.f32 %v15359_v62, %v20105_v13  ;;  %v15361_v1 = vadd.f32 %v12349_v23, %v20295_v27  ;;  %v12351_v2 = vpop.f32.mrb[183].mxu0  ;;  %11755 = vmatmul.mubr.bf16.gmra.mrb[240].mxu1 %v20885_v9  ;;  %v20473_v21 = vrot.slane %v20297_v25, %v20914_v18 }
 0x81c   :  { %vm12535_vm5 = vcmp.gt.f32.partialorder %v15360_v16, 0.0  ;;  %v12729_v22 = vmul.f32 %v15360_v16, %v20105_v13  ;;  %v15362_v20 = vadd.f32 %v12351_v2, %v20302_v24  ;;  %11764 = vmatprep.mubr.bf16.mxu1 %v20910_v58 }
 0x81d   :  { %v12920_v30 = vsel %vm12534_vm4, %v15359_v62, %v12728_v40  ;;  %vm12540_vm6 = vcmp.gt.f32.partialorder %v15361_v1, 0.0  ;;  %v12734_v31 = vmul.f32 %v15361_v1, %v20105_v13 }
 0x81e   :  { %v12921_v17 = vsel %vm12535_vm5, %v15360_v16, %v12729_v22  ;;  %vm12541_vm7 = vcmp.gt.f32.partialorder %v15362_v20, 0.0  ;;  %v12735_v56 = vmul.f32 %v15362_v20, %v20105_v13 }
 0x81f   :  { %v14875_v52 = vpack.c.bf16 %v12921_v17, %v12920_v30  ;;  %v12926_v55 = vsel %vm12540_vm6, %v15361_v1, %v12734_v31 }
 0x820   :  { %v12927_v35 = vsel %vm12541_vm7, %v15362_v20, %v12735_v56  ;;  %v12355_v0 = vpop.f32.mrb[184].mxu0 }
 0x821   :  { %13608 = vst [vmem:[#allocation14 + $0x280] sm:$0xff] %v14875_v52  ;;  %v14878_v9 = vpack.c.bf16 %v12927_v35, %v12926_v55  ;;  %v15363_v51 = vadd.f32 %v12355_v0, %v20295_v27  ;;  %v12357_v60 = vpop.f32.mrb[185].mxu0 }
 0x822   :  { %v15364_v32 = vadd.f32 %v12357_v60, %v20302_v24  ;;  %v12359_v10 = vpop.f32.mrb[186].mxu0 }
 0x823   :  { %13611 = vst [vmem:[#allocation14 + $0x298] sm:$0xff] %v14878_v9  ;;  %vm12546_vm8 = vcmp.gt.f32.partialorder %v15363_v51, 0.0  ;;  %v12740_v5 = vmul.f32 %v15363_v51, %v20105_v13  ;;  %v15365_v34 = vadd.f32 %v12359_v10, %v20295_v27  ;;  %v12361_v43 = vpop.f32.mrb[187].mxu0  ;;  %11765 = vmatmul.mubr.bf16.gmra.mrb[244].mxu1 %v20889_v39 }
 0x824   :  { %vm12547_vm9 = vcmp.gt.f32.partialorder %v15364_v32, 0.0  ;;  %v12741_v41 = vmul.f32 %v15364_v32, %v20105_v13  ;;  %v15366_v46 = vadd.f32 %v12361_v43, %v20302_v24  ;;  %11774 = vmatprep.mubr.bf16.mxu1 %v20024_v14 }
 0x825   :  { %v12932_v12 = vsel %vm12546_vm8, %v15363_v51, %v12740_v5  ;;  %vm12552_vm10 = vcmp.gt.f32.partialorder %v15365_v34, 0.0  ;;  %v12746_v29 = vmul.f32 %v15365_v34, %v20105_v13 }
 0x826   :  { %v12933_v33 = vsel %vm12547_vm9, %v15364_v32, %v12741_v41  ;;  %vm12553_vm11 = vcmp.gt.f32.partialorder %v15366_v46, 0.0  ;;  %v12747_v54 = vmul.f32 %v15366_v46, %v20105_v13 }
 0x827   :  { %v14881_v45 = vpack.c.bf16 %v12933_v33, %v12932_v12  ;;  %v12938_v59 = vsel %vm12552_vm10, %v15365_v34, %v12746_v29 }
 0x828   :  { %v12939_v48 = vsel %vm12553_vm11, %v15366_v46, %v12747_v54  ;;  %v12365_v42 = vpop.f32.mrb[188].mxu0 }
 0x829   :  { %13614 = vst [vmem:[#allocation14 + $0x2b0] sm:$0xff] %v14881_v45  ;;  %v14884_v39 = vpack.c.bf16 %v12939_v48, %v12938_v59  ;;  %v15367_v57 = vadd.f32 %v12365_v42, %v20295_v27  ;;  %v12367_v6 = vpop.f32.mrb[189].mxu0 }
 0x82a   :  { %v15368_v19 = vadd.f32 %v12367_v6, %v20302_v24  ;;  %v12369_v14 = vpop.f32.mrb[190].mxu0 }
 0x82b   :  { %13617 = vst [vmem:[#allocation14 + $0x2c8] sm:$0xff] %v14884_v39  ;;  %vm12558_vm12 = vcmp.gt.f32.partialorder %v15367_v57, 0.0  ;;  %v12752_v50 = vmul.f32 %v15367_v57, %v20105_v13  ;;  %v15369_v7 = vadd.f32 %v12369_v14, %v20295_v27  ;;  %v12371_v53 = vpop.f32.mrb[191].mxu0  ;;  %11775 = vmatmul.mubr.bf16.gmra.mrb[248].mxu1 %v20021_v49 }
 0x82c   :  { %vm12559_vm13 = vcmp.gt.f32.partialorder %v15368_v19, 0.0  ;;  %v12753_v61 = vmul.f32 %v15368_v19, %v20105_v13  ;;  %v15370_v36 = vadd.f32 %v12371_v53, %v20302_v24  ;;  %11784 = vmatprep.mubr.bf16.mxu1 %v20911_v4  ;;  %v20913_v24 = vsub.s32 2, %v20861_v26 }
 0x82d   :  { %v12944_v38 = vsel %vm12558_vm12, %v15367_v57, %v12752_v50  ;;  %vm12564_vm14 = vcmp.gt.f32.partialorder %v15369_v7, 0.0  ;;  %v12758_v15 = vmul.f32 %v15369_v7, %v20105_v13 }
 0x82e   :  { %v12945_v8 = vsel %vm12559_vm13, %v15368_v19, %v12753_v61  ;;  %vm12565_vm15 = vcmp.gt.f32.partialorder %v15370_v36, 0.0  ;;  %v12759_v28 = vmul.f32 %v15370_v36, %v20105_v13  ;;  %v20468_v47 = vrot.slane %v20297_v25, %v20913_v24 }
 0x82f   :  { %v14887_v44 = vpack.c.bf16 %v12945_v8, %v12944_v38  ;;  %v12950_v27 = vsel %vm12564_vm14, %v15369_v7, %v12758_v15 }
 0x830   :  { %v12951_v63 = vsel %vm12565_vm15, %v15370_v36, %v12759_v28 }
 0x831   :  { %13620 = vst [vmem:[#allocation14 + $0x2e0] sm:$0xff] %v14887_v44  ;;  %v14890_v49 = vpack.c.bf16 %v12951_v63, %v12950_v27 }
 0x833   :  { %13623 = vst [vmem:[#allocation14 + $0x2f8] sm:$0xff] %v14890_v49  ;;  %11785 = vmatmul.mubr.bf16.gmra.mrb[252].mxu1 %v20912_v37 }
 0x88e   :  { %v11636_v11 = vpop.f32.mrb[192].mxu1 }
 0x88f   :  { %v15243_v62 = vadd.f32 %v11636_v11, %v20468_v47  ;;  %v11638_v3 = vpop.f32.mrb[193].mxu1 }
 0x890   :  { %v15244_v16 = vadd.f32 %v11638_v3, %v20473_v21  ;;  %v11640_v23 = vpop.f32.mrb[194].mxu1 }
 0x891   :  { %vm12376_vm0 = vcmp.gt.f32.partialorder %v15243_v62, 0.0  ;;  %v12570_v40 = vmul.f32 %v15243_v62, %v20105_v13  ;;  %v15245_v1 = vadd.f32 %v11640_v23, %v20468_v47  ;;  %v11642_v2 = vpop.f32.mrb[195].mxu1 }
 0x892   :  { %vm12377_vm1 = vcmp.gt.f32.partialorder %v15244_v16, 0.0  ;;  %v12571_v22 = vmul.f32 %v15244_v16, %v20105_v13  ;;  %v15246_v26 = vadd.f32 %v11642_v2, %v20473_v21 }
 0x893   :  { %v12762_v25 = vsel %vm12376_vm0, %v15243_v62, %v12570_v40  ;;  %vm12382_vm2 = vcmp.gt.f32.partialorder %v15245_v1, 0.0  ;;  %v12576_v20 = vmul.f32 %v15245_v1, %v20105_v13 }
 0x894   :  { %v12763_v58 = vsel %vm12377_vm1, %v15244_v16, %v12571_v22  ;;  %vm12383_vm3 = vcmp.gt.f32.partialorder %v15246_v26, 0.0  ;;  %v12577_v30 = vmul.f32 %v15246_v26, %v20105_v13 }
 0x895   :  { %v14796_v31 = vpack.c.bf16 %v12763_v58, %v12762_v25  ;;  %v12768_v17 = vsel %vm12382_vm2, %v15245_v1, %v12576_v20 }
 0x896   :  { %v12769_v56 = vsel %vm12383_vm3, %v15246_v26, %v12577_v30  ;;  %v11646_v52 = vpop.f32.mrb[196].mxu1 }
 0x897   :  { %13529 = vst [vmem:[#allocation14 + $0x8] sm:$0xff] %v14796_v31  ;;  %v14799_v55 = vpack.c.bf16 %v12769_v56, %v12768_v17  ;;  %v15247_v35 = vadd.f32 %v11646_v52, %v20468_v47  ;;  %v11648_v0 = vpop.f32.mrb[197].mxu1 }
 0x898   :  { %v15248_v9 = vadd.f32 %v11648_v0, %v20473_v21  ;;  %v11650_v51 = vpop.f32.mrb[198].mxu1 }
 0x899   :  { %13532 = vst [vmem:[#allocation14 + $0x20] sm:$0xff] %v14799_v55  ;;  %vm12388_vm4 = vcmp.gt.f32.partialorder %v15247_v35, 0.0  ;;  %v12582_v60 = vmul.f32 %v15247_v35, %v20105_v13  ;;  %v15249_v32 = vadd.f32 %v11650_v51, %v20468_v47  ;;  %v11652_v10 = vpop.f32.mrb[199].mxu1 }
 0x89a   :  { %vm12389_vm5 = vcmp.gt.f32.partialorder %v15248_v9, 0.0  ;;  %v12583_v5 = vmul.f32 %v15248_v9, %v20105_v13  ;;  %v15250_v34 = vadd.f32 %v11652_v10, %v20473_v21 }
 0x89b   :  { %v12774_v43 = vsel %vm12388_vm4, %v15247_v35, %v12582_v60  ;;  %vm12394_vm6 = vcmp.gt.f32.partialorder %v15249_v32, 0.0  ;;  %v12588_v41 = vmul.f32 %v15249_v32, %v20105_v13 }
 0x89c   :  { %v12775_v46 = vsel %vm12389_vm5, %v15248_v9, %v12583_v5  ;;  %vm12395_vm7 = vcmp.gt.f32.partialorder %v15250_v34, 0.0  ;;  %v12589_v12 = vmul.f32 %v15250_v34, %v20105_v13 }
 0x89d   :  { %v14802_v29 = vpack.c.bf16 %v12775_v46, %v12774_v43  ;;  %v12780_v33 = vsel %vm12394_vm6, %v15249_v32, %v12588_v41 }
 0x89e   :  { %v12781_v54 = vsel %vm12395_vm7, %v15250_v34, %v12589_v12  ;;  %v11656_v45 = vpop.f32.mrb[200].mxu1 }
 0x89f   :  { %13535 = vst [vmem:[#allocation14 + $0x38] sm:$0xff] %v14802_v29  ;;  %v14805_v59 = vpack.c.bf16 %v12781_v54, %v12780_v33  ;;  %v15251_v48 = vadd.f32 %v11656_v45, %v20468_v47  ;;  %v11658_v42 = vpop.f32.mrb[201].mxu1 }
 0x8a0   :  { %v15252_v39 = vadd.f32 %v11658_v42, %v20473_v21  ;;  %v11660_v57 = vpop.f32.mrb[202].mxu1 }
 0x8a1   :  { %13538 = vst [vmem:[#allocation14 + $0x50] sm:$0xff] %v14805_v59  ;;  %vm12400_vm8 = vcmp.gt.f32.partialorder %v15251_v48, 0.0  ;;  %v12594_v6 = vmul.f32 %v15251_v48, %v20105_v13  ;;  %v15253_v19 = vadd.f32 %v11660_v57, %v20468_v47  ;;  %v11662_v14 = vpop.f32.mrb[203].mxu1 }
 0x8a2   :  { %vm12401_vm9 = vcmp.gt.f32.partialorder %v15252_v39, 0.0  ;;  %v12595_v50 = vmul.f32 %v15252_v39, %v20105_v13  ;;  %v15254_v7 = vadd.f32 %v11662_v14, %v20473_v21 }
 0x8a3   :  { %v12786_v53 = vsel %vm12400_vm8, %v15251_v48, %v12594_v6  ;;  %vm12406_vm10 = vcmp.gt.f32.partialorder %v15253_v19, 0.0  ;;  %v12600_v61 = vmul.f32 %v15253_v19, %v20105_v13 }
 0x8a4   :  { %v12787_v36 = vsel %vm12401_vm9, %v15252_v39, %v12595_v50  ;;  %vm12407_vm11 = vcmp.gt.f32.partialorder %v15254_v7, 0.0  ;;  %v12601_v4 = vmul.f32 %v15254_v7, %v20105_v13 }
 0x8a5   :  { %v14808_v38 = vpack.c.bf16 %v12787_v36, %v12786_v53  ;;  %v12792_v15 = vsel %vm12406_vm10, %v15253_v19, %v12600_v61 }
 0x8a6   :  { %v12793_v8 = vsel %vm12407_vm11, %v15254_v7, %v12601_v4  ;;  %v11666_v28 = vpop.f32.mrb[204].mxu1 }
 0x8a7   :  { %13541 = vst [vmem:[#allocation14 + $0x68] sm:$0xff] %v14808_v38  ;;  %v14811_v44 = vpack.c.bf16 %v12793_v8, %v12792_v15  ;;  %v15255_v27 = vadd.f32 %v11666_v28, %v20468_v47  ;;  %v11668_v63 = vpop.f32.mrb[205].mxu1 }
 0x8a8   :  { %v15256_v49 = vadd.f32 %v11668_v63, %v20473_v21  ;;  %v11670_v37 = vpop.f32.mrb[206].mxu1 }
 0x8a9   :  { %13544 = vst [vmem:[#allocation14 + $0x80] sm:$0xff] %v14811_v44  ;;  %vm12412_vm12 = vcmp.gt.f32.partialorder %v15255_v27, 0.0  ;;  %v12606_v24 = vmul.f32 %v15255_v27, %v20105_v13  ;;  %v15257_v18 = vadd.f32 %v11670_v37, %v20468_v47  ;;  %v11672_v11 = vpop.f32.mrb[207].mxu1 }
 0x8aa   :  { %vm12413_vm13 = vcmp.gt.f32.partialorder %v15256_v49, 0.0  ;;  %v12607_v62 = vmul.f32 %v15256_v49, %v20105_v13  ;;  %v15258_v3 = vadd.f32 %v11672_v11, %v20473_v21 }
 0x8ab   :  { %v12798_v16 = vsel %vm12412_vm12, %v15255_v27, %v12606_v24  ;;  %vm12418_vm14 = vcmp.gt.f32.partialorder %v15257_v18, 0.0  ;;  %v12612_v23 = vmul.f32 %v15257_v18, %v20105_v13 }
 0x8ac   :  { %v12799_v40 = vsel %vm12413_vm13, %v15256_v49, %v12607_v62  ;;  %vm12419_vm15 = vcmp.gt.f32.partialorder %v15258_v3, 0.0  ;;  %v12613_v1 = vmul.f32 %v15258_v3, %v20105_v13 }
 0x8ad   :  { %v14814_v2 = vpack.c.bf16 %v12799_v40, %v12798_v16  ;;  %v12804_v22 = vsel %vm12418_vm14, %v15257_v18, %v12612_v23 }
 0x8ae   :  { %v12805_v26 = vsel %vm12419_vm15, %v15258_v3, %v12613_v1  ;;  %v11676_v25 = vpop.f32.mrb[208].mxu1 }
 0x8af   :  { %13547 = vst [vmem:[#allocation14 + $0x98] sm:$0xff] %v14814_v2  ;;  %v14817_v20 = vpack.c.bf16 %v12805_v26, %v12804_v22  ;;  %v15259_v58 = vadd.f32 %v11676_v25, %v20468_v47  ;;  %v11678_v30 = vpop.f32.mrb[209].mxu1 }
 0x8b0   :  { %v15260_v31 = vadd.f32 %v11678_v30, %v20473_v21  ;;  %v11680_v17 = vpop.f32.mrb[210].mxu1 }
 0x8b1   :  { %13550 = vst [vmem:[#allocation14 + $0xb0] sm:$0xff] %v14817_v20  ;;  %vm12424_vm0 = vcmp.gt.f32.partialorder %v15259_v58, 0.0  ;;  %v12618_v56 = vmul.f32 %v15259_v58, %v20105_v13  ;;  %v15261_v52 = vadd.f32 %v11680_v17, %v20468_v47  ;;  %v11682_v55 = vpop.f32.mrb[211].mxu1 }
 0x8b2   :  { %vm12425_vm1 = vcmp.gt.f32.partialorder %v15260_v31, 0.0  ;;  %v12619_v35 = vmul.f32 %v15260_v31, %v20105_v13  ;;  %v15262_v0 = vadd.f32 %v11682_v55, %v20473_v21 }
 0x8b3   :  { %v12810_v9 = vsel %vm12424_vm0, %v15259_v58, %v12618_v56  ;;  %vm12430_vm2 = vcmp.gt.f32.partialorder %v15261_v52, 0.0  ;;  %v12624_v51 = vmul.f32 %v15261_v52, %v20105_v13 }
 0x8b4   :  { %v12811_v60 = vsel %vm12425_vm1, %v15260_v31, %v12619_v35  ;;  %vm12431_vm3 = vcmp.gt.f32.partialorder %v15262_v0, 0.0  ;;  %v12625_v32 = vmul.f32 %v15262_v0, %v20105_v13 }
 0x8b5   :  { %v14820_v10 = vpack.c.bf16 %v12811_v60, %v12810_v9  ;;  %v12816_v5 = vsel %vm12430_vm2, %v15261_v52, %v12624_v51 }
 0x8b6   :  { %v12817_v34 = vsel %vm12431_vm3, %v15262_v0, %v12625_v32  ;;  %v11686_v43 = vpop.f32.mrb[212].mxu1 }
 0x8b7   :  { %13553 = vst [vmem:[#allocation14 + $0xc8] sm:$0xff] %v14820_v10  ;;  %v14823_v41 = vpack.c.bf16 %v12817_v34, %v12816_v5  ;;  %v15263_v46 = vadd.f32 %v11686_v43, %v20468_v47  ;;  %v11688_v12 = vpop.f32.mrb[213].mxu1 }
 0x8b8   :  { %v15264_v29 = vadd.f32 %v11688_v12, %v20473_v21  ;;  %v11690_v33 = vpop.f32.mrb[214].mxu1 }
 0x8b9   :  { %13556 = vst [vmem:[#allocation14 + $0xe0] sm:$0xff] %v14823_v41  ;;  %vm12436_vm4 = vcmp.gt.f32.partialorder %v15263_v46, 0.0  ;;  %v12630_v54 = vmul.f32 %v15263_v46, %v20105_v13  ;;  %v15265_v45 = vadd.f32 %v11690_v33, %v20468_v47  ;;  %v11692_v59 = vpop.f32.mrb[215].mxu1 }
 0x8ba   :  { %vm12437_vm5 = vcmp.gt.f32.partialorder %v15264_v29, 0.0  ;;  %v12631_v48 = vmul.f32 %v15264_v29, %v20105_v13  ;;  %v15266_v42 = vadd.f32 %v11692_v59, %v20473_v21 }
 0x8bb   :  { %v12822_v39 = vsel %vm12436_vm4, %v15263_v46, %v12630_v54  ;;  %vm12442_vm6 = vcmp.gt.f32.partialorder %v15265_v45, 0.0  ;;  %v12636_v57 = vmul.f32 %v15265_v45, %v20105_v13 }
 0x8bc   :  { %v12823_v6 = vsel %vm12437_vm5, %v15264_v29, %v12631_v48  ;;  %vm12443_vm7 = vcmp.gt.f32.partialorder %v15266_v42, 0.0  ;;  %v12637_v19 = vmul.f32 %v15266_v42, %v20105_v13 }
 0x8bd   :  { %v14826_v14 = vpack.c.bf16 %v12823_v6, %v12822_v39  ;;  %v12828_v50 = vsel %vm12442_vm6, %v15265_v45, %v12636_v57 }
 0x8be   :  { %v12829_v7 = vsel %vm12443_vm7, %v15266_v42, %v12637_v19  ;;  %v11696_v53 = vpop.f32.mrb[216].mxu1 }
 0x8bf   :  { %13559 = vst [vmem:[#allocation14 + $0xf8] sm:$0xff] %v14826_v14  ;;  %v14829_v61 = vpack.c.bf16 %v12829_v7, %v12828_v50  ;;  %v15267_v36 = vadd.f32 %v11696_v53, %v20468_v47  ;;  %v11698_v4 = vpop.f32.mrb[217].mxu1 }
 0x8c0   :  { %v15268_v38 = vadd.f32 %v11698_v4, %v20473_v21  ;;  %v11700_v15 = vpop.f32.mrb[218].mxu1 }
 0x8c1   :  { %13562 = vst [vmem:[#allocation14 + $0x110] sm:$0xff] %v14829_v61  ;;  %vm12448_vm8 = vcmp.gt.f32.partialorder %v15267_v36, 0.0  ;;  %v12642_v8 = vmul.f32 %v15267_v36, %v20105_v13  ;;  %v15269_v28 = vadd.f32 %v11700_v15, %v20468_v47  ;;  %v11702_v44 = vpop.f32.mrb[219].mxu1 }
 0x8c2   :  { %vm12449_vm9 = vcmp.gt.f32.partialorder %v15268_v38, 0.0  ;;  %v12643_v27 = vmul.f32 %v15268_v38, %v20105_v13  ;;  %v15270_v63 = vadd.f32 %v11702_v44, %v20473_v21 }
 0x8c3   :  { %v12834_v49 = vsel %vm12448_vm8, %v15267_v36, %v12642_v8  ;;  %vm12454_vm10 = vcmp.gt.f32.partialorder %v15269_v28, 0.0  ;;  %v12648_v37 = vmul.f32 %v15269_v28, %v20105_v13 }
 0x8c4   :  { %v12835_v24 = vsel %vm12449_vm9, %v15268_v38, %v12643_v27  ;;  %vm12455_vm11 = vcmp.gt.f32.partialorder %v15270_v63, 0.0  ;;  %v12649_v18 = vmul.f32 %v15270_v63, %v20105_v13 }
 0x8c5   :  { %v14832_v11 = vpack.c.bf16 %v12835_v24, %v12834_v49  ;;  %v12840_v62 = vsel %vm12454_vm10, %v15269_v28, %v12648_v37 }
 0x8c6   :  { %v12841_v3 = vsel %vm12455_vm11, %v15270_v63, %v12649_v18  ;;  %v11706_v16 = vpop.f32.mrb[220].mxu1 }
 0x8c7   :  { %13565 = vst [vmem:[#allocation14 + $0x128] sm:$0xff] %v14832_v11  ;;  %v14835_v23 = vpack.c.bf16 %v12841_v3, %v12840_v62  ;;  %v15271_v40 = vadd.f32 %v11706_v16, %v20468_v47  ;;  %v11708_v1 = vpop.f32.mrb[221].mxu1 }
 0x8c8   :  { %v15272_v2 = vadd.f32 %v11708_v1, %v20473_v21  ;;  %v11710_v22 = vpop.f32.mrb[222].mxu1 }
 0x8c9   :  { %13568 = vst [vmem:[#allocation14 + $0x140] sm:$0xff] %v14835_v23  ;;  %vm12460_vm12 = vcmp.gt.f32.partialorder %v15271_v40, 0.0  ;;  %v12654_v26 = vmul.f32 %v15271_v40, %v20105_v13  ;;  %v15273_v25 = vadd.f32 %v11710_v22, %v20468_v47  ;;  %v11712_v20 = vpop.f32.mrb[223].mxu1 }
 0x8ca   :  { %vm12461_vm13 = vcmp.gt.f32.partialorder %v15272_v2, 0.0  ;;  %v12655_v58 = vmul.f32 %v15272_v2, %v20105_v13  ;;  %v15274_v30 = vadd.f32 %v11712_v20, %v20473_v21 }
 0x8cb   :  { %v12846_v31 = vsel %vm12460_vm12, %v15271_v40, %v12654_v26  ;;  %vm12466_vm14 = vcmp.gt.f32.partialorder %v15273_v25, 0.0  ;;  %v12660_v17 = vmul.f32 %v15273_v25, %v20105_v13 }
 0x8cc   :  { %v12847_v56 = vsel %vm12461_vm13, %v15272_v2, %v12655_v58  ;;  %vm12467_vm15 = vcmp.gt.f32.partialorder %v15274_v30, 0.0  ;;  %v12661_v52 = vmul.f32 %v15274_v30, %v20105_v13 }
 0x8cd   :  { %v14838_v55 = vpack.c.bf16 %v12847_v56, %v12846_v31  ;;  %v12852_v35 = vsel %vm12466_vm14, %v15273_v25, %v12660_v17 }
 0x8ce   :  { %v12853_v0 = vsel %vm12467_vm15, %v15274_v30, %v12661_v52  ;;  %v11716_v9 = vpop.f32.mrb[224].mxu1 }
 0x8cf   :  { %13571 = vst [vmem:[#allocation14 + $0x158] sm:$0xff] %v14838_v55  ;;  %v14841_v51 = vpack.c.bf16 %v12853_v0, %v12852_v35  ;;  %v15275_v60 = vadd.f32 %v11716_v9, %v20468_v47  ;;  %v11718_v32 = vpop.f32.mrb[225].mxu1 }
 0x8d0   :  { %v15276_v10 = vadd.f32 %v11718_v32, %v20473_v21  ;;  %v11720_v5 = vpop.f32.mrb[226].mxu1 }
 0x8d1   :  { %13574 = vst [vmem:[#allocation14 + $0x170] sm:$0xff] %v14841_v51  ;;  %vm12472_vm0 = vcmp.gt.f32.partialorder %v15275_v60, 0.0  ;;  %v12666_v34 = vmul.f32 %v15275_v60, %v20105_v13  ;;  %v15277_v43 = vadd.f32 %v11720_v5, %v20468_v47  ;;  %v11722_v41 = vpop.f32.mrb[227].mxu1 }
 0x8d2   :  { %vm12473_vm1 = vcmp.gt.f32.partialorder %v15276_v10, 0.0  ;;  %v12667_v46 = vmul.f32 %v15276_v10, %v20105_v13  ;;  %v15278_v12 = vadd.f32 %v11722_v41, %v20473_v21 }
 0x8d3   :  { %v12858_v29 = vsel %vm12472_vm0, %v15275_v60, %v12666_v34  ;;  %vm12478_vm2 = vcmp.gt.f32.partialorder %v15277_v43, 0.0  ;;  %v12672_v33 = vmul.f32 %v15277_v43, %v20105_v13 }
 0x8d4   :  { %v12859_v54 = vsel %vm12473_vm1, %v15276_v10, %v12667_v46  ;;  %vm12479_vm3 = vcmp.gt.f32.partialorder %v15278_v12, 0.0  ;;  %v12673_v45 = vmul.f32 %v15278_v12, %v20105_v13 }
 0x8d5   :  { %v14844_v59 = vpack.c.bf16 %v12859_v54, %v12858_v29  ;;  %v12864_v48 = vsel %vm12478_vm2, %v15277_v43, %v12672_v33 }
 0x8d6   :  { %v12865_v42 = vsel %vm12479_vm3, %v15278_v12, %v12673_v45  ;;  %v11726_v39 = vpop.f32.mrb[228].mxu1 }
 0x8d7   :  { %13577 = vst [vmem:[#allocation14 + $0x188] sm:$0xff] %v14844_v59  ;;  %v14847_v57 = vpack.c.bf16 %v12865_v42, %v12864_v48  ;;  %v15279_v6 = vadd.f32 %v11726_v39, %v20468_v47  ;;  %v11728_v19 = vpop.f32.mrb[229].mxu1 }
 0x8d8   :  { %v15280_v14 = vadd.f32 %v11728_v19, %v20473_v21  ;;  %v11730_v50 = vpop.f32.mrb[230].mxu1 }
 0x8d9   :  { %13580 = vst [vmem:[#allocation14 + $0x1a0] sm:$0xff] %v14847_v57  ;;  %vm12484_vm4 = vcmp.gt.f32.partialorder %v15279_v6, 0.0  ;;  %v12678_v7 = vmul.f32 %v15279_v6, %v20105_v13  ;;  %v15281_v53 = vadd.f32 %v11730_v50, %v20468_v47  ;;  %v11732_v61 = vpop.f32.mrb[231].mxu1 }
 0x8da   :  { %vm12485_vm5 = vcmp.gt.f32.partialorder %v15280_v14, 0.0  ;;  %v12679_v36 = vmul.f32 %v15280_v14, %v20105_v13  ;;  %v15282_v4 = vadd.f32 %v11732_v61, %v20473_v21 }
 0x8db   :  { %v12870_v38 = vsel %vm12484_vm4, %v15279_v6, %v12678_v7  ;;  %vm12490_vm6 = vcmp.gt.f32.partialorder %v15281_v53, 0.0  ;;  %v12684_v15 = vmul.f32 %v15281_v53, %v20105_v13 }
 0x8dc   :  { %v12871_v8 = vsel %vm12485_vm5, %v15280_v14, %v12679_v36  ;;  %vm12491_vm7 = vcmp.gt.f32.partialorder %v15282_v4, 0.0  ;;  %v12685_v28 = vmul.f32 %v15282_v4, %v20105_v13 }
 0x8dd   :  { %v14850_v44 = vpack.c.bf16 %v12871_v8, %v12870_v38  ;;  %v12876_v27 = vsel %vm12490_vm6, %v15281_v53, %v12684_v15 }
 0x8de   :  { %v12877_v63 = vsel %vm12491_vm7, %v15282_v4, %v12685_v28  ;;  %v11736_v49 = vpop.f32.mrb[232].mxu1 }
 0x8df   :  { %13583 = vst [vmem:[#allocation14 + $0x1b8] sm:$0xff] %v14850_v44  ;;  %v14853_v37 = vpack.c.bf16 %v12877_v63, %v12876_v27  ;;  %v15283_v24 = vadd.f32 %v11736_v49, %v20468_v47  ;;  %v11738_v18 = vpop.f32.mrb[233].mxu1 }
 0x8e0   :  { %v15284_v11 = vadd.f32 %v11738_v18, %v20473_v21  ;;  %v11740_v62 = vpop.f32.mrb[234].mxu1 }
 0x8e1   :  { %13586 = vst [vmem:[#allocation14 + $0x1d0] sm:$0xff] %v14853_v37  ;;  %vm12496_vm8 = vcmp.gt.f32.partialorder %v15283_v24, 0.0  ;;  %v12690_v3 = vmul.f32 %v15283_v24, %v20105_v13  ;;  %v15285_v16 = vadd.f32 %v11740_v62, %v20468_v47  ;;  %v11742_v23 = vpop.f32.mrb[235].mxu1 }
 0x8e2   :  { %vm12497_vm9 = vcmp.gt.f32.partialorder %v15284_v11, 0.0  ;;  %v12691_v40 = vmul.f32 %v15284_v11, %v20105_v13  ;;  %v15286_v1 = vadd.f32 %v11742_v23, %v20473_v21 }
 0x8e3   :  { %v12882_v2 = vsel %vm12496_vm8, %v15283_v24, %v12690_v3  ;;  %vm12502_vm10 = vcmp.gt.f32.partialorder %v15285_v16, 0.0  ;;  %v12696_v22 = vmul.f32 %v15285_v16, %v20105_v13 }
 0x8e4   :  { %v12883_v26 = vsel %vm12497_vm9, %v15284_v11, %v12691_v40  ;;  %vm12503_vm11 = vcmp.gt.f32.partialorder %v15286_v1, 0.0  ;;  %v12697_v25 = vmul.f32 %v15286_v1, %v20105_v13 }
 0x8e5   :  { %v14856_v20 = vpack.c.bf16 %v12883_v26, %v12882_v2  ;;  %v12888_v58 = vsel %vm12502_vm10, %v15285_v16, %v12696_v22 }
 0x8e6   :  { %v12889_v30 = vsel %vm12503_vm11, %v15286_v1, %v12697_v25  ;;  %v11746_v31 = vpop.f32.mrb[236].mxu1 }
 0x8e7   :  { %13589 = vst [vmem:[#allocation14 + $0x1e8] sm:$0xff] %v14856_v20  ;;  %v14859_v17 = vpack.c.bf16 %v12889_v30, %v12888_v58  ;;  %v15287_v56 = vadd.f32 %v11746_v31, %v20468_v47  ;;  %v11748_v52 = vpop.f32.mrb[237].mxu1 }
 0x8e8   :  { %v15288_v55 = vadd.f32 %v11748_v52, %v20473_v21  ;;  %v11750_v35 = vpop.f32.mrb[238].mxu1 }
 0x8e9   :  { %13592 = vst [vmem:[#allocation14 + $0x200] sm:$0xff] %v14859_v17  ;;  %vm12508_vm12 = vcmp.gt.f32.partialorder %v15287_v56, 0.0  ;;  %v12702_v0 = vmul.f32 %v15287_v56, %v20105_v13  ;;  %v15289_v9 = vadd.f32 %v11750_v35, %v20468_v47  ;;  %v11752_v51 = vpop.f32.mrb[239].mxu1 }
 0x8ea   :  { %vm12509_vm13 = vcmp.gt.f32.partialorder %v15288_v55, 0.0  ;;  %v12703_v60 = vmul.f32 %v15288_v55, %v20105_v13  ;;  %v15290_v32 = vadd.f32 %v11752_v51, %v20473_v21 }
 0x8eb   :  { %v12894_v10 = vsel %vm12508_vm12, %v15287_v56, %v12702_v0  ;;  %vm12514_vm14 = vcmp.gt.f32.partialorder %v15289_v9, 0.0  ;;  %v12708_v5 = vmul.f32 %v15289_v9, %v20105_v13 }
 0x8ec   :  { %v12895_v34 = vsel %vm12509_vm13, %v15288_v55, %v12703_v60  ;;  %vm12515_vm15 = vcmp.gt.f32.partialorder %v15290_v32, 0.0  ;;  %v12709_v43 = vmul.f32 %v15290_v32, %v20105_v13 }
 0x8ed   :  { %v14862_v41 = vpack.c.bf16 %v12895_v34, %v12894_v10  ;;  %v12900_v46 = vsel %vm12514_vm14, %v15289_v9, %v12708_v5 }
 0x8ee   :  { %v12901_v12 = vsel %vm12515_vm15, %v15290_v32, %v12709_v43  ;;  %v11756_v29 = vpop.f32.mrb[240].mxu1 }
 0x8ef   :  { %13595 = vst [vmem:[#allocation14 + $0x218] sm:$0xff] %v14862_v41  ;;  %v14865_v33 = vpack.c.bf16 %v12901_v12, %v12900_v46  ;;  %v15291_v54 = vadd.f32 %v11756_v29, %v20468_v47  ;;  %v11758_v45 = vpop.f32.mrb[241].mxu1 }
 0x8f0   :  { %v15292_v59 = vadd.f32 %v11758_v45, %v20473_v21  ;;  %v11760_v48 = vpop.f32.mrb[242].mxu1 }
 0x8f1   :  { %13598 = vst [vmem:[#allocation14 + $0x230] sm:$0xff] %v14865_v33  ;;  %vm12520_vm0 = vcmp.gt.f32.partialorder %v15291_v54, 0.0  ;;  %v12714_v42 = vmul.f32 %v15291_v54, %v20105_v13  ;;  %v15293_v39 = vadd.f32 %v11760_v48, %v20468_v47  ;;  %v11762_v57 = vpop.f32.mrb[243].mxu1 }
 0x8f2   :  { %vm12521_vm1 = vcmp.gt.f32.partialorder %v15292_v59, 0.0  ;;  %v12715_v6 = vmul.f32 %v15292_v59, %v20105_v13  ;;  %v15294_v19 = vadd.f32 %v11762_v57, %v20473_v21 }
 0x8f3   :  { %v12906_v14 = vsel %vm12520_vm0, %v15291_v54, %v12714_v42  ;;  %vm12526_vm2 = vcmp.gt.f32.partialorder %v15293_v39, 0.0  ;;  %v12720_v50 = vmul.f32 %v15293_v39, %v20105_v13 }
 0x8f4   :  { %v12907_v7 = vsel %vm12521_vm1, %v15292_v59, %v12715_v6  ;;  %vm12527_vm3 = vcmp.gt.f32.partialorder %v15294_v19, 0.0  ;;  %v12721_v53 = vmul.f32 %v15294_v19, %v20105_v13 }
 0x8f5   :  { %v14868_v61 = vpack.c.bf16 %v12907_v7, %v12906_v14  ;;  %v12912_v36 = vsel %vm12526_vm2, %v15293_v39, %v12720_v50 }
 0x8f6   :  { %v12913_v4 = vsel %vm12527_vm3, %v15294_v19, %v12721_v53  ;;  %v11766_v38 = vpop.f32.mrb[244].mxu1 }
 0x8f7   :  { %13601 = vst [vmem:[#allocation14 + $0x248] sm:$0xff] %v14868_v61  ;;  %v14871_v15 = vpack.c.bf16 %v12913_v4, %v12912_v36  ;;  %v15295_v8 = vadd.f32 %v11766_v38, %v20468_v47  ;;  %v11768_v28 = vpop.f32.mrb[245].mxu1 }
 0x8f8   :  { %v15296_v44 = vadd.f32 %v11768_v28, %v20473_v21  ;;  %v11770_v27 = vpop.f32.mrb[246].mxu1 }
 0x8f9   :  { %13604 = vst [vmem:[#allocation14 + $0x260] sm:$0xff] %v14871_v15  ;;  %vm12532_vm4 = vcmp.gt.f32.partialorder %v15295_v8, 0.0  ;;  %v12726_v63 = vmul.f32 %v15295_v8, %v20105_v13  ;;  %v15297_v49 = vadd.f32 %v11770_v27, %v20468_v47  ;;  %v11772_v37 = vpop.f32.mrb[247].mxu1 }
 0x8fa   :  { %vm12533_vm5 = vcmp.gt.f32.partialorder %v15296_v44, 0.0  ;;  %v12727_v24 = vmul.f32 %v15296_v44, %v20105_v13  ;;  %v15298_v18 = vadd.f32 %v11772_v37, %v20473_v21 }
 0x8fb   :  { %v12918_v11 = vsel %vm12532_vm4, %v15295_v8, %v12726_v63  ;;  %vm12538_vm6 = vcmp.gt.f32.partialorder %v15297_v49, 0.0  ;;  %v12732_v62 = vmul.f32 %v15297_v49, %v20105_v13 }
 0x8fc   :  { %v12919_v3 = vsel %vm12533_vm5, %v15296_v44, %v12727_v24  ;;  %vm12539_vm7 = vcmp.gt.f32.partialorder %v15298_v18, 0.0  ;;  %v12733_v16 = vmul.f32 %v15298_v18, %v20105_v13 }
 0x8fd   :  { %v14874_v23 = vpack.c.bf16 %v12919_v3, %v12918_v11  ;;  %v12924_v40 = vsel %vm12538_vm6, %v15297_v49, %v12732_v62 }
 0x8fe   :  { %v12925_v1 = vsel %vm12539_vm7, %v15298_v18, %v12733_v16  ;;  %v11776_v2 = vpop.f32.mrb[248].mxu1 }
 0x8ff   :  { %13607 = vst [vmem:[#allocation14 + $0x278] sm:$0xff] %v14874_v23  ;;  %v14877_v22 = vpack.c.bf16 %v12925_v1, %v12924_v40  ;;  %v15299_v26 = vadd.f32 %v11776_v2, %v20468_v47  ;;  %v11778_v25 = vpop.f32.mrb[249].mxu1 }
 0x900   :  { %v15300_v20 = vadd.f32 %v11778_v25, %v20473_v21  ;;  %v11780_v58 = vpop.f32.mrb[250].mxu1 }
 0x901   :  { %13610 = vst [vmem:[#allocation14 + $0x290] sm:$0xff] %v14877_v22  ;;  %vm12544_vm8 = vcmp.gt.f32.partialorder %v15299_v26, 0.0  ;;  %v12738_v30 = vmul.f32 %v15299_v26, %v20105_v13  ;;  %v15301_v31 = vadd.f32 %v11780_v58, %v20468_v47  ;;  %v11782_v17 = vpop.f32.mrb[251].mxu1 }
 0x902   :  { %vm12545_vm9 = vcmp.gt.f32.partialorder %v15300_v20, 0.0  ;;  %v12739_v56 = vmul.f32 %v15300_v20, %v20105_v13  ;;  %v15302_v52 = vadd.f32 %v11782_v17, %v20473_v21 }
 0x903   :  { %v12930_v55 = vsel %vm12544_vm8, %v15299_v26, %v12738_v30  ;;  %vm12550_vm10 = vcmp.gt.f32.partialorder %v15301_v31, 0.0  ;;  %v12744_v35 = vmul.f32 %v15301_v31, %v20105_v13 }
 0x904   :  { %v12931_v0 = vsel %vm12545_vm9, %v15300_v20, %v12739_v56  ;;  %vm12551_vm11 = vcmp.gt.f32.partialorder %v15302_v52, 0.0  ;;  %v12745_v9 = vmul.f32 %v15302_v52, %v20105_v13 }
 0x905   :  { %v14880_v51 = vpack.c.bf16 %v12931_v0, %v12930_v55  ;;  %v12936_v60 = vsel %vm12550_vm10, %v15301_v31, %v12744_v35 }
 0x906   :  { %v12937_v32 = vsel %vm12551_vm11, %v15302_v52, %v12745_v9  ;;  %v11786_v10 = vpop.f32.mrb[252].mxu1 }
 0x907   :  { %13613 = vst [vmem:[#allocation14 + $0x2a8] sm:$0xff] %v14880_v51  ;;  %v14883_v5 = vpack.c.bf16 %v12937_v32, %v12936_v60  ;;  %v15303_v34 = vadd.f32 %v11786_v10, %v20468_v47  ;;  %v11788_v43 = vpop.f32.mrb[253].mxu1 }
 0x908   :  { %v15304_v41 = vadd.f32 %v11788_v43, %v20473_v21  ;;  %v11790_v46 = vpop.f32.mrb[254].mxu1 }
 0x909   :  { %13616 = vst [vmem:[#allocation14 + $0x2c0] sm:$0xff] %v14883_v5  ;;  %vm12556_vm12 = vcmp.gt.f32.partialorder %v15303_v34, 0.0  ;;  %v12750_v12 = vmul.f32 %v15303_v34, %v20105_v13  ;;  %v15305_v29 = vadd.f32 %v11790_v46, %v20468_v47  ;;  %v11792_v33 = vpop.f32.mrb[255].mxu1 }
 0x90a   :  { %vm12557_vm13 = vcmp.gt.f32.partialorder %v15304_v41, 0.0  ;;  %v12751_v54 = vmul.f32 %v15304_v41, %v20105_v13  ;;  %v15306_v45 = vadd.f32 %v11792_v33, %v20473_v21 }
 0x90b   :  { %v12942_v59 = vsel %vm12556_vm12, %v15303_v34, %v12750_v12  ;;  %vm12562_vm14 = vcmp.gt.f32.partialorder %v15305_v29, 0.0  ;;  %v12756_v48 = vmul.f32 %v15305_v29, %v20105_v13 }
 0x90c   :  { %v12943_v42 = vsel %vm12557_vm13, %v15304_v41, %v12751_v54  ;;  %vm12563_vm15 = vcmp.gt.f32.partialorder %v15306_v45, 0.0  ;;  %v12757_v39 = vmul.f32 %v15306_v45, %v20105_v13 }
 0x90d   :  { %v14886_v57 = vpack.c.bf16 %v12943_v42, %v12942_v59  ;;  %v12948_v6 = vsel %vm12562_vm14, %v15305_v29, %v12756_v48 }
 0x90e   :  { %v12949_v19 = vsel %vm12563_vm15, %v15306_v45, %v12757_v39 }
 0x90f   :  { %13619 = vst [vmem:[#allocation14 + $0x2d8] sm:$0xff] %v14886_v57  ;;  %v14889_v47 = vpack.c.bf16 %v12949_v19, %v12948_v6 }
 0x911   :  { %13622 = vst [vmem:[#allocation14 + $0x2f0] sm:$0xff] %v14889_v47 }
 0x912   :  { %18753 = shalt.err (!%p18750_p2)
}
 0x913   :  { %s18754_s24 = scalar_lea.hbm %s20625_s7, 12288 }
 0x914   :  { %p18755_p3 = scmp.ne.s32.totalorder %s20625_s7, %s18754_s24  ;;  %p18758_p4 = scmp.lt.u32.totalorder %s18754_s24, %s20625_s7 }
 0x916   :  { %p18760_p5 = pnand %p18758_p4, %p18755_p3 }
 0x918   :  { %18763 = shalt.err (!%p18760_p5)
}
 0x919   :  { %13635 = dma.vmem_to_hbm [thread:$0]  %s13630_s20, 12288, %s20625_s7, [#allocation7], %s18773_s11, %s18773_s11, %s18774_s12  }
 0x91a   :  { %18770 = dma.done.wait [#allocation7], 12288  }
 0x91b   :  { %18771 = vsyncadd [#allocation7], 4294955008 }
 0x91c   :  { %13639 = vsyncpa [#allocation6], 1 }
 0x91d   :  { %13640 = vsyncpa [#allocation9], 1 }
 0x91e   :  { %13641 = vsyncpa [#allocation12], 1 }
 0x91f   :  { %13642 = vsyncpa [#allocation7], 1 }

</bundles_post_ra>
